<compile_context>
chip_gen: v7x
topology: tpu7x:2x2x1
jax: 0.10.0
libtpu: 0.0.40
codegen_flags: <defaults>
</compile_context>

<pallas_src>
import numpy as np

import jax
import jax.numpy as jnp
from jax.experimental import pallas as pl
from jax.experimental.pallas import tpu as pltpu

EPS = 1e-5


# ----------------------------------------------------------------------------
# The single fused Pallas kernel (one batch sample per grid step)
# ----------------------------------------------------------------------------
def betanet_kernel(x_ref, d_ref,
                   w0_ref, b0_ref, w1_ref, b1_ref,
                   w2_ref, b2_ref, w3_ref, b3_ref,
                   s1_ref, s2_ref, s3_ref,
                   dw_ref, db_ref, pool_ref,
                   wff_ref, wfd_ref, bf_ref,
                   wd_ref, bd_ref, wb_ref, bb_ref,
                   od_ref, ob_ref,
                   p0, dpad, p1, p2, p3):
    f32 = jnp.float32

    def fill_padded(pad_ref, act):
        """Zero a (Hp, Wp, C) scratch buffer and write `act` into its interior."""
        hp, wp, c = pad_ref.shape
        pad_ref[...] = jnp.zeros((hp, wp, c), f32)
        if act.ndim == 2:                       # (rows, C) -> (H, W, C)
            act = act.reshape(hp - 2, wp - 2, c)
        pad_ref[1:hp - 1, 1:wp - 1, :] = act

    def instnorm_relu(y):
        # InstanceNorm2d(affine=False, eps=1e-5): per-channel stats over rows.
        mu = jnp.mean(y, axis=0, keepdims=True)
        var = jnp.mean(jnp.square(y - mu), axis=0, keepdims=True)
        return jnp.maximum((y - mu) * jax.lax.rsqrt(var + EPS), 0.0)

    def conv_in_relu(pad_ref, w_ref, b_ref, sel):
        """3x3 conv (stride 1) + optional stride-2 selection + IN + ReLU.

        In-kernel im2col: 9 shifted static slices of the padded VMEM buffer,
        one bf16 MXU matmul per tap, accumulated in f32.
        """
        hp, wp, cin = pad_ref.shape
        hc, wc = hp - 2, wp - 2
        acc = None
        for t in range(9):
            di, dj = divmod(t, 3)
            xs = pad_ref[di:di + hc, dj:dj + wc, :]          # (hc, wc, cin)
            xs = xs.reshape(hc * wc, cin).astype(jnp.bfloat16)
            part = jnp.dot(xs, w_ref[t], preferred_element_type=f32)
            acc = part if acc is None else acc + part
        acc = acc + b_ref[...]
        if sel is not None:
            # stride-2 conv == stride-1 conv sampled at even (2i, 2j) positions
            acc = jnp.dot(sel, acc, preferred_element_type=f32)
        return instnorm_relu(acc)

    # ---- stage the per-sample inputs into zero-padded VMEM scratch ----------
    fill_padded(p0, x_ref[...])
    fill_padded(dpad, d_ref[...])

    # ---- encoder: 4 BasicBlocks, activations never leave VMEM ---------------
    a0 = conv_in_relu(p0, w0_ref, b0_ref, None)              # (H*W,    C)
    fill_padded(p1, a0)
    a1 = conv_in_relu(p1, w1_ref, b1_ref, s1_ref[...])       # (H*W/4,  C)
    fill_padded(p2, a1)
    a2 = conv_in_relu(p2, w2_ref, b2_ref, s2_ref[...])       # (H*W/16, C)
    fill_padded(p3, a2)
    feat = conv_in_relu(p3, w3_ref, b3_ref, s3_ref[...])     # (H*W/64, C)

    # ---- depth branch: 3x3 conv (1->1) on the VPU + ReLU + AvgPool2d(8) -----
    hp, wp, _ = dpad.shape
    hd, wd = hp - 2, wp - 2
    dconv = None
    for t in range(9):
        di, dj = divmod(t, 3)
        part = dpad[di:di + hd, dj:dj + wd, :] * dw_ref[t]   # SMEM scalar weight
        dconv = part if dconv is None else dconv + part
    dconv = jnp.maximum(dconv + db_ref[0], 0.0)              # (Hd, Wd, 1)
    dfeat = jnp.dot(pool_ref[...], dconv.reshape(hd * wd, 1),
                    preferred_element_type=f32)              # (H*W/64, 1)

    # ---- fusion 1x1 conv on concat([feat, depth_feat]) + IN + ReLU ----------
    y = jnp.dot(feat, wff_ref[...], preferred_element_type=f32)
    y = y + dfeat * wfd_ref[...] + bf_ref[...]
    fusion = instnorm_relu(y)                                # (H*W/64, C)

    # ---- heads: global average pool + Linear + Sigmoid ----------------------
    gap_fusion = jnp.mean(fusion, axis=0, keepdims=True)     # (1, C)
    gap_feat = jnp.mean(feat, axis=0, keepdims=True)         # (1, C)
    od_ref[...] = jax.nn.sigmoid(
        jnp.dot(gap_fusion, wd_ref[...], preferred_element_type=f32) + bd_ref[...])
    ob_ref[...] = jax.nn.sigmoid(
        jnp.dot(gap_feat, wb_ref[...], preferred_element_type=f32) + bb_ref[...])


# ----------------------------------------------------------------------------
# One-time host-side preprocessing (hoisted out of the jitted forward)
# ----------------------------------------------------------------------------
def make_stride2_select(h, w):
    """(h/2*w/2, h*w) 0/1 matrix: picks rows (2i, 2j) of a flattened stride-1
    conv output == the stride-2 (padding 1) conv output."""
    ho, wo = h // 2, w // 2
    rows = np.arange(ho * wo)
    src = (rows // wo) * 2 * w + (rows % wo) * 2
    m = np.zeros((ho * wo, h * w), np.float32)
    m[rows, src] = 1.0
    return jnp.asarray(m)


def make_avgpool_matrix(h, w, k):
    """(h/k*w/k, h*w) averaging matrix for AvgPool2d(k) (entries 1/k^2 or 0)."""
    ho, wo = h // k, w // k
    p = np.arange(h * w)
    oid = (p // w // k) * wo + (p % w) // k
    m = np.zeros((ho * wo, h * w), np.float32)
    m[oid, p] = 1.0 / (k * k)
    return jnp.asarray(m)


def init_params(key, n_feat=64):
    ks = jax.random.split(key, 16)
    nrm = lambda k, shp: (0.05 * jax.random.normal(k, shp)).astype(jnp.float32)
    return {
        # encoder: 4 BasicBlocks (conv weights stored as (kh, kw, cin, cout))
        "enc0_w": nrm(ks[0], (3, 3, 3, n_feat)),      "enc0_b": nrm(ks[1], (n_feat,)),
        "enc1_w": nrm(ks[2], (3, 3, n_feat, n_feat)), "enc1_b": nrm(ks[3], (n_feat,)),
        "enc2_w": nrm(ks[4], (3, 3, n_feat, n_feat)), "enc2_b": nrm(ks[5], (n_feat,)),
        "enc3_w": nrm(ks[6], (3, 3, n_feat, n_feat)), "enc3_b": nrm(ks[7], (n_feat,)),
        # depth conv (1 -> 1)
        "depth_w": nrm(ks[8], (3, 3, 1, 1)),          "depth_b": nrm(ks[9], (1,)),
        # fusion 1x1 conv (n_feat+1 -> n_feat)
        "fusion_w": nrm(ks[10], (1, 1, n_feat + 1, n_feat)),
        "fusion_b": nrm(ks[11], (n_feat,)),
        # heads (Linear n_feat -> 3), stored as (in, out)
        "head_d_w": nrm(ks[12], (n_feat, 3)), "head_d_b": nrm(ks[13], (3,)),
        "head_b_w": nrm(ks[14], (n_feat, 3)), "head_b_b": nrm(ks[15], (3,)),
    }


def prepare_params(params, h, w, n_feat=64):
    """Pack conv weights as (9, Cin, Cout) bf16 taps, biases as (1, C) rows,
    split the fusion weight, and build the tiny constant selection / pooling
    matrices.  Done once, outside the jitted forward."""
    f32 = jnp.float32

    def taps(name):
        wt = params[name]
        k, _, cin, cout = wt.shape
        return wt.reshape(k * k, cin, cout).astype(jnp.bfloat16)

    wf = params["fusion_w"].reshape(n_feat + 1, n_feat).astype(f32)
    return {
        "w0": taps("enc0_w"), "b0": params["enc0_b"].reshape(1, n_feat).astype(f32),
        "w1": taps("enc1_w"), "b1": params["enc1_b"].reshape(1, n_feat).astype(f32),
        "w2": taps("enc2_w"), "b2": params["enc2_b"].reshape(1, n_feat).astype(f32),
        "w3": taps("enc3_w"), "b3": params["enc3_b"].reshape(1, n_feat).astype(f32),
        "s1": make_stride2_select(h, w),
        "s2": make_stride2_select(h // 2, w // 2),
        "s3": make_stride2_select(h // 4, w // 4),
        "dw": params["depth_w"].reshape(9).astype(f32),
        "db": params["depth_b"].reshape(1).astype(f32),
        "pool": make_avgpool_matrix(h, w, 8),
        "wf_f": wf[:n_feat], "wf_d": wf[n_feat:],
        "bf": params["fusion_b"].reshape(1, n_feat).astype(f32),
        "wd": params["head_d_w"].astype(f32), "bd": params["head_d_b"].reshape(1, 3).astype(f32),
        "wb": params["head_b_w"].astype(f32), "bb": params["head_b_b"].reshape(1, 3).astype(f32),
    }


# ----------------------------------------------------------------------------
# Forward
# ----------------------------------------------------------------------------
@jax.jit
def betanet_forward(x_nchw, depth_nchw, prep):
    # NCHW (PyTorch convention) -> NHWC internal layout.
    x = jnp.transpose(x_nchw, (0, 2, 3, 1)).astype(jnp.float32)
    d = jnp.transpose(depth_nchw, (0, 2, 3, 1)).astype(jnp.float32)
    b, h, w, cin = x.shape
    c = prep["w0"].shape[-1]

    def bcast(arr):
        shp = arr.shape
        return pl.BlockSpec(shp, lambda *_: (0,) * len(shp))

    smem = pl.BlockSpec(memory_space=pltpu.MemorySpace.SMEM)

    in_specs = [
        pl.BlockSpec((None, h, w, cin), lambda i: (i, 0, 0, 0)),
        pl.BlockSpec((None, h, w, 1), lambda i: (i, 0, 0, 0)),
        bcast(prep["w0"]), bcast(prep["b0"]),
        bcast(prep["w1"]), bcast(prep["b1"]),
        bcast(prep["w2"]), bcast(prep["b2"]),
        bcast(prep["w3"]), bcast(prep["b3"]),
        bcast(prep["s1"]), bcast(prep["s2"]), bcast(prep["s3"]),
        smem, smem,
        bcast(prep["pool"]),
        bcast(prep["wf_f"]), bcast(prep["wf_d"]), bcast(prep["bf"]),
        bcast(prep["wd"]), bcast(prep["bd"]),
        bcast(prep["wb"]), bcast(prep["bb"]),
    ]
    out_specs = (pl.BlockSpec((None, 1, 3), lambda i: (i, 0, 0)),
                 pl.BlockSpec((None, 1, 3), lambda i: (i, 0, 0)))
    scratch_shapes = [
        pltpu.VMEM((h + 2, w + 2, cin), jnp.float32),          # padded RGB
        pltpu.VMEM((h + 2, w + 2, 1), jnp.float32),             # padded depth
        pltpu.VMEM((h + 2, w + 2, c), jnp.float32),             # padded enc0 act
        pltpu.VMEM((h // 2 + 2, w // 2 + 2, c), jnp.float32),   # padded enc1 act
        pltpu.VMEM((h // 4 + 2, w // 4 + 2, c), jnp.float32),   # padded enc2 act
    ]

    out_d, out_b = pl.pallas_call(
        betanet_kernel,
        out_shape=(jax.ShapeDtypeStruct((b, 1, 3), jnp.float32),
                   jax.ShapeDtypeStruct((b, 1, 3), jnp.float32)),
        grid=(b,),
        in_specs=in_specs,
        out_specs=out_specs,
        scratch_shapes=scratch_shapes,
        compiler_params=pltpu.CompilerParams(
            dimension_semantics=("parallel",)),
    )(x, d,
      prep["w0"], prep["b0"], prep["w1"], prep["b1"],
      prep["w2"], prep["b2"], prep["w3"], prep["b3"],
      prep["s1"], prep["s2"], prep["s3"],
      prep["dw"], prep["db"], prep["pool"],
      prep["wf_f"], prep["wf_d"], prep["bf"],
      prep["wd"], prep["bd"], prep["wb"], prep["bb"])

    return out_d[:, 0, :], out_b[:, 0, :]


if __name__ == "__main__":
    key = jax.random.PRNGKey(0)
    kx, kd, kp = jax.random.split(key, 3)
    B, H, W, n_feat = 2, 16, 16, 64
    x = jax.random.normal(kx, (B, 3, H, W), dtype=jnp.float32)       # NCHW
    depth = jax.random.normal(kd, (B, 1, H, W), dtype=jnp.float32)   # NCHW
    params = init_params(kp, n_feat=n_feat)
    prep = prepare_params(params, H, W, n_feat=n_feat)

    out_d, out_b = betanet_forward(x, depth, prep)
    out_d, out_b = jax.block_until_ready((out_d, out_b))

    assert out_d.shape == (B, 3) and out_b.shape == (B, 3)
    assert bool(jnp.all(jnp.isfinite(out_d))) and bool(jnp.all(jnp.isfinite(out_b)))
    assert bool(jnp.all((out_d >= 0) & (out_d <= 1)))
    assert bool(jnp.all((out_b >= 0) & (out_b <= 1)))
    print("KERNEL_OK")
</pallas_src>

<mosaic_0001>
module attributes {stable_mosaic.version = 11 : i64} {
  func.func @betanet_kernel(%arg0: i32, %arg1: memref<1x16x16x3xf32, #tpu.memory_space<vmem>>, %arg2: memref<1x16x16x1xf32, #tpu.memory_space<vmem>>, %arg3: memref<9x3x64xbf16, #tpu.memory_space<vmem>>, %arg4: memref<1x64xf32, #tpu.memory_space<vmem>>, %arg5: memref<9x64x64xbf16, #tpu.memory_space<vmem>>, %arg6: memref<1x64xf32, #tpu.memory_space<vmem>>, %arg7: memref<9x64x64xbf16, #tpu.memory_space<vmem>>, %arg8: memref<1x64xf32, #tpu.memory_space<vmem>>, %arg9: memref<9x64x64xbf16, #tpu.memory_space<vmem>>, %arg10: memref<1x64xf32, #tpu.memory_space<vmem>>, %arg11: memref<64x256xf32, #tpu.memory_space<vmem>>, %arg12: memref<16x64xf32, #tpu.memory_space<vmem>>, %arg13: memref<4x16xf32, #tpu.memory_space<vmem>>, %arg14: memref<9xf32, #tpu.memory_space<smem>>, %arg15: memref<1xf32, #tpu.memory_space<smem>>, %arg16: memref<4x256xf32, #tpu.memory_space<vmem>>, %arg17: memref<64x64xf32, #tpu.memory_space<vmem>>, %arg18: memref<1x64xf32, #tpu.memory_space<vmem>>, %arg19: memref<1x64xf32, #tpu.memory_space<vmem>>, %arg20: memref<64x3xf32, #tpu.memory_space<vmem>>, %arg21: memref<1x3xf32, #tpu.memory_space<vmem>>, %arg22: memref<64x3xf32, #tpu.memory_space<vmem>>, %arg23: memref<1x3xf32, #tpu.memory_space<vmem>>, %arg24: memref<1x1x3xf32, #tpu.memory_space<vmem>>, %arg25: memref<1x1x3xf32, #tpu.memory_space<vmem>>, %arg26: memref<18x18x3xf32, #tpu.memory_space<vmem>>, %arg27: memref<18x18x1xf32, #tpu.memory_space<vmem>>, %arg28: memref<18x18x64xf32, #tpu.memory_space<vmem>>, %arg29: memref<10x10x64xf32, #tpu.memory_space<vmem>>, %arg30: memref<6x6x64xf32, #tpu.memory_space<vmem>>) attributes {dimension_semantics = [#tpu.dimension_semantics<parallel>], iteration_bounds = array<i64: 2>, scalar_prefetch = 0 : i64, scratch_operands = 5 : i64, tpu.core_type = #tpu.core_type<tc>, window_params = [{transform_indices = @transform_0, window_bounds = array<i64: 1, 16, 16, 3>}, {transform_indices = @transform_1, window_bounds = array<i64: 1, 16, 16, 1>}, {pipeline_mode = #tpu.pipeline_mode<synchronous>, transform_indices = @transform_2, window_bounds = array<i64: 9, 3, 64>}, {pipeline_mode = #tpu.pipeline_mode<synchronous>, transform_indices = @transform_3, window_bounds = array<i64: 1, 64>}, {pipeline_mode = #tpu.pipeline_mode<synchronous>, transform_indices = @transform_4, window_bounds = array<i64: 9, 64, 64>}, {pipeline_mode = #tpu.pipeline_mode<synchronous>, transform_indices = @transform_5, window_bounds = array<i64: 1, 64>}, {pipeline_mode = #tpu.pipeline_mode<synchronous>, transform_indices = @transform_6, window_bounds = array<i64: 9, 64, 64>}, {pipeline_mode = #tpu.pipeline_mode<synchronous>, transform_indices = @transform_7, window_bounds = array<i64: 1, 64>}, {pipeline_mode = #tpu.pipeline_mode<synchronous>, transform_indices = @transform_8, window_bounds = array<i64: 9, 64, 64>}, {pipeline_mode = #tpu.pipeline_mode<synchronous>, transform_indices = @transform_9, window_bounds = array<i64: 1, 64>}, {pipeline_mode = #tpu.pipeline_mode<synchronous>, transform_indices = @transform_10, window_bounds = array<i64: 64, 256>}, {pipeline_mode = #tpu.pipeline_mode<synchronous>, transform_indices = @transform_11, window_bounds = array<i64: 16, 64>}, {pipeline_mode = #tpu.pipeline_mode<synchronous>, transform_indices = @transform_12, window_bounds = array<i64: 4, 16>}, {transform_indices = @transform_13, window_bounds = array<i64: 9>}, {transform_indices = @transform_14, window_bounds = array<i64: 1>}, {pipeline_mode = #tpu.pipeline_mode<synchronous>, transform_indices = @transform_15, window_bounds = array<i64: 4, 256>}, {pipeline_mode = #tpu.pipeline_mode<synchronous>, transform_indices = @transform_16, window_bounds = array<i64: 64, 64>}, {pipeline_mode = #tpu.pipeline_mode<synchronous>, transform_indices = @transform_17, window_bounds = array<i64: 1, 64>}, {pipeline_mode = #tpu.pipeline_mode<synchronous>, transform_indices = @transform_18, window_bounds = array<i64: 1, 64>}, {pipeline_mode = #tpu.pipeline_mode<synchronous>, transform_indices = @transform_19, window_bounds = array<i64: 64, 3>}, {pipeline_mode = #tpu.pipeline_mode<synchronous>, transform_indices = @transform_20, window_bounds = array<i64: 1, 3>}, {pipeline_mode = #tpu.pipeline_mode<synchronous>, transform_indices = @transform_21, window_bounds = array<i64: 64, 3>}, {pipeline_mode = #tpu.pipeline_mode<synchronous>, transform_indices = @transform_22, window_bounds = array<i64: 1, 3>}, {transform_indices = @transform_23, window_bounds = array<i64: 1, 1, 3>}, {transform_indices = @transform_24, window_bounds = array<i64: 1, 1, 3>}]} {
    %c0 = arith.constant 0 : index
    %c0_0 = arith.constant 0 : index
    %c0_1 = arith.constant 0 : index
    %c0_2 = arith.constant 0 : index
    %0 = vector.load %arg1[%c0, %c0_0, %c0_1, %c0_2] : memref<1x16x16x3xf32, #tpu.memory_space<vmem>>, vector<1x16x16x3xf32>
    %1 = vector.shape_cast %0 : vector<1x16x16x3xf32> to vector<16x16x3xf32>
    %cst = arith.constant 0.000000e+00 : f32
    %2 = vector.broadcast %cst : f32 to vector<18x18x3xf32>
    %c0_3 = arith.constant 0 : index
    %c0_4 = arith.constant 0 : index
    %c0_5 = arith.constant 0 : index
    %3 = vector.load %arg26[%c0_3, %c0_4, %c0_5] : memref<18x18x3xf32, #tpu.memory_space<vmem>>, vector<18x18x3xf32>
    tpu.vector_store %arg26[%c0_3, %c0_4, %c0_5], %2 {strides = array<i32>} : memref<18x18x3xf32, #tpu.memory_space<vmem>>, vector<18x18x3xf32>,
    %c1 = arith.constant 1 : index
    %c1_6 = arith.constant 1 : index
    %c0_7 = arith.constant 0 : index
    %4 = vector.load %arg26[%c1, %c1_6, %c0_7] : memref<18x18x3xf32, #tpu.memory_space<vmem>>, vector<16x16x3xf32>
    tpu.vector_store %arg26[%c1, %c1_6, %c0_7], %1 {strides = array<i32>} : memref<18x18x3xf32, #tpu.memory_space<vmem>>, vector<16x16x3xf32>,
    %c0_8 = arith.constant 0 : index
    %c0_9 = arith.constant 0 : index
    %c0_10 = arith.constant 0 : index
    %c0_11 = arith.constant 0 : index
    %5 = vector.load %arg2[%c0_8, %c0_9, %c0_10, %c0_11] : memref<1x16x16x1xf32, #tpu.memory_space<vmem>>, vector<1x16x16x1xf32>
    %6 = vector.shape_cast %5 : vector<1x16x16x1xf32> to vector<16x16x1xf32>
    %cst_12 = arith.constant 0.000000e+00 : f32
    %7 = vector.broadcast %cst_12 : f32 to vector<18x18x1xf32>
    %c0_13 = arith.constant 0 : index
    %c0_14 = arith.constant 0 : index
    %c0_15 = arith.constant 0 : index
    %8 = vector.load %arg27[%c0_13, %c0_14, %c0_15] : memref<18x18x1xf32, #tpu.memory_space<vmem>>, vector<18x18x1xf32>
    tpu.vector_store %arg27[%c0_13, %c0_14, %c0_15], %7 {strides = array<i32>} : memref<18x18x1xf32, #tpu.memory_space<vmem>>, vector<18x18x1xf32>,
    %c1_16 = arith.constant 1 : index
    %c1_17 = arith.constant 1 : index
    %c0_18 = arith.constant 0 : index
    %9 = vector.load %arg27[%c1_16, %c1_17, %c0_18] : memref<18x18x1xf32, #tpu.memory_space<vmem>>, vector<16x16x1xf32>
    tpu.vector_store %arg27[%c1_16, %c1_17, %c0_18], %6 {strides = array<i32>} : memref<18x18x1xf32, #tpu.memory_space<vmem>>, vector<16x16x1xf32>,
    %c0_19 = arith.constant 0 : index
    %c0_20 = arith.constant 0 : index
    %c0_21 = arith.constant 0 : index
    %10 = vector.load %arg26[%c0_19, %c0_20, %c0_21] : memref<18x18x3xf32, #tpu.memory_space<vmem>>, vector<16x16x3xf32>
    %11 = vector.shape_cast %10 : vector<16x16x3xf32> to vector<256x3xf32>
    %12 = arith.truncf %11 : vector<256x3xf32> to vector<256x3xbf16>
    %c0_22 = arith.constant 0 : index
    %c0_23 = arith.constant 0 : index
    %c0_24 = arith.constant 0 : index
    %13 = vector.load %arg3[%c0_22, %c0_23, %c0_24] : memref<9x3x64xbf16, #tpu.memory_space<vmem>>, vector<1x3x64xbf16>
    %14 = vector.shape_cast %13 : vector<1x3x64xbf16> to vector<3x64xbf16>
    %cst_25 = arith.constant dense<0.000000e+00> : vector<256x64xf32>
    %15 = tpu.matmul %12, %14, %cst_25 {dimension_numbers = #tpu.dot_dimension_numbers<[1], [0], [0], [1], [0, 0, 1, 1], [], []>} : vector<256x3xbf16>, vector<3x64xbf16>, vector<256x64xf32> -> vector<256x64xf32>
    %c0_26 = arith.constant 0 : index
    %c1_27 = arith.constant 1 : index
    %c0_28 = arith.constant 0 : index
    %16 = vector.load %arg26[%c0_26, %c1_27, %c0_28] : memref<18x18x3xf32, #tpu.memory_space<vmem>>, vector<16x16x3xf32>
    %17 = vector.shape_cast %16 : vector<16x16x3xf32> to vector<256x3xf32>
    %18 = arith.truncf %17 : vector<256x3xf32> to vector<256x3xbf16>
    %c1_29 = arith.constant 1 : index
    %c0_30 = arith.constant 0 : index
    %c0_31 = arith.constant 0 : index
    %19 = vector.load %arg3[%c1_29, %c0_30, %c0_31] : memref<9x3x64xbf16, #tpu.memory_space<vmem>>, vector<1x3x64xbf16>
    %20 = vector.shape_cast %19 : vector<1x3x64xbf16> to vector<3x64xbf16>
    %cst_32 = arith.constant dense<0.000000e+00> : vector<256x64xf32>
    %21 = tpu.matmul %18, %20, %cst_32 {dimension_numbers = #tpu.dot_dimension_numbers<[1], [0], [0], [1], [0, 0, 1, 1], [], []>} : vector<256x3xbf16>, vector<3x64xbf16>, vector<256x64xf32> -> vector<256x64xf32>
    %22 = arith.addf %15, %21 : vector<256x64xf32>
    %c0_33 = arith.constant 0 : index
    %c2 = arith.constant 2 : index
    %c0_34 = arith.constant 0 : index
    %23 = vector.load %arg26[%c0_33, %c2, %c0_34] : memref<18x18x3xf32, #tpu.memory_space<vmem>>, vector<16x16x3xf32>
    %24 = vector.shape_cast %23 : vector<16x16x3xf32> to vector<256x3xf32>
    %25 = arith.truncf %24 : vector<256x3xf32> to vector<256x3xbf16>
    %c2_35 = arith.constant 2 : index
    %c0_36 = arith.constant 0 : index
    %c0_37 = arith.constant 0 : index
    %26 = vector.load %arg3[%c2_35, %c0_36, %c0_37] : memref<9x3x64xbf16, #tpu.memory_space<vmem>>, vector<1x3x64xbf16>
    %27 = vector.shape_cast %26 : vector<1x3x64xbf16> to vector<3x64xbf16>
    %cst_38 = arith.constant dense<0.000000e+00> : vector<256x64xf32>
    %28 = tpu.matmul %25, %27, %cst_38 {dimension_numbers = #tpu.dot_dimension_numbers<[1], [0], [0], [1], [0, 0, 1, 1], [], []>} : vector<256x3xbf16>, vector<3x64xbf16>, vector<256x64xf32> -> vector<256x64xf32>
    %29 = arith.addf %22, %28 : vector<256x64xf32>
    %c1_39 = arith.constant 1 : index
    %c0_40 = arith.constant 0 : index
    %c0_41 = arith.constant 0 : index
    %30 = vector.load %arg26[%c1_39, %c0_40, %c0_41] : memref<18x18x3xf32, #tpu.memory_space<vmem>>, vector<16x16x3xf32>
    %31 = vector.shape_cast %30 : vector<16x16x3xf32> to vector<256x3xf32>
    %32 = arith.truncf %31 : vector<256x3xf32> to vector<256x3xbf16>
    %c3 = arith.constant 3 : index
    %c0_42 = arith.constant 0 : index
    %c0_43 = arith.constant 0 : index
    %33 = vector.load %arg3[%c3, %c0_42, %c0_43] : memref<9x3x64xbf16, #tpu.memory_space<vmem>>, vector<1x3x64xbf16>
    %34 = vector.shape_cast %33 : vector<1x3x64xbf16> to vector<3x64xbf16>
    %cst_44 = arith.constant dense<0.000000e+00> : vector<256x64xf32>
    %35 = tpu.matmul %32, %34, %cst_44 {dimension_numbers = #tpu.dot_dimension_numbers<[1], [0], [0], [1], [0, 0, 1, 1], [], []>} : vector<256x3xbf16>, vector<3x64xbf16>, vector<256x64xf32> -> vector<256x64xf32>
    %36 = arith.addf %29, %35 : vector<256x64xf32>
    %c1_45 = arith.constant 1 : index
    %c1_46 = arith.constant 1 : index
    %c0_47 = arith.constant 0 : index
    %37 = vector.load %arg26[%c1_45, %c1_46, %c0_47] : memref<18x18x3xf32, #tpu.memory_space<vmem>>, vector<16x16x3xf32>
    %38 = vector.shape_cast %37 : vector<16x16x3xf32> to vector<256x3xf32>
    %39 = arith.truncf %38 : vector<256x3xf32> to vector<256x3xbf16>
    %c4 = arith.constant 4 : index
    %c0_48 = arith.constant 0 : index
    %c0_49 = arith.constant 0 : index
    %40 = vector.load %arg3[%c4, %c0_48, %c0_49] : memref<9x3x64xbf16, #tpu.memory_space<vmem>>, vector<1x3x64xbf16>
    %41 = vector.shape_cast %40 : vector<1x3x64xbf16> to vector<3x64xbf16>
    %cst_50 = arith.constant dense<0.000000e+00> : vector<256x64xf32>
    %42 = tpu.matmul %39, %41, %cst_50 {dimension_numbers = #tpu.dot_dimension_numbers<[1], [0], [0], [1], [0, 0, 1, 1], [], []>} : vector<256x3xbf16>, vector<3x64xbf16>, vector<256x64xf32> -> vector<256x64xf32>
    %43 = arith.addf %36, %42 : vector<256x64xf32>
    %c1_51 = arith.constant 1 : index
    %c2_52 = arith.constant 2 : index
    %c0_53 = arith.constant 0 : index
    %44 = vector.load %arg26[%c1_51, %c2_52, %c0_53] : memref<18x18x3xf32, #tpu.memory_space<vmem>>, vector<16x16x3xf32>
    %45 = vector.shape_cast %44 : vector<16x16x3xf32> to vector<256x3xf32>
    %46 = arith.truncf %45 : vector<256x3xf32> to vector<256x3xbf16>
    %c5 = arith.constant 5 : index
    %c0_54 = arith.constant 0 : index
    %c0_55 = arith.constant 0 : index
    %47 = vector.load %arg3[%c5, %c0_54, %c0_55] : memref<9x3x64xbf16, #tpu.memory_space<vmem>>, vector<1x3x64xbf16>
    %48 = vector.shape_cast %47 : vector<1x3x64xbf16> to vector<3x64xbf16>
    %cst_56 = arith.constant dense<0.000000e+00> : vector<256x64xf32>
    %49 = tpu.matmul %46, %48, %cst_56 {dimension_numbers = #tpu.dot_dimension_numbers<[1], [0], [0], [1], [0, 0, 1, 1], [], []>} : vector<256x3xbf16>, vector<3x64xbf16>, vector<256x64xf32> -> vector<256x64xf32>
    %50 = arith.addf %43, %49 : vector<256x64xf32>
    %c2_57 = arith.constant 2 : index
    %c0_58 = arith.constant 0 : index
    %c0_59 = arith.constant 0 : index
    %51 = vector.load %arg26[%c2_57, %c0_58, %c0_59] : memref<18x18x3xf32, #tpu.memory_space<vmem>>, vector<16x16x3xf32>
    %52 = vector.shape_cast %51 : vector<16x16x3xf32> to vector<256x3xf32>
    %53 = arith.truncf %52 : vector<256x3xf32> to vector<256x3xbf16>
    %c6 = arith.constant 6 : index
    %c0_60 = arith.constant 0 : index
    %c0_61 = arith.constant 0 : index
    %54 = vector.load %arg3[%c6, %c0_60, %c0_61] : memref<9x3x64xbf16, #tpu.memory_space<vmem>>, vector<1x3x64xbf16>
    %55 = vector.shape_cast %54 : vector<1x3x64xbf16> to vector<3x64xbf16>
    %cst_62 = arith.constant dense<0.000000e+00> : vector<256x64xf32>
    %56 = tpu.matmul %53, %55, %cst_62 {dimension_numbers = #tpu.dot_dimension_numbers<[1], [0], [0], [1], [0, 0, 1, 1], [], []>} : vector<256x3xbf16>, vector<3x64xbf16>, vector<256x64xf32> -> vector<256x64xf32>
    %57 = arith.addf %50, %56 : vector<256x64xf32>
    %c2_63 = arith.constant 2 : index
    %c1_64 = arith.constant 1 : index
    %c0_65 = arith.constant 0 : index
    %58 = vector.load %arg26[%c2_63, %c1_64, %c0_65] : memref<18x18x3xf32, #tpu.memory_space<vmem>>, vector<16x16x3xf32>
    %59 = vector.shape_cast %58 : vector<16x16x3xf32> to vector<256x3xf32>
    %60 = arith.truncf %59 : vector<256x3xf32> to vector<256x3xbf16>
    %c7 = arith.constant 7 : index
    %c0_66 = arith.constant 0 : index
    %c0_67 = arith.constant 0 : index
    %61 = vector.load %arg3[%c7, %c0_66, %c0_67] : memref<9x3x64xbf16, #tpu.memory_space<vmem>>, vector<1x3x64xbf16>
    %62 = vector.shape_cast %61 : vector<1x3x64xbf16> to vector<3x64xbf16>
    %cst_68 = arith.constant dense<0.000000e+00> : vector<256x64xf32>
    %63 = tpu.matmul %60, %62, %cst_68 {dimension_numbers = #tpu.dot_dimension_numbers<[1], [0], [0], [1], [0, 0, 1, 1], [], []>} : vector<256x3xbf16>, vector<3x64xbf16>, vector<256x64xf32> -> vector<256x64xf32>
    %64 = arith.addf %57, %63 : vector<256x64xf32>
    %c2_69 = arith.constant 2 : index
    %c2_70 = arith.constant 2 : index
    %c0_71 = arith.constant 0 : index
    %65 = vector.load %arg26[%c2_69, %c2_70, %c0_71] : memref<18x18x3xf32, #tpu.memory_space<vmem>>, vector<16x16x3xf32>
    %66 = vector.shape_cast %65 : vector<16x16x3xf32> to vector<256x3xf32>
    %67 = arith.truncf %66 : vector<256x3xf32> to vector<256x3xbf16>
    %c8 = arith.constant 8 : index
    %c0_72 = arith.constant 0 : index
    %c0_73 = arith.constant 0 : index
    %68 = vector.load %arg3[%c8, %c0_72, %c0_73] : memref<9x3x64xbf16, #tpu.memory_space<vmem>>, vector<1x3x64xbf16>
    %69 = vector.shape_cast %68 : vector<1x3x64xbf16> to vector<3x64xbf16>
    %cst_74 = arith.constant dense<0.000000e+00> : vector<256x64xf32>
    %70 = tpu.matmul %67, %69, %cst_74 {dimension_numbers = #tpu.dot_dimension_numbers<[1], [0], [0], [1], [0, 0, 1, 1], [], []>} : vector<256x3xbf16>, vector<3x64xbf16>, vector<256x64xf32> -> vector<256x64xf32>
    %71 = arith.addf %64, %70 : vector<256x64xf32>
    %c0_75 = arith.constant 0 : index
    %c0_76 = arith.constant 0 : index
    %72 = vector.load %arg4[%c0_75, %c0_76] : memref<1x64xf32, #tpu.memory_space<vmem>>, vector<1x64xf32>
    %73 = vector.broadcast %72 : vector<1x64xf32> to vector<256x64xf32>
    %74 = arith.addf %71, %73 : vector<256x64xf32>
    %cst_77 = arith.constant dense<0.000000e+00> : vector<64xf32>
    %75 = vector.multi_reduction <add>, %74, %cst_77 [0] : vector<256x64xf32> to vector<64xf32>
    %76 = vector.shape_cast %75 : vector<64xf32> to vector<1x64xf32>
    %cst_78 = arith.constant 2.560000e+02 : f32
    %77 = vector.broadcast %cst_78 : f32 to vector<1x64xf32>
    %78 = arith.divf %76, %77 : vector<1x64xf32>
    %79 = vector.broadcast %78 : vector<1x64xf32> to vector<256x64xf32>
    %80 = arith.subf %74, %79 : vector<256x64xf32>
    %81 = arith.mulf %80, %80 : vector<256x64xf32>
    %cst_79 = arith.constant dense<0.000000e+00> : vector<64xf32>
    %82 = vector.multi_reduction <add>, %81, %cst_79 [0] : vector<256x64xf32> to vector<64xf32>
    %83 = vector.shape_cast %82 : vector<64xf32> to vector<1x64xf32>
    %cst_80 = arith.constant 2.560000e+02 : f32
    %84 = vector.broadcast %cst_80 : f32 to vector<1x64xf32>
    %85 = arith.divf %83, %84 : vector<1x64xf32>
    %86 = vector.broadcast %78 : vector<1x64xf32> to vector<256x64xf32>
    %87 = arith.subf %74, %86 : vector<256x64xf32>
    %cst_81 = arith.constant 9.99999974E-6 : f32
    %88 = vector.broadcast %cst_81 : f32 to vector<1x64xf32>
    %89 = arith.addf %85, %88 : vector<1x64xf32>
    %90 = math.rsqrt %89 : vector<1x64xf32>
    %91 = vector.broadcast %90 : vector<1x64xf32> to vector<256x64xf32>
    %92 = arith.mulf %87, %91 : vector<256x64xf32>
    %cst_82 = arith.constant 0.000000e+00 : f32
    %93 = vector.broadcast %cst_82 : f32 to vector<256x64xf32>
    %94 = arith.maximumf %92, %93 : vector<256x64xf32>
    %cst_83 = arith.constant 0.000000e+00 : f32
    %95 = vector.broadcast %cst_83 : f32 to vector<18x18x64xf32>
    %c0_84 = arith.constant 0 : index
    %c0_85 = arith.constant 0 : index
    %c0_86 = arith.constant 0 : index
    %96 = vector.load %arg28[%c0_84, %c0_85, %c0_86] : memref<18x18x64xf32, #tpu.memory_space<vmem>>, vector<18x18x64xf32>
    tpu.vector_store %arg28[%c0_84, %c0_85, %c0_86], %95 {strides = array<i32>} : memref<18x18x64xf32, #tpu.memory_space<vmem>>, vector<18x18x64xf32>,
    %97 = vector.shape_cast %94 : vector<256x64xf32> to vector<16x16x64xf32>
    %c1_87 = arith.constant 1 : index
    %c1_88 = arith.constant 1 : index
    %c0_89 = arith.constant 0 : index
    %98 = vector.load %arg28[%c1_87, %c1_88, %c0_89] : memref<18x18x64xf32, #tpu.memory_space<vmem>>, vector<16x16x64xf32>
    tpu.vector_store %arg28[%c1_87, %c1_88, %c0_89], %97 {strides = array<i32>} : memref<18x18x64xf32, #tpu.memory_space<vmem>>, vector<16x16x64xf32>,
    %c0_90 = arith.constant 0 : index
    %c0_91 = arith.constant 0 : index
    %99 = vector.load %arg11[%c0_90, %c0_91] : memref<64x256xf32, #tpu.memory_space<vmem>>, vector<64x256xf32>
    %c0_92 = arith.constant 0 : index
    %c0_93 = arith.constant 0 : index
    %c0_94 = arith.constant 0 : index
    %100 = vector.load %arg28[%c0_92, %c0_93, %c0_94] : memref<18x18x64xf32, #tpu.memory_space<vmem>>, vector<16x16x64xf32>
    %101 = vector.shape_cast %100 : vector<16x16x64xf32> to vector<256x64xf32>
    %102 = arith.truncf %101 : vector<256x64xf32> to vector<256x64xbf16>
    %c0_95 = arith.constant 0 : index
    %c0_96 = arith.constant 0 : index
    %c0_97 = arith.constant 0 : index
    %103 = vector.load %arg5[%c0_95, %c0_96, %c0_97] : memref<9x64x64xbf16, #tpu.memory_space<vmem>>, vector<1x64x64xbf16>
    %104 = vector.shape_cast %103 : vector<1x64x64xbf16> to vector<64x64xbf16>
    %cst_98 = arith.constant dense<0.000000e+00> : vector<256x64xf32>
    %105 = tpu.matmul %102, %104, %cst_98 {dimension_numbers = #tpu.dot_dimension_numbers<[1], [0], [0], [1], [0, 0, 1, 1], [], []>} : vector<256x64xbf16>, vector<64x64xbf16>, vector<256x64xf32> -> vector<256x64xf32>
    %c0_99 = arith.constant 0 : index
    %c1_100 = arith.constant 1 : index
    %c0_101 = arith.constant 0 : index
    %106 = vector.load %arg28[%c0_99, %c1_100, %c0_101] : memref<18x18x64xf32, #tpu.memory_space<vmem>>, vector<16x16x64xf32>
    %107 = vector.shape_cast %106 : vector<16x16x64xf32> to vector<256x64xf32>
    %108 = arith.truncf %107 : vector<256x64xf32> to vector<256x64xbf16>
    %c1_102 = arith.constant 1 : index
    %c0_103 = arith.constant 0 : index
    %c0_104 = arith.constant 0 : index
    %109 = vector.load %arg5[%c1_102, %c0_103, %c0_104] : memref<9x64x64xbf16, #tpu.memory_space<vmem>>, vector<1x64x64xbf16>
    %110 = vector.shape_cast %109 : vector<1x64x64xbf16> to vector<64x64xbf16>
    %cst_105 = arith.constant dense<0.000000e+00> : vector<256x64xf32>
    %111 = tpu.matmul %108, %110, %cst_105 {dimension_numbers = #tpu.dot_dimension_numbers<[1], [0], [0], [1], [0, 0, 1, 1], [], []>} : vector<256x64xbf16>, vector<64x64xbf16>, vector<256x64xf32> -> vector<256x64xf32>
    %112 = arith.addf %105, %111 : vector<256x64xf32>
    %c0_106 = arith.constant 0 : index
    %c2_107 = arith.constant 2 : index
    %c0_108 = arith.constant 0 : index
    %113 = vector.load %arg28[%c0_106, %c2_107, %c0_108] : memref<18x18x64xf32, #tpu.memory_space<vmem>>, vector<16x16x64xf32>
    %114 = vector.shape_cast %113 : vector<16x16x64xf32> to vector<256x64xf32>
    %115 = arith.truncf %114 : vector<256x64xf32> to vector<256x64xbf16>
    %c2_109 = arith.constant 2 : index
    %c0_110 = arith.constant 0 : index
    %c0_111 = arith.constant 0 : index
    %116 = vector.load %arg5[%c2_109, %c0_110, %c0_111] : memref<9x64x64xbf16, #tpu.memory_space<vmem>>, vector<1x64x64xbf16>
    %117 = vector.shape_cast %116 : vector<1x64x64xbf16> to vector<64x64xbf16>
    %cst_112 = arith.constant dense<0.000000e+00> : vector<256x64xf32>
    %118 = tpu.matmul %115, %117, %cst_112 {dimension_numbers = #tpu.dot_dimension_numbers<[1], [0], [0], [1], [0, 0, 1, 1], [], []>} : vector<256x64xbf16>, vector<64x64xbf16>, vector<256x64xf32> -> vector<256x64xf32>
    %119 = arith.addf %112, %118 : vector<256x64xf32>
    %c1_113 = arith.constant 1 : index
    %c0_114 = arith.constant 0 : index
    %c0_115 = arith.constant 0 : index
    %120 = vector.load %arg28[%c1_113, %c0_114, %c0_115] : memref<18x18x64xf32, #tpu.memory_space<vmem>>, vector<16x16x64xf32>
    %121 = vector.shape_cast %120 : vector<16x16x64xf32> to vector<256x64xf32>
    %122 = arith.truncf %121 : vector<256x64xf32> to vector<256x64xbf16>
    %c3_116 = arith.constant 3 : index
    %c0_117 = arith.constant 0 : index
    %c0_118 = arith.constant 0 : index
    %123 = vector.load %arg5[%c3_116, %c0_117, %c0_118] : memref<9x64x64xbf16, #tpu.memory_space<vmem>>, vector<1x64x64xbf16>
    %124 = vector.shape_cast %123 : vector<1x64x64xbf16> to vector<64x64xbf16>
    %cst_119 = arith.constant dense<0.000000e+00> : vector<256x64xf32>
    %125 = tpu.matmul %122, %124, %cst_119 {dimension_numbers = #tpu.dot_dimension_numbers<[1], [0], [0], [1], [0, 0, 1, 1], [], []>} : vector<256x64xbf16>, vector<64x64xbf16>, vector<256x64xf32> -> vector<256x64xf32>
    %126 = arith.addf %119, %125 : vector<256x64xf32>
    %c1_120 = arith.constant 1 : index
    %c1_121 = arith.constant 1 : index
    %c0_122 = arith.constant 0 : index
    %127 = vector.load %arg28[%c1_120, %c1_121, %c0_122] : memref<18x18x64xf32, #tpu.memory_space<vmem>>, vector<16x16x64xf32>
    %128 = vector.shape_cast %127 : vector<16x16x64xf32> to vector<256x64xf32>
    %129 = arith.truncf %128 : vector<256x64xf32> to vector<256x64xbf16>
    %c4_123 = arith.constant 4 : index
    %c0_124 = arith.constant 0 : index
    %c0_125 = arith.constant 0 : index
    %130 = vector.load %arg5[%c4_123, %c0_124, %c0_125] : memref<9x64x64xbf16, #tpu.memory_space<vmem>>, vector<1x64x64xbf16>
    %131 = vector.shape_cast %130 : vector<1x64x64xbf16> to vector<64x64xbf16>
    %cst_126 = arith.constant dense<0.000000e+00> : vector<256x64xf32>
    %132 = tpu.matmul %129, %131, %cst_126 {dimension_numbers = #tpu.dot_dimension_numbers<[1], [0], [0], [1], [0, 0, 1, 1], [], []>} : vector<256x64xbf16>, vector<64x64xbf16>, vector<256x64xf32> -> vector<256x64xf32>
    %133 = arith.addf %126, %132 : vector<256x64xf32>
    %c1_127 = arith.constant 1 : index
    %c2_128 = arith.constant 2 : index
    %c0_129 = arith.constant 0 : index
    %134 = vector.load %arg28[%c1_127, %c2_128, %c0_129] : memref<18x18x64xf32, #tpu.memory_space<vmem>>, vector<16x16x64xf32>
    %135 = vector.shape_cast %134 : vector<16x16x64xf32> to vector<256x64xf32>
    %136 = arith.truncf %135 : vector<256x64xf32> to vector<256x64xbf16>
    %c5_130 = arith.constant 5 : index
    %c0_131 = arith.constant 0 : index
    %c0_132 = arith.constant 0 : index
    %137 = vector.load %arg5[%c5_130, %c0_131, %c0_132] : memref<9x64x64xbf16, #tpu.memory_space<vmem>>, vector<1x64x64xbf16>
    %138 = vector.shape_cast %137 : vector<1x64x64xbf16> to vector<64x64xbf16>
    %cst_133 = arith.constant dense<0.000000e+00> : vector<256x64xf32>
    %139 = tpu.matmul %136, %138, %cst_133 {dimension_numbers = #tpu.dot_dimension_numbers<[1], [0], [0], [1], [0, 0, 1, 1], [], []>} : vector<256x64xbf16>, vector<64x64xbf16>, vector<256x64xf32> -> vector<256x64xf32>
    %140 = arith.addf %133, %139 : vector<256x64xf32>
    %c2_134 = arith.constant 2 : index
    %c0_135 = arith.constant 0 : index
    %c0_136 = arith.constant 0 : index
    %141 = vector.load %arg28[%c2_134, %c0_135, %c0_136] : memref<18x18x64xf32, #tpu.memory_space<vmem>>, vector<16x16x64xf32>
    %142 = vector.shape_cast %141 : vector<16x16x64xf32> to vector<256x64xf32>
    %143 = arith.truncf %142 : vector<256x64xf32> to vector<256x64xbf16>
    %c6_137 = arith.constant 6 : index
    %c0_138 = arith.constant 0 : index
    %c0_139 = arith.constant 0 : index
    %144 = vector.load %arg5[%c6_137, %c0_138, %c0_139] : memref<9x64x64xbf16, #tpu.memory_space<vmem>>, vector<1x64x64xbf16>
    %145 = vector.shape_cast %144 : vector<1x64x64xbf16> to vector<64x64xbf16>
    %cst_140 = arith.constant dense<0.000000e+00> : vector<256x64xf32>
    %146 = tpu.matmul %143, %145, %cst_140 {dimension_numbers = #tpu.dot_dimension_numbers<[1], [0], [0], [1], [0, 0, 1, 1], [], []>} : vector<256x64xbf16>, vector<64x64xbf16>, vector<256x64xf32> -> vector<256x64xf32>
    %147 = arith.addf %140, %146 : vector<256x64xf32>
    %c2_141 = arith.constant 2 : index
    %c1_142 = arith.constant 1 : index
    %c0_143 = arith.constant 0 : index
    %148 = vector.load %arg28[%c2_141, %c1_142, %c0_143] : memref<18x18x64xf32, #tpu.memory_space<vmem>>, vector<16x16x64xf32>
    %149 = vector.shape_cast %148 : vector<16x16x64xf32> to vector<256x64xf32>
    %150 = arith.truncf %149 : vector<256x64xf32> to vector<256x64xbf16>
    %c7_144 = arith.constant 7 : index
    %c0_145 = arith.constant 0 : index
    %c0_146 = arith.constant 0 : index
    %151 = vector.load %arg5[%c7_144, %c0_145, %c0_146] : memref<9x64x64xbf16, #tpu.memory_space<vmem>>, vector<1x64x64xbf16>
    %152 = vector.shape_cast %151 : vector<1x64x64xbf16> to vector<64x64xbf16>
    %cst_147 = arith.constant dense<0.000000e+00> : vector<256x64xf32>
    %153 = tpu.matmul %150, %152, %cst_147 {dimension_numbers = #tpu.dot_dimension_numbers<[1], [0], [0], [1], [0, 0, 1, 1], [], []>} : vector<256x64xbf16>, vector<64x64xbf16>, vector<256x64xf32> -> vector<256x64xf32>
    %154 = arith.addf %147, %153 : vector<256x64xf32>
    %c2_148 = arith.constant 2 : index
    %c2_149 = arith.constant 2 : index
    %c0_150 = arith.constant 0 : index
    %155 = vector.load %arg28[%c2_148, %c2_149, %c0_150] : memref<18x18x64xf32, #tpu.memory_space<vmem>>, vector<16x16x64xf32>
    %156 = vector.shape_cast %155 : vector<16x16x64xf32> to vector<256x64xf32>
    %157 = arith.truncf %156 : vector<256x64xf32> to vector<256x64xbf16>
    %c8_151 = arith.constant 8 : index
    %c0_152 = arith.constant 0 : index
    %c0_153 = arith.constant 0 : index
    %158 = vector.load %arg5[%c8_151, %c0_152, %c0_153] : memref<9x64x64xbf16, #tpu.memory_space<vmem>>, vector<1x64x64xbf16>
    %159 = vector.shape_cast %158 : vector<1x64x64xbf16> to vector<64x64xbf16>
    %cst_154 = arith.constant dense<0.000000e+00> : vector<256x64xf32>
    %160 = tpu.matmul %157, %159, %cst_154 {dimension_numbers = #tpu.dot_dimension_numbers<[1], [0], [0], [1], [0, 0, 1, 1], [], []>} : vector<256x64xbf16>, vector<64x64xbf16>, vector<256x64xf32> -> vector<256x64xf32>
    %161 = arith.addf %154, %160 : vector<256x64xf32>
    %c0_155 = arith.constant 0 : index
    %c0_156 = arith.constant 0 : index
    %162 = vector.load %arg6[%c0_155, %c0_156] : memref<1x64xf32, #tpu.memory_space<vmem>>, vector<1x64xf32>
    %163 = vector.broadcast %162 : vector<1x64xf32> to vector<256x64xf32>
    %164 = arith.addf %161, %163 : vector<256x64xf32>
    %cst_157 = arith.constant dense<0.000000e+00> : vector<64x64xf32>
    %165 = tpu.matmul %99, %164, %cst_157 {dimension_numbers = #tpu.dot_dimension_numbers<[1], [0], [0], [1], [0, 0, 1, 1], [], []>} : vector<64x256xf32>, vector<256x64xf32>, vector<64x64xf32> -> vector<64x64xf32>
    %cst_158 = arith.constant dense<0.000000e+00> : vector<64xf32>
    %166 = vector.multi_reduction <add>, %165, %cst_158 [0] : vector<64x64xf32> to vector<64xf32>
    %167 = vector.shape_cast %166 : vector<64xf32> to vector<1x64xf32>
    %cst_159 = arith.constant 6.400000e+01 : f32
    %168 = vector.broadcast %cst_159 : f32 to vector<1x64xf32>
    %169 = arith.divf %167, %168 : vector<1x64xf32>
    %170 = vector.broadcast %169 : vector<1x64xf32> to vector<64x64xf32>
    %171 = arith.subf %165, %170 : vector<64x64xf32>
    %172 = arith.mulf %171, %171 : vector<64x64xf32>
    %cst_160 = arith.constant dense<0.000000e+00> : vector<64xf32>
    %173 = vector.multi_reduction <add>, %172, %cst_160 [0] : vector<64x64xf32> to vector<64xf32>
    %174 = vector.shape_cast %173 : vector<64xf32> to vector<1x64xf32>
    %cst_161 = arith.constant 6.400000e+01 : f32
    %175 = vector.broadcast %cst_161 : f32 to vector<1x64xf32>
    %176 = arith.divf %174, %175 : vector<1x64xf32>
    %177 = vector.broadcast %169 : vector<1x64xf32> to vector<64x64xf32>
    %178 = arith.subf %165, %177 : vector<64x64xf32>
    %cst_162 = arith.constant 9.99999974E-6 : f32
    %179 = vector.broadcast %cst_162 : f32 to vector<1x64xf32>
    %180 = arith.addf %176, %179 : vector<1x64xf32>
    %181 = math.rsqrt %180 : vector<1x64xf32>
    %182 = vector.broadcast %181 : vector<1x64xf32> to vector<64x64xf32>
    %183 = arith.mulf %178, %182 : vector<64x64xf32>
    %cst_163 = arith.constant 0.000000e+00 : f32
    %184 = vector.broadcast %cst_163 : f32 to vector<64x64xf32>
    %185 = arith.maximumf %183, %184 : vector<64x64xf32>
    %cst_164 = arith.constant 0.000000e+00 : f32
    %186 = vector.broadcast %cst_164 : f32 to vector<10x10x64xf32>
    %c0_165 = arith.constant 0 : index
    %c0_166 = arith.constant 0 : index
    %c0_167 = arith.constant 0 : index
    %187 = vector.load %arg29[%c0_165, %c0_166, %c0_167] : memref<10x10x64xf32, #tpu.memory_space<vmem>>, vector<10x10x64xf32>
    tpu.vector_store %arg29[%c0_165, %c0_166, %c0_167], %186 {strides = array<i32>} : memref<10x10x64xf32, #tpu.memory_space<vmem>>, vector<10x10x64xf32>,
    %188 = vector.shape_cast %185 : vector<64x64xf32> to vector<8x8x64xf32>
    %c1_168 = arith.constant 1 : index
    %c1_169 = arith.constant 1 : index
    %c0_170 = arith.constant 0 : index
    %189 = vector.load %arg29[%c1_168, %c1_169, %c0_170] : memref<10x10x64xf32, #tpu.memory_space<vmem>>, vector<8x8x64xf32>
    tpu.vector_store %arg29[%c1_168, %c1_169, %c0_170], %188 {strides = array<i32>} : memref<10x10x64xf32, #tpu.memory_space<vmem>>, vector<8x8x64xf32>,
    %c0_171 = arith.constant 0 : index
    %c0_172 = arith.constant 0 : index
    %190 = vector.load %arg12[%c0_171, %c0_172] : memref<16x64xf32, #tpu.memory_space<vmem>>, vector<16x64xf32>
    %c0_173 = arith.constant 0 : index
    %c0_174 = arith.constant 0 : index
    %c0_175 = arith.constant 0 : index
    %191 = vector.load %arg29[%c0_173, %c0_174, %c0_175] : memref<10x10x64xf32, #tpu.memory_space<vmem>>, vector<8x8x64xf32>
    %192 = vector.shape_cast %191 : vector<8x8x64xf32> to vector<64x64xf32>
    %193 = arith.truncf %192 : vector<64x64xf32> to vector<64x64xbf16>
    %c0_176 = arith.constant 0 : index
    %c0_177 = arith.constant 0 : index
    %c0_178 = arith.constant 0 : index
    %194 = vector.load %arg7[%c0_176, %c0_177, %c0_178] : memref<9x64x64xbf16, #tpu.memory_space<vmem>>, vector<1x64x64xbf16>
    %195 = vector.shape_cast %194 : vector<1x64x64xbf16> to vector<64x64xbf16>
    %cst_179 = arith.constant dense<0.000000e+00> : vector<64x64xf32>
    %196 = tpu.matmul %193, %195, %cst_179 {dimension_numbers = #tpu.dot_dimension_numbers<[1], [0], [0], [1], [0, 0, 1, 1], [], []>} : vector<64x64xbf16>, vector<64x64xbf16>, vector<64x64xf32> -> vector<64x64xf32>
    %c0_180 = arith.constant 0 : index
    %c1_181 = arith.constant 1 : index
    %c0_182 = arith.constant 0 : index
    %197 = vector.load %arg29[%c0_180, %c1_181, %c0_182] : memref<10x10x64xf32, #tpu.memory_space<vmem>>, vector<8x8x64xf32>
    %198 = vector.shape_cast %197 : vector<8x8x64xf32> to vector<64x64xf32>
    %199 = arith.truncf %198 : vector<64x64xf32> to vector<64x64xbf16>
    %c1_183 = arith.constant 1 : index
    %c0_184 = arith.constant 0 : index
    %c0_185 = arith.constant 0 : index
    %200 = vector.load %arg7[%c1_183, %c0_184, %c0_185] : memref<9x64x64xbf16, #tpu.memory_space<vmem>>, vector<1x64x64xbf16>
    %201 = vector.shape_cast %200 : vector<1x64x64xbf16> to vector<64x64xbf16>
    %cst_186 = arith.constant dense<0.000000e+00> : vector<64x64xf32>
    %202 = tpu.matmul %199, %201, %cst_186 {dimension_numbers = #tpu.dot_dimension_numbers<[1], [0], [0], [1], [0, 0, 1, 1], [], []>} : vector<64x64xbf16>, vector<64x64xbf16>, vector<64x64xf32> -> vector<64x64xf32>
    %203 = arith.addf %196, %202 : vector<64x64xf32>
    %c0_187 = arith.constant 0 : index
    %c2_188 = arith.constant 2 : index
    %c0_189 = arith.constant 0 : index
    %204 = vector.load %arg29[%c0_187, %c2_188, %c0_189] : memref<10x10x64xf32, #tpu.memory_space<vmem>>, vector<8x8x64xf32>
    %205 = vector.shape_cast %204 : vector<8x8x64xf32> to vector<64x64xf32>
    %206 = arith.truncf %205 : vector<64x64xf32> to vector<64x64xbf16>
    %c2_190 = arith.constant 2 : index
    %c0_191 = arith.constant 0 : index
    %c0_192 = arith.constant 0 : index
    %207 = vector.load %arg7[%c2_190, %c0_191, %c0_192] : memref<9x64x64xbf16, #tpu.memory_space<vmem>>, vector<1x64x64xbf16>
    %208 = vector.shape_cast %207 : vector<1x64x64xbf16> to vector<64x64xbf16>
    %cst_193 = arith.constant dense<0.000000e+00> : vector<64x64xf32>
    %209 = tpu.matmul %206, %208, %cst_193 {dimension_numbers = #tpu.dot_dimension_numbers<[1], [0], [0], [1], [0, 0, 1, 1], [], []>} : vector<64x64xbf16>, vector<64x64xbf16>, vector<64x64xf32> -> vector<64x64xf32>
    %210 = arith.addf %203, %209 : vector<64x64xf32>
    %c1_194 = arith.constant 1 : index
    %c0_195 = arith.constant 0 : index
    %c0_196 = arith.constant 0 : index
    %211 = vector.load %arg29[%c1_194, %c0_195, %c0_196] : memref<10x10x64xf32, #tpu.memory_space<vmem>>, vector<8x8x64xf32>
    %212 = vector.shape_cast %211 : vector<8x8x64xf32> to vector<64x64xf32>
    %213 = arith.truncf %212 : vector<64x64xf32> to vector<64x64xbf16>
    %c3_197 = arith.constant 3 : index
    %c0_198 = arith.constant 0 : index
    %c0_199 = arith.constant 0 : index
    %214 = vector.load %arg7[%c3_197, %c0_198, %c0_199] : memref<9x64x64xbf16, #tpu.memory_space<vmem>>, vector<1x64x64xbf16>
    %215 = vector.shape_cast %214 : vector<1x64x64xbf16> to vector<64x64xbf16>
    %cst_200 = arith.constant dense<0.000000e+00> : vector<64x64xf32>
    %216 = tpu.matmul %213, %215, %cst_200 {dimension_numbers = #tpu.dot_dimension_numbers<[1], [0], [0], [1], [0, 0, 1, 1], [], []>} : vector<64x64xbf16>, vector<64x64xbf16>, vector<64x64xf32> -> vector<64x64xf32>
    %217 = arith.addf %210, %216 : vector<64x64xf32>
    %c1_201 = arith.constant 1 : index
    %c1_202 = arith.constant 1 : index
    %c0_203 = arith.constant 0 : index
    %218 = vector.load %arg29[%c1_201, %c1_202, %c0_203] : memref<10x10x64xf32, #tpu.memory_space<vmem>>, vector<8x8x64xf32>
    %219 = vector.shape_cast %218 : vector<8x8x64xf32> to vector<64x64xf32>
    %220 = arith.truncf %219 : vector<64x64xf32> to vector<64x64xbf16>
    %c4_204 = arith.constant 4 : index
    %c0_205 = arith.constant 0 : index
    %c0_206 = arith.constant 0 : index
    %221 = vector.load %arg7[%c4_204, %c0_205, %c0_206] : memref<9x64x64xbf16, #tpu.memory_space<vmem>>, vector<1x64x64xbf16>
    %222 = vector.shape_cast %221 : vector<1x64x64xbf16> to vector<64x64xbf16>
    %cst_207 = arith.constant dense<0.000000e+00> : vector<64x64xf32>
    %223 = tpu.matmul %220, %222, %cst_207 {dimension_numbers = #tpu.dot_dimension_numbers<[1], [0], [0], [1], [0, 0, 1, 1], [], []>} : vector<64x64xbf16>, vector<64x64xbf16>, vector<64x64xf32> -> vector<64x64xf32>
    %224 = arith.addf %217, %223 : vector<64x64xf32>
    %c1_208 = arith.constant 1 : index
    %c2_209 = arith.constant 2 : index
    %c0_210 = arith.constant 0 : index
    %225 = vector.load %arg29[%c1_208, %c2_209, %c0_210] : memref<10x10x64xf32, #tpu.memory_space<vmem>>, vector<8x8x64xf32>
    %226 = vector.shape_cast %225 : vector<8x8x64xf32> to vector<64x64xf32>
    %227 = arith.truncf %226 : vector<64x64xf32> to vector<64x64xbf16>
    %c5_211 = arith.constant 5 : index
    %c0_212 = arith.constant 0 : index
    %c0_213 = arith.constant 0 : index
    %228 = vector.load %arg7[%c5_211, %c0_212, %c0_213] : memref<9x64x64xbf16, #tpu.memory_space<vmem>>, vector<1x64x64xbf16>
    %229 = vector.shape_cast %228 : vector<1x64x64xbf16> to vector<64x64xbf16>
    %cst_214 = arith.constant dense<0.000000e+00> : vector<64x64xf32>
    %230 = tpu.matmul %227, %229, %cst_214 {dimension_numbers = #tpu.dot_dimension_numbers<[1], [0], [0], [1], [0, 0, 1, 1], [], []>} : vector<64x64xbf16>, vector<64x64xbf16>, vector<64x64xf32> -> vector<64x64xf32>
    %231 = arith.addf %224, %230 : vector<64x64xf32>
    %c2_215 = arith.constant 2 : index
    %c0_216 = arith.constant 0 : index
    %c0_217 = arith.constant 0 : index
    %232 = vector.load %arg29[%c2_215, %c0_216, %c0_217] : memref<10x10x64xf32, #tpu.memory_space<vmem>>, vector<8x8x64xf32>
    %233 = vector.shape_cast %232 : vector<8x8x64xf32> to vector<64x64xf32>
    %234 = arith.truncf %233 : vector<64x64xf32> to vector<64x64xbf16>
    %c6_218 = arith.constant 6 : index
    %c0_219 = arith.constant 0 : index
    %c0_220 = arith.constant 0 : index
    %235 = vector.load %arg7[%c6_218, %c0_219, %c0_220] : memref<9x64x64xbf16, #tpu.memory_space<vmem>>, vector<1x64x64xbf16>
    %236 = vector.shape_cast %235 : vector<1x64x64xbf16> to vector<64x64xbf16>
    %cst_221 = arith.constant dense<0.000000e+00> : vector<64x64xf32>
    %237 = tpu.matmul %234, %236, %cst_221 {dimension_numbers = #tpu.dot_dimension_numbers<[1], [0], [0], [1], [0, 0, 1, 1], [], []>} : vector<64x64xbf16>, vector<64x64xbf16>, vector<64x64xf32> -> vector<64x64xf32>
    %238 = arith.addf %231, %237 : vector<64x64xf32>
    %c2_222 = arith.constant 2 : index
    %c1_223 = arith.constant 1 : index
    %c0_224 = arith.constant 0 : index
    %239 = vector.load %arg29[%c2_222, %c1_223, %c0_224] : memref<10x10x64xf32, #tpu.memory_space<vmem>>, vector<8x8x64xf32>
    %240 = vector.shape_cast %239 : vector<8x8x64xf32> to vector<64x64xf32>
    %241 = arith.truncf %240 : vector<64x64xf32> to vector<64x64xbf16>
    %c7_225 = arith.constant 7 : index
    %c0_226 = arith.constant 0 : index
    %c0_227 = arith.constant 0 : index
    %242 = vector.load %arg7[%c7_225, %c0_226, %c0_227] : memref<9x64x64xbf16, #tpu.memory_space<vmem>>, vector<1x64x64xbf16>
    %243 = vector.shape_cast %242 : vector<1x64x64xbf16> to vector<64x64xbf16>
    %cst_228 = arith.constant dense<0.000000e+00> : vector<64x64xf32>
    %244 = tpu.matmul %241, %243, %cst_228 {dimension_numbers = #tpu.dot_dimension_numbers<[1], [0], [0], [1], [0, 0, 1, 1], [], []>} : vector<64x64xbf16>, vector<64x64xbf16>, vector<64x64xf32> -> vector<64x64xf32>
    %245 = arith.addf %238, %244 : vector<64x64xf32>
    %c2_229 = arith.constant 2 : index
    %c2_230 = arith.constant 2 : index
    %c0_231 = arith.constant 0 : index
    %246 = vector.load %arg29[%c2_229, %c2_230, %c0_231] : memref<10x10x64xf32, #tpu.memory_space<vmem>>, vector<8x8x64xf32>
    %247 = vector.shape_cast %246 : vector<8x8x64xf32> to vector<64x64xf32>
    %248 = arith.truncf %247 : vector<64x64xf32> to vector<64x64xbf16>
    %c8_232 = arith.constant 8 : index
    %c0_233 = arith.constant 0 : index
    %c0_234 = arith.constant 0 : index
    %249 = vector.load %arg7[%c8_232, %c0_233, %c0_234] : memref<9x64x64xbf16, #tpu.memory_space<vmem>>, vector<1x64x64xbf16>
    %250 = vector.shape_cast %249 : vector<1x64x64xbf16> to vector<64x64xbf16>
    %cst_235 = arith.constant dense<0.000000e+00> : vector<64x64xf32>
    %251 = tpu.matmul %248, %250, %cst_235 {dimension_numbers = #tpu.dot_dimension_numbers<[1], [0], [0], [1], [0, 0, 1, 1], [], []>} : vector<64x64xbf16>, vector<64x64xbf16>, vector<64x64xf32> -> vector<64x64xf32>
    %252 = arith.addf %245, %251 : vector<64x64xf32>
    %c0_236 = arith.constant 0 : index
    %c0_237 = arith.constant 0 : index
    %253 = vector.load %arg8[%c0_236, %c0_237] : memref<1x64xf32, #tpu.memory_space<vmem>>, vector<1x64xf32>
    %254 = vector.broadcast %253 : vector<1x64xf32> to vector<64x64xf32>
    %255 = arith.addf %252, %254 : vector<64x64xf32>
    %cst_238 = arith.constant dense<0.000000e+00> : vector<16x64xf32>
    %256 = tpu.matmul %190, %255, %cst_238 {dimension_numbers = #tpu.dot_dimension_numbers<[1], [0], [0], [1], [0, 0, 1, 1], [], []>} : vector<16x64xf32>, vector<64x64xf32>, vector<16x64xf32> -> vector<16x64xf32>
    %cst_239 = arith.constant dense<0.000000e+00> : vector<64xf32>
    %257 = vector.multi_reduction <add>, %256, %cst_239 [0] : vector<16x64xf32> to vector<64xf32>
    %258 = vector.shape_cast %257 : vector<64xf32> to vector<1x64xf32>
    %cst_240 = arith.constant 1.600000e+01 : f32
    %259 = vector.broadcast %cst_240 : f32 to vector<1x64xf32>
    %260 = arith.divf %258, %259 : vector<1x64xf32>
    %261 = vector.broadcast %260 : vector<1x64xf32> to vector<16x64xf32>
    %262 = arith.subf %256, %261 : vector<16x64xf32>
    %263 = arith.mulf %262, %262 : vector<16x64xf32>
    %cst_241 = arith.constant dense<0.000000e+00> : vector<64xf32>
    %264 = vector.multi_reduction <add>, %263, %cst_241 [0] : vector<16x64xf32> to vector<64xf32>
    %265 = vector.shape_cast %264 : vector<64xf32> to vector<1x64xf32>
    %cst_242 = arith.constant 1.600000e+01 : f32
    %266 = vector.broadcast %cst_242 : f32 to vector<1x64xf32>
    %267 = arith.divf %265, %266 : vector<1x64xf32>
    %268 = vector.broadcast %260 : vector<1x64xf32> to vector<16x64xf32>
    %269 = arith.subf %256, %268 : vector<16x64xf32>
    %cst_243 = arith.constant 9.99999974E-6 : f32
    %270 = vector.broadcast %cst_243 : f32 to vector<1x64xf32>
    %271 = arith.addf %267, %270 : vector<1x64xf32>
    %272 = math.rsqrt %271 : vector<1x64xf32>
    %273 = vector.broadcast %272 : vector<1x64xf32> to vector<16x64xf32>
    %274 = arith.mulf %269, %273 : vector<16x64xf32>
    %cst_244 = arith.constant 0.000000e+00 : f32
    %275 = vector.broadcast %cst_244 : f32 to vector<16x64xf32>
    %276 = arith.maximumf %274, %275 : vector<16x64xf32>
    %cst_245 = arith.constant 0.000000e+00 : f32
    %277 = vector.broadcast %cst_245 : f32 to vector<6x6x64xf32>
    %c0_246 = arith.constant 0 : index
    %c0_247 = arith.constant 0 : index
    %c0_248 = arith.constant 0 : index
    %278 = vector.load %arg30[%c0_246, %c0_247, %c0_248] : memref<6x6x64xf32, #tpu.memory_space<vmem>>, vector<6x6x64xf32>
    tpu.vector_store %arg30[%c0_246, %c0_247, %c0_248], %277 {strides = array<i32>} : memref<6x6x64xf32, #tpu.memory_space<vmem>>, vector<6x6x64xf32>,
    %279 = vector.shape_cast %276 : vector<16x64xf32> to vector<4x4x64xf32>
    %c1_249 = arith.constant 1 : index
    %c1_250 = arith.constant 1 : index
    %c0_251 = arith.constant 0 : index
    %280 = vector.load %arg30[%c1_249, %c1_250, %c0_251] : memref<6x6x64xf32, #tpu.memory_space<vmem>>, vector<4x4x64xf32>
    tpu.vector_store %arg30[%c1_249, %c1_250, %c0_251], %279 {strides = array<i32>} : memref<6x6x64xf32, #tpu.memory_space<vmem>>, vector<4x4x64xf32>,
    %c0_252 = arith.constant 0 : index
    %c0_253 = arith.constant 0 : index
    %281 = vector.load %arg13[%c0_252, %c0_253] : memref<4x16xf32, #tpu.memory_space<vmem>>, vector<4x16xf32>
    %c0_254 = arith.constant 0 : index
    %c0_255 = arith.constant 0 : index
    %c0_256 = arith.constant 0 : index
    %282 = vector.load %arg30[%c0_254, %c0_255, %c0_256] : memref<6x6x64xf32, #tpu.memory_space<vmem>>, vector<4x4x64xf32>
    %283 = vector.shape_cast %282 : vector<4x4x64xf32> to vector<16x64xf32>
    %284 = arith.truncf %283 : vector<16x64xf32> to vector<16x64xbf16>
    %c0_257 = arith.constant 0 : index
    %c0_258 = arith.constant 0 : index
    %c0_259 = arith.constant 0 : index
    %285 = vector.load %arg9[%c0_257, %c0_258, %c0_259] : memref<9x64x64xbf16, #tpu.memory_space<vmem>>, vector<1x64x64xbf16>
    %286 = vector.shape_cast %285 : vector<1x64x64xbf16> to vector<64x64xbf16>
    %cst_260 = arith.constant dense<0.000000e+00> : vector<16x64xf32>
    %287 = tpu.matmul %284, %286, %cst_260 {dimension_numbers = #tpu.dot_dimension_numbers<[1], [0], [0], [1], [0, 0, 1, 1], [], []>} : vector<16x64xbf16>, vector<64x64xbf16>, vector<16x64xf32> -> vector<16x64xf32>
    %c0_261 = arith.constant 0 : index
    %c1_262 = arith.constant 1 : index
    %c0_263 = arith.constant 0 : index
    %288 = vector.load %arg30[%c0_261, %c1_262, %c0_263] : memref<6x6x64xf32, #tpu.memory_space<vmem>>, vector<4x4x64xf32>
    %289 = vector.shape_cast %288 : vector<4x4x64xf32> to vector<16x64xf32>
    %290 = arith.truncf %289 : vector<16x64xf32> to vector<16x64xbf16>
    %c1_264 = arith.constant 1 : index
    %c0_265 = arith.constant 0 : index
    %c0_266 = arith.constant 0 : index
    %291 = vector.load %arg9[%c1_264, %c0_265, %c0_266] : memref<9x64x64xbf16, #tpu.memory_space<vmem>>, vector<1x64x64xbf16>
    %292 = vector.shape_cast %291 : vector<1x64x64xbf16> to vector<64x64xbf16>
    %cst_267 = arith.constant dense<0.000000e+00> : vector<16x64xf32>
    %293 = tpu.matmul %290, %292, %cst_267 {dimension_numbers = #tpu.dot_dimension_numbers<[1], [0], [0], [1], [0, 0, 1, 1], [], []>} : vector<16x64xbf16>, vector<64x64xbf16>, vector<16x64xf32> -> vector<16x64xf32>
    %294 = arith.addf %287, %293 : vector<16x64xf32>
    %c0_268 = arith.constant 0 : index
    %c2_269 = arith.constant 2 : index
    %c0_270 = arith.constant 0 : index
    %295 = vector.load %arg30[%c0_268, %c2_269, %c0_270] : memref<6x6x64xf32, #tpu.memory_space<vmem>>, vector<4x4x64xf32>
    %296 = vector.shape_cast %295 : vector<4x4x64xf32> to vector<16x64xf32>
    %297 = arith.truncf %296 : vector<16x64xf32> to vector<16x64xbf16>
    %c2_271 = arith.constant 2 : index
    %c0_272 = arith.constant 0 : index
    %c0_273 = arith.constant 0 : index
    %298 = vector.load %arg9[%c2_271, %c0_272, %c0_273] : memref<9x64x64xbf16, #tpu.memory_space<vmem>>, vector<1x64x64xbf16>
    %299 = vector.shape_cast %298 : vector<1x64x64xbf16> to vector<64x64xbf16>
    %cst_274 = arith.constant dense<0.000000e+00> : vector<16x64xf32>
    %300 = tpu.matmul %297, %299, %cst_274 {dimension_numbers = #tpu.dot_dimension_numbers<[1], [0], [0], [1], [0, 0, 1, 1], [], []>} : vector<16x64xbf16>, vector<64x64xbf16>, vector<16x64xf32> -> vector<16x64xf32>
    %301 = arith.addf %294, %300 : vector<16x64xf32>
    %c1_275 = arith.constant 1 : index
    %c0_276 = arith.constant 0 : index
    %c0_277 = arith.constant 0 : index
    %302 = vector.load %arg30[%c1_275, %c0_276, %c0_277] : memref<6x6x64xf32, #tpu.memory_space<vmem>>, vector<4x4x64xf32>
    %303 = vector.shape_cast %302 : vector<4x4x64xf32> to vector<16x64xf32>
    %304 = arith.truncf %303 : vector<16x64xf32> to vector<16x64xbf16>
    %c3_278 = arith.constant 3 : index
    %c0_279 = arith.constant 0 : index
    %c0_280 = arith.constant 0 : index
    %305 = vector.load %arg9[%c3_278, %c0_279, %c0_280] : memref<9x64x64xbf16, #tpu.memory_space<vmem>>, vector<1x64x64xbf16>
    %306 = vector.shape_cast %305 : vector<1x64x64xbf16> to vector<64x64xbf16>
    %cst_281 = arith.constant dense<0.000000e+00> : vector<16x64xf32>
    %307 = tpu.matmul %304, %306, %cst_281 {dimension_numbers = #tpu.dot_dimension_numbers<[1], [0], [0], [1], [0, 0, 1, 1], [], []>} : vector<16x64xbf16>, vector<64x64xbf16>, vector<16x64xf32> -> vector<16x64xf32>
    %308 = arith.addf %301, %307 : vector<16x64xf32>
    %c1_282 = arith.constant 1 : index
    %c1_283 = arith.constant 1 : index
    %c0_284 = arith.constant 0 : index
    %309 = vector.load %arg30[%c1_282, %c1_283, %c0_284] : memref<6x6x64xf32, #tpu.memory_space<vmem>>, vector<4x4x64xf32>
    %310 = vector.shape_cast %309 : vector<4x4x64xf32> to vector<16x64xf32>
    %311 = arith.truncf %310 : vector<16x64xf32> to vector<16x64xbf16>
    %c4_285 = arith.constant 4 : index
    %c0_286 = arith.constant 0 : index
    %c0_287 = arith.constant 0 : index
    %312 = vector.load %arg9[%c4_285, %c0_286, %c0_287] : memref<9x64x64xbf16, #tpu.memory_space<vmem>>, vector<1x64x64xbf16>
    %313 = vector.shape_cast %312 : vector<1x64x64xbf16> to vector<64x64xbf16>
    %cst_288 = arith.constant dense<0.000000e+00> : vector<16x64xf32>
    %314 = tpu.matmul %311, %313, %cst_288 {dimension_numbers = #tpu.dot_dimension_numbers<[1], [0], [0], [1], [0, 0, 1, 1], [], []>} : vector<16x64xbf16>, vector<64x64xbf16>, vector<16x64xf32> -> vector<16x64xf32>
    %315 = arith.addf %308, %314 : vector<16x64xf32>
    %c1_289 = arith.constant 1 : index
    %c2_290 = arith.constant 2 : index
    %c0_291 = arith.constant 0 : index
    %316 = vector.load %arg30[%c1_289, %c2_290, %c0_291] : memref<6x6x64xf32, #tpu.memory_space<vmem>>, vector<4x4x64xf32>
    %317 = vector.shape_cast %316 : vector<4x4x64xf32> to vector<16x64xf32>
    %318 = arith.truncf %317 : vector<16x64xf32> to vector<16x64xbf16>
    %c5_292 = arith.constant 5 : index
    %c0_293 = arith.constant 0 : index
    %c0_294 = arith.constant 0 : index
    %319 = vector.load %arg9[%c5_292, %c0_293, %c0_294] : memref<9x64x64xbf16, #tpu.memory_space<vmem>>, vector<1x64x64xbf16>
    %320 = vector.shape_cast %319 : vector<1x64x64xbf16> to vector<64x64xbf16>
    %cst_295 = arith.constant dense<0.000000e+00> : vector<16x64xf32>
    %321 = tpu.matmul %318, %320, %cst_295 {dimension_numbers = #tpu.dot_dimension_numbers<[1], [0], [0], [1], [0, 0, 1, 1], [], []>} : vector<16x64xbf16>, vector<64x64xbf16>, vector<16x64xf32> -> vector<16x64xf32>
    %322 = arith.addf %315, %321 : vector<16x64xf32>
    %c2_296 = arith.constant 2 : index
    %c0_297 = arith.constant 0 : index
    %c0_298 = arith.constant 0 : index
    %323 = vector.load %arg30[%c2_296, %c0_297, %c0_298] : memref<6x6x64xf32, #tpu.memory_space<vmem>>, vector<4x4x64xf32>
    %324 = vector.shape_cast %323 : vector<4x4x64xf32> to vector<16x64xf32>
    %325 = arith.truncf %324 : vector<16x64xf32> to vector<16x64xbf16>
    %c6_299 = arith.constant 6 : index
    %c0_300 = arith.constant 0 : index
    %c0_301 = arith.constant 0 : index
    %326 = vector.load %arg9[%c6_299, %c0_300, %c0_301] : memref<9x64x64xbf16, #tpu.memory_space<vmem>>, vector<1x64x64xbf16>
    %327 = vector.shape_cast %326 : vector<1x64x64xbf16> to vector<64x64xbf16>
    %cst_302 = arith.constant dense<0.000000e+00> : vector<16x64xf32>
    %328 = tpu.matmul %325, %327, %cst_302 {dimension_numbers = #tpu.dot_dimension_numbers<[1], [0], [0], [1], [0, 0, 1, 1], [], []>} : vector<16x64xbf16>, vector<64x64xbf16>, vector<16x64xf32> -> vector<16x64xf32>
    %329 = arith.addf %322, %328 : vector<16x64xf32>
    %c2_303 = arith.constant 2 : index
    %c1_304 = arith.constant 1 : index
    %c0_305 = arith.constant 0 : index
    %330 = vector.load %arg30[%c2_303, %c1_304, %c0_305] : memref<6x6x64xf32, #tpu.memory_space<vmem>>, vector<4x4x64xf32>
    %331 = vector.shape_cast %330 : vector<4x4x64xf32> to vector<16x64xf32>
    %332 = arith.truncf %331 : vector<16x64xf32> to vector<16x64xbf16>
    %c7_306 = arith.constant 7 : index
    %c0_307 = arith.constant 0 : index
    %c0_308 = arith.constant 0 : index
    %333 = vector.load %arg9[%c7_306, %c0_307, %c0_308] : memref<9x64x64xbf16, #tpu.memory_space<vmem>>, vector<1x64x64xbf16>
    %334 = vector.shape_cast %333 : vector<1x64x64xbf16> to vector<64x64xbf16>
    %cst_309 = arith.constant dense<0.000000e+00> : vector<16x64xf32>
    %335 = tpu.matmul %332, %334, %cst_309 {dimension_numbers = #tpu.dot_dimension_numbers<[1], [0], [0], [1], [0, 0, 1, 1], [], []>} : vector<16x64xbf16>, vector<64x64xbf16>, vector<16x64xf32> -> vector<16x64xf32>
    %336 = arith.addf %329, %335 : vector<16x64xf32>
    %c2_310 = arith.constant 2 : index
    %c2_311 = arith.constant 2 : index
    %c0_312 = arith.constant 0 : index
    %337 = vector.load %arg30[%c2_310, %c2_311, %c0_312] : memref<6x6x64xf32, #tpu.memory_space<vmem>>, vector<4x4x64xf32>
    %338 = vector.shape_cast %337 : vector<4x4x64xf32> to vector<16x64xf32>
    %339 = arith.truncf %338 : vector<16x64xf32> to vector<16x64xbf16>
    %c8_313 = arith.constant 8 : index
    %c0_314 = arith.constant 0 : index
    %c0_315 = arith.constant 0 : index
    %340 = vector.load %arg9[%c8_313, %c0_314, %c0_315] : memref<9x64x64xbf16, #tpu.memory_space<vmem>>, vector<1x64x64xbf16>
    %341 = vector.shape_cast %340 : vector<1x64x64xbf16> to vector<64x64xbf16>
    %cst_316 = arith.constant dense<0.000000e+00> : vector<16x64xf32>
    %342 = tpu.matmul %339, %341, %cst_316 {dimension_numbers = #tpu.dot_dimension_numbers<[1], [0], [0], [1], [0, 0, 1, 1], [], []>} : vector<16x64xbf16>, vector<64x64xbf16>, vector<16x64xf32> -> vector<16x64xf32>
    %343 = arith.addf %336, %342 : vector<16x64xf32>
    %c0_317 = arith.constant 0 : index
    %c0_318 = arith.constant 0 : index
    %344 = vector.load %arg10[%c0_317, %c0_318] : memref<1x64xf32, #tpu.memory_space<vmem>>, vector<1x64xf32>
    %345 = vector.broadcast %344 : vector<1x64xf32> to vector<16x64xf32>
    %346 = arith.addf %343, %345 : vector<16x64xf32>
    %cst_319 = arith.constant dense<0.000000e+00> : vector<4x64xf32>
    %347 = tpu.matmul %281, %346, %cst_319 {dimension_numbers = #tpu.dot_dimension_numbers<[1], [0], [0], [1], [0, 0, 1, 1], [], []>} : vector<4x16xf32>, vector<16x64xf32>, vector<4x64xf32> -> vector<4x64xf32>
    %cst_320 = arith.constant dense<0.000000e+00> : vector<64xf32>
    %348 = vector.multi_reduction <add>, %347, %cst_320 [0] : vector<4x64xf32> to vector<64xf32>
    %349 = vector.shape_cast %348 : vector<64xf32> to vector<1x64xf32>
    %cst_321 = arith.constant 4.000000e+00 : f32
    %350 = vector.broadcast %cst_321 : f32 to vector<1x64xf32>
    %351 = arith.divf %349, %350 : vector<1x64xf32>
    %352 = vector.broadcast %351 : vector<1x64xf32> to vector<4x64xf32>
    %353 = arith.subf %347, %352 : vector<4x64xf32>
    %354 = arith.mulf %353, %353 : vector<4x64xf32>
    %cst_322 = arith.constant dense<0.000000e+00> : vector<64xf32>
    %355 = vector.multi_reduction <add>, %354, %cst_322 [0] : vector<4x64xf32> to vector<64xf32>
    %356 = vector.shape_cast %355 : vector<64xf32> to vector<1x64xf32>
    %cst_323 = arith.constant 4.000000e+00 : f32
    %357 = vector.broadcast %cst_323 : f32 to vector<1x64xf32>
    %358 = arith.divf %356, %357 : vector<1x64xf32>
    %359 = vector.broadcast %351 : vector<1x64xf32> to vector<4x64xf32>
    %360 = arith.subf %347, %359 : vector<4x64xf32>
    %cst_324 = arith.constant 9.99999974E-6 : f32
    %361 = vector.broadcast %cst_324 : f32 to vector<1x64xf32>
    %362 = arith.addf %358, %361 : vector<1x64xf32>
    %363 = math.rsqrt %362 : vector<1x64xf32>
    %364 = vector.broadcast %363 : vector<1x64xf32> to vector<4x64xf32>
    %365 = arith.mulf %360, %364 : vector<4x64xf32>
    %cst_325 = arith.constant 0.000000e+00 : f32
    %366 = vector.broadcast %cst_325 : f32 to vector<4x64xf32>
    %367 = arith.maximumf %365, %366 : vector<4x64xf32>
    %c0_326 = arith.constant 0 : index
    %c0_327 = arith.constant 0 : index
    %c0_328 = arith.constant 0 : index
    %368 = vector.load %arg27[%c0_326, %c0_327, %c0_328] : memref<18x18x1xf32, #tpu.memory_space<vmem>>, vector<16x16x1xf32>
    %c0_329 = arith.constant 0 : index
    %369 = memref.load %arg14[%c0_329] : memref<9xf32, #tpu.memory_space<smem>>
    %370 = vector.broadcast %369 : f32 to vector<16x16x1xf32>
    %371 = arith.mulf %368, %370 : vector<16x16x1xf32>
    %c0_330 = arith.constant 0 : index
    %c1_331 = arith.constant 1 : index
    %c0_332 = arith.constant 0 : index
    %372 = vector.load %arg27[%c0_330, %c1_331, %c0_332] : memref<18x18x1xf32, #tpu.memory_space<vmem>>, vector<16x16x1xf32>
    %c1_333 = arith.constant 1 : index
    %373 = memref.load %arg14[%c1_333] : memref<9xf32, #tpu.memory_space<smem>>
    %374 = vector.broadcast %373 : f32 to vector<16x16x1xf32>
    %375 = arith.mulf %372, %374 : vector<16x16x1xf32>
    %376 = arith.addf %371, %375 : vector<16x16x1xf32>
    %c0_334 = arith.constant 0 : index
    %c2_335 = arith.constant 2 : index
    %c0_336 = arith.constant 0 : index
    %377 = vector.load %arg27[%c0_334, %c2_335, %c0_336] : memref<18x18x1xf32, #tpu.memory_space<vmem>>, vector<16x16x1xf32>
    %c2_337 = arith.constant 2 : index
    %378 = memref.load %arg14[%c2_337] : memref<9xf32, #tpu.memory_space<smem>>
    %379 = vector.broadcast %378 : f32 to vector<16x16x1xf32>
    %380 = arith.mulf %377, %379 : vector<16x16x1xf32>
    %381 = arith.addf %376, %380 : vector<16x16x1xf32>
    %c1_338 = arith.constant 1 : index
    %c0_339 = arith.constant 0 : index
    %c0_340 = arith.constant 0 : index
    %382 = vector.load %arg27[%c1_338, %c0_339, %c0_340] : memref<18x18x1xf32, #tpu.memory_space<vmem>>, vector<16x16x1xf32>
    %c3_341 = arith.constant 3 : index
    %383 = memref.load %arg14[%c3_341] : memref<9xf32, #tpu.memory_space<smem>>
    %384 = vector.broadcast %383 : f32 to vector<16x16x1xf32>
    %385 = arith.mulf %382, %384 : vector<16x16x1xf32>
    %386 = arith.addf %381, %385 : vector<16x16x1xf32>
    %c1_342 = arith.constant 1 : index
    %c1_343 = arith.constant 1 : index
    %c0_344 = arith.constant 0 : index
    %387 = vector.load %arg27[%c1_342, %c1_343, %c0_344] : memref<18x18x1xf32, #tpu.memory_space<vmem>>, vector<16x16x1xf32>
    %c4_345 = arith.constant 4 : index
    %388 = memref.load %arg14[%c4_345] : memref<9xf32, #tpu.memory_space<smem>>
    %389 = vector.broadcast %388 : f32 to vector<16x16x1xf32>
    %390 = arith.mulf %387, %389 : vector<16x16x1xf32>
    %391 = arith.addf %386, %390 : vector<16x16x1xf32>
    %c1_346 = arith.constant 1 : index
    %c2_347 = arith.constant 2 : index
    %c0_348 = arith.constant 0 : index
    %392 = vector.load %arg27[%c1_346, %c2_347, %c0_348] : memref<18x18x1xf32, #tpu.memory_space<vmem>>, vector<16x16x1xf32>
    %c5_349 = arith.constant 5 : index
    %393 = memref.load %arg14[%c5_349] : memref<9xf32, #tpu.memory_space<smem>>
    %394 = vector.broadcast %393 : f32 to vector<16x16x1xf32>
    %395 = arith.mulf %392, %394 : vector<16x16x1xf32>
    %396 = arith.addf %391, %395 : vector<16x16x1xf32>
    %c2_350 = arith.constant 2 : index
    %c0_351 = arith.constant 0 : index
    %c0_352 = arith.constant 0 : index
    %397 = vector.load %arg27[%c2_350, %c0_351, %c0_352] : memref<18x18x1xf32, #tpu.memory_space<vmem>>, vector<16x16x1xf32>
    %c6_353 = arith.constant 6 : index
    %398 = memref.load %arg14[%c6_353] : memref<9xf32, #tpu.memory_space<smem>>
    %399 = vector.broadcast %398 : f32 to vector<16x16x1xf32>
    %400 = arith.mulf %397, %399 : vector<16x16x1xf32>
    %401 = arith.addf %396, %400 : vector<16x16x1xf32>
    %c2_354 = arith.constant 2 : index
    %c1_355 = arith.constant 1 : index
    %c0_356 = arith.constant 0 : index
    %402 = vector.load %arg27[%c2_354, %c1_355, %c0_356] : memref<18x18x1xf32, #tpu.memory_space<vmem>>, vector<16x16x1xf32>
    %c7_357 = arith.constant 7 : index
    %403 = memref.load %arg14[%c7_357] : memref<9xf32, #tpu.memory_space<smem>>
    %404 = vector.broadcast %403 : f32 to vector<16x16x1xf32>
    %405 = arith.mulf %402, %404 : vector<16x16x1xf32>
    %406 = arith.addf %401, %405 : vector<16x16x1xf32>
    %c2_358 = arith.constant 2 : index
    %c2_359 = arith.constant 2 : index
    %c0_360 = arith.constant 0 : index
    %407 = vector.load %arg27[%c2_358, %c2_359, %c0_360] : memref<18x18x1xf32, #tpu.memory_space<vmem>>, vector<16x16x1xf32>
    %c8_361 = arith.constant 8 : index
    %408 = memref.load %arg14[%c8_361] : memref<9xf32, #tpu.memory_space<smem>>
    %409 = vector.broadcast %408 : f32 to vector<16x16x1xf32>
    %410 = arith.mulf %407, %409 : vector<16x16x1xf32>
    %411 = arith.addf %406, %410 : vector<16x16x1xf32>
    %c0_362 = arith.constant 0 : index
    %412 = memref.load %arg15[%c0_362] : memref<1xf32, #tpu.memory_space<smem>>
    %413 = vector.broadcast %412 : f32 to vector<16x16x1xf32>
    %414 = arith.addf %411, %413 : vector<16x16x1xf32>
    %cst_363 = arith.constant 0.000000e+00 : f32
    %415 = vector.broadcast %cst_363 : f32 to vector<16x16x1xf32>
    %416 = arith.maximumf %414, %415 : vector<16x16x1xf32>
    %c0_364 = arith.constant 0 : index
    %c0_365 = arith.constant 0 : index
    %417 = vector.load %arg16[%c0_364, %c0_365] : memref<4x256xf32, #tpu.memory_space<vmem>>, vector<4x256xf32>
    %418 = vector.shape_cast %416 : vector<16x16x1xf32> to vector<256x1xf32>
    %cst_366 = arith.constant dense<0.000000e+00> : vector<4x1xf32>
    %419 = tpu.matmul %417, %418, %cst_366 {dimension_numbers = #tpu.dot_dimension_numbers<[1], [0], [0], [1], [0, 0, 1, 1], [], []>} : vector<4x256xf32>, vector<256x1xf32>, vector<4x1xf32> -> vector<4x1xf32>
    %c0_367 = arith.constant 0 : index
    %c0_368 = arith.constant 0 : index
    %420 = vector.load %arg17[%c0_367, %c0_368] : memref<64x64xf32, #tpu.memory_space<vmem>>, vector<64x64xf32>
    %cst_369 = arith.constant dense<0.000000e+00> : vector<4x64xf32>
    %421 = tpu.matmul %367, %420, %cst_369 {dimension_numbers = #tpu.dot_dimension_numbers<[1], [0], [0], [1], [0, 0, 1, 1], [], []>} : vector<4x64xf32>, vector<64x64xf32>, vector<4x64xf32> -> vector<4x64xf32>
    %c0_370 = arith.constant 0 : index
    %c0_371 = arith.constant 0 : index
    %422 = vector.load %arg18[%c0_370, %c0_371] : memref<1x64xf32, #tpu.memory_space<vmem>>, vector<1x64xf32>
    %423 = vector.broadcast %419 : vector<4x1xf32> to vector<4x64xf32>
    %424 = vector.broadcast %422 : vector<1x64xf32> to vector<4x64xf32>
    %425 = arith.mulf %423, %424 : vector<4x64xf32>
    %426 = arith.addf %421, %425 : vector<4x64xf32>
    %c0_372 = arith.constant 0 : index
    %c0_373 = arith.constant 0 : index
    %427 = vector.load %arg19[%c0_372, %c0_373] : memref<1x64xf32, #tpu.memory_space<vmem>>, vector<1x64xf32>
    %428 = vector.broadcast %427 : vector<1x64xf32> to vector<4x64xf32>
    %429 = arith.addf %426, %428 : vector<4x64xf32>
    %cst_374 = arith.constant dense<0.000000e+00> : vector<64xf32>
    %430 = vector.multi_reduction <add>, %429, %cst_374 [0] : vector<4x64xf32> to vector<64xf32>
    %431 = vector.shape_cast %430 : vector<64xf32> to vector<1x64xf32>
    %cst_375 = arith.constant 4.000000e+00 : f32
    %432 = vector.broadcast %cst_375 : f32 to vector<1x64xf32>
    %433 = arith.divf %431, %432 : vector<1x64xf32>
    %434 = vector.broadcast %433 : vector<1x64xf32> to vector<4x64xf32>
    %435 = arith.subf %429, %434 : vector<4x64xf32>
    %436 = arith.mulf %435, %435 : vector<4x64xf32>
    %cst_376 = arith.constant dense<0.000000e+00> : vector<64xf32>
    %437 = vector.multi_reduction <add>, %436, %cst_376 [0] : vector<4x64xf32> to vector<64xf32>
    %438 = vector.shape_cast %437 : vector<64xf32> to vector<1x64xf32>
    %cst_377 = arith.constant 4.000000e+00 : f32
    %439 = vector.broadcast %cst_377 : f32 to vector<1x64xf32>
    %440 = arith.divf %438, %439 : vector<1x64xf32>
    %441 = vector.broadcast %433 : vector<1x64xf32> to vector<4x64xf32>
    %442 = arith.subf %429, %441 : vector<4x64xf32>
    %cst_378 = arith.constant 9.99999974E-6 : f32
    %443 = vector.broadcast %cst_378 : f32 to vector<1x64xf32>
    %444 = arith.addf %440, %443 : vector<1x64xf32>
    %445 = math.rsqrt %444 : vector<1x64xf32>
    %446 = vector.broadcast %445 : vector<1x64xf32> to vector<4x64xf32>
    %447 = arith.mulf %442, %446 : vector<4x64xf32>
    %cst_379 = arith.constant 0.000000e+00 : f32
    %448 = vector.broadcast %cst_379 : f32 to vector<4x64xf32>
    %449 = arith.maximumf %447, %448 : vector<4x64xf32>
    %cst_380 = arith.constant dense<0.000000e+00> : vector<64xf32>
    %450 = vector.multi_reduction <add>, %449, %cst_380 [0] : vector<4x64xf32> to vector<64xf32>
    %451 = vector.shape_cast %450 : vector<64xf32> to vector<1x64xf32>
    %cst_381 = arith.constant 4.000000e+00 : f32
    %452 = vector.broadcast %cst_381 : f32 to vector<1x64xf32>
    %453 = arith.divf %451, %452 : vector<1x64xf32>
    %cst_382 = arith.constant dense<0.000000e+00> : vector<64xf32>
    %454 = vector.multi_reduction <add>, %367, %cst_382 [0] : vector<4x64xf32> to vector<64xf32>
    %455 = vector.shape_cast %454 : vector<64xf32> to vector<1x64xf32>
    %cst_383 = arith.constant 4.000000e+00 : f32
    %456 = vector.broadcast %cst_383 : f32 to vector<1x64xf32>
    %457 = arith.divf %455, %456 : vector<1x64xf32>
    %c0_384 = arith.constant 0 : index
    %c0_385 = arith.constant 0 : index
    %458 = vector.load %arg20[%c0_384, %c0_385] : memref<64x3xf32, #tpu.memory_space<vmem>>, vector<64x3xf32>
    %cst_386 = arith.constant dense<0.000000e+00> : vector<1x3xf32>
    %459 = tpu.matmul %453, %458, %cst_386 {dimension_numbers = #tpu.dot_dimension_numbers<[1], [0], [0], [1], [0, 0, 1, 1], [], []>} : vector<1x64xf32>, vector<64x3xf32>, vector<1x3xf32> -> vector<1x3xf32>
    %c0_387 = arith.constant 0 : index
    %c0_388 = arith.constant 0 : index
    %460 = vector.load %arg21[%c0_387, %c0_388] : memref<1x3xf32, #tpu.memory_space<vmem>>, vector<1x3xf32>
    %461 = arith.addf %459, %460 : vector<1x3xf32>
    %462 = arith.negf %461 : vector<1x3xf32>
    %463 = math.exp %462 : vector<1x3xf32>
    %cst_389 = arith.constant 1.000000e+00 : f32
    %464 = vector.broadcast %cst_389 : f32 to vector<1x3xf32>
    %465 = arith.addf %464, %463 : vector<1x3xf32>
    %466 = arith.divf %464, %465 : vector<1x3xf32>
    %c0_390 = arith.constant 0 : index
    %c0_391 = arith.constant 0 : index
    %c0_392 = arith.constant 0 : index
    %467 = vector.load %arg24[%c0_390, %c0_391, %c0_392] : memref<1x1x3xf32, #tpu.memory_space<vmem>>, vector<1x1x3xf32>
    %468 = vector.shape_cast %467 : vector<1x1x3xf32> to vector<1x3xf32>
    %469 = vector.shape_cast %466 : vector<1x3xf32> to vector<1x1x3xf32>
    tpu.vector_store %arg24[%c0_390, %c0_391, %c0_392], %469 {strides = array<i32>} : memref<1x1x3xf32, #tpu.memory_space<vmem>>, vector<1x1x3xf32>,
    %c0_393 = arith.constant 0 : index
    %c0_394 = arith.constant 0 : index
    %470 = vector.load %arg22[%c0_393, %c0_394] : memref<64x3xf32, #tpu.memory_space<vmem>>, vector<64x3xf32>
    %cst_395 = arith.constant dense<0.000000e+00> : vector<1x3xf32>
    %471 = tpu.matmul %457, %470, %cst_395 {dimension_numbers = #tpu.dot_dimension_numbers<[1], [0], [0], [1], [0, 0, 1, 1], [], []>} : vector<1x64xf32>, vector<64x3xf32>, vector<1x3xf32> -> vector<1x3xf32>
    %c0_396 = arith.constant 0 : index
    %c0_397 = arith.constant 0 : index
    %472 = vector.load %arg23[%c0_396, %c0_397] : memref<1x3xf32, #tpu.memory_space<vmem>>, vector<1x3xf32>
    %473 = arith.addf %471, %472 : vector<1x3xf32>
    %474 = arith.negf %473 : vector<1x3xf32>
    %475 = math.exp %474 : vector<1x3xf32>
    %cst_398 = arith.constant 1.000000e+00 : f32
    %476 = vector.broadcast %cst_398 : f32 to vector<1x3xf32>
    %477 = arith.addf %476, %475 : vector<1x3xf32>
    %478 = arith.divf %476, %477 : vector<1x3xf32>
    %c0_399 = arith.constant 0 : index
    %c0_400 = arith.constant 0 : index
    %c0_401 = arith.constant 0 : index
    %479 = vector.load %arg25[%c0_399, %c0_400, %c0_401] : memref<1x1x3xf32, #tpu.memory_space<vmem>>, vector<1x1x3xf32>
    %480 = vector.shape_cast %479 : vector<1x1x3xf32> to vector<1x3xf32>
    %481 = vector.shape_cast %478 : vector<1x3xf32> to vector<1x1x3xf32>
    tpu.vector_store %arg25[%c0_399, %c0_400, %c0_401], %481 {strides = array<i32>} : memref<1x1x3xf32, #tpu.memory_space<vmem>>, vector<1x1x3xf32>,
    return
  }
  func.func @transform_0(%arg0: i32) -> (i32, i32, i32, i32) {
    %c0_i32 = arith.constant 0 : i32
    %c0_i32_0 = arith.constant 0 : i32
    %c0_i32_1 = arith.constant 0 : i32
    %c0_i32_2 = arith.constant 0 : i32
    return %arg0, %c0_i32, %c0_i32_0, %c0_i32_1 : i32, i32, i32, i32
  }
  func.func @transform_1(%arg0: i32) -> (i32, i32, i32, i32) {
    %c0_i32 = arith.constant 0 : i32
    %c0_i32_0 = arith.constant 0 : i32
    %c0_i32_1 = arith.constant 0 : i32
    %c0_i32_2 = arith.constant 0 : i32
    return %arg0, %c0_i32, %c0_i32_0, %c0_i32_1 : i32, i32, i32, i32
  }
  func.func @transform_2(%arg0: i32) -> (i32, i32, i32) {
    %c0_i32 = arith.constant 0 : i32
    %c0_i32_0 = arith.constant 0 : i32
    %c0_i32_1 = arith.constant 0 : i32
    %c0_i32_2 = arith.constant 0 : i32
    return %c0_i32, %c0_i32_0, %c0_i32_1 : i32, i32, i32
  }
  func.func @transform_3(%arg0: i32) -> (i32, i32) {
    %c0_i32 = arith.constant 0 : i32
    %c0_i32_0 = arith.constant 0 : i32
    %c0_i32_1 = arith.constant 0 : i32
    return %c0_i32, %c0_i32_0 : i32, i32
  }
  func.func @transform_4(%arg0: i32) -> (i32, i32, i32) {
    %c0_i32 = arith.constant 0 : i32
    %c0_i32_0 = arith.constant 0 : i32
    %c0_i32_1 = arith.constant 0 : i32
    %c0_i32_2 = arith.constant 0 : i32
    return %c0_i32, %c0_i32_0, %c0_i32_1 : i32, i32, i32
  }
  func.func @transform_5(%arg0: i32) -> (i32, i32) {
    %c0_i32 = arith.constant 0 : i32
    %c0_i32_0 = arith.constant 0 : i32
    %c0_i32_1 = arith.constant 0 : i32
    return %c0_i32, %c0_i32_0 : i32, i32
  }
  func.func @transform_6(%arg0: i32) -> (i32, i32, i32) {
    %c0_i32 = arith.constant 0 : i32
    %c0_i32_0 = arith.constant 0 : i32
    %c0_i32_1 = arith.constant 0 : i32
    %c0_i32_2 = arith.constant 0 : i32
    return %c0_i32, %c0_i32_0, %c0_i32_1 : i32, i32, i32
  }
  func.func @transform_7(%arg0: i32) -> (i32, i32) {
    %c0_i32 = arith.constant 0 : i32
    %c0_i32_0 = arith.constant 0 : i32
    %c0_i32_1 = arith.constant 0 : i32
    return %c0_i32, %c0_i32_0 : i32, i32
  }
  func.func @transform_8(%arg0: i32) -> (i32, i32, i32) {
    %c0_i32 = arith.constant 0 : i32
    %c0_i32_0 = arith.constant 0 : i32
    %c0_i32_1 = arith.constant 0 : i32
    %c0_i32_2 = arith.constant 0 : i32
    return %c0_i32, %c0_i32_0, %c0_i32_1 : i32, i32, i32
  }
  func.func @transform_9(%arg0: i32) -> (i32, i32) {
    %c0_i32 = arith.constant 0 : i32
    %c0_i32_0 = arith.constant 0 : i32
    %c0_i32_1 = arith.constant 0 : i32
    return %c0_i32, %c0_i32_0 : i32, i32
  }
  func.func @transform_10(%arg0: i32) -> (i32, i32) {
    %c0_i32 = arith.constant 0 : i32
    %c0_i32_0 = arith.constant 0 : i32
    %c0_i32_1 = arith.constant 0 : i32
    return %c0_i32, %c0_i32_0 : i32, i32
  }
  func.func @transform_11(%arg0: i32) -> (i32, i32) {
    %c0_i32 = arith.constant 0 : i32
    %c0_i32_0 = arith.constant 0 : i32
    %c0_i32_1 = arith.constant 0 : i32
    return %c0_i32, %c0_i32_0 : i32, i32
  }
  func.func @transform_12(%arg0: i32) -> (i32, i32) {
    %c0_i32 = arith.constant 0 : i32
    %c0_i32_0 = arith.constant 0 : i32
    %c0_i32_1 = arith.constant 0 : i32
    return %c0_i32, %c0_i32_0 : i32, i32
  }
  func.func @transform_13(%arg0: i32) -> i32 {
    %c0_i32 = arith.constant 0 : i32
    %c0_i32_0 = arith.constant 0 : i32
    return %c0_i32 : i32
  }
  func.func @transform_14(%arg0: i32) -> i32 {
    %c0_i32 = arith.constant 0 : i32
    %c0_i32_0 = arith.constant 0 : i32
    return %c0_i32 : i32
  }
  func.func @transform_15(%arg0: i32) -> (i32, i32) {
    %c0_i32 = arith.constant 0 : i32
    %c0_i32_0 = arith.constant 0 : i32
    %c0_i32_1 = arith.constant 0 : i32
    return %c0_i32, %c0_i32_0 : i32, i32
  }
  func.func @transform_16(%arg0: i32) -> (i32, i32) {
    %c0_i32 = arith.constant 0 : i32
    %c0_i32_0 = arith.constant 0 : i32
    %c0_i32_1 = arith.constant 0 : i32
    return %c0_i32, %c0_i32_0 : i32, i32
  }
  func.func @transform_17(%arg0: i32) -> (i32, i32) {
    %c0_i32 = arith.constant 0 : i32
    %c0_i32_0 = arith.constant 0 : i32
    %c0_i32_1 = arith.constant 0 : i32
    return %c0_i32, %c0_i32_0 : i32, i32
  }
  func.func @transform_18(%arg0: i32) -> (i32, i32) {
    %c0_i32 = arith.constant 0 : i32
    %c0_i32_0 = arith.constant 0 : i32
    %c0_i32_1 = arith.constant 0 : i32
    return %c0_i32, %c0_i32_0 : i32, i32
  }
  func.func @transform_19(%arg0: i32) -> (i32, i32) {
    %c0_i32 = arith.constant 0 : i32
    %c0_i32_0 = arith.constant 0 : i32
    %c0_i32_1 = arith.constant 0 : i32
    return %c0_i32, %c0_i32_0 : i32, i32
  }
  func.func @transform_20(%arg0: i32) -> (i32, i32) {
    %c0_i32 = arith.constant 0 : i32
    %c0_i32_0 = arith.constant 0 : i32
    %c0_i32_1 = arith.constant 0 : i32
    return %c0_i32, %c0_i32_0 : i32, i32
  }
  func.func @transform_21(%arg0: i32) -> (i32, i32) {
    %c0_i32 = arith.constant 0 : i32
    %c0_i32_0 = arith.constant 0 : i32
    %c0_i32_1 = arith.constant 0 : i32
    return %c0_i32, %c0_i32_0 : i32, i32
  }
  func.func @transform_22(%arg0: i32) -> (i32, i32) {
    %c0_i32 = arith.constant 0 : i32
    %c0_i32_0 = arith.constant 0 : i32
    %c0_i32_1 = arith.constant 0 : i32
    return %c0_i32, %c0_i32_0 : i32, i32
  }
  func.func @transform_23(%arg0: i32) -> (i32, i32, i32) {
    %c0_i32 = arith.constant 0 : i32
    %c0_i32_0 = arith.constant 0 : i32
    %c0_i32_1 = arith.constant 0 : i32
    return %arg0, %c0_i32, %c0_i32_0 : i32, i32, i32
  }
  func.func @transform_24(%arg0: i32) -> (i32, i32, i32) {
    %c0_i32 = arith.constant 0 : i32
    %c0_i32_0 = arith.constant 0 : i32
    %c0_i32_1 = arith.constant 0 : i32
    return %arg0, %c0_i32, %c0_i32_0 : i32, i32, i32
  }
}

</mosaic_0001>

<bundles_post_ra>
// kernel: betanet_forward.1
= control target key start
LH: loop header
LB: loop body
LE: loop exit
PB: predicated region body
PF: predicated region fallthrough
CT: control target
= control target key end

     0   :  { %s17786_s0 = inlined_call_operand.vmem [shape: f32[2,16,16,3], index: 0, kind: input, shape index: {}]   ;;  %s17787_s1 = inlined_call_operand.vmem [shape: f32[2,16,16,1], index: 1, kind: input, shape index: {}]   ;;  %s17788_s2 = inlined_call_operand.vmem [shape: bf16[9,3,64], index: 2, kind: input, shape index: {}]   ;;  %s17789_s3 = inlined_call_operand.vmem [shape: f32[1,64], index: 3, kind: input, shape index: {}]   ;;  %s17790_s4 = inlined_call_operand.vmem [shape: bf16[9,64,64], index: 4, kind: input, shape index: {}]   ;;  %s17791_s5 = inlined_call_operand.vmem [shape: f32[1,64], index: 5, kind: input, shape index: {}]   ;;  %s17792_s6 = inlined_call_operand.vmem [shape: bf16[9,64,64], index: 6, kind: input, shape index: {}]   ;;  %s17793_s7 = inlined_call_operand.vmem [shape: f32[1,64], index: 7, kind: input, shape index: {}]   ;;  %s17794_s8 = inlined_call_operand.vmem [shape: bf16[9,64,64], index: 8, kind: input, shape index: {}]   ;;  %s17795_s9 = inlined_call_operand.vmem [shape: f32[1,64], index: 9, kind: input, shape index: {}]   ;;  %s17796_s10 = inlined_call_operand.vmem [shape: f32[64,256], index: 10, kind: input, shape index: {}]   ;;  %s17797_s11 = inlined_call_operand.vmem [shape: f32[16,64], index: 11, kind: input, shape index: {}]   ;;  %s17798_s12 = inlined_call_operand.vmem [shape: f32[4,16], index: 12, kind: input, shape index: {}]   ;;  %s17799_s13 = inlined_call_operand.vmem [shape: f32[9], index: 13, kind: input, shape index: {}]   ;;  %s17800_s14 = inlined_call_operand.<no memory space> [shape: f32[1], index: 14, kind: input, shape index: {}]   ;;  %s17801_s15 = inlined_call_operand.vmem [shape: f32[4,256], index: 15, kind: input, shape index: {}]   ;;  %s17802_s16 = inlined_call_operand.vmem [shape: f32[64,64], index: 16, kind: input, shape index: {}]   ;;  %s17803_s17 = inlined_call_operand.vmem [shape: f32[1,64], index: 17, kind: input, shape index: {}]   ;;  %s17804_s18 = inlined_call_operand.vmem [shape: f32[1,64], index: 18, kind: input, shape index: {}]   ;;  %s17805_s19 = inlined_call_operand.vmem [shape: f32[64,3], index: 19, kind: input, shape index: {}]   ;;  %s17806_s20 = inlined_call_operand.vmem [shape: f32[1,3], index: 20, kind: input, shape index: {}]   ;;  %s17807_s21 = inlined_call_operand.vmem [shape: f32[64,3], index: 21, kind: input, shape index: {}]   ;;  %s17808_s22 = inlined_call_operand.vmem [shape: f32[1,3], index: 22, kind: input, shape index: {}]   ;;  %s17809_s23 = inlined_call_operand.hbm [shape: f32[2,1,3], index: 23, kind: output, shape index: {0}]   ;;  %s17810_s24 = inlined_call_operand.hbm [shape: f32[2,1,3], index: 24, kind: output, shape index: {1}]  }
   0x1   :  { %17828 = sst [smem:[#allocation21_spill]] %s17786_s0 }
   0x2   :  { %17829 = sst [smem:[#allocation22_spill]] %s17787_s1 }
   0x3   :  { %17830 = sst [smem:[#allocation23_spill]] %s17788_s2 }
   0x4   :  { %17831 = sst [smem:[#allocation24_spill]] %s17789_s3 }
   0x5   :  { %17832 = sst [smem:[#allocation25_spill]] %s17790_s4 }
   0x6   :  { %17833 = sst [smem:[#allocation26_spill]] %s17791_s5 }
   0x7   :  { %17834 = sst [smem:[#allocation27_spill]] %s17792_s6 }
   0x8   :  { %17835 = sst [smem:[#allocation28_spill]] %s17793_s7 }
   0x9   :  { %17836 = sst [smem:[#allocation29_spill]] %s17794_s8 }
   0xa   :  { %17837 = sst [smem:[#allocation30_spill]] %s17795_s9 }
   0xb   :  { %17838 = sst [smem:[#allocation31_spill]] %s17799_s13 }
   0xc   :  { %30 = sst [smem:[#allocation7]] %s17800_s14 }
   0xd   :  { %31 = vsyncpa [#allocation10], 0 }
   0xe   :  { %32 = vsyncpa [#allocation9], 0 }
   0xf   :  { %34 = vsyncpa [#allocation9 + $0x1], 0 }
  0x10   :  { %35 = vsyncpa [#allocation13], 0 }
  0x11   :  { %37 = vsyncpa [#allocation13 + $0x1], 0  ;;  %s14203_s27 = smov 0   ;;  %s14205_s28 = smov 0  }
  0x12   :  { %s14207_s6 = smov 0   ;;  %s14209_s2 = smov 0  }
  0x13 LB: > { %17839 = sst [smem:[#allocation17_spill]] %s14061_s6  ;;  %s14224_s14 = sadd.s32 4294967295, %s14065_s2   ;;  %s14065_s2 = sphi %s14209_s2, %s17862_s2   ;;  %s14061_s6 = sphi %s14207_s6, %s17864_s6   ;;  %s14057_s28 = sphi %s14205_s28, %s17866_s28   ;;  %s14053_s27 = sphi %s14203_s27, %s17865_s27  }
  0x14   : > { %s10790_s29 = sadd.s32 4294967294, %s14065_s2   ;;  %s14228_s0 = sadd.s32 1, %s14065_s2  }
  0x15   : > { %17840 = sst [smem:[#allocation18_spill]] %s14228_s0  ;;  %s543_s7 = sadd.s32 1, %s14061_s6 }
  0x16   : > { %s540_s30 = ssub.s32 %s14065_s2, %s14228_s0  ;;  %p553_p0 = scmp.ne.s32.totalorder %s14061_s6, %s14057_s28 }
  0x17   : > { %p541_p1 = scmp.eq.s32.totalorder %s540_s30, 0  ;;  %p554_p2 = scmp.eq.s32.totalorder %s14224_s14, 1 }
  0x18   : > { %p559_p3 = scmp.ne.s32.totalorder %s14057_s28, %s14053_s27  ;;  %p560_p4 = scmp.eq.s32.totalorder %s10790_s29, 1 }
  0x19   : > { %s14239_s3 = scalar_select %p541_p1, %s14061_s6, %s543_s7  }
  0x1a   : > { %p14241_p5 = por %p554_p2, %p553_p0  ;;  %p14245_p6 = por %p560_p4, %p559_p3 }
  0x1b   : > { %17841 = sst [smem:[#allocation19_spill]] %s14239_s3  ;;  %p10791_p7 = scmp.ge.s32.totalorder %s14065_s2, 1 }
  0x1c   : > { %s17843_s8 = scalar_select %p14245_p6, 1, 0 }
  0x1d   : > { %p593_p8 = scmp.lt.s32.totalorder %s14065_s2, 3  ;;  %p13765_p9 = scmp.eq.s32.totalorder %s14224_s14, 0 }
  0x1e   : > { %17844 = sst [smem:[#allocation20_spill]] %s17843_s8  ;;  %s17846_s13 = sld [smem:[#allocation31_spill]] }
  0x1f   : > { %p14252_p10 = pnand %p10791_p7, %p593_p8 }
  0x21   : > { %p13754_p11 = pneg %p14252_p10 }
  0x23   : > { %p13755_p12 = pnand %p13765_p9, %p13754_p11 }
  0x24   : > { %s639_s26 = sshll.u32 %s17846_s13, 4  ;;  %s640_s26 = int_to_ptr.vmem [resolvable:$true] %s639_s26 }
  0x25   : > { %s13952_s29 = scalar_lea.vmem %s640_s26, 16  ;;  %p13954_p0 = pneg %p13755_p12 }
  0x26   : > { %p13953_p13 = scmp.ne.s32.totalorder %s640_s26, %s13952_s29  ;;  %p13960_p3 = scmp.lt.s32.totalorder %s640_s26, %s640_s26 }
  0x27   : > { %p13961_p4 = scmp.lt.s32.totalorder %s13952_s29, %s13952_s29 }
  0x28   : > { %p13955_p1 = pnand %p13954_p0, %p13953_p13 }
  0x29   : > { %p13962_p7 = por %p13961_p4, %p13960_p3 }
  0x2a   : > { %p13956_p2 = pneg %p13955_p1 }
  0x2c   : > { %p13963_p8 = pnand %p13962_p7, %p13956_p2 }
  0x2e   : > { %13966 = shalt.err (!%p13963_p8)
}
  0x2f   : > { %s14067_s7 = smov [#allocation8]   ;;  %695 = sbr.rel (%p14252_p10) target bundleno = 3915 (0xf4b), region = 112 }
  0x30   : > { %13757 = dma.vmem_to_smem (!%p13755_p12), %s640_s26, 16, %s14067_s7, [#allocation10]  }
  0x36   : > { %14040 = dma.done.wait (%p13765_p9), [#allocation10], 16  }
  0x37   : > { %14042 = vsyncadd (%p13765_p9), [#allocation10], 4294967280 }
  0x38   : > { %701 = sfence }
  0x39   : > { %s17847_s5 = sld [smem:[#allocation23_spill]]  ;;  %vm1170_vm0 = vcmask 1040384   ;;  %vm1171_vm1 = vcmask 1041408   ;;  %vm813_vm2 = vcmask 23552   ;;  %v14068_v1 = vmov 65535   ;;  %p770_p10 = scmp.lt.s32.totalorder %s14224_s14, 1 }
  0x3a   : > { %v1172_v2 = vsel %vm1170_vm0, 4294967295, %v14068_v1  ;;  %vm816_vm3 = vcmask 17408   ;;  %v17823_v5 = vmov 0.0   ;;  %s17848_s4 = sld [smem:[#allocation21_spill]]  ;;  %vm3648_vm4 = vcmask 523264   ;;  %s17850_s30 = sld [smem:[#allocation25_spill]] }
  0x3b   : > { %v14278_v4 = vsel %vm1171_vm1, %v1172_v2, 0  ;;  %814 = vst.msk [vmem:[#allocation2] sm:$0xff] %vm813_vm2, %v17823_v5  ;;  %815 = vst.msk [vmem:[#allocation2 + $0x8] sm:$0xff] %vm813_vm2, %v17823_v5  ;;  %s14393_s29 = scalar_select %p770_p10, %s14224_s14, 1  ;;  %vm3922_vm5 = vcmask 517120   ;;  %vm8393_vm6 = vcmask 521216  }
  0x3c   : > { %817 = vst.msk [vmem:[#allocation2 + $0x10] sm:$0x3] %vm816_vm3, %v17823_v5  ;;  %820 = vst.msk [vmem:[#allocation2 + $0x28] sm:$0x3] %vm816_vm3, %v17823_v5  ;;  %s17854_s1 = sld [smem:[#allocation29_spill]]  ;;  %vm14070_vm7 = vmmov 0  }
  0x3d   : > { %818 = vst.msk [vmem:[#allocation2 + $0x18] sm:$0xff] %vm813_vm2, %v17823_v5  ;;  %819 = vst.msk [vmem:[#allocation2 + $0x20] sm:$0xff] %vm813_vm2, %v17823_v5  ;;  %s17815_s7 = sshll.u32 %s14393_s29, 8  ;;  %vm8407_vm8 = vcmask 519168   ;;  %s17856_s13 = sld [smem:[#allocation22_spill]]  ;;  %vm934_vm9 = vcmask 7168  }
  0x3e   : > { %821 = vst.msk [vmem:[#allocation2 + $0x30] sm:$0xff] %vm813_vm2, %v17823_v5  ;;  %822 = vst.msk [vmem:[#allocation2 + $0x38] sm:$0xff] %vm813_vm2, %v17823_v5  ;;  %vm937_vm10 = vcmask 1024   ;;  %s16651_s3 = sld [smem:[#allocation8 + $0x1]]  ;;  %s16659_s0 = sld [smem:[#allocation8 + $0x4]]  ;;  %vm9246_vm11 = vcmask 130048  }
  0x3f   : > { %v14272_v0 = vld [vmem:[%s17847_s5 + $0x2] sm:$0x3]  ;;  %v1071_v3 = vld [vmem:[%s17847_s5] sm:$0x3]  ;;  %823 = vst.msk [vmem:[#allocation2 + $0x40] sm:$0x3] %vm816_vm3, %v17823_v5 }
  0x40   : > { %824 = vst.msk [vmem:[#allocation2 + $0x48] sm:$0xff] %vm813_vm2, %v17823_v5  ;;  %825 = vst.msk [vmem:[#allocation2 + $0x50] sm:$0xff] %vm813_vm2, %v17823_v5  ;;  %v1175_v6 = vand.u32 %v14272_v0, %v14278_v4  ;;  %v14396_v7 = vand.u32 %v14278_v4, %v1071_v3  ;;  %s14404_s26 = scalar_lea.vmem %s17848_s4, %s17815_s7  ;;  %v10833_v24 = vld [vmem:[%s17847_s5 + $0x4] sm:$0x3]  ;;  %s17851_s7 = sld [smem:[#allocation26_spill]]  ;;  %vm10562_vm12 = vcmask 16384  }
  0x41   : > { %826 = vst.msk [vmem:[#allocation2 + $0x58] sm:$0x3] %vm816_vm3, %v17823_v5  ;;  %829 = vst.msk [vmem:[#allocation2 + $0x70] sm:$0x3] %vm816_vm3, %v17823_v5  ;;  %v781_v8 = vld [vmem:[%s14404_s26] sm:$0xff]  ;;  %v782_v9 = vld [vmem:[%s14404_s26 + $0x8] sm:$0xff]  ;;  %v14458_v39 = vand.u32 %v10833_v24, %v14278_v4 }
  0x42   : > { %827 = vst.msk [vmem:[#allocation2 + $0x60] sm:$0xff] %vm813_vm2, %v17823_v5  ;;  %828 = vst.msk [vmem:[#allocation2 + $0x68] sm:$0xff] %vm813_vm2, %v17823_v5  ;;  %12050 = vmatprep.subr.bf16.mxu0 %v1175_v6  ;;  %v783_v10 = vld [vmem:[%s14404_s26 + $0x10] sm:$0xff]  ;;  %v784_v11 = vld [vmem:[%s14404_s26 + $0x18] sm:$0xff]  ;;  %s16669_s8 = sld [smem:[#allocation8 + $0x6]]  ;;  %s16676_s4 = sld [smem:[#allocation8 + $0x7]] }
  0x43   : > { %830 = vst.msk [vmem:[#allocation2 + $0x78] sm:$0xff] %vm813_vm2, %v17823_v5  ;;  %831 = vst.msk [vmem:[#allocation2 + $0x80] sm:$0xff] %vm813_vm2, %v17823_v5  ;;  %12051 = vmatpush3.bf16.msra.mxu0 %v1175_v6  ;;  %v785_v12 = vld [vmem:[%s14404_s26 + $0x20] sm:$0xff]  ;;  %v786_v13 = vld [vmem:[%s14404_s26 + $0x28] sm:$0xff]  ;;  %s17857_s9 = sld [smem:[#allocation30_spill]] }
  0x44   : > { %832 = vst.msk [vmem:[#allocation2 + $0x88] sm:$0x3] %vm816_vm3, %v17823_v5  ;;  %835 = vst.msk [vmem:[#allocation2 + $0xa0] sm:$0x3] %vm816_vm3, %v17823_v5  ;;  %12084 = vmatprep.subr.bf16.mxu0 %v14396_v7  ;;  %v1072_v14 = vld [vmem:[#allocation2 + $0x1] sm:$0xff]  ;;  %v1073_v15 = vld [vmem:[#allocation2 + $0x9] sm:$0xff] }
  0x45   : > { %833 = vst.msk [vmem:[#allocation2 + $0x90] sm:$0xff] %vm813_vm2, %v17823_v5  ;;  %834 = vst.msk [vmem:[#allocation2 + $0x98] sm:$0xff] %vm813_vm2, %v17823_v5  ;;  %v787_v16 = vld [vmem:[%s14404_s26 + $0x30] sm:$0xff]  ;;  %v1104_v17 = vpack.c.bf16 %v1073_v15, %v1072_v14  ;;  %v788_v18 = vld [vmem:[%s14404_s26 + $0x38] sm:$0xff] }
  0x46   : > { %836 = vst.msk [vmem:[#allocation2 + $0xa8] sm:$0xff] %vm813_vm2, %v17823_v5  ;;  %837 = vst.msk [vmem:[#allocation2 + $0xb0] sm:$0xff] %vm813_vm2, %v17823_v5  ;;  %v789_v19 = vld [vmem:[%s14404_s26 + $0x40] sm:$0xff]  ;;  %v790_v20 = vld [vmem:[%s14404_s26 + $0x48] sm:$0xff] }
  0x47   : > { %838 = vst.msk [vmem:[#allocation2 + $0xb8] sm:$0x3] %vm816_vm3, %v17823_v5  ;;  %841 = vst.msk [vmem:[#allocation2 + $0xd0] sm:$0x3] %vm816_vm3, %v17823_v5  ;;  %v791_v21 = vld [vmem:[%s14404_s26 + $0x50] sm:$0xff]  ;;  %v792_v22 = vld [vmem:[%s14404_s26 + $0x58] sm:$0xff]  ;;  %12052 = vmatprep.mubr.msk.bf16.mxu0 %vm813_vm2, %v1104_v17 }
  0x48   : > { %839 = vst.msk [vmem:[#allocation2 + $0xc0] sm:$0xff] %vm813_vm2, %v17823_v5  ;;  %840 = vst.msk [vmem:[#allocation2 + $0xc8] sm:$0xff] %vm813_vm2, %v17823_v5  ;;  %v793_v23 = vld [vmem:[%s14404_s26 + $0x60] sm:$0xff]  ;;  %v794_v25 = vld [vmem:[%s14404_s26 + $0x68] sm:$0xff] }
  0x49   : > { %842 = vst.msk [vmem:[#allocation2 + $0xd8] sm:$0xff] %vm813_vm2, %v17823_v5  ;;  %843 = vst.msk [vmem:[#allocation2 + $0xe0] sm:$0xff] %vm813_vm2, %v17823_v5  ;;  %v795_v26 = vld [vmem:[%s14404_s26 + $0x70] sm:$0xff]  ;;  %v796_v27 = vld [vmem:[%s14404_s26 + $0x78] sm:$0xff] }
  0x4a   : > { %844 = vst.msk [vmem:[#allocation2 + $0xe8] sm:$0x3] %vm816_vm3, %v17823_v5  ;;  %847 = vst.msk [vmem:[#allocation2 + $0x100] sm:$0x3] %vm816_vm3, %v17823_v5  ;;  %v797_v28 = vld [vmem:[%s14404_s26 + $0x80] sm:$0xff]  ;;  %v798_v29 = vld [vmem:[%s14404_s26 + $0x88] sm:$0xff] }
  0x4b   : > { %845 = vst.msk [vmem:[#allocation2 + $0xf0] sm:$0xff] %vm813_vm2, %v17823_v5  ;;  %846 = vst.msk [vmem:[#allocation2 + $0xf8] sm:$0xff] %vm813_vm2, %v17823_v5  ;;  %v799_v30 = vld [vmem:[%s14404_s26 + $0x90] sm:$0xff]  ;;  %v800_v31 = vld [vmem:[%s14404_s26 + $0x98] sm:$0xff] }
  0x4c   : > { %848 = vst.msk [vmem:[#allocation2 + $0x108] sm:$0xff] %vm813_vm2, %v17823_v5  ;;  %849 = vst.msk [vmem:[#allocation2 + $0x110] sm:$0xff] %vm813_vm2, %v17823_v5  ;;  %v801_v32 = vld [vmem:[%s14404_s26 + $0xa0] sm:$0xff]  ;;  %v802_v33 = vld [vmem:[%s14404_s26 + $0xa8] sm:$0xff] }
  0x4d   : > { %850 = vst.msk [vmem:[#allocation2 + $0x118] sm:$0x3] %vm816_vm3, %v17823_v5  ;;  %853 = vst.msk [vmem:[#allocation2 + $0x130] sm:$0x3] %vm816_vm3, %v17823_v5  ;;  %v803_v41 = vld [vmem:[%s14404_s26 + $0xb0] sm:$0xff]  ;;  %v804_v42 = vld [vmem:[%s14404_s26 + $0xb8] sm:$0xff] }
  0x4e   : > { %851 = vst.msk [vmem:[#allocation2 + $0x120] sm:$0xff] %vm813_vm2, %v17823_v5  ;;  %852 = vst.msk [vmem:[#allocation2 + $0x128] sm:$0xff] %vm813_vm2, %v17823_v5  ;;  %v805_v49 = vld [vmem:[%s14404_s26 + $0xc0] sm:$0xff]  ;;  %v806_v50 = vld [vmem:[%s14404_s26 + $0xc8] sm:$0xff] }
  0x4f   : > { %854 = vst.msk [vmem:[#allocation2 + $0x138] sm:$0xff] %vm813_vm2, %v17823_v5  ;;  %855 = vst.msk [vmem:[#allocation2 + $0x140] sm:$0xff] %vm813_vm2, %v17823_v5  ;;  %v807_v51 = vld [vmem:[%s14404_s26 + $0xd0] sm:$0xff]  ;;  %v808_v52 = vld [vmem:[%s14404_s26 + $0xd8] sm:$0xff] }
  0x50   : > { %856 = vst.msk [vmem:[#allocation2 + $0x148] sm:$0x3] %vm816_vm3, %v17823_v5  ;;  %859 = vst.msk [vmem:[#allocation2 + $0x160] sm:$0x3] %vm816_vm3, %v17823_v5  ;;  %v809_v53 = vld [vmem:[%s14404_s26 + $0xe0] sm:$0xff]  ;;  %v810_v54 = vld [vmem:[%s14404_s26 + $0xe8] sm:$0xff] }
  0x51   : > { %857 = vst.msk [vmem:[#allocation2 + $0x150] sm:$0xff] %vm813_vm2, %v17823_v5  ;;  %858 = vst.msk [vmem:[#allocation2 + $0x158] sm:$0xff] %vm813_vm2, %v17823_v5  ;;  %v1024_v24 = vld [vmem:[#allocation2 + $0x8] sm:$0xff] }
  0x52   : > { %860 = vst.msk [vmem:[#allocation2 + $0x168] sm:$0xff] %vm813_vm2, %v17823_v5  ;;  %861 = vst.msk [vmem:[#allocation2 + $0x170] sm:$0xff] %vm813_vm2, %v17823_v5 }
  0x53   : > { %862 = vst.msk [vmem:[#allocation2 + $0x178] sm:$0x3] %vm816_vm3, %v17823_v5  ;;  %865 = vst.msk [vmem:[#allocation2 + $0x190] sm:$0x3] %vm816_vm3, %v17823_v5 }
  0x54   : > { %863 = vst.msk [vmem:[#allocation2 + $0x180] sm:$0xff] %vm813_vm2, %v17823_v5  ;;  %864 = vst.msk [vmem:[#allocation2 + $0x188] sm:$0xff] %vm813_vm2, %v17823_v5 }
  0x55   : > { %866 = vst.msk [vmem:[#allocation2 + $0x198] sm:$0xff] %vm813_vm2, %v17823_v5  ;;  %867 = vst.msk [vmem:[#allocation2 + $0x1a0] sm:$0xff] %vm813_vm2, %v17823_v5 }
  0x56   : > { %868 = vst.msk [vmem:[#allocation2 + $0x1a8] sm:$0x3] %vm816_vm3, %v17823_v5 }
  0x57   : > { %870 = vst.msk [vmem:[#allocation2 + $0x19] sm:$0xff] %vm813_vm2, %v781_v8  ;;  %871 = vst.msk [vmem:[#allocation2 + $0x21] sm:$0xff] %vm813_vm2, %v782_v9 }
  0x58   : > { %872 = vst.msk [vmem:[#allocation2 + $0x31] sm:$0xff] %vm813_vm2, %v783_v10  ;;  %873 = vst.msk [vmem:[#allocation2 + $0x39] sm:$0xff] %vm813_vm2, %v784_v11 }
  0x59   : > { %874 = vst.msk [vmem:[#allocation2 + $0x49] sm:$0xff] %vm813_vm2, %v785_v12  ;;  %875 = vst.msk [vmem:[#allocation2 + $0x51] sm:$0xff] %vm813_vm2, %v786_v13 }
  0x5a   : > { %876 = vst.msk [vmem:[#allocation2 + $0x61] sm:$0xff] %vm813_vm2, %v787_v16  ;;  %877 = vst.msk [vmem:[#allocation2 + $0x69] sm:$0xff] %vm813_vm2, %v788_v18 }
  0x5b   : > { %878 = vst.msk [vmem:[#allocation2 + $0x79] sm:$0xff] %vm813_vm2, %v789_v19  ;;  %879 = vst.msk [vmem:[#allocation2 + $0x81] sm:$0xff] %vm813_vm2, %v790_v20 }
  0x5c   : > { %880 = vst.msk [vmem:[#allocation2 + $0x91] sm:$0xff] %vm813_vm2, %v791_v21  ;;  %881 = vst.msk [vmem:[#allocation2 + $0x99] sm:$0xff] %vm813_vm2, %v792_v22 }
  0x5d   : > { %882 = vst.msk [vmem:[#allocation2 + $0xa9] sm:$0xff] %vm813_vm2, %v793_v23  ;;  %883 = vst.msk [vmem:[#allocation2 + $0xb1] sm:$0xff] %vm813_vm2, %v794_v25  ;;  %v1023_v23 = vld [vmem:[#allocation2] sm:$0xff] }
  0x5e   : > { %884 = vst.msk [vmem:[#allocation2 + $0xc1] sm:$0xff] %vm813_vm2, %v795_v26  ;;  %885 = vst.msk [vmem:[#allocation2 + $0xc9] sm:$0xff] %vm813_vm2, %v796_v27  ;;  %v1074_v34 = vld [vmem:[#allocation2 + $0x19] sm:$0xff]  ;;  %v1075_v35 = vld [vmem:[#allocation2 + $0x21] sm:$0xff] }
  0x5f   : > { %886 = vst.msk [vmem:[#allocation2 + $0xd9] sm:$0xff] %vm813_vm2, %v797_v28  ;;  %887 = vst.msk [vmem:[#allocation2 + $0xe1] sm:$0xff] %vm813_vm2, %v798_v29  ;;  %v1076_v36 = vld [vmem:[#allocation2 + $0x31] sm:$0xff]  ;;  %v14455_v37 = vpack.c.bf16 %v1075_v35, %v1074_v34  ;;  %v1077_v38 = vld [vmem:[#allocation2 + $0x39] sm:$0xff]  ;;  %v1055_v28 = vpack.c.bf16 %v1024_v24, %v1023_v23 }
  0x60   : > { %888 = vst.msk [vmem:[#allocation2 + $0xf1] sm:$0xff] %vm813_vm2, %v799_v30  ;;  %889 = vst.msk [vmem:[#allocation2 + $0xf9] sm:$0xff] %vm813_vm2, %v800_v31  ;;  %v14460_v40 = vpack.c.bf16 %v1077_v38, %v1076_v36  ;;  %v1078_v43 = vld [vmem:[#allocation2 + $0x49] sm:$0xff]  ;;  %v1079_v44 = vld [vmem:[#allocation2 + $0x51] sm:$0xff] }
  0x61   : > { %890 = vst.msk [vmem:[#allocation2 + $0x109] sm:$0xff] %vm813_vm2, %v801_v32  ;;  %891 = vst.msk [vmem:[#allocation2 + $0x111] sm:$0xff] %vm813_vm2, %v802_v33  ;;  %12053 = vmatmul.mubr.msk.bf16.vlgmr.msra.gmra.mrb[0].mxu0 %vm813_vm2, %v14455_v37  ;;  %v1080_v45 = vld [vmem:[#allocation2 + $0x61] sm:$0xff]  ;;  %v1081_v46 = vld [vmem:[#allocation2 + $0x69] sm:$0xff]  ;;  %v14472_v47 = vpack.c.bf16 %v1079_v44, %v1078_v43 }
  0x62   : > { %892 = vst.msk [vmem:[#allocation2 + $0x121] sm:$0xff] %vm813_vm2, %v803_v41  ;;  %893 = vst.msk [vmem:[#allocation2 + $0x129] sm:$0xff] %vm813_vm2, %v804_v42  ;;  %12056 = vmatprep.mubr.msk.bf16.mxu0 %vm813_vm2, %v14460_v40  ;;  %12085 = vmatpush3.bf16.msra.mxu0 %v14396_v7  ;;  %v14474_v48 = vpack.c.bf16 %v1081_v46, %v1080_v45  ;;  %v1082_v55 = vld [vmem:[#allocation2 + $0x79] sm:$0xff]  ;;  %v1083_v56 = vld [vmem:[#allocation2 + $0x81] sm:$0xff] }
  0x63   : > { %12118 = vmatprep.subr.bf16.mxu0 %v14458_v39  ;;  %894 = vst.msk [vmem:[#allocation2 + $0x139] sm:$0xff] %vm813_vm2, %v805_v49  ;;  %895 = vst.msk [vmem:[#allocation2 + $0x141] sm:$0xff] %vm813_vm2, %v806_v50  ;;  %v1084_v57 = vld [vmem:[#allocation2 + $0x91] sm:$0xff]  ;;  %v1085_v58 = vld [vmem:[#allocation2 + $0x99] sm:$0xff]  ;;  %v14492_v59 = vpack.c.bf16 %v1083_v56, %v1082_v55 }
  0x64   : > { %896 = vst.msk [vmem:[#allocation2 + $0x151] sm:$0xff] %vm813_vm2, %v807_v51  ;;  %897 = vst.msk [vmem:[#allocation2 + $0x159] sm:$0xff] %vm813_vm2, %v808_v52  ;;  %v14494_v60 = vpack.c.bf16 %v1085_v58, %v1084_v57  ;;  %v1086_v61 = vld [vmem:[#allocation2 + $0xa9] sm:$0xff]  ;;  %v1087_v62 = vld [vmem:[#allocation2 + $0xb1] sm:$0xff] }
  0x65   : > { %898 = vst.msk [vmem:[#allocation2 + $0x169] sm:$0xff] %vm813_vm2, %v809_v53  ;;  %899 = vst.msk [vmem:[#allocation2 + $0x171] sm:$0xff] %vm813_vm2, %v810_v54  ;;  %v1088_v63 = vld [vmem:[#allocation2 + $0xc1] sm:$0xff]  ;;  %v1089_v0 = vld [vmem:[#allocation2 + $0xc9] sm:$0xff]  ;;  %v14500_v1 = vpack.c.bf16 %v1087_v62, %v1086_v61 }
  0x66   : > { %v14502_v2 = vpack.c.bf16 %v1089_v0, %v1088_v63  ;;  %v1090_v3 = vld [vmem:[#allocation2 + $0xd9] sm:$0xff]  ;;  %v1091_v6 = vld [vmem:[#allocation2 + $0xe1] sm:$0xff]  ;;  %v1027_v31 = vld [vmem:[#allocation2 + $0x30] sm:$0xff]  ;;  %3927 = vst.msk [vmem:[#allocation4 + $0x30] sm:$0xff] %vm3648_vm4, %v17823_v5 }
  0x67   : > { %v1092_v7 = vld [vmem:[#allocation2 + $0xf1] sm:$0xff]  ;;  %v1093_v8 = vld [vmem:[#allocation2 + $0xf9] sm:$0xff]  ;;  %v14508_v9 = vpack.c.bf16 %v1091_v6, %v1090_v3  ;;  %v10850_v33 = vld [vmem:[%s17847_s5 + $0x6] sm:$0x3]  ;;  %3928 = vst.msk [vmem:[#allocation4 + $0x38] sm:$0xff] %vm3648_vm4, %v17823_v5 }
  0x68   : > { %v14510_v10 = vpack.c.bf16 %v1093_v8, %v1092_v7  ;;  %v1094_v11 = vld [vmem:[#allocation2 + $0x109] sm:$0xff]  ;;  %v1095_v12 = vld [vmem:[#allocation2 + $0x111] sm:$0xff]  ;;  %v1026_v30 = vld [vmem:[#allocation2 + $0x20] sm:$0xff]  ;;  %v14545_v36 = vand.u32 %v10850_v33, %v14278_v4  ;;  %3920 = vst.msk [vmem:[#allocation4] sm:$0xff] %vm3648_vm4, %v17823_v5 }
  0x69   : > { %12057 = vmatmul.mubr.msk.bf16.gmra.mrb[4].mxu0 %vm813_vm2, %v14472_v47  ;;  %v1096_v13 = vld [vmem:[#allocation2 + $0x121] sm:$0xff]  ;;  %v1097_v14 = vld [vmem:[#allocation2 + $0x129] sm:$0xff]  ;;  %v14516_v15 = vpack.c.bf16 %v1095_v12, %v1094_v11  ;;  %v1025_v29 = vld [vmem:[#allocation2 + $0x18] sm:$0xff]  ;;  %3921 = vst.msk [vmem:[#allocation4 + $0x8] sm:$0xff] %vm3648_vm4, %v17823_v5 }
  0x6a   : > { %12060 = vmatprep.mubr.msk.bf16.mxu0 %vm813_vm2, %v14474_v48  ;;  %v14518_v16 = vpack.c.bf16 %v1097_v14, %v1096_v13  ;;  %v1098_v17 = vld [vmem:[#allocation2 + $0x139] sm:$0xff]  ;;  %v1099_v18 = vld [vmem:[#allocation2 + $0x141] sm:$0xff]  ;;  %v14540_v34 = vpack.c.bf16 %v1026_v30, %v1025_v29  ;;  %v1030_v41 = vld [vmem:[#allocation2 + $0x50] sm:$0xff]  ;;  %3924 = vst.msk [vmem:[#allocation4 + $0x18] sm:$0xff] %vm3648_vm4, %v17823_v5 }
  0x6b   : > { %v1100_v19 = vld [vmem:[#allocation2 + $0x151] sm:$0xff]  ;;  %v1101_v20 = vld [vmem:[#allocation2 + $0x159] sm:$0xff]  ;;  %v14524_v21 = vpack.c.bf16 %v1099_v18, %v1098_v17  ;;  %v1029_v38 = vld [vmem:[#allocation2 + $0x48] sm:$0xff]  ;;  %3925 = vst.msk [vmem:[#allocation4 + $0x20] sm:$0xff] %vm3648_vm4, %v17823_v5 }
  0x6c   : > { %v14526_v22 = vpack.c.bf16 %v1101_v20, %v1100_v19  ;;  %v1102_v25 = vld [vmem:[#allocation2 + $0x169] sm:$0xff]  ;;  %v1103_v26 = vld [vmem:[#allocation2 + $0x171] sm:$0xff]  ;;  %v1031_v42 = vld [vmem:[#allocation2 + $0x60] sm:$0xff]  ;;  %v14553_v44 = vpack.c.bf16 %v1030_v41, %v1029_v38  ;;  %3930 = vst.msk [vmem:[#allocation4 + $0x48] sm:$0xff] %vm3648_vm4, %v17823_v5 }
  0x6d   : > { %v14532_v27 = vpack.c.bf16 %v1103_v26, %v1102_v25  ;;  %v1028_v32 = vld [vmem:[#allocation2 + $0x38] sm:$0xff]  ;;  %v1032_v43 = vld [vmem:[#allocation2 + $0x68] sm:$0xff]  ;;  %v1034_v49 = vld [vmem:[#allocation2 + $0x80] sm:$0xff]  ;;  %3931 = vst.msk [vmem:[#allocation4 + $0x50] sm:$0xff] %vm3648_vm4, %v17823_v5 }
  0x6e   : > { %v14542_v35 = vpack.c.bf16 %v1028_v32, %v1027_v31  ;;  %v14555_v45 = vpack.c.bf16 %v1032_v43, %v1031_v42  ;;  %v1033_v46 = vld [vmem:[#allocation2 + $0x78] sm:$0xff]  ;;  %v1035_v50 = vld [vmem:[#allocation2 + $0x90] sm:$0xff]  ;;  %v1039_v55 = vld [vmem:[#allocation2 + $0xc0] sm:$0xff]  ;;  %3933 = vst.msk [vmem:[#allocation4 + $0x60] sm:$0xff] %vm3648_vm4, %v17823_v5 }
  0x6f   : > { %v1036_v51 = vld [vmem:[#allocation2 + $0x98] sm:$0xff]  ;;  %v14561_v52 = vpack.c.bf16 %v1034_v49, %v1033_v46  ;;  %v1038_v54 = vld [vmem:[#allocation2 + $0xb0] sm:$0xff]  ;;  %v1040_v56 = vld [vmem:[#allocation2 + $0xc8] sm:$0xff]  ;;  %3934 = vst.msk [vmem:[#allocation4 + $0x68] sm:$0xff] %vm3648_vm4, %v17823_v5 }
  0x70   : > { %v14563_v53 = vpack.c.bf16 %v1036_v51, %v1035_v50  ;;  %v14571_v58 = vpack.c.bf16 %v1040_v56, %v1039_v55  ;;  %v1041_v61 = vld [vmem:[#allocation2 + $0xd8] sm:$0xff]  ;;  %v1042_v62 = vld [vmem:[#allocation2 + $0xe0] sm:$0xff]  ;;  %v1043_v63 = vld [vmem:[#allocation2 + $0xf0] sm:$0xff]  ;;  %3936 = vst.msk [vmem:[#allocation4 + $0x78] sm:$0xff] %vm3648_vm4, %v17823_v5 }
  0x71   : > { %12061 = vmatmul.mubr.msk.bf16.gmra.mrb[8].mxu0 %vm813_vm2, %v14492_v59  ;;  %v1044_v0 = vld [vmem:[#allocation2 + $0xf8] sm:$0xff]  ;;  %v14577_v3 = vpack.c.bf16 %v1042_v62, %v1041_v61  ;;  %v1045_v7 = vld [vmem:[#allocation2 + $0x108] sm:$0xff]  ;;  %v1046_v8 = vld [vmem:[#allocation2 + $0x110] sm:$0xff]  ;;  %3937 = vst.msk [vmem:[#allocation4 + $0x80] sm:$0xff] %vm3648_vm4, %v17823_v5 }
  0x72   : > { %12064 = vmatprep.mubr.msk.bf16.mxu0 %vm813_vm2, %v14494_v60  ;;  %v14579_v6 = vpack.c.bf16 %v1044_v0, %v1043_v63  ;;  %v1047_v11 = vld [vmem:[#allocation2 + $0x120] sm:$0xff]  ;;  %v1048_v12 = vld [vmem:[#allocation2 + $0x128] sm:$0xff]  ;;  %v14585_v13 = vpack.c.bf16 %v1046_v8, %v1045_v7  ;;  %v1049_v17 = vld [vmem:[#allocation2 + $0x138] sm:$0xff]  ;;  %3939 = vst.msk [vmem:[#allocation4 + $0x90] sm:$0xff] %vm3648_vm4, %v17823_v5 }
  0x73   : > { %v14587_v14 = vpack.c.bf16 %v1048_v12, %v1047_v11  ;;  %v1050_v18 = vld [vmem:[#allocation2 + $0x140] sm:$0xff]  ;;  %v1051_v19 = vld [vmem:[#allocation2 + $0x150] sm:$0xff]  ;;  %v1052_v20 = vld [vmem:[#allocation2 + $0x158] sm:$0xff]  ;;  %3940 = vst.msk [vmem:[#allocation4 + $0x98] sm:$0xff] %vm3648_vm4, %v17823_v5 }
  0x74   : > { %v14593_v23 = vpack.c.bf16 %v1050_v18, %v1049_v17  ;;  %v14595_v24 = vpack.c.bf16 %v1052_v20, %v1051_v19  ;;  %v811_v25 = vld [vmem:[%s14404_s26 + $0xf0] sm:$0xff]  ;;  %v812_v26 = vld [vmem:[%s14404_s26 + $0xf8] sm:$0xff]  ;;  %v1550_v30 = vld [vmem:[#allocation2 + $0x2] sm:$0xff]  ;;  %3942 = vst.msk [vmem:[#allocation4 + $0xa8] sm:$0xff] %vm3648_vm4, %v17823_v5  ;;  %s17849_s26 = sld [smem:[#allocation24_spill]] }
  0x75   : > { %900 = vst.msk [vmem:[#allocation2 + $0x181] sm:$0xff] %vm813_vm2, %v811_v25  ;;  %901 = vst.msk [vmem:[#allocation2 + $0x189] sm:$0xff] %vm813_vm2, %v812_v26  ;;  %v1054_v29 = vld [vmem:[#allocation2 + $0x170] sm:$0xff]  ;;  %v1552_v38 = vld [vmem:[#allocation2 + $0x1a] sm:$0xff] }
  0x76   : > { %v1551_v31 = vld [vmem:[#allocation2 + $0xa] sm:$0xff]  ;;  %v1553_v41 = vld [vmem:[#allocation2 + $0x22] sm:$0xff]  ;;  %v1554_v42 = vld [vmem:[#allocation2 + $0x32] sm:$0xff]  ;;  %3943 = vst.msk [vmem:[#allocation4 + $0xb0] sm:$0xff] %vm3648_vm4, %v17823_v5 }
  0x77   : > { %v1582_v33 = vpack.c.bf16 %v1551_v31, %v1550_v30  ;;  %v1555_v43 = vld [vmem:[#allocation2 + $0x3a] sm:$0xff]  ;;  %v10867_v46 = vld [vmem:[%s17847_s5 + $0x8] sm:$0x3]  ;;  %v14613_v49 = vpack.c.bf16 %v1553_v41, %v1552_v38  ;;  %v1559_v56 = vld [vmem:[#allocation2 + $0x6a] sm:$0xff]  ;;  %3945 = vst.msk [vmem:[#allocation4 + $0xc0] sm:$0xff] %vm3648_vm4, %v17823_v5 }
  0x78   : > { %v14615_v50 = vpack.c.bf16 %v1555_v43, %v1554_v42  ;;  %v2237_v51 = vand.u32 %v10867_v46, %v14278_v4  ;;  %v1558_v55 = vld [vmem:[#allocation2 + $0x62] sm:$0xff]  ;;  %v1560_v63 = vld [vmem:[#allocation2 + $0x7a] sm:$0xff]  ;;  %v1562_v7 = vld [vmem:[#allocation2 + $0x92] sm:$0xff]  ;;  %3946 = vst.msk [vmem:[#allocation4 + $0xc8] sm:$0xff] %vm3648_vm4, %v17823_v5 }
  0x79   : > { %12065 = vmatmul.mubr.msk.bf16.gmra.mrb[12].mxu0 %vm813_vm2, %v14500_v1  ;;  %v14625_v62 = vpack.c.bf16 %v1559_v56, %v1558_v55  ;;  %v1561_v0 = vld [vmem:[#allocation2 + $0x82] sm:$0xff]  ;;  %v1563_v8 = vld [vmem:[#allocation2 + $0x9a] sm:$0xff]  ;;  %v1564_v12 = vld [vmem:[#allocation2 + $0xaa] sm:$0xff]  ;;  %3948 = vst.msk [vmem:[#allocation4 + $0xd8] sm:$0xff] %vm3648_vm4, %v17823_v5 }
  0x7a   : > { %12068 = vmatprep.mubr.msk.bf16.mxu0 %vm813_vm2, %v14502_v2  ;;  %v14631_v11 = vpack.c.bf16 %v1561_v0, %v1560_v63  ;;  %v1565_v17 = vld [vmem:[#allocation2 + $0xb2] sm:$0xff]  ;;  %v1566_v18 = vld [vmem:[#allocation2 + $0xc2] sm:$0xff]  ;;  %v1567_v19 = vld [vmem:[#allocation2 + $0xca] sm:$0xff]  ;;  %3949 = vst.msk [vmem:[#allocation4 + $0xe0] sm:$0xff] %vm3648_vm4, %v17823_v5 }
  0x7b   : > { %v14639_v20 = vpack.c.bf16 %v1565_v17, %v1564_v12  ;;  %v14641_v25 = vpack.c.bf16 %v1567_v19, %v1566_v18  ;;  %v1568_v26 = vld [vmem:[#allocation2 + $0xda] sm:$0xff]  ;;  %v1572_v38 = vld [vmem:[#allocation2 + $0x10a] sm:$0xff]  ;;  %v1573_v41 = vld [vmem:[#allocation2 + $0x112] sm:$0xff]  ;;  %3951 = vst.msk [vmem:[#allocation4 + $0xf0] sm:$0xff] %vm3648_vm4, %v17823_v5 }
  0x7c   : > { %v1571_v30 = vld [vmem:[#allocation2 + $0xfa] sm:$0xff]  ;;  %v1574_v42 = vld [vmem:[#allocation2 + $0x122] sm:$0xff]  ;;  %v1575_v43 = vld [vmem:[#allocation2 + $0x12a] sm:$0xff]  ;;  %v14655_v46 = vpack.c.bf16 %v1573_v41, %v1572_v38  ;;  %3952 = vst.msk [vmem:[#allocation4 + $0xf8] sm:$0xff] %vm3648_vm4, %v17823_v5 }
  0x7d   : > { %v1577_v55 = vld [vmem:[#allocation2 + $0x142] sm:$0xff]  ;;  %v1578_v56 = vld [vmem:[#allocation2 + $0x152] sm:$0xff]  ;;  %v1579_v63 = vld [vmem:[#allocation2 + $0x15a] sm:$0xff]  ;;  %3954 = vst.msk [vmem:[#allocation4 + $0x108] sm:$0xff] %vm3648_vm4, %v17823_v5 }
  0x7e   : > { %v1581_v12 = vld [vmem:[#allocation2 + $0x172] sm:$0xff]  ;;  %v10884_v18 = vld [vmem:[%s17847_s5 + $0xa] sm:$0x3]  ;;  %3955 = vst.msk [vmem:[#allocation4 + $0x110] sm:$0xff] %vm3648_vm4, %v17823_v5  ;;  %3957 = vst.msk [vmem:[#allocation4 + $0x120] sm:$0xff] %vm3648_vm4, %v17823_v5 }
  0x7f   : > { %v2531_v19 = vand.u32 %v10884_v18, %v14278_v4  ;;  %v2463_v38 = vld [vmem:[#allocation2 + $0x18a] sm:$0xff]  ;;  %3958 = vst.msk [vmem:[#allocation4 + $0x128] sm:$0xff] %vm3648_vm4, %v17823_v5  ;;  %3960 = vst.msk [vmem:[#allocation4 + $0x138] sm:$0xff] %vm3648_vm4, %v17823_v5 }
  0x80   : > { %3961 = vst.msk [vmem:[#allocation4 + $0x140] sm:$0xff] %vm3648_vm4, %v17823_v5  ;;  %3963 = vst.msk [vmem:[#allocation4 + $0x150] sm:$0xff] %vm3648_vm4, %v17823_v5 }
  0x81   : > { %12069 = vmatmul.mubr.msk.bf16.gmra.mrb[16].mxu0 %vm813_vm2, %v14508_v9  ;;  %3964 = vst.msk [vmem:[#allocation4 + $0x158] sm:$0xff] %vm3648_vm4, %v17823_v5  ;;  %3966 = vst.msk [vmem:[#allocation4 + $0x168] sm:$0xff] %vm3648_vm4, %v17823_v5 }
  0x82   : > { %12072 = vmatprep.mubr.msk.bf16.mxu0 %vm813_vm2, %v14510_v10  ;;  %3967 = vst.msk [vmem:[#allocation4 + $0x170] sm:$0xff] %vm3648_vm4, %v17823_v5  ;;  %3969 = vst.msk [vmem:[#allocation4 + $0x180] sm:$0xff] %vm3648_vm4, %v17823_v5 }
  0x83   : > { %3970 = vst.msk [vmem:[#allocation4 + $0x188] sm:$0xff] %vm3648_vm4, %v17823_v5  ;;  %3972 = vst.msk [vmem:[#allocation4 + $0x198] sm:$0xff] %vm3648_vm4, %v17823_v5 }
  0x84   : > { %3973 = vst.msk [vmem:[#allocation4 + $0x1a0] sm:$0xff] %vm3648_vm4, %v17823_v5  ;;  %7081 = vst.msk [vmem:[#allocation5] sm:$0xff] %vm3648_vm4, %v17823_v5 }
  0x85   : > { %7083 = vst.msk [vmem:[#allocation5 + $0x10] sm:$0xff] %vm3648_vm4, %v17823_v5  ;;  %7085 = vst.msk [vmem:[#allocation5 + $0x20] sm:$0xff] %vm3648_vm4, %v17823_v5 }
  0x86   : > { %7087 = vst.msk [vmem:[#allocation5 + $0x30] sm:$0xff] %vm3648_vm4, %v17823_v5  ;;  %7089 = vst.msk [vmem:[#allocation5 + $0x40] sm:$0xff] %vm3648_vm4, %v17823_v5 }
  0x87   : > { %7091 = vst.msk [vmem:[#allocation5 + $0x50] sm:$0xff] %vm3648_vm4, %v17823_v5  ;;  %7093 = vst.msk [vmem:[#allocation5 + $0x60] sm:$0xff] %vm3648_vm4, %v17823_v5 }
  0x88   : > { %7095 = vst.msk [vmem:[#allocation5 + $0x70] sm:$0xff] %vm3648_vm4, %v17823_v5  ;;  %7097 = vst.msk [vmem:[#allocation5 + $0x80] sm:$0xff] %vm3648_vm4, %v17823_v5 }
  0x89   : > { %12073 = vmatmul.mubr.msk.bf16.gmra.mrb[20].mxu0 %vm813_vm2, %v14516_v15  ;;  %7099 = vst.msk [vmem:[#allocation5 + $0x90] sm:$0xff] %vm3648_vm4, %v17823_v5 }
  0x8a   : > { %12076 = vmatprep.mubr.msk.bf16.mxu0 %vm813_vm2, %v14518_v16  ;;  %3929 = vst.msk [vmem:[#allocation4 + $0x40] sm:$0x3] %vm3922_vm5, %v17823_v5  ;;  %3923 = vst.msk [vmem:[#allocation4 + $0x10] sm:$0x3] %vm3922_vm5, %v17823_v5 }
  0x8b   : > { %3926 = vst.msk [vmem:[#allocation4 + $0x28] sm:$0x3] %vm3922_vm5, %v17823_v5  ;;  %3932 = vst.msk [vmem:[#allocation4 + $0x58] sm:$0x3] %vm3922_vm5, %v17823_v5 }
  0x8c   : > { %3935 = vst.msk [vmem:[#allocation4 + $0x70] sm:$0x3] %vm3922_vm5, %v17823_v5  ;;  %3938 = vst.msk [vmem:[#allocation4 + $0x88] sm:$0x3] %vm3922_vm5, %v17823_v5 }
  0x8d   : > { %3941 = vst.msk [vmem:[#allocation4 + $0xa0] sm:$0x3] %vm3922_vm5, %v17823_v5  ;;  %3944 = vst.msk [vmem:[#allocation4 + $0xb8] sm:$0x3] %vm3922_vm5, %v17823_v5 }
  0x8e   : > { %3947 = vst.msk [vmem:[#allocation4 + $0xd0] sm:$0x3] %vm3922_vm5, %v17823_v5  ;;  %3950 = vst.msk [vmem:[#allocation4 + $0xe8] sm:$0x3] %vm3922_vm5, %v17823_v5 }
  0x8f   : > { %3953 = vst.msk [vmem:[#allocation4 + $0x100] sm:$0x3] %vm3922_vm5, %v17823_v5  ;;  %3956 = vst.msk [vmem:[#allocation4 + $0x118] sm:$0x3] %vm3922_vm5, %v17823_v5 }
  0x90   : > { %3959 = vst.msk [vmem:[#allocation4 + $0x130] sm:$0x3] %vm3922_vm5, %v17823_v5  ;;  %3962 = vst.msk [vmem:[#allocation4 + $0x148] sm:$0x3] %vm3922_vm5, %v17823_v5 }
  0x91   : > { %12077 = vmatmul.mubr.msk.bf16.gmra.mrb[24].mxu0 %vm813_vm2, %v14524_v21  ;;  %3965 = vst.msk [vmem:[#allocation4 + $0x160] sm:$0x3] %vm3922_vm5, %v17823_v5  ;;  %3968 = vst.msk [vmem:[#allocation4 + $0x178] sm:$0x3] %vm3922_vm5, %v17823_v5 }
  0x92   : > { %12080 = vmatprep.mubr.msk.bf16.mxu0 %vm813_vm2, %v14526_v22  ;;  %3971 = vst.msk [vmem:[#allocation4 + $0x190] sm:$0x3] %vm3922_vm5, %v17823_v5  ;;  %3974 = vst.msk [vmem:[#allocation4 + $0x1a8] sm:$0x3] %vm3922_vm5, %v17823_v5 }
  0x93   : > { %7082 = vst.msk [vmem:[#allocation5 + $0x8] sm:$0x3] %vm3922_vm5, %v17823_v5  ;;  %7084 = vst.msk [vmem:[#allocation5 + $0x18] sm:$0x3] %vm3922_vm5, %v17823_v5 }
  0x94   : > { %7086 = vst.msk [vmem:[#allocation5 + $0x28] sm:$0x3] %vm3922_vm5, %v17823_v5  ;;  %7088 = vst.msk [vmem:[#allocation5 + $0x38] sm:$0x3] %vm3922_vm5, %v17823_v5 }
  0x95   : > { %7090 = vst.msk [vmem:[#allocation5 + $0x48] sm:$0x3] %vm3922_vm5, %v17823_v5  ;;  %7092 = vst.msk [vmem:[#allocation5 + $0x58] sm:$0x3] %vm3922_vm5, %v17823_v5 }
  0x96   : > { %7094 = vst.msk [vmem:[#allocation5 + $0x68] sm:$0x3] %vm3922_vm5, %v17823_v5  ;;  %7096 = vst.msk [vmem:[#allocation5 + $0x78] sm:$0x3] %vm3922_vm5, %v17823_v5 }
  0x97   : > { %7098 = vst.msk [vmem:[#allocation5 + $0x88] sm:$0x3] %vm3922_vm5, %v17823_v5  ;;  %7100 = vst.msk [vmem:[#allocation5 + $0x98] sm:$0x3] %vm3922_vm5, %v17823_v5 }
  0x98   : > { %8394 = vst.msk [vmem:[#allocation6] sm:$0x3f] %vm8393_vm6, %v17823_v5  ;;  %8395 = vst.msk [vmem:[#allocation6 + $0x8] sm:$0x3f] %vm8393_vm6, %v17823_v5 }
  0x99   : > { %12081 = vmatmul.mubr.msk.bf16.gmra.mrb[28].mxu0 %vm813_vm2, %v14532_v27  ;;  %8396 = vst.msk [vmem:[#allocation6 + $0x10] sm:$0x3f] %vm8393_vm6, %v17823_v5  ;;  %8397 = vst.msk [vmem:[#allocation6 + $0x18] sm:$0x3f] %vm8393_vm6, %v17823_v5 }
  0x9a   : > { %12086 = vmatprep.mubr.msk.bf16.mxu0 %vm813_vm2, %v1055_v28  ;;  %v1053_v28 = vld [vmem:[#allocation2 + $0x168] sm:$0xff]  ;;  %8398 = vst.msk [vmem:[#allocation6 + $0x20] sm:$0x3f] %vm8393_vm6, %v17823_v5  ;;  %8399 = vst.msk [vmem:[#allocation6 + $0x28] sm:$0x3f] %vm8393_vm6, %v17823_v5 }
  0x9b   : > { %v14605_v32 = vpack.c.bf16 %v1054_v29, %v1053_v28  ;;  %v1569_v28 = vld [vmem:[#allocation2 + $0xe2] sm:$0xff]  ;;  %v1570_v29 = vld [vmem:[#allocation2 + $0xf2] sm:$0xff]  ;;  %960 = vst.msk [vmem:[#allocation3 + $0xc0] sm:$0xff] %vm934_vm9, %v17823_v5  ;;  %961 = vst.msk [vmem:[#allocation3 + $0xc8] sm:$0xff] %vm934_vm9, %v17823_v5 }
  0x9c   : > { %v14647_v31 = vpack.c.bf16 %v1569_v28, %v1568_v26  ;;  %v10901_v28 = vld [vmem:[%s17847_s5 + $0xc] sm:$0x3]  ;;  %962 = vst.msk [vmem:[#allocation3 + $0xd0] sm:$0x3] %vm937_vm10, %v17823_v5  ;;  %965 = vst.msk [vmem:[#allocation3 + $0xe8] sm:$0x3] %vm937_vm10, %v17823_v5 }
  0x9d   : > { %963 = vst.msk [vmem:[#allocation3 + $0xd8] sm:$0xff] %vm934_vm9, %v17823_v5  ;;  %964 = vst.msk [vmem:[#allocation3 + $0xe0] sm:$0xff] %vm934_vm9, %v17823_v5 }
  0x9e   : > { %966 = vst.msk [vmem:[#allocation3 + $0xf0] sm:$0xff] %vm934_vm9, %v17823_v5  ;;  %967 = vst.msk [vmem:[#allocation3 + $0xf8] sm:$0xff] %vm934_vm9, %v17823_v5 }
  0x9f   : > { %968 = vst.msk [vmem:[#allocation3 + $0x100] sm:$0x3] %vm937_vm10, %v17823_v5  ;;  %938 = vst.msk [vmem:[#allocation3 + $0x10] sm:$0x3] %vm937_vm10, %v17823_v5 }
  0xa0   : > { %935 = vst.msk [vmem:[#allocation3] sm:$0xff] %vm934_vm9, %v17823_v5  ;;  %936 = vst.msk [vmem:[#allocation3 + $0x8] sm:$0xff] %vm934_vm9, %v17823_v5 }
  0xa1   : > { %12087 = vmatmul.mubr.msk.bf16.vlgmr.msra.gmra.mrb[0].mxu0 %vm813_vm2, %v14540_v34  ;;  %939 = vst.msk [vmem:[#allocation3 + $0x18] sm:$0xff] %vm934_vm9, %v17823_v5  ;;  %940 = vst.msk [vmem:[#allocation3 + $0x20] sm:$0xff] %vm934_vm9, %v17823_v5 }
  0xa2   : > { %12090 = vmatprep.mubr.msk.bf16.mxu0 %vm813_vm2, %v14542_v35  ;;  %12119 = vmatpush3.bf16.msra.mxu0 %v14458_v39  ;;  %v1037_v39 = vld [vmem:[#allocation2 + $0xa8] sm:$0xff]  ;;  %941 = vst.msk [vmem:[#allocation3 + $0x28] sm:$0x3] %vm937_vm10, %v17823_v5  ;;  %944 = vst.msk [vmem:[#allocation3 + $0x40] sm:$0x3] %vm937_vm10, %v17823_v5 }
  0xa3   : > { %12152 = vmatprep.subr.bf16.mxu0 %v14545_v36  ;;  %v14569_v57 = vpack.c.bf16 %v1038_v54, %v1037_v39  ;;  %v1556_v39 = vld [vmem:[#allocation2 + $0x4a] sm:$0xff]  ;;  %v1557_v54 = vld [vmem:[#allocation2 + $0x52] sm:$0xff]  ;;  %942 = vst.msk [vmem:[#allocation3 + $0x30] sm:$0xff] %vm934_vm9, %v17823_v5  ;;  %943 = vst.msk [vmem:[#allocation3 + $0x38] sm:$0xff] %vm934_vm9, %v17823_v5 }
  0xa4   : > { %v14623_v61 = vpack.c.bf16 %v1557_v54, %v1556_v39  ;;  %v14657_v39 = vpack.c.bf16 %v1575_v43, %v1574_v42  ;;  %v1576_v54 = vld [vmem:[#allocation2 + $0x13a] sm:$0xff]  ;;  %v10935_v42 = vld [vmem:[%s17847_s5 + $0x10] sm:$0x3]  ;;  %945 = vst.msk [vmem:[#allocation3 + $0x48] sm:$0xff] %vm934_vm9, %v17823_v5  ;;  %946 = vst.msk [vmem:[#allocation3 + $0x50] sm:$0xff] %vm934_vm9, %v17823_v5 }
  0xa5   : > { %v14663_v0 = vpack.c.bf16 %v1577_v55, %v1576_v54  ;;  %v3414_v43 = vand.u32 %v10935_v42, %v14278_v4  ;;  %947 = vst.msk [vmem:[#allocation3 + $0x58] sm:$0x3] %vm937_vm10, %v17823_v5  ;;  %950 = vst.msk [vmem:[#allocation3 + $0x70] sm:$0x3] %vm937_vm10, %v17823_v5 }
  0xa6   : > { %948 = vst.msk [vmem:[#allocation3 + $0x60] sm:$0xff] %vm934_vm9, %v17823_v5  ;;  %949 = vst.msk [vmem:[#allocation3 + $0x68] sm:$0xff] %vm934_vm9, %v17823_v5 }
  0xa7   : > { %951 = vst.msk [vmem:[#allocation3 + $0x78] sm:$0xff] %vm934_vm9, %v17823_v5  ;;  %952 = vst.msk [vmem:[#allocation3 + $0x80] sm:$0xff] %vm934_vm9, %v17823_v5 }
  0xa8   : > { %953 = vst.msk [vmem:[#allocation3 + $0x88] sm:$0x3] %vm937_vm10, %v17823_v5  ;;  %956 = vst.msk [vmem:[#allocation3 + $0xa0] sm:$0x3] %vm937_vm10, %v17823_v5 }
  0xa9   : > { %12091 = vmatmul.mubr.msk.bf16.gmra.mrb[4].mxu0 %vm813_vm2, %v14553_v44  ;;  %954 = vst.msk [vmem:[#allocation3 + $0x90] sm:$0xff] %vm934_vm9, %v17823_v5  ;;  %955 = vst.msk [vmem:[#allocation3 + $0x98] sm:$0xff] %vm934_vm9, %v17823_v5 }
  0xaa   : > { %12094 = vmatprep.mubr.msk.bf16.mxu0 %vm813_vm2, %v14555_v45  ;;  %957 = vst.msk [vmem:[#allocation3 + $0xa8] sm:$0xff] %vm934_vm9, %v17823_v5  ;;  %958 = vst.msk [vmem:[#allocation3 + $0xb0] sm:$0xff] %vm934_vm9, %v17823_v5 }
  0xab   : > { %959 = vst.msk [vmem:[#allocation3 + $0xb8] sm:$0x3] %vm937_vm10, %v17823_v5  ;;  %971 = vst.msk [vmem:[#allocation3 + $0x118] sm:$0x3] %vm937_vm10, %v17823_v5 }
  0xac   : > { %969 = vst.msk [vmem:[#allocation3 + $0x108] sm:$0xff] %vm934_vm9, %v17823_v5  ;;  %970 = vst.msk [vmem:[#allocation3 + $0x110] sm:$0xff] %vm934_vm9, %v17823_v5 }
  0xad   : > { %972 = vst.msk [vmem:[#allocation3 + $0x120] sm:$0xff] %vm934_vm9, %v17823_v5  ;;  %973 = vst.msk [vmem:[#allocation3 + $0x128] sm:$0xff] %vm934_vm9, %v17823_v5 }
  0xae   : > { %974 = vst.msk [vmem:[#allocation3 + $0x130] sm:$0x3] %vm937_vm10, %v17823_v5  ;;  %977 = vst.msk [vmem:[#allocation3 + $0x148] sm:$0x3] %vm937_vm10, %v17823_v5 }
  0xaf   : > { %975 = vst.msk [vmem:[#allocation3 + $0x138] sm:$0xff] %vm934_vm9, %v17823_v5  ;;  %976 = vst.msk [vmem:[#allocation3 + $0x140] sm:$0xff] %vm934_vm9, %v17823_v5 }
  0xb0   : > { %978 = vst.msk [vmem:[#allocation3 + $0x150] sm:$0xff] %vm934_vm9, %v17823_v5  ;;  %979 = vst.msk [vmem:[#allocation3 + $0x158] sm:$0xff] %vm934_vm9, %v17823_v5 }
  0xb1   : > { %12095 = vmatmul.mubr.msk.bf16.gmra.mrb[8].mxu0 %vm813_vm2, %v14561_v52  ;;  %980 = vst.msk [vmem:[#allocation3 + $0x160] sm:$0x3] %vm937_vm10, %v17823_v5  ;;  %983 = vst.msk [vmem:[#allocation3 + $0x178] sm:$0x3] %vm937_vm10, %v17823_v5 }
  0xb2   : > { %12098 = vmatprep.mubr.msk.bf16.mxu0 %vm813_vm2, %v14563_v53  ;;  %981 = vst.msk [vmem:[#allocation3 + $0x168] sm:$0xff] %vm934_vm9, %v17823_v5  ;;  %982 = vst.msk [vmem:[#allocation3 + $0x170] sm:$0xff] %vm934_vm9, %v17823_v5 }
  0xb3   : > { %984 = vst.msk [vmem:[#allocation3 + $0x180] sm:$0xff] %vm934_vm9, %v17823_v5  ;;  %985 = vst.msk [vmem:[#allocation3 + $0x188] sm:$0xff] %vm934_vm9, %v17823_v5 }
  0xb4   : > { %986 = vst.msk [vmem:[#allocation3 + $0x190] sm:$0x3] %vm937_vm10, %v17823_v5  ;;  %989 = vst.msk [vmem:[#allocation3 + $0x1a8] sm:$0x3] %vm937_vm10, %v17823_v5 }
  0xb5   : > { %987 = vst.msk [vmem:[#allocation3 + $0x198] sm:$0xff] %vm934_vm9, %v17823_v5  ;;  %988 = vst.msk [vmem:[#allocation3 + $0x1a0] sm:$0xff] %vm934_vm9, %v17823_v5 }
  0xb9   : > { %12099 = vmatmul.mubr.msk.bf16.gmra.mrb[12].mxu0 %vm813_vm2, %v14569_v57 }
  0xba   : > { %12102 = vmatprep.mubr.msk.bf16.mxu0 %vm813_vm2, %v14571_v58 }
  0xc1   : > { %12103 = vmatmul.mubr.msk.bf16.gmra.mrb[16].mxu0 %vm813_vm2, %v14577_v3 }
  0xc2   : > { %12106 = vmatprep.mubr.msk.bf16.mxu0 %vm813_vm2, %v14579_v6 }
  0xc9   : > { %12107 = vmatmul.mubr.msk.bf16.gmra.mrb[20].mxu0 %vm813_vm2, %v14585_v13 }
  0xca   : > { %12110 = vmatprep.mubr.msk.bf16.mxu0 %vm813_vm2, %v14587_v14 }
  0xd1   : > { %12111 = vmatmul.mubr.msk.bf16.gmra.mrb[24].mxu0 %vm813_vm2, %v14593_v23 }
  0xd2   : > { %12114 = vmatprep.mubr.msk.bf16.mxu0 %vm813_vm2, %v14595_v24 }
  0xd9   : > { %12115 = vmatmul.mubr.msk.bf16.gmra.mrb[28].mxu0 %vm813_vm2, %v14605_v32 }
  0xda   : > { %12120 = vmatprep.mubr.msk.bf16.mxu0 %vm813_vm2, %v1582_v33  ;;  %v14649_v33 = vpack.c.bf16 %v1571_v30, %v1570_v29  ;;  %v2826_v29 = vand.u32 %v10901_v28, %v14278_v4 }
  0xe1   : > { %12121 = vmatmul.mubr.msk.bf16.vlgmr.msra.gmra.mrb[0].mxu0 %vm813_vm2, %v14613_v49 }
  0xe2   : > { %12124 = vmatprep.mubr.msk.bf16.mxu0 %vm813_vm2, %v14615_v50  ;;  %12153 = vmatpush3.bf16.msra.mxu0 %v14545_v36  ;;  %v14633_v36 = vpack.c.bf16 %v1563_v8, %v1562_v7  ;;  %v14665_v7 = vpack.c.bf16 %v1579_v63, %v1578_v56  ;;  %v1580_v8 = vld [vmem:[#allocation2 + $0x16a] sm:$0xff] }
  0xe3   : > { %12186 = vmatprep.subr.bf16.mxu0 %v2237_v51  ;;  %v14671_v17 = vpack.c.bf16 %v1581_v12, %v1580_v8 }
  0xe9   : > { %12125 = vmatmul.mubr.msk.bf16.gmra.mrb[4].mxu0 %vm813_vm2, %v14623_v61 }
  0xea   : > { %12128 = vmatprep.mubr.msk.bf16.mxu0 %vm813_vm2, %v14625_v62 }
  0xf1   : > { %12129 = vmatmul.mubr.msk.bf16.gmra.mrb[8].mxu0 %vm813_vm2, %v14631_v11 }
  0xf2   : > { %12132 = vmatprep.mubr.msk.bf16.mxu0 %vm813_vm2, %v14633_v36 }
  0xf9   : > { %12133 = vmatmul.mubr.msk.bf16.gmra.mrb[12].mxu0 %vm813_vm2, %v14639_v20 }
  0xfa   : > { %12136 = vmatprep.mubr.msk.bf16.mxu0 %vm813_vm2, %v14641_v25 }
 0x101   : > { %12137 = vmatmul.mubr.msk.bf16.gmra.mrb[16].mxu0 %vm813_vm2, %v14647_v31 }
 0x102   : > { %12140 = vmatprep.mubr.msk.bf16.mxu0 %vm813_vm2, %v14649_v33 }
 0x109   : > { %12141 = vmatmul.mubr.msk.bf16.gmra.mrb[20].mxu0 %vm813_vm2, %v14655_v46 }
 0x10a   : > { %12144 = vmatprep.mubr.msk.bf16.mxu0 %vm813_vm2, %v14657_v39 }
 0x111   : > { %12145 = vmatmul.mubr.msk.bf16.gmra.mrb[24].mxu0 %vm813_vm2, %v14663_v0 }
 0x112   : > { %12148 = vmatprep.mubr.msk.bf16.mxu0 %vm813_vm2, %v14665_v7 }
 0x119   : > { %12149 = vmatmul.mubr.msk.bf16.gmra.mrb[28].mxu0 %vm813_vm2, %v14671_v17 }
 0x11a   : > { %12154 = vmatprep.mubr.msk.bf16.mxu0 %vm813_vm2, %v14540_v34  ;;  %v1874_v34 = vld [vmem:[#allocation2 + $0x180] sm:$0xff] }
 0x121   : > { %12155 = vmatmul.mubr.msk.bf16.vlgmr.msra.gmra.mrb[0].mxu0 %vm813_vm2, %v14542_v35 }
 0x122   : > { %12158 = vmatprep.mubr.msk.bf16.mxu0 %vm813_vm2, %v14553_v44  ;;  %12187 = vmatpush3.bf16.msra.mxu0 %v2237_v51  ;;  %v1875_v51 = vld [vmem:[#allocation2 + $0x188] sm:$0xff] }
 0x123   : > { %12220 = vmatprep.subr.bf16.mxu0 %v2531_v19  ;;  %v14709_v26 = vpack.c.bf16 %v1875_v51, %v1874_v34 }
 0x129   : > { %12159 = vmatmul.mubr.msk.bf16.gmra.mrb[4].mxu0 %vm813_vm2, %v14555_v45 }
 0x12a   : > { %12162 = vmatprep.mubr.msk.bf16.mxu0 %vm813_vm2, %v14561_v52 }
 0x131   : > { %12163 = vmatmul.mubr.msk.bf16.gmra.mrb[8].mxu0 %vm813_vm2, %v14563_v53 }
 0x132   : > { %12166 = vmatprep.mubr.msk.bf16.mxu0 %vm813_vm2, %v14569_v57 }
 0x139   : > { %12167 = vmatmul.mubr.msk.bf16.gmra.mrb[12].mxu0 %vm813_vm2, %v14571_v58 }
 0x13a   : > { %12170 = vmatprep.mubr.msk.bf16.mxu0 %vm813_vm2, %v14577_v3 }
 0x141   : > { %12171 = vmatmul.mubr.msk.bf16.gmra.mrb[16].mxu0 %vm813_vm2, %v14579_v6 }
 0x142   : > { %12174 = vmatprep.mubr.msk.bf16.mxu0 %vm813_vm2, %v14585_v13 }
 0x149   : > { %12175 = vmatmul.mubr.msk.bf16.gmra.mrb[20].mxu0 %vm813_vm2, %v14587_v14 }
 0x14a   : > { %12178 = vmatprep.mubr.msk.bf16.mxu0 %vm813_vm2, %v14593_v23 }
 0x151   : > { %12179 = vmatmul.mubr.msk.bf16.gmra.mrb[24].mxu0 %vm813_vm2, %v14595_v24 }
 0x152   : > { %12182 = vmatprep.mubr.msk.bf16.mxu0 %vm813_vm2, %v14605_v32 }
 0x159   : > { %12183 = vmatmul.mubr.msk.bf16.gmra.mrb[28].mxu0 %vm813_vm2, %v14709_v26 }
 0x15a   : > { %12188 = vmatprep.mubr.msk.bf16.mxu0 %vm813_vm2, %v14455_v37  ;;  %v2168_v37 = vld [vmem:[#allocation2 + $0x181] sm:$0xff] }
 0x161   : > { %12189 = vmatmul.mubr.msk.bf16.vlgmr.msra.gmra.mrb[0].mxu0 %vm813_vm2, %v14460_v40  ;;  %v2169_v40 = vld [vmem:[#allocation2 + $0x189] sm:$0xff] }
 0x162   : > { %12192 = vmatprep.mubr.msk.bf16.mxu0 %vm813_vm2, %v14472_v47  ;;  %12221 = vmatpush3.bf16.msra.mxu0 %v2531_v19  ;;  %v14747_v47 = vpack.c.bf16 %v2169_v40, %v2168_v37 }
 0x163   : > { %12254 = vmatprep.subr.bf16.mxu0 %v2826_v29 }
 0x169   : > { %12193 = vmatmul.mubr.msk.bf16.gmra.mrb[4].mxu0 %vm813_vm2, %v14474_v48  ;;  %v10918_v48 = vld [vmem:[%s17847_s5 + $0xe] sm:$0x3]  ;;  %s17853_s5 = sld [smem:[#allocation28_spill]] }
 0x16a   : > { %12196 = vmatprep.mubr.msk.bf16.mxu0 %vm813_vm2, %v14492_v59  ;;  %v3120_v30 = vand.u32 %v10918_v48, %v14278_v4  ;;  %v2757_v4 = vld [vmem:[#allocation2 + $0x198] sm:$0xff] }
 0x171   : > { %12197 = vmatmul.mubr.msk.bf16.gmra.mrb[8].mxu0 %vm813_vm2, %v14494_v60 }
 0x172   : > { %12200 = vmatprep.mubr.msk.bf16.mxu0 %vm813_vm2, %v14500_v1 }
 0x179   : > { %12201 = vmatmul.mubr.msk.bf16.gmra.mrb[12].mxu0 %vm813_vm2, %v14502_v2 }
 0x17a   : > { %12204 = vmatprep.mubr.msk.bf16.mxu0 %vm813_vm2, %v14508_v9 }
 0x181   : > { %12205 = vmatmul.mubr.msk.bf16.gmra.mrb[16].mxu0 %vm813_vm2, %v14510_v10 }
 0x182   : > { %12208 = vmatprep.mubr.msk.bf16.mxu0 %vm813_vm2, %v14516_v15 }
 0x189   : > { %12209 = vmatmul.mubr.msk.bf16.gmra.mrb[20].mxu0 %vm813_vm2, %v14518_v16 }
 0x18a   : > { %12212 = vmatprep.mubr.msk.bf16.mxu0 %vm813_vm2, %v14524_v21 }
 0x191   : > { %12213 = vmatmul.mubr.msk.bf16.gmra.mrb[24].mxu0 %vm813_vm2, %v14526_v22 }
 0x192   : > { %12216 = vmatprep.mubr.msk.bf16.mxu0 %vm813_vm2, %v14532_v27 }
 0x199   : > { %12217 = vmatmul.mubr.msk.bf16.gmra.mrb[28].mxu0 %vm813_vm2, %v14747_v47 }
 0x19a   : > { %12222 = vmatprep.mubr.msk.bf16.mxu0 %vm813_vm2, %v14613_v49  ;;  %v2462_v49 = vld [vmem:[#allocation2 + $0x182] sm:$0xff] }
 0x19b   : > { %v14785_v41 = vpack.c.bf16 %v2463_v38, %v2462_v49 }
 0x1a1   : > { %12223 = vmatmul.mubr.msk.bf16.vlgmr.msra.gmra.mrb[0].mxu0 %vm813_vm2, %v14615_v50 }
 0x1a2   : > { %12226 = vmatprep.mubr.msk.bf16.mxu0 %vm813_vm2, %v14623_v61  ;;  %12255 = vmatpush3.bf16.msra.mxu0 %v2826_v29 }
 0x1a3   : > { %12288 = vmatprep.subr.bf16.mxu0 %v3120_v30 }
 0x1a9   : > { %12227 = vmatmul.mubr.msk.bf16.gmra.mrb[4].mxu0 %vm813_vm2, %v14625_v62 }
 0x1aa   : > { %12230 = vmatprep.mubr.msk.bf16.mxu0 %vm813_vm2, %v14631_v11 }
 0x1b1   : > { %12231 = vmatmul.mubr.msk.bf16.gmra.mrb[8].mxu0 %vm813_vm2, %v14633_v36 }
 0x1b2   : > { %12234 = vmatprep.mubr.msk.bf16.mxu0 %vm813_vm2, %v14639_v20 }
 0x1b9   : > { %12235 = vmatmul.mubr.msk.bf16.gmra.mrb[12].mxu0 %vm813_vm2, %v14641_v25 }
 0x1ba   : > { %12238 = vmatprep.mubr.msk.bf16.mxu0 %vm813_vm2, %v14647_v31 }
 0x1c1   : > { %12239 = vmatmul.mubr.msk.bf16.gmra.mrb[16].mxu0 %vm813_vm2, %v14649_v33 }
 0x1c2   : > { %12242 = vmatprep.mubr.msk.bf16.mxu0 %vm813_vm2, %v14655_v46 }
 0x1c9   : > { %12243 = vmatmul.mubr.msk.bf16.gmra.mrb[20].mxu0 %vm813_vm2, %v14657_v39 }
 0x1ca   : > { %12246 = vmatprep.mubr.msk.bf16.mxu0 %vm813_vm2, %v14663_v0 }
 0x1d1   : > { %12247 = vmatmul.mubr.msk.bf16.gmra.mrb[24].mxu0 %vm813_vm2, %v14665_v7 }
 0x1d2   : > { %12250 = vmatprep.mubr.msk.bf16.mxu0 %vm813_vm2, %v14671_v17 }
 0x1d9   : > { %12251 = vmatmul.mubr.msk.bf16.gmra.mrb[28].mxu0 %vm813_vm2, %v14785_v41 }
 0x1da   : > { %12256 = vmatprep.mubr.msk.bf16.mxu0 %vm813_vm2, %v14542_v35  ;;  %v2758_v35 = vld [vmem:[#allocation2 + $0x1a0] sm:$0xff] }
 0x1e1   : > { %12257 = vmatmul.mubr.msk.bf16.vlgmr.msra.gmra.mrb[0].mxu0 %vm813_vm2, %v14553_v44  ;;  %v3021_v44 = vld [vmem:[#allocation2 + $0x31] sm:$0xff] }
 0x1e2   : > { %12260 = vmatprep.mubr.msk.bf16.mxu0 %vm813_vm2, %v14555_v45  ;;  %12289 = vmatpush3.bf16.msra.mxu0 %v3120_v30  ;;  %v3022_v45 = vld [vmem:[#allocation2 + $0x39] sm:$0xff] }
 0x1e3   : > { %12322 = vmatprep.subr.bf16.mxu0 %v3414_v43 }
 0x1e9   : > { %12261 = vmatmul.mubr.msk.bf16.gmra.mrb[4].mxu0 %vm813_vm2, %v14561_v52  ;;  %v2774_v52 = vpack.c.bf16 %v2758_v35, %v2757_v4 }
 0x1ea   : > { %12264 = vmatprep.mubr.msk.bf16.mxu0 %vm813_vm2, %v14563_v53  ;;  %v3053_v53 = vpack.c.bf16 %v3022_v45, %v3021_v44 }
 0x1f1   : > { %12265 = vmatmul.mubr.msk.bf16.gmra.mrb[8].mxu0 %vm813_vm2, %v14569_v57  ;;  %v3023_v57 = vld [vmem:[#allocation2 + $0x49] sm:$0xff] }
 0x1f2   : > { %12268 = vmatprep.mubr.msk.bf16.mxu0 %vm813_vm2, %v14571_v58  ;;  %v3024_v58 = vld [vmem:[#allocation2 + $0x51] sm:$0xff] }
 0x1f9   : > { %12269 = vmatmul.mubr.msk.bf16.gmra.mrb[12].mxu0 %vm813_vm2, %v14577_v3  ;;  %v3025_v3 = vld [vmem:[#allocation2 + $0x61] sm:$0xff] }
 0x1fa   : > { %12272 = vmatprep.mubr.msk.bf16.mxu0 %vm813_vm2, %v14579_v6  ;;  %v3026_v6 = vld [vmem:[#allocation2 + $0x69] sm:$0xff] }
 0x201   : > { %12273 = vmatmul.mubr.msk.bf16.gmra.mrb[16].mxu0 %vm813_vm2, %v14585_v13  ;;  %v3054_v13 = vpack.c.bf16 %v3024_v58, %v3023_v57 }
 0x202   : > { %12276 = vmatprep.mubr.msk.bf16.mxu0 %vm813_vm2, %v14587_v14  ;;  %v3055_v14 = vpack.c.bf16 %v3026_v6, %v3025_v3 }
 0x209   : > { %12277 = vmatmul.mubr.msk.bf16.gmra.mrb[20].mxu0 %vm813_vm2, %v14593_v23 }
 0x20a   : > { %12280 = vmatprep.mubr.msk.bf16.mxu0 %vm813_vm2, %v14595_v24 }
 0x211   : > { %12281 = vmatmul.mubr.msk.bf16.gmra.mrb[24].mxu0 %vm813_vm2, %v14605_v32 }
 0x212   : > { %12284 = vmatprep.mubr.msk.bf16.mxu0 %vm813_vm2, %v14709_v26 }
 0x219   : > { %12285 = vmatmul.mubr.msk.bf16.gmra.mrb[28].mxu0 %vm813_vm2, %v2774_v52 }
 0x21a   : > { %12290 = vmatprep.mubr.msk.bf16.mxu0 %vm813_vm2, %v3053_v53 }
 0x221   : > { %12291 = vmatmul.mubr.msk.bf16.vlgmr.msra.gmra.mrb[0].mxu0 %vm813_vm2, %v3054_v13 }
 0x222   : > { %12294 = vmatprep.mubr.msk.bf16.mxu0 %vm813_vm2, %v3055_v14  ;;  %12323 = vmatpush3.bf16.msra.mxu0 %v3414_v43 }
 0x229   : > { %12295 = vmatmul.mubr.msk.bf16.gmra.mrb[4].mxu0 %vm813_vm2, %v14492_v59  ;;  %v3051_v59 = vld [vmem:[#allocation2 + $0x199] sm:$0xff] }
 0x22a   : > { %12298 = vmatprep.mubr.msk.bf16.mxu0 %vm813_vm2, %v14494_v60  ;;  %v3052_v60 = vld [vmem:[#allocation2 + $0x1a1] sm:$0xff] }
 0x231   : > { %12299 = vmatmul.mubr.msk.bf16.gmra.mrb[8].mxu0 %vm813_vm2, %v14500_v1  ;;  %v3068_v1 = vpack.c.bf16 %v3052_v60, %v3051_v59 }
 0x232   : > { %12302 = vmatprep.mubr.msk.bf16.mxu0 %vm813_vm2, %v14502_v2  ;;  %v3345_v2 = vld [vmem:[#allocation2 + $0x19a] sm:$0xff] }
 0x239   : > { %12303 = vmatmul.mubr.msk.bf16.gmra.mrb[12].mxu0 %vm813_vm2, %v14508_v9  ;;  %v3346_v9 = vld [vmem:[#allocation2 + $0x1a2] sm:$0xff] }
 0x23a   : > { %12306 = vmatprep.mubr.msk.bf16.mxu0 %vm813_vm2, %v14510_v10  ;;  %v3362_v10 = vpack.c.bf16 %v3346_v9, %v3345_v2 }
 0x241   : > { %12307 = vmatmul.mubr.msk.bf16.gmra.mrb[16].mxu0 %vm813_vm2, %v14516_v15  ;;  %v15034_v15 = vld [vmem:[%s17849_s26] ss:$0 sm:$0xff]  ;;  %s17852_s26 = sld [smem:[#allocation27_spill]] }
 0x242   : > { %12310 = vmatprep.mubr.msk.bf16.mxu0 %vm813_vm2, %v14518_v16 }
 0x249   : > { %12311 = vmatmul.mubr.msk.bf16.gmra.mrb[20].mxu0 %vm813_vm2, %v14524_v21 }
 0x24a   : > { %12314 = vmatprep.mubr.msk.bf16.mxu0 %vm813_vm2, %v14526_v22 }
 0x251   : > { %12315 = vmatmul.mubr.msk.bf16.gmra.mrb[24].mxu0 %vm813_vm2, %v14532_v27 }
 0x252   : > { %12318 = vmatprep.mubr.msk.bf16.mxu0 %vm813_vm2, %v14747_v47 }
 0x259   : > { %12319 = vmatmul.mubr.msk.bf16.gmra.mrb[28].mxu0 %vm813_vm2, %v3068_v1 }
 0x25a   : > { %12324 = vmatprep.mubr.msk.bf16.mxu0 %vm813_vm2, %v14615_v50 }
 0x261   : > { %12325 = vmatmul.mubr.msk.bf16.vlgmr.msra.gmra.mrb[0].mxu0 %vm813_vm2, %v14623_v61 }
 0x262   : > { %12328 = vmatprep.mubr.msk.bf16.mxu0 %vm813_vm2, %v14625_v62 }
 0x269   : > { %12329 = vmatmul.mubr.msk.bf16.gmra.mrb[4].mxu0 %vm813_vm2, %v14631_v11 }
 0x26a   : > { %12332 = vmatprep.mubr.msk.bf16.mxu0 %vm813_vm2, %v14633_v36 }
 0x271   : > { %12333 = vmatmul.mubr.msk.bf16.gmra.mrb[8].mxu0 %vm813_vm2, %v14639_v20 }
 0x272   : > { %12336 = vmatprep.mubr.msk.bf16.mxu0 %vm813_vm2, %v14641_v25 }
 0x279   : > { %12337 = vmatmul.mubr.msk.bf16.gmra.mrb[12].mxu0 %vm813_vm2, %v14647_v31 }
 0x27a   : > { %12340 = vmatprep.mubr.msk.bf16.mxu0 %vm813_vm2, %v14649_v33 }
 0x281   : > { %12341 = vmatmul.mubr.msk.bf16.gmra.mrb[16].mxu0 %vm813_vm2, %v14655_v46 }
 0x282   : > { %12344 = vmatprep.mubr.msk.bf16.mxu0 %vm813_vm2, %v14657_v39 }
 0x289   : > { %12345 = vmatmul.mubr.msk.bf16.gmra.mrb[20].mxu0 %vm813_vm2, %v14663_v0 }
 0x28a   : > { %12348 = vmatprep.mubr.msk.bf16.mxu0 %vm813_vm2, %v14665_v7 }
 0x291   : > { %12349 = vmatmul.mubr.msk.bf16.gmra.mrb[24].mxu0 %vm813_vm2, %v14671_v17 }
 0x292   : > { %12352 = vmatprep.mubr.msk.bf16.mxu0 %vm813_vm2, %v14785_v41 }
 0x299   : > { %12353 = vmatmul.mubr.msk.bf16.gmra.mrb[28].mxu0 %vm813_vm2, %v3362_v10 }
 0x334   : > { %v12326_v16 = vpop.f32.mrb[0].mxu0 }
 0x335   : > { %v3450_v21 = vpop.f32.mrb[1].mxu0  ;;  %v15040_v24 = vadd.f32 %v12326_v16, %v15034_v15 }
 0x336   : > { %v15037_v22 = vadd.f32 %v15034_v15, %v3450_v21  ;;  %v12327_v27 = vpop.f32.mrb[2].mxu0 }
 0x337   : > { %v3453_v23 = vpop.f32.mrb[3].mxu0  ;;  %v15048_v61 = vadd.f32 %v12327_v27, %v15034_v15  ;;  %v3652_v36 = vsel %vm3648_vm4, %v15040_v24, 0.0 }
 0x338   : > { %v15043_v32 = vadd.f32 %v15034_v15, %v3453_v23  ;;  %v3649_v50 = vsel %vm3648_vm4, %v15037_v22, 0.0 }
 0x339   : > { %v3654_v33 = vsel %vm3648_vm4, %v15048_v61, 0.0 }
 0x33a   : > { %v3650_v62 = vsel %vm3648_vm4, %v15043_v32, 0.0 }
 0x33b   : > { %v3651_v11 = vadd.f32 %v3650_v62, %v3649_v50 }
 0x33c   : > { %v12330_v20 = vpop.f32.mrb[4].mxu0 }
 0x33d   : > { %v3653_v25 = vadd.f32 %v3652_v36, %v3651_v11  ;;  %v3466_v31 = vpop.f32.mrb[5].mxu0  ;;  %v15060_v56 = vadd.f32 %v12330_v20, %v15034_v15 }
 0x33e   : > { %v15057_v46 = vadd.f32 %v15034_v15, %v3466_v31  ;;  %v12331_v39 = vpop.f32.mrb[6].mxu0 }
 0x33f   : > { %v3655_v54 = vadd.f32 %v3654_v33, %v3653_v25  ;;  %v3469_v55 = vpop.f32.mrb[7].mxu0  ;;  %v15068_v8 = vadd.f32 %v12331_v39, %v15034_v15  ;;  %v3660_v18 = vsel %vm3648_vm4, %v15060_v56, 0.0 }
 0x340   : > { %v3656_v63 = vsel %vm3648_vm4, %v15057_v46, 0.0  ;;  %v15065_v0 = vadd.f32 %v15034_v15, %v3469_v55 }
 0x341   : > { %v3657_v7 = vadd.f32 %v3656_v63, %v3655_v54  ;;  %v3662_v26 = vsel %vm3648_vm4, %v15068_v8, 0.0 }
 0x342   : > { %v3658_v12 = vsel %vm3648_vm4, %v15065_v0, 0.0 }
 0x343   : > { %v3659_v17 = vadd.f32 %v3658_v12, %v3657_v7 }
 0x344   : > { %v12334_v19 = vpop.f32.mrb[8].mxu0 }
 0x345   : > { %v3661_v34 = vadd.f32 %v3660_v18, %v3659_v17  ;;  %v3482_v51 = vpop.f32.mrb[9].mxu0  ;;  %v15080_v47 = vadd.f32 %v12334_v19, %v15034_v15 }
 0x346   : > { %v15077_v28 = vadd.f32 %v15034_v15, %v3482_v51  ;;  %v12335_v29 = vpop.f32.mrb[10].mxu0 }
 0x347   : > { %v3663_v37 = vadd.f32 %v3662_v26, %v3661_v34  ;;  %v3485_v40 = vpop.f32.mrb[11].mxu0  ;;  %v15088_v38 = vadd.f32 %v12335_v29, %v15034_v15  ;;  %v3668_v43 = vsel %vm3648_vm4, %v15080_v47, 0.0 }
 0x348   : > { %v3664_v48 = vsel %vm3648_vm4, %v15077_v28, 0.0  ;;  %v15085_v30 = vadd.f32 %v15034_v15, %v3485_v40 }
 0x349   : > { %v3665_v49 = vadd.f32 %v3664_v48, %v3663_v37  ;;  %v3670_v45 = vsel %vm3648_vm4, %v15088_v38, 0.0 }
 0x34a   : > { %v3666_v41 = vsel %vm3648_vm4, %v15085_v30, 0.0 }
 0x34b   : > { %v3667_v42 = vadd.f32 %v3666_v41, %v3665_v49 }
 0x34c   : > { %v12338_v4 = vpop.f32.mrb[12].mxu0 }
 0x34d   : > { %v3669_v35 = vadd.f32 %v3668_v43, %v3667_v42  ;;  %v3498_v44 = vpop.f32.mrb[13].mxu0  ;;  %v15100_v3 = vadd.f32 %v12338_v4, %v15034_v15 }
 0x34e   : > { %v15097_v52 = vadd.f32 %v15034_v15, %v3498_v44  ;;  %v12339_v53 = vpop.f32.mrb[14].mxu0 }
 0x34f   : > { %v3671_v57 = vadd.f32 %v3670_v45, %v3669_v35  ;;  %v3501_v58 = vpop.f32.mrb[15].mxu0  ;;  %v15108_v59 = vadd.f32 %v12339_v53, %v15034_v15  ;;  %v3676_v2 = vsel %vm3648_vm4, %v15100_v3, 0.0 }
 0x350   : > { %v3672_v6 = vsel %vm3648_vm4, %v15097_v52, 0.0  ;;  %v15105_v13 = vadd.f32 %v15034_v15, %v3501_v58 }
 0x351   : > { %v3673_v14 = vadd.f32 %v3672_v6, %v3671_v57  ;;  %v3678_v21 = vsel %vm3648_vm4, %v15108_v59, 0.0 }
 0x352   : > { %v3674_v60 = vsel %vm3648_vm4, %v15105_v13, 0.0 }
 0x353   : > { %v3675_v1 = vadd.f32 %v3674_v60, %v3673_v14 }
 0x354   : > { %v12342_v9 = vpop.f32.mrb[16].mxu0 }
 0x355   : > { %v3677_v10 = vadd.f32 %v3676_v2, %v3675_v1  ;;  %v3514_v16 = vpop.f32.mrb[17].mxu0  ;;  %v15120_v11 = vadd.f32 %v12342_v9, %v15034_v15 }
 0x356   : > { %v15117_v27 = vadd.f32 %v15034_v15, %v3514_v16  ;;  %v12343_v23 = vpop.f32.mrb[18].mxu0 }
 0x357   : > { %v3679_v50 = vadd.f32 %v3678_v21, %v3677_v10  ;;  %v3517_v62 = vpop.f32.mrb[19].mxu0  ;;  %v15128_v31 = vadd.f32 %v12343_v23, %v15034_v15  ;;  %v3684_v54 = vsel %vm3648_vm4, %v15120_v11, 0.0 }
 0x358   : > { %v3680_v36 = vsel %vm3648_vm4, %v15117_v27, 0.0  ;;  %v15125_v20 = vadd.f32 %v15034_v15, %v3517_v62 }
 0x359   : > { %v3681_v25 = vadd.f32 %v3680_v36, %v3679_v50  ;;  %v3686_v12 = vsel %vm3648_vm4, %v15128_v31, 0.0 }
 0x35a   : > { %v3682_v33 = vsel %vm3648_vm4, %v15125_v20, 0.0 }
 0x35b   : > { %v3683_v39 = vadd.f32 %v3682_v33, %v3681_v25 }
 0x35c   : > { %v12346_v55 = vpop.f32.mrb[20].mxu0 }
 0x35d   : > { %v3685_v63 = vadd.f32 %v3684_v54, %v3683_v39  ;;  %v3530_v7 = vpop.f32.mrb[21].mxu0  ;;  %v15140_v51 = vadd.f32 %v12346_v55, %v15034_v15 }
 0x35e   : > { %v15137_v17 = vadd.f32 %v15034_v15, %v3530_v7  ;;  %v12347_v18 = vpop.f32.mrb[22].mxu0 }
 0x35f   : > { %v3687_v19 = vadd.f32 %v3686_v12, %v3685_v63  ;;  %v3533_v34 = vpop.f32.mrb[23].mxu0  ;;  %v15148_v40 = vadd.f32 %v12347_v18, %v15034_v15  ;;  %v3692_v41 = vsel %vm3648_vm4, %v15140_v51, 0.0 }
 0x360   : > { %v3688_v26 = vsel %vm3648_vm4, %v15137_v17, 0.0  ;;  %v15145_v29 = vadd.f32 %v15034_v15, %v3533_v34 }
 0x361   : > { %v3689_v37 = vadd.f32 %v3688_v26, %v3687_v19  ;;  %v3694_v35 = vsel %vm3648_vm4, %v15148_v40, 0.0 }
 0x362   : > { %v3690_v48 = vsel %vm3648_vm4, %v15145_v29, 0.0 }
 0x363   : > { %v3691_v49 = vadd.f32 %v3690_v48, %v3689_v37 }
 0x364   : > { %v12350_v42 = vpop.f32.mrb[24].mxu0 }
 0x365   : > { %v3693_v43 = vadd.f32 %v3692_v41, %v3691_v49  ;;  %v3546_v4 = vpop.f32.mrb[25].mxu0  ;;  %v15160_v58 = vadd.f32 %v12350_v42, %v15034_v15  ;;  %v13807_v49 = vld [vmem:[%s17850_s30 + $0x20] sm:$0xff]  }
 0x366   : > { %v15157_v44 = vadd.f32 %v15034_v15, %v3546_v4  ;;  %v12351_v45 = vpop.f32.mrb[26].mxu0  ;;  %12356 = vmatprep.subr.bf16.mxu1 %v13807_v49 }
 0x367   : > { %v3695_v53 = vadd.f32 %v3694_v35, %v3693_v43  ;;  %v3549_v57 = vpop.f32.mrb[27].mxu0  ;;  %v15168_v1 = vadd.f32 %v12351_v45, %v15034_v15  ;;  %v3700_v10 = vsel %vm3648_vm4, %v15160_v58, 0.0  ;;  %12357 = vmatpush3.bf16.msra.mxu1 %v13807_v49  ;;  %v13809_v35 = vld [vmem:[%s17850_s30 + $0x30] sm:$0xff]   ;;  %v13810_v45 = vld [vmem:[%s17850_s30 + $0x38] sm:$0xff]  }
 0x368   : > { %v3696_v6 = vsel %vm3648_vm4, %v15157_v44, 0.0  ;;  %v15165_v14 = vadd.f32 %v15034_v15, %v3549_v57 }
 0x369   : > { %v3697_v60 = vadd.f32 %v3696_v6, %v3695_v53  ;;  %v3702_v50 = vsel %vm3648_vm4, %v15168_v1, 0.0  ;;  %v4080_v53 = vld [vmem:[#allocation4 + $0x1] sm:$0xff]  ;;  %v4081_v6 = vld [vmem:[#allocation4 + $0x9] sm:$0xff] }
 0x36a   : > { %v3698_v2 = vsel %vm3648_vm4, %v15165_v14, 0.0 }
 0x36b   : > { %v3699_v9 = vadd.f32 %v3698_v2, %v3697_v60  ;;  %v4112_v60 = vpack.c.bf16 %v4081_v6, %v4080_v53 }
 0x36c   : > { %v12354_v16 = vpop.f32.mrb[28].mxu0 }
 0x36d   : > { %v3701_v21 = vadd.f32 %v3700_v10, %v3699_v9  ;;  %v3562_v23 = vpop.f32.mrb[29].mxu0  ;;  %v3646_v39 = vadd.f32 %v12354_v16, %v15034_v15  ;;  %12364 = vmatprep.mubr.msk.bf16.mxu1 %vm3648_vm4, %v4112_v60 }
 0x36e   : > { %v3644_v62 = vadd.f32 %v15034_v15, %v3562_v23  ;;  %v12355_v36 = vpop.f32.mrb[30].mxu0 }
 0x36f   : > { %v3703_v25 = vadd.f32 %v3702_v50, %v3701_v21  ;;  %v3565_v33 = vpop.f32.mrb[31].mxu0  ;;  %v3647_v7 = vadd.f32 %v12355_v36, %v15034_v15  ;;  %v3708_v19 = vsel %vm3648_vm4, %v3646_v39, 0.0 }
 0x370   : > { %v3704_v54 = vsel %vm3648_vm4, %v3644_v62, 0.0  ;;  %v3645_v55 = vadd.f32 %v15034_v15, %v3565_v33  ;;  %v13808_v15 = vld [vmem:[%s17850_s30 + $0x28] sm:$0xff]  }
 0x371   : > { %v3705_v63 = vadd.f32 %v3704_v54, %v3703_v25  ;;  %v3710_v26 = vsel %vm3648_vm4, %v3647_v7, 0.0  ;;  %12358 = vmatprep.subr.bf16.mxu1 %v13808_v15 }
 0x372   : > { %v3706_v12 = vsel %vm3648_vm4, %v3645_v55, 0.0  ;;  %12359 = vmatpush3.bf16.msra.mxu1 %v13808_v15 }
 0x373   : > { %v3707_v18 = vadd.f32 %v3706_v12, %v3705_v63  ;;  %12360 = vmatprep.subr.bf16.mxu1 %v13809_v35 }
 0x375   : > { %v3709_v34 = vadd.f32 %v3708_v19, %v3707_v18 }
 0x376   : > { %12361 = vmatpush3.bf16.msra.mxu1 %v13809_v35 }
 0x377   : > { %v3711_v37 = vadd.f32 %v3710_v26, %v3709_v34  ;;  %12362 = vmatprep.subr.bf16.mxu1 %v13810_v45 }
 0x379   : > { %v3712_v48 = vrot.slane %v3711_v37, 4 }
 0x37a   : > { %12363 = vmatpush3.bf16.msra.mxu1 %v13810_v45 }
 0x37b   : > { %v3713_v41 = vadd.f32 %v3712_v48, %v3711_v37 }
 0x37d   : > { %v3714_v42 = vrot.slane %v3713_v41, 2 }
 0x37f   : > { %v3715_v43 = vadd.f32 %v3714_v42, %v3713_v41 }
 0x381   : > { %v3716_v4 = vrot.slane %v3715_v43, 1 }
 0x383   : > { %v3717_v57 = vadd.f32 %v3716_v4, %v3715_v43 }
 0x385   : > { %v3719_v2 = vmul.f32 0.00390625, %v3717_v57 }
 0x387   : > { %v15198_v9 = vsub.f32 %v15085_v30, %v3719_v2  ;;  %v15201_v10 = vsub.f32 %v15088_v38, %v3719_v2  ;;  %v15204_v16 = vsub.f32 %v15097_v52, %v3719_v2  ;;  %v15207_v21 = vsub.f32 %v15105_v13, %v3719_v2 }
 0x388   : > { %v15210_v23 = vsub.f32 %v15100_v3, %v3719_v2  ;;  %v15213_v50 = vsub.f32 %v15108_v59, %v3719_v2  ;;  %v15216_v36 = vsub.f32 %v15117_v27, %v3719_v2  ;;  %v15219_v30 = vsub.f32 %v15125_v20, %v3719_v2 }
 0x389   : > { %v15222_v38 = vsub.f32 %v15120_v11, %v3719_v2  ;;  %v15225_v52 = vsub.f32 %v15128_v31, %v3719_v2  ;;  %v15228_v13 = vsub.f32 %v15137_v17, %v3719_v2  ;;  %v15231_v3 = vsub.f32 %v15145_v29, %v3719_v2 }
 0x38a   : > { %v15234_v59 = vsub.f32 %v15140_v51, %v3719_v2  ;;  %v15237_v27 = vsub.f32 %v15148_v40, %v3719_v2  ;;  %v15240_v20 = vsub.f32 %v15157_v44, %v3719_v2  ;;  %v15243_v11 = vsub.f32 %v15165_v14, %v3719_v2 }
 0x38b   : > { %v15246_v31 = vsub.f32 %v15160_v58, %v3719_v2  ;;  %v15249_v17 = vsub.f32 %v15168_v1, %v3719_v2  ;;  %v15251_v29 = vsub.f32 %v3644_v62, %v3719_v2  ;;  %v15253_v25 = vsub.f32 %v3645_v55, %v3719_v2 }
 0x38c   : > { %v15255_v51 = vsub.f32 %v3646_v39, %v3719_v2  ;;  %v15257_v40 = vsub.f32 %v3647_v7, %v3719_v2  ;;  %v15260_v44 = vsub.f32 %v15037_v22, %v3719_v2  ;;  %v15263_v14 = vsub.f32 %v15043_v32, %v3719_v2 }
 0x38d   : > { %v15266_v58 = vsub.f32 %v15040_v24, %v3719_v2  ;;  %v15269_v1 = vsub.f32 %v15048_v61, %v3719_v2  ;;  %v15276_v39 = vsub.f32 %v15057_v46, %v3719_v2  ;;  %v15281_v32 = vsub.f32 %v15065_v0, %v3719_v2 }
 0x38e   : > { %v3752_v62 = vmul.f32 %v15260_v44, %v15260_v44  ;;  %v3753_v33 = vmul.f32 %v15263_v14, %v15263_v14  ;;  %v15288_v63 = vsub.f32 %v15060_v56, %v3719_v2  ;;  %v15294_v0 = vsub.f32 %v15068_v8, %v3719_v2 }
 0x38f   : > { %v3754_v22 = vmul.f32 %v15266_v58, %v15266_v58  ;;  %v3755_v24 = vmul.f32 %v15269_v1, %v15269_v1  ;;  %v3756_v46 = vmul.f32 %v15276_v39, %v15276_v39  ;;  %v3757_v18 = vmul.f32 %v15281_v32, %v15281_v32 }
 0x390   : > { %v3784_v61 = vsel %vm3648_vm4, %v3752_v62, 0.0  ;;  %v3785_v54 = vsel %vm3648_vm4, %v3753_v33, 0.0  ;;  %v15300_v26 = vsub.f32 %v15077_v28, %v3719_v2  ;;  %v3758_v56 = vmul.f32 %v15288_v63, %v15288_v63 }
 0x391   : > { %v3786_v55 = vadd.f32 %v3785_v54, %v3784_v61  ;;  %v3787_v7 = vsel %vm3648_vm4, %v3754_v22, 0.0  ;;  %v3789_v19 = vsel %vm3648_vm4, %v3755_v24, 0.0  ;;  %v3791_v37 = vsel %vm3648_vm4, %v3756_v46, 0.0 }
 0x392   : > { %v3759_v49 = vmul.f32 %v15294_v0, %v15294_v0  ;;  %v3793_v8 = vsel %vm3648_vm4, %v3757_v18, 0.0  ;;  %v15309_v42 = vsub.f32 %v15080_v47, %v3719_v2  ;;  %v3760_v15 = vmul.f32 %v15300_v26, %v15300_v26  ;;  %v15323_v47 = vld [vmem:[%s17850_s30] sm:$0xff]  }
 0x393   : > { %v3788_v12 = vadd.f32 %v3787_v7, %v3786_v55  ;;  %v3795_v28 = vsel %vm3648_vm4, %v3758_v56, 0.0  ;;  %v3761_v4 = vmul.f32 %v15198_v9, %v15198_v9  ;;  %v3763_v60 = vmul.f32 %v15201_v10, %v15201_v10  ;;  %12396 = vmatprep.subr.bf16.mxu1 %v15323_v47 }
 0x394   : > { %v3797_v35 = vsel %vm3648_vm4, %v3759_v49, 0.0  ;;  %v3762_v53 = vmul.f32 %v15309_v42, %v15309_v42  ;;  %v3799_v57 = vsel %vm3648_vm4, %v3760_v15, 0.0  ;;  %v3764_v33 = vmul.f32 %v15204_v16, %v15204_v16 }
 0x395   : > { %v3790_v34 = vadd.f32 %v3789_v19, %v3788_v12  ;;  %v3801_v2 = vsel %vm3648_vm4, %v3761_v4, 0.0  ;;  %v3765_v61 = vmul.f32 %v15207_v21, %v15207_v21  ;;  %v3805_v54 = vsel %vm3648_vm4, %v3763_v60, 0.0 }
 0x396   : > { %v3803_v22 = vsel %vm3648_vm4, %v3762_v53, 0.0  ;;  %v3766_v46 = vmul.f32 %v15210_v23, %v15210_v23  ;;  %v3807_v7 = vsel %vm3648_vm4, %v3764_v33, 0.0  ;;  %v3767_v18 = vmul.f32 %v15213_v50, %v15213_v50 }
 0x397   : > { %v3792_v48 = vadd.f32 %v3791_v37, %v3790_v34  ;;  %v3809_v19 = vsel %vm3648_vm4, %v3765_v61, 0.0  ;;  %v3768_v56 = vmul.f32 %v15216_v36, %v15216_v36  ;;  %v3769_v49 = vmul.f32 %v15219_v30, %v15219_v30 }
 0x398   : > { %v3811_v37 = vsel %vm3648_vm4, %v3766_v46, 0.0  ;;  %v3770_v15 = vmul.f32 %v15222_v38, %v15222_v38  ;;  %v3771_v4 = vmul.f32 %v15225_v52, %v15225_v52  ;;  %v3772_v53 = vmul.f32 %v15228_v13, %v15228_v13 }
 0x399   : > { %v3794_v41 = vadd.f32 %v3793_v8, %v3792_v48  ;;  %v3813_v8 = vsel %vm3648_vm4, %v3767_v18, 0.0  ;;  %v3773_v60 = vmul.f32 %v15231_v3, %v15231_v3  ;;  %v3774_v33 = vmul.f32 %v15234_v59, %v15234_v59 }
 0x39a   : > { %v3775_v61 = vmul.f32 %v15237_v27, %v15237_v27  ;;  %v3776_v46 = vmul.f32 %v15240_v20, %v15240_v20  ;;  %v3777_v18 = vmul.f32 %v15243_v11, %v15243_v11 }
 0x39b   : > { %v3796_v43 = vadd.f32 %v3795_v28, %v3794_v41  ;;  %v3815_v28 = vsel %vm3648_vm4, %v3768_v56, 0.0  ;;  %v3778_v56 = vmul.f32 %v15246_v31, %v15246_v31 }
 0x39d   : > { %v3798_v45 = vadd.f32 %v3797_v35, %v3796_v43  ;;  %v3817_v35 = vsel %vm3648_vm4, %v3769_v49, 0.0  ;;  %v3779_v49 = vmul.f32 %v15249_v17, %v15249_v17 }
 0x39f   : > { %v3800_v6 = vadd.f32 %v3799_v57, %v3798_v45  ;;  %v3819_v57 = vsel %vm3648_vm4, %v3770_v15, 0.0  ;;  %v3780_v15 = vmul.f32 %v15251_v29, %v15251_v29 }
 0x3a1   : > { %v3802_v62 = vadd.f32 %v3801_v2, %v3800_v6  ;;  %v3821_v2 = vsel %vm3648_vm4, %v3771_v4, 0.0  ;;  %v3781_v4 = vmul.f32 %v15253_v25, %v15253_v25 }
 0x3a3   : > { %v3804_v24 = vadd.f32 %v3803_v22, %v3802_v62  ;;  %v3823_v22 = vsel %vm3648_vm4, %v3772_v53, 0.0  ;;  %v3782_v53 = vmul.f32 %v15255_v51, %v15255_v51 }
 0x3a5   : > { %v3806_v55 = vadd.f32 %v3805_v54, %v3804_v24  ;;  %v3825_v54 = vsel %vm3648_vm4, %v3773_v60, 0.0  ;;  %v3783_v60 = vmul.f32 %v15257_v40, %v15257_v40 }
 0x3a7   : > { %v3808_v12 = vadd.f32 %v3807_v7, %v3806_v55  ;;  %v3827_v7 = vsel %vm3648_vm4, %v3774_v33, 0.0  ;;  %v3843_v33 = vsel %vm3648_vm4, %v3782_v53, 0.0 }
 0x3a9   : > { %v3810_v34 = vadd.f32 %v3809_v19, %v3808_v12  ;;  %v3829_v19 = vsel %vm3648_vm4, %v3775_v61, 0.0 }
 0x3ab   : > { %v3812_v48 = vadd.f32 %v3811_v37, %v3810_v34  ;;  %v3831_v37 = vsel %vm3648_vm4, %v3776_v46, 0.0 }
 0x3ad   : > { %v3814_v41 = vadd.f32 %v3813_v8, %v3812_v48  ;;  %v3833_v8 = vsel %vm3648_vm4, %v3777_v18, 0.0 }
 0x3af   : > { %v3816_v43 = vadd.f32 %v3815_v28, %v3814_v41  ;;  %v3835_v28 = vsel %vm3648_vm4, %v3778_v56, 0.0 }
 0x3b1   : > { %v3818_v45 = vadd.f32 %v3817_v35, %v3816_v43  ;;  %v3837_v35 = vsel %vm3648_vm4, %v3779_v49, 0.0 }
 0x3b3   : > { %v3820_v6 = vadd.f32 %v3819_v57, %v3818_v45  ;;  %v3839_v57 = vsel %vm3648_vm4, %v3780_v15, 0.0 }
 0x3b5   : > { %v3822_v62 = vadd.f32 %v3821_v2, %v3820_v6  ;;  %v3841_v2 = vsel %vm3648_vm4, %v3781_v4, 0.0 }
 0x3b7   : > { %v3824_v24 = vadd.f32 %v3823_v22, %v3822_v62 }
 0x3b9   : > { %v3826_v55 = vadd.f32 %v3825_v54, %v3824_v24  ;;  %v3845_v24 = vsel %vm3648_vm4, %v3783_v60, 0.0 }
 0x3bb   : > { %v3828_v12 = vadd.f32 %v3827_v7, %v3826_v55 }
 0x3bd   : > { %v3830_v34 = vadd.f32 %v3829_v19, %v3828_v12 }
 0x3bf   : > { %v3832_v48 = vadd.f32 %v3831_v37, %v3830_v34 }
 0x3c1   : > { %v3834_v41 = vadd.f32 %v3833_v8, %v3832_v48 }
 0x3c3   : > { %v3836_v43 = vadd.f32 %v3835_v28, %v3834_v41 }
 0x3c5   : > { %v3838_v45 = vadd.f32 %v3837_v35, %v3836_v43 }
 0x3c7   : > { %v3840_v6 = vadd.f32 %v3839_v57, %v3838_v45 }
 0x3c9   : > { %v3842_v62 = vadd.f32 %v3841_v2, %v3840_v6 }
 0x3cb   : > { %v3844_v22 = vadd.f32 %v3843_v33, %v3842_v62 }
 0x3cd   : > { %v3846_v61 = vadd.f32 %v3845_v24, %v3844_v22 }
 0x3cf   : > { %v3847_v54 = vrot.slane %v3846_v61, 4 }
 0x3d1   : > { %v3848_v55 = vadd.f32 %v3847_v54, %v3846_v61 }
 0x3d3   : > { %v3849_v46 = vrot.slane %v3848_v55, 2 }
 0x3d5   : > { %v3850_v7 = vadd.f32 %v3849_v46, %v3848_v55 }
 0x3d7   : > { %v3851_v12 = vrot.slane %v3850_v7, 1 }
 0x3d9   : > { %v3852_v18 = vadd.f32 %v3851_v12, %v3850_v7 }
 0x3db   : > { %v3853_v19 = vmul.f32 0.00390625, %v3852_v18 }
 0x3dd   : > { %v3854_v34 = vadd.f32 1e-05, %v3853_v19 }
 0x3df   : > { %13934 = vrsqrt.f32 %v3854_v34 }
 0x3e9   : > { %v13935_v56 = vpop.eup %13934 }
 0x3ea   : > { %v3885_v37 = vmul.f32 %v13935_v56, %v15253_v25  ;;  %v3856_v48 = vmul.f32 %v13935_v56, %v15260_v44  ;;  %v3857_v49 = vmul.f32 %v13935_v56, %v15263_v14  ;;  %v3858_v8 = vmul.f32 %v13935_v56, %v15266_v58 }
 0x3eb   : > { %v3859_v41 = vmul.f32 %v13935_v56, %v15269_v1  ;;  %v3860_v15 = vmul.f32 %v13935_v56, %v15276_v39  ;;  %v3861_v28 = vmul.f32 %v13935_v56, %v15281_v32  ;;  %v3862_v43 = vmul.f32 %v13935_v56, %v15288_v63 }
 0x3ec   : > { %v3917_v4 = vmax.f32 %v3885_v37, 0.0  ;;  %v3863_v35 = vmul.f32 %v13935_v56, %v15294_v0  ;;  %v3864_v45 = vmul.f32 %v13935_v56, %v15300_v26  ;;  %v3865_v25 = vmul.f32 %v13935_v56, %v15198_v9 }
 0x3ed   : > { %v3866_v44 = vmul.f32 %v13935_v56, %v15309_v42  ;;  %v3867_v14 = vmul.f32 %v13935_v56, %v15201_v10  ;;  %v3868_v58 = vmul.f32 %v13935_v56, %v15204_v16  ;;  %v3869_v1 = vmul.f32 %v13935_v56, %v15207_v21 }
 0x3ee   : > { %4005 = vst.msk [vmem:[#allocation4 + $0x171] sm:$0xff] %vm3648_vm4, %v3917_v4  ;;  %v3870_v39 = vmul.f32 %v13935_v56, %v15210_v23  ;;  %v3871_v32 = vmul.f32 %v13935_v56, %v15213_v50  ;;  %v3872_v63 = vmul.f32 %v13935_v56, %v15216_v36  ;;  %v3873_v0 = vmul.f32 %v13935_v56, %v15219_v30 }
 0x3ef   : > { %v3874_v9 = vmul.f32 %v13935_v56, %v15222_v38  ;;  %v15413_v26 = vmul.f32 %v13935_v56, %v15225_v52  ;;  %v15416_v10 = vmul.f32 %v13935_v56, %v15228_v13  ;;  %v15419_v16 = vmul.f32 %v13935_v56, %v15231_v3 }
 0x3f0   : > { %v15422_v21 = vmul.f32 %v13935_v56, %v15234_v59  ;;  %v15425_v23 = vmul.f32 %v13935_v56, %v15237_v27  ;;  %v15428_v50 = vmul.f32 %v13935_v56, %v15240_v20  ;;  %v15431_v36 = vmul.f32 %v13935_v56, %v15243_v11 }
 0x3f1   : > { %v15434_v30 = vmul.f32 %v13935_v56, %v15246_v31  ;;  %v15437_v38 = vmul.f32 %v13935_v56, %v15249_v17  ;;  %v15440_v52 = vmul.f32 %v13935_v56, %v15251_v29  ;;  %v15443_v13 = vmul.f32 %v13935_v56, %v15255_v51 }
 0x3f2   : > { %v15446_v3 = vmul.f32 %v13935_v56, %v15257_v40  ;;  %v3888_v59 = vmax.f32 %v3856_v48, 0.0  ;;  %v3889_v27 = vmax.f32 %v3857_v49, 0.0  ;;  %v3890_v20 = vmax.f32 %v3858_v8, 0.0 }
 0x3f3   : > { %v3891_v11 = vmax.f32 %v3859_v41, 0.0  ;;  %v3892_v42 = vmax.f32 %v3860_v15, 0.0  ;;  %v3893_v53 = vmax.f32 %v3861_v28, 0.0  ;;  %v3894_v31 = vmax.f32 %v3862_v43, 0.0  ;;  %v13812_v43 = vld [vmem:[%s17850_s30 + $0x8] sm:$0xff]  }
 0x3f4   : > { %v3895_v57 = vmax.f32 %v3863_v35, 0.0  ;;  %v3896_v6 = vmax.f32 %v3864_v45, 0.0  ;;  %v3897_v17 = vmax.f32 %v3865_v25, 0.0  ;;  %v3898_v60 = vmax.f32 %v3866_v44, 0.0  ;;  %3976 = vst.msk [vmem:[#allocation4 + $0x19] sm:$0xff] %vm3648_vm4, %v3888_v59  ;;  %3977 = vst.msk [vmem:[#allocation4 + $0x21] sm:$0xff] %vm3648_vm4, %v3889_v27 }
 0x3f5   : > { %3978 = vst.msk [vmem:[#allocation4 + $0x31] sm:$0xff] %vm3648_vm4, %v3890_v20  ;;  %v3899_v29 = vmax.f32 %v3867_v14, 0.0  ;;  %v3900_v51 = vmax.f32 %v3868_v58, 0.0  ;;  %v3901_v40 = vmax.f32 %v3869_v1, 0.0  ;;  %v3902_v2 = vmax.f32 %v3870_v39, 0.0  ;;  %3979 = vst.msk [vmem:[#allocation4 + $0x39] sm:$0xff] %vm3648_vm4, %v3891_v11 }
 0x3f6   : > { %3980 = vst.msk [vmem:[#allocation4 + $0x49] sm:$0xff] %vm3648_vm4, %v3892_v42  ;;  %3981 = vst.msk [vmem:[#allocation4 + $0x51] sm:$0xff] %vm3648_vm4, %v3893_v53  ;;  %v3903_v62 = vmax.f32 %v3871_v32, 0.0  ;;  %v3904_v33 = vmax.f32 %v3872_v63, 0.0  ;;  %v3905_v22 = vmax.f32 %v3873_v0, 0.0  ;;  %v3906_v24 = vmax.f32 %v3874_v9, 0.0 }
 0x3f7   : > { %3982 = vst.msk [vmem:[#allocation4 + $0x61] sm:$0xff] %vm3648_vm4, %v3894_v31  ;;  %3983 = vst.msk [vmem:[#allocation4 + $0x69] sm:$0xff] %vm3648_vm4, %v3895_v57  ;;  %v3907_v61 = vmax.f32 %v15413_v26, 0.0  ;;  %v3908_v54 = vmax.f32 %v15416_v10, 0.0  ;;  %v3909_v55 = vmax.f32 %v15419_v16, 0.0  ;;  %v3910_v46 = vmax.f32 %v15422_v21, 0.0 }
 0x3f8   : > { %3984 = vst.msk [vmem:[#allocation4 + $0x79] sm:$0xff] %vm3648_vm4, %v3896_v6  ;;  %3985 = vst.msk [vmem:[#allocation4 + $0x81] sm:$0xff] %vm3648_vm4, %v3897_v17  ;;  %v3911_v7 = vmax.f32 %v15425_v23, 0.0  ;;  %v3912_v12 = vmax.f32 %v15428_v50, 0.0  ;;  %v3913_v18 = vmax.f32 %v15431_v36, 0.0  ;;  %v3914_v19 = vmax.f32 %v15434_v30, 0.0 }
 0x3f9   : > { %3986 = vst.msk [vmem:[#allocation4 + $0x91] sm:$0xff] %vm3648_vm4, %v3898_v60  ;;  %3987 = vst.msk [vmem:[#allocation4 + $0x99] sm:$0xff] %vm3648_vm4, %v3899_v29  ;;  %v3915_v34 = vmax.f32 %v15437_v38, 0.0  ;;  %v3916_v56 = vmax.f32 %v15440_v52, 0.0  ;;  %v3918_v37 = vmax.f32 %v15443_v13, 0.0  ;;  %v3919_v48 = vmax.f32 %v15446_v3, 0.0 }
 0x3fa   : > { %3988 = vst.msk [vmem:[#allocation4 + $0xa9] sm:$0xff] %vm3648_vm4, %v3900_v51  ;;  %3989 = vst.msk [vmem:[#allocation4 + $0xb1] sm:$0xff] %vm3648_vm4, %v3901_v40  ;;  %v13813_v35 = vld [vmem:[%s17850_s30 + $0x10] sm:$0xff]   ;;  %v13814_v1 = vld [vmem:[%s17850_s30 + $0x18] sm:$0xff]  }
 0x3fb   : > { %3990 = vst.msk [vmem:[#allocation4 + $0xc1] sm:$0xff] %vm3648_vm4, %v3902_v2  ;;  %3991 = vst.msk [vmem:[#allocation4 + $0xc9] sm:$0xff] %vm3648_vm4, %v3903_v62  ;;  %v4082_v49 = vld [vmem:[#allocation4 + $0x19] sm:$0xff]  ;;  %v4083_v8 = vld [vmem:[#allocation4 + $0x21] sm:$0xff] }
 0x3fc   : > { %3992 = vst.msk [vmem:[#allocation4 + $0xd9] sm:$0xff] %vm3648_vm4, %v3904_v33  ;;  %3993 = vst.msk [vmem:[#allocation4 + $0xe1] sm:$0xff] %vm3648_vm4, %v3905_v22  ;;  %v4084_v41 = vld [vmem:[#allocation4 + $0x31] sm:$0xff]  ;;  %v15491_v15 = vpack.c.bf16 %v4083_v8, %v4082_v49  ;;  %v4085_v28 = vld [vmem:[#allocation4 + $0x39] sm:$0xff] }
 0x3fd   : > { %3994 = vst.msk [vmem:[#allocation4 + $0xf1] sm:$0xff] %vm3648_vm4, %v3906_v24  ;;  %3995 = vst.msk [vmem:[#allocation4 + $0xf9] sm:$0xff] %vm3648_vm4, %v3907_v61  ;;  %v15496_v4 = vpack.c.bf16 %v4085_v28, %v4084_v41  ;;  %v4086_v45 = vld [vmem:[#allocation4 + $0x49] sm:$0xff]  ;;  %v4087_v25 = vld [vmem:[#allocation4 + $0x51] sm:$0xff] }
 0x3fe   : > { %3996 = vst.msk [vmem:[#allocation4 + $0x109] sm:$0xff] %vm3648_vm4, %v3908_v54  ;;  %3997 = vst.msk [vmem:[#allocation4 + $0x111] sm:$0xff] %vm3648_vm4, %v3909_v55  ;;  %12365 = vmatmul.mubr.msk.bf16.vlgmr.msra.gmra.mrb[0].mxu1 %vm3648_vm4, %v15491_v15  ;;  %v4088_v44 = vld [vmem:[#allocation4 + $0x61] sm:$0xff]  ;;  %v4089_v14 = vld [vmem:[#allocation4 + $0x69] sm:$0xff]  ;;  %v15506_v58 = vpack.c.bf16 %v4087_v25, %v4086_v45 }
 0x3ff   : > { %3998 = vst.msk [vmem:[#allocation4 + $0x121] sm:$0xff] %vm3648_vm4, %v3910_v46  ;;  %3999 = vst.msk [vmem:[#allocation4 + $0x129] sm:$0xff] %vm3648_vm4, %v3911_v7  ;;  %12368 = vmatprep.mubr.msk.bf16.mxu1 %vm3648_vm4, %v15496_v4  ;;  %12397 = vmatpush3.bf16.msra.mxu1 %v15323_v47  ;;  %v15511_v39 = vpack.c.bf16 %v4089_v14, %v4088_v44  ;;  %v13815_v47 = vld [vmem:[%s17850_s30 + $0x40] sm:$0xff]   ;;  %v4025_v62 = vld [vmem:[#allocation4 + $0x8] sm:$0xff] }
 0x400   : > { %4000 = vst.msk [vmem:[#allocation4 + $0x139] sm:$0xff] %vm3648_vm4, %v3912_v12  ;;  %4001 = vst.msk [vmem:[#allocation4 + $0x141] sm:$0xff] %vm3648_vm4, %v3913_v18  ;;  %12398 = vmatprep.subr.bf16.mxu1 %v13812_v43  ;;  %v4090_v32 = vld [vmem:[#allocation4 + $0x79] sm:$0xff]  ;;  %v4091_v63 = vld [vmem:[#allocation4 + $0x81] sm:$0xff] }
 0x401   : > { %4002 = vst.msk [vmem:[#allocation4 + $0x151] sm:$0xff] %vm3648_vm4, %v3914_v19  ;;  %4003 = vst.msk [vmem:[#allocation4 + $0x159] sm:$0xff] %vm3648_vm4, %v3915_v34  ;;  %v4092_v0 = vld [vmem:[#allocation4 + $0x91] sm:$0xff]  ;;  %v4093_v9 = vld [vmem:[#allocation4 + $0x99] sm:$0xff]  ;;  %v15520_v26 = vpack.c.bf16 %v4091_v63, %v4090_v32 }
 0x402   : > { %4004 = vst.msk [vmem:[#allocation4 + $0x169] sm:$0xff] %vm3648_vm4, %v3916_v56  ;;  %4006 = vst.msk [vmem:[#allocation4 + $0x181] sm:$0xff] %vm3648_vm4, %v3918_v37  ;;  %v15522_v10 = vpack.c.bf16 %v4093_v9, %v4092_v0  ;;  %v4094_v16 = vld [vmem:[#allocation4 + $0xa9] sm:$0xff]  ;;  %v4095_v21 = vld [vmem:[#allocation4 + $0xb1] sm:$0xff] }
 0x403   : > { %4007 = vst.msk [vmem:[#allocation4 + $0x189] sm:$0xff] %vm3648_vm4, %v3919_v48  ;;  %12399 = vmatpush3.bf16.msra.mxu1 %v13812_v43  ;;  %v4096_v23 = vld [vmem:[#allocation4 + $0xc1] sm:$0xff]  ;;  %v4097_v50 = vld [vmem:[#allocation4 + $0xc9] sm:$0xff]  ;;  %v15528_v36 = vpack.c.bf16 %v4095_v21, %v4094_v16  ;;  %v4098_v38 = vld [vmem:[#allocation4 + $0xd9] sm:$0xff] }
 0x404   : > { %12400 = vmatprep.subr.bf16.mxu1 %v13813_v35  ;;  %v15530_v30 = vpack.c.bf16 %v4097_v50, %v4096_v23  ;;  %v4099_v52 = vld [vmem:[#allocation4 + $0xe1] sm:$0xff]  ;;  %v4100_v13 = vld [vmem:[#allocation4 + $0xf1] sm:$0xff]  ;;  %v4101_v3 = vld [vmem:[#allocation4 + $0xf9] sm:$0xff] }
 0x405   : > { %v15536_v59 = vpack.c.bf16 %v4099_v52, %v4098_v38  ;;  %v15538_v27 = vpack.c.bf16 %v4101_v3, %v4100_v13  ;;  %v4102_v20 = vld [vmem:[#allocation4 + $0x109] sm:$0xff]  ;;  %v4103_v11 = vld [vmem:[#allocation4 + $0x111] sm:$0xff]  ;;  %v4024_v2 = vld [vmem:[#allocation4] sm:$0xff] }
 0x406   : > { %12369 = vmatmul.mubr.msk.bf16.gmra.mrb[4].mxu1 %vm3648_vm4, %v15506_v58  ;;  %v4104_v42 = vld [vmem:[#allocation4 + $0x121] sm:$0xff]  ;;  %v4105_v53 = vld [vmem:[#allocation4 + $0x129] sm:$0xff]  ;;  %v15544_v31 = vpack.c.bf16 %v4103_v11, %v4102_v20  ;;  %v4111_v22 = vld [vmem:[#allocation4 + $0x171] sm:$0xff]  ;;  %v4056_v24 = vpack.c.bf16 %v4025_v62, %v4024_v2 }
 0x407   : > { %12372 = vmatprep.mubr.msk.bf16.mxu1 %vm3648_vm4, %v15511_v39  ;;  %12401 = vmatpush3.bf16.msra.mxu1 %v13813_v35  ;;  %v15546_v57 = vpack.c.bf16 %v4105_v53, %v4104_v42  ;;  %v4106_v6 = vld [vmem:[#allocation4 + $0x139] sm:$0xff]  ;;  %v4107_v17 = vld [vmem:[#allocation4 + $0x141] sm:$0xff]  ;;  %v4028_v46 = vld [vmem:[#allocation4 + $0x30] sm:$0xff] }
 0x408   : > { %12402 = vmatprep.subr.bf16.mxu1 %v13814_v1  ;;  %v4108_v60 = vld [vmem:[#allocation4 + $0x151] sm:$0xff]  ;;  %v4109_v29 = vld [vmem:[#allocation4 + $0x159] sm:$0xff]  ;;  %v15552_v51 = vpack.c.bf16 %v4107_v17, %v4106_v6  ;;  %v13816_v18 = vld [vmem:[%s17850_s30 + $0x48] sm:$0xff]  }
 0x409   : > { %v15554_v40 = vpack.c.bf16 %v4109_v29, %v4108_v60  ;;  %v4110_v33 = vld [vmem:[#allocation4 + $0x169] sm:$0xff]  ;;  %v4026_v54 = vld [vmem:[#allocation4 + $0x18] sm:$0xff]  ;;  %v4027_v55 = vld [vmem:[#allocation4 + $0x20] sm:$0xff] }
 0x40a   : > { %v15560_v61 = vpack.c.bf16 %v4111_v22, %v4110_v33  ;;  %v4029_v7 = vld [vmem:[#allocation4 + $0x38] sm:$0xff]  ;;  %v15565_v12 = vpack.c.bf16 %v4027_v55, %v4026_v54  ;;  %v13817_v34 = vld [vmem:[%s17850_s30 + $0x50] sm:$0xff]   ;;  %v4030_v56 = vld [vmem:[#allocation4 + $0x48] sm:$0xff] }
 0x40b   : > { %12403 = vmatpush3.bf16.msra.mxu1 %v13814_v1  ;;  %v15570_v19 = vpack.c.bf16 %v4029_v7, %v4028_v46  ;;  %v4031_v37 = vld [vmem:[#allocation4 + $0x50] sm:$0xff]  ;;  %v4032_v48 = vld [vmem:[#allocation4 + $0x60] sm:$0xff]  ;;  %v4033_v49 = vld [vmem:[#allocation4 + $0x68] sm:$0xff] }
 0x40c   : > { %12436 = vmatprep.subr.bf16.mxu1 %v13815_v47  ;;  %v15579_v8 = vpack.c.bf16 %v4031_v37, %v4030_v56  ;;  %v13818_v41 = vld [vmem:[%s17850_s30 + $0x58] sm:$0xff]   ;;  %v15584_v28 = vpack.c.bf16 %v4033_v49, %v4032_v48  ;;  %v13819_v43 = vld [vmem:[%s17850_s30 + $0x60] sm:$0xff]   ;;  %v4036_v25 = vld [vmem:[#allocation4 + $0x90] sm:$0xff] }
 0x40d   : > { %v4034_v35 = vld [vmem:[#allocation4 + $0x78] sm:$0xff]  ;;  %v4035_v45 = vld [vmem:[#allocation4 + $0x80] sm:$0xff]  ;;  %v4039_v32 = vld [vmem:[#allocation4 + $0xb0] sm:$0xff] }
 0x40e   : > { %12373 = vmatmul.mubr.msk.bf16.gmra.mrb[8].mxu1 %vm3648_vm4, %v15520_v26  ;;  %v4037_v44 = vld [vmem:[#allocation4 + $0x98] sm:$0xff]  ;;  %v15593_v14 = vpack.c.bf16 %v4035_v45, %v4034_v35  ;;  %v4040_v63 = vld [vmem:[#allocation4 + $0xc0] sm:$0xff]  ;;  %v4041_v0 = vld [vmem:[#allocation4 + $0xc8] sm:$0xff] }
 0x40f   : > { %12376 = vmatprep.mubr.msk.bf16.mxu1 %vm3648_vm4, %v15522_v10  ;;  %v15595_v1 = vpack.c.bf16 %v4037_v44, %v4036_v25  ;;  %v15603_v16 = vpack.c.bf16 %v4041_v0, %v4040_v63  ;;  %v4042_v21 = vld [vmem:[#allocation4 + $0xd8] sm:$0xff]  ;;  %v4043_v23 = vld [vmem:[#allocation4 + $0xe0] sm:$0xff]  ;;  %v4044_v50 = vld [vmem:[#allocation4 + $0xf0] sm:$0xff] }
 0x410   : > { %v4045_v38 = vld [vmem:[#allocation4 + $0xf8] sm:$0xff]  ;;  %v15609_v52 = vpack.c.bf16 %v4043_v23, %v4042_v21  ;;  %v4046_v3 = vld [vmem:[#allocation4 + $0x108] sm:$0xff]  ;;  %v4047_v20 = vld [vmem:[#allocation4 + $0x110] sm:$0xff] }
 0x411   : > { %v15611_v13 = vpack.c.bf16 %v4045_v38, %v4044_v50  ;;  %v4048_v11 = vld [vmem:[#allocation4 + $0x120] sm:$0xff]  ;;  %v4049_v42 = vld [vmem:[#allocation4 + $0x128] sm:$0xff]  ;;  %v15617_v53 = vpack.c.bf16 %v4047_v20, %v4046_v3  ;;  %v4050_v17 = vld [vmem:[#allocation4 + $0x138] sm:$0xff] }
 0x412   : > { %v15619_v6 = vpack.c.bf16 %v4049_v42, %v4048_v11  ;;  %v4051_v60 = vld [vmem:[#allocation4 + $0x140] sm:$0xff]  ;;  %v4052_v29 = vld [vmem:[#allocation4 + $0x150] sm:$0xff]  ;;  %v4053_v2 = vld [vmem:[#allocation4 + $0x158] sm:$0xff] }
 0x413   : > { %v15625_v62 = vpack.c.bf16 %v4051_v60, %v4050_v17  ;;  %v15627_v33 = vpack.c.bf16 %v4053_v2, %v4052_v29  ;;  %v4603_v22 = vld [vmem:[#allocation4 + $0x2] sm:$0xff]  ;;  %v4055_v55 = vld [vmem:[#allocation4 + $0x170] sm:$0xff]  ;;  %v4608_v37 = vld [vmem:[#allocation4 + $0x3a] sm:$0xff] }
 0x414   : > { %v4054_v54 = vld [vmem:[#allocation4 + $0x168] sm:$0xff]  ;;  %v4607_v56 = vld [vmem:[#allocation4 + $0x32] sm:$0xff]  ;;  %v4613_v21 = vld [vmem:[#allocation4 + $0x7a] sm:$0xff] }
 0x415   : > { %v15633_v7 = vpack.c.bf16 %v4055_v55, %v4054_v54  ;;  %v13820_v49 = vld [vmem:[%s17850_s30 + $0x68] sm:$0xff]   ;;  %v13821_v35 = vld [vmem:[%s17850_s30 + $0x70] sm:$0xff]   ;;  %v13822_v63 = vld [vmem:[%s17850_s30 + $0x78] sm:$0xff]  }
 0x416   : > { %12377 = vmatmul.mubr.msk.bf16.gmra.mrb[12].mxu1 %vm3648_vm4, %v15528_v36  ;;  %v4609_v45 = vld [vmem:[#allocation4 + $0x4a] sm:$0xff]  ;;  %v4610_v25 = vld [vmem:[#allocation4 + $0x52] sm:$0xff]  ;;  %v4611_v44 = vld [vmem:[#allocation4 + $0x62] sm:$0xff] }
 0x417   : > { %12380 = vmatprep.mubr.msk.bf16.mxu1 %vm3648_vm4, %v15530_v30  ;;  %v4614_v23 = vld [vmem:[#allocation4 + $0x82] sm:$0xff]  ;;  %v4615_v50 = vld [vmem:[#allocation4 + $0x92] sm:$0xff]  ;;  %v4616_v38 = vld [vmem:[#allocation4 + $0x9a] sm:$0xff] }
 0x418   : > { %v15666_v3 = vpack.c.bf16 %v4614_v23, %v4613_v21  ;;  %v15668_v20 = vpack.c.bf16 %v4616_v38, %v4615_v50  ;;  %v4617_v11 = vld [vmem:[#allocation4 + $0xaa] sm:$0xff]  ;;  %v4618_v42 = vld [vmem:[#allocation4 + $0xb2] sm:$0xff]  ;;  %v4619_v17 = vld [vmem:[#allocation4 + $0xc2] sm:$0xff] }
 0x419   : > { %v4620_v60 = vld [vmem:[#allocation4 + $0xca] sm:$0xff]  ;;  %v15674_v29 = vpack.c.bf16 %v4618_v42, %v4617_v11  ;;  %v4623_v54 = vld [vmem:[#allocation4 + $0xf2] sm:$0xff]  ;;  %v4624_v55 = vld [vmem:[#allocation4 + $0xfa] sm:$0xff] }
 0x41a   : > { %v15676_v2 = vpack.c.bf16 %v4620_v60, %v4619_v17  ;;  %v4633_v50 = vld [vmem:[#allocation4 + $0x16a] sm:$0xff]  ;;  %v4634_v38 = vld [vmem:[#allocation4 + $0x172] sm:$0xff]  ;;  %v4955_v60 = vld [vmem:[#allocation4 + $0x180] sm:$0xff] }
 0x41b   : > { %v15706_v11 = vpack.c.bf16 %v4634_v38, %v4633_v50  ;;  %v13824_v42 = vld [vmem:[%s17850_s30 + $0x88] sm:$0xff]   ;;  %v13825_v17 = vld [vmem:[%s17850_s30 + $0x90] sm:$0xff]  }
 0x41c   : > { %v6225_v50 = vld [vmem:[#allocation4 + $0xb1] sm:$0xff]  ;;  %v6226_v38 = vld [vmem:[#allocation4 + $0xc1] sm:$0xff] }
 0x41e   : > { %12381 = vmatmul.mubr.msk.bf16.gmra.mrb[16].mxu1 %vm3648_vm4, %v15536_v59 }
 0x41f   : > { %12384 = vmatprep.mubr.msk.bf16.mxu1 %vm3648_vm4, %v15538_v27 }
 0x426   : > { %12385 = vmatmul.mubr.msk.bf16.gmra.mrb[20].mxu1 %vm3648_vm4, %v15544_v31 }
 0x427   : > { %12388 = vmatprep.mubr.msk.bf16.mxu1 %vm3648_vm4, %v15546_v57 }
 0x42e   : > { %12389 = vmatmul.mubr.msk.bf16.gmra.mrb[24].mxu1 %vm3648_vm4, %v15552_v51 }
 0x42f   : > { %12392 = vmatprep.mubr.msk.bf16.mxu1 %vm3648_vm4, %v15554_v40 }
 0x436   : > { %12393 = vmatmul.mubr.msk.bf16.gmra.mrb[28].mxu1 %vm3648_vm4, %v15560_v61 }
 0x437   : > { %12404 = vmatprep.mubr.msk.bf16.mxu1 %vm3648_vm4, %v4056_v24  ;;  %v4604_v24 = vld [vmem:[#allocation4 + $0xa] sm:$0xff] }
 0x438   : > { %v4635_v46 = vpack.c.bf16 %v4604_v24, %v4603_v22  ;;  %v4621_v22 = vld [vmem:[#allocation4 + $0xda] sm:$0xff]  ;;  %v4622_v24 = vld [vmem:[#allocation4 + $0xe2] sm:$0xff] }
 0x43e   : > { %12405 = vmatmul.mubr.msk.bf16.vlgmr.msra.gmra.mrb[0].mxu1 %vm3648_vm4, %v15565_v12 }
 0x43f   : > { %12408 = vmatprep.mubr.msk.bf16.mxu1 %vm3648_vm4, %v15570_v19  ;;  %12437 = vmatpush3.bf16.msra.mxu1 %v13815_v47  ;;  %v4038_v47 = vld [vmem:[#allocation4 + $0xa8] sm:$0xff] }
 0x440   : > { %12438 = vmatprep.subr.bf16.mxu1 %v13816_v18  ;;  %v15601_v9 = vpack.c.bf16 %v4039_v32, %v4038_v47  ;;  %v4612_v47 = vld [vmem:[#allocation4 + $0x6a] sm:$0xff]  ;;  %v15652_v32 = vpack.c.bf16 %v4610_v25, %v4609_v45  ;;  %v4629_v25 = vld [vmem:[#allocation4 + $0x13a] sm:$0xff] }
 0x441   : > { %v15657_v0 = vpack.c.bf16 %v4612_v47, %v4611_v44  ;;  %v4630_v44 = vld [vmem:[#allocation4 + $0x142] sm:$0xff]  ;;  %v4631_v47 = vld [vmem:[#allocation4 + $0x152] sm:$0xff] }
 0x442   : > { %v15698_v21 = vpack.c.bf16 %v4630_v44, %v4629_v25  ;;  %v13842_v44 = vld [vmem:[%s17850_s30 + $0x118] sm:$0xff]  }
 0x443   : > { %12439 = vmatpush3.bf16.msra.mxu1 %v13816_v18  ;;  %v4605_v18 = vld [vmem:[#allocation4 + $0x1a] sm:$0xff] }
 0x444   : > { %12440 = vmatprep.subr.bf16.mxu1 %v13817_v34 }
 0x446   : > { %12409 = vmatmul.mubr.msk.bf16.gmra.mrb[4].mxu1 %vm3648_vm4, %v15579_v8 }
 0x447   : > { %12412 = vmatprep.mubr.msk.bf16.mxu1 %vm3648_vm4, %v15584_v28  ;;  %12441 = vmatpush3.bf16.msra.mxu1 %v13817_v34  ;;  %v4606_v34 = vld [vmem:[#allocation4 + $0x22] sm:$0xff] }
 0x448   : > { %12442 = vmatprep.subr.bf16.mxu1 %v13818_v41  ;;  %v15638_v48 = vpack.c.bf16 %v4606_v34, %v4605_v18  ;;  %v15684_v18 = vpack.c.bf16 %v4624_v55, %v4623_v54  ;;  %v4625_v34 = vld [vmem:[#allocation4 + $0x10a] sm:$0xff] }
 0x449   : > { %v13828_v54 = vld [vmem:[%s17850_s30 + $0xa8] sm:$0xff]   ;;  %v13829_v55 = vld [vmem:[%s17850_s30 + $0xb0] sm:$0xff]  }
 0x44b   : > { %12443 = vmatpush3.bf16.msra.mxu1 %v13818_v41  ;;  %v15643_v41 = vpack.c.bf16 %v4608_v37, %v4607_v56  ;;  %v4626_v56 = vld [vmem:[#allocation4 + $0x112] sm:$0xff]  ;;  %v4627_v37 = vld [vmem:[#allocation4 + $0x122] sm:$0xff] }
 0x44c   : > { %12476 = vmatprep.subr.bf16.mxu1 %v13819_v43 }
 0x44e   : > { %12413 = vmatmul.mubr.msk.bf16.gmra.mrb[8].mxu1 %vm3648_vm4, %v15593_v14 }
 0x44f   : > { %12416 = vmatprep.mubr.msk.bf16.mxu1 %vm3648_vm4, %v15595_v1 }
 0x456   : > { %12417 = vmatmul.mubr.msk.bf16.gmra.mrb[12].mxu1 %vm3648_vm4, %v15601_v9 }
 0x457   : > { %12420 = vmatprep.mubr.msk.bf16.mxu1 %vm3648_vm4, %v15603_v16 }
 0x45e   : > { %12421 = vmatmul.mubr.msk.bf16.gmra.mrb[16].mxu1 %vm3648_vm4, %v15609_v52 }
 0x45f   : > { %12424 = vmatprep.mubr.msk.bf16.mxu1 %vm3648_vm4, %v15611_v13 }
 0x466   : > { %12425 = vmatmul.mubr.msk.bf16.gmra.mrb[20].mxu1 %vm3648_vm4, %v15617_v53 }
 0x467   : > { %12428 = vmatprep.mubr.msk.bf16.mxu1 %vm3648_vm4, %v15619_v6 }
 0x46e   : > { %12429 = vmatmul.mubr.msk.bf16.gmra.mrb[24].mxu1 %vm3648_vm4, %v15625_v62 }
 0x46f   : > { %12432 = vmatprep.mubr.msk.bf16.mxu1 %vm3648_vm4, %v15627_v33 }
 0x476   : > { %12433 = vmatmul.mubr.msk.bf16.gmra.mrb[28].mxu1 %vm3648_vm4, %v15633_v7 }
 0x477   : > { %12444 = vmatprep.mubr.msk.bf16.mxu1 %vm3648_vm4, %v4635_v46  ;;  %v15682_v46 = vpack.c.bf16 %v4622_v24, %v4621_v22  ;;  %v4956_v22 = vld [vmem:[#allocation4 + $0x188] sm:$0xff] }
 0x478   : > { %v15752_v24 = vpack.c.bf16 %v4956_v22, %v4955_v60  ;;  %v6229_v60 = vld [vmem:[#allocation4 + $0xe1] sm:$0xff]  ;;  %v6230_v22 = vld [vmem:[#allocation4 + $0xf1] sm:$0xff] }
 0x47e   : > { %12445 = vmatmul.mubr.msk.bf16.vlgmr.msra.gmra.mrb[0].mxu1 %vm3648_vm4, %v15638_v48 }
 0x47f   : > { %12448 = vmatprep.mubr.msk.bf16.mxu1 %vm3648_vm4, %v15643_v41  ;;  %12477 = vmatpush3.bf16.msra.mxu1 %v13819_v43  ;;  %v13823_v43 = vld [vmem:[%s17850_s30 + $0x80] sm:$0xff]  }
 0x480   : > { %12478 = vmatprep.subr.bf16.mxu1 %v13820_v49 }
 0x483   : > { %12479 = vmatpush3.bf16.msra.mxu1 %v13820_v49  ;;  %v4628_v49 = vld [vmem:[#allocation4 + $0x12a] sm:$0xff] }
 0x484   : > { %12480 = vmatprep.subr.bf16.mxu1 %v13821_v35  ;;  %v15692_v45 = vpack.c.bf16 %v4628_v49, %v4627_v37  ;;  %v6222_v37 = vld [vmem:[#allocation4 + $0x91] sm:$0xff]  ;;  %v6223_v49 = vld [vmem:[#allocation4 + $0x99] sm:$0xff] }
 0x486   : > { %12449 = vmatmul.mubr.msk.bf16.gmra.mrb[4].mxu1 %vm3648_vm4, %v15652_v32 }
 0x487   : > { %12452 = vmatprep.mubr.msk.bf16.mxu1 %vm3648_vm4, %v15657_v0  ;;  %12481 = vmatpush3.bf16.msra.mxu1 %v13821_v35  ;;  %v15690_v35 = vpack.c.bf16 %v4626_v56, %v4625_v34  ;;  %v6220_v34 = vld [vmem:[#allocation4 + $0x79] sm:$0xff]  ;;  %v6221_v56 = vld [vmem:[#allocation4 + $0x81] sm:$0xff] }
 0x488   : > { %12482 = vmatprep.subr.bf16.mxu1 %v13822_v63  ;;  %v6249_v25 = vpack.c.bf16 %v6221_v56, %v6220_v34 }
 0x48b   : > { %12483 = vmatpush3.bf16.msra.mxu1 %v13822_v63  ;;  %v4632_v63 = vld [vmem:[#allocation4 + $0x15a] sm:$0xff] }
 0x48c   : > { %12516 = vmatprep.subr.bf16.mxu1 %v13823_v43  ;;  %v15700_v23 = vpack.c.bf16 %v4632_v63, %v4631_v47  ;;  %v6250_v47 = vpack.c.bf16 %v6223_v49, %v6222_v37  ;;  %v6224_v63 = vld [vmem:[#allocation4 + $0xa9] sm:$0xff] }
 0x48e   : > { %12453 = vmatmul.mubr.msk.bf16.gmra.mrb[8].mxu1 %vm3648_vm4, %v15666_v3 }
 0x48f   : > { %12456 = vmatprep.mubr.msk.bf16.mxu1 %vm3648_vm4, %v15668_v20 }
 0x496   : > { %12457 = vmatmul.mubr.msk.bf16.gmra.mrb[12].mxu1 %vm3648_vm4, %v15674_v29 }
 0x497   : > { %12460 = vmatprep.mubr.msk.bf16.mxu1 %vm3648_vm4, %v15676_v2 }
 0x49e   : > { %12461 = vmatmul.mubr.msk.bf16.gmra.mrb[16].mxu1 %vm3648_vm4, %v15682_v46 }
 0x49f   : > { %12464 = vmatprep.mubr.msk.bf16.mxu1 %vm3648_vm4, %v15684_v18 }
 0x4a6   : > { %12465 = vmatmul.mubr.msk.bf16.gmra.mrb[20].mxu1 %vm3648_vm4, %v15690_v35 }
 0x4a7   : > { %12468 = vmatprep.mubr.msk.bf16.mxu1 %vm3648_vm4, %v15692_v45 }
 0x4ae   : > { %12469 = vmatmul.mubr.msk.bf16.gmra.mrb[24].mxu1 %vm3648_vm4, %v15698_v21 }
 0x4af   : > { %12472 = vmatprep.mubr.msk.bf16.mxu1 %vm3648_vm4, %v15700_v23 }
 0x4b6   : > { %12473 = vmatmul.mubr.msk.bf16.gmra.mrb[28].mxu1 %vm3648_vm4, %v15706_v11 }
 0x4b7   : > { %12484 = vmatprep.mubr.msk.bf16.mxu1 %vm3648_vm4, %v15565_v12  ;;  %v13826_v12 = vld [vmem:[%s17850_s30 + $0x98] sm:$0xff]  }
 0x4be   : > { %12485 = vmatmul.mubr.msk.bf16.vlgmr.msra.gmra.mrb[0].mxu1 %vm3648_vm4, %v15570_v19 }
 0x4bf   : > { %12488 = vmatprep.mubr.msk.bf16.mxu1 %vm3648_vm4, %v15579_v8  ;;  %12517 = vmatpush3.bf16.msra.mxu1 %v13823_v43  ;;  %v13827_v43 = vld [vmem:[%s17850_s30 + $0xa0] sm:$0xff]  }
 0x4c0   : > { %12518 = vmatprep.subr.bf16.mxu1 %v13824_v42 }
 0x4c3   : > { %12519 = vmatpush3.bf16.msra.mxu1 %v13824_v42  ;;  %v6227_v42 = vld [vmem:[#allocation4 + $0xc9] sm:$0xff] }
 0x4c4   : > { %12520 = vmatprep.subr.bf16.mxu1 %v13825_v17 }
 0x4c6   : > { %12489 = vmatmul.mubr.msk.bf16.gmra.mrb[4].mxu1 %vm3648_vm4, %v15584_v28 }
 0x4c7   : > { %12492 = vmatprep.mubr.msk.bf16.mxu1 %vm3648_vm4, %v15593_v14  ;;  %12521 = vmatpush3.bf16.msra.mxu1 %v13825_v17  ;;  %v6251_v17 = vpack.c.bf16 %v6225_v50, %v6224_v63 }
 0x4c8   : > { %12522 = vmatprep.subr.bf16.mxu1 %v13826_v12 }
 0x4cb   : > { %12523 = vmatpush3.bf16.msra.mxu1 %v13826_v12  ;;  %v6252_v12 = vpack.c.bf16 %v6227_v42, %v6226_v38 }
 0x4cc   : > { %12556 = vmatprep.subr.bf16.mxu1 %v13827_v43 }
 0x4ce   : > { %12493 = vmatmul.mubr.msk.bf16.gmra.mrb[8].mxu1 %vm3648_vm4, %v15595_v1 }
 0x4cf   : > { %12496 = vmatprep.mubr.msk.bf16.mxu1 %vm3648_vm4, %v15601_v9 }
 0x4d6   : > { %12497 = vmatmul.mubr.msk.bf16.gmra.mrb[12].mxu1 %vm3648_vm4, %v15603_v16 }
 0x4d7   : > { %12500 = vmatprep.mubr.msk.bf16.mxu1 %vm3648_vm4, %v15609_v52 }
 0x4de   : > { %12501 = vmatmul.mubr.msk.bf16.gmra.mrb[16].mxu1 %vm3648_vm4, %v15611_v13 }
 0x4df   : > { %12504 = vmatprep.mubr.msk.bf16.mxu1 %vm3648_vm4, %v15617_v53 }
 0x4e6   : > { %12505 = vmatmul.mubr.msk.bf16.gmra.mrb[20].mxu1 %vm3648_vm4, %v15619_v6 }
 0x4e7   : > { %12508 = vmatprep.mubr.msk.bf16.mxu1 %vm3648_vm4, %v15625_v62 }
 0x4ee   : > { %12509 = vmatmul.mubr.msk.bf16.gmra.mrb[24].mxu1 %vm3648_vm4, %v15627_v33 }
 0x4ef   : > { %12512 = vmatprep.mubr.msk.bf16.mxu1 %vm3648_vm4, %v15633_v7 }
 0x4f6   : > { %12513 = vmatmul.mubr.msk.bf16.gmra.mrb[28].mxu1 %vm3648_vm4, %v15752_v24 }
 0x4f7   : > { %12524 = vmatprep.mubr.msk.bf16.mxu1 %vm3648_vm4, %v15491_v15  ;;  %v13830_v15 = vld [vmem:[%s17850_s30 + $0xb8] sm:$0xff]  }
 0x4fe   : > { %12525 = vmatmul.mubr.msk.bf16.vlgmr.msra.gmra.mrb[0].mxu1 %vm3648_vm4, %v15496_v4  ;;  %v13831_v4 = vld [vmem:[%s17850_s30 + $0xc0] sm:$0xff]  }
 0x4ff   : > { %12528 = vmatprep.mubr.msk.bf16.mxu1 %vm3648_vm4, %v15506_v58  ;;  %12557 = vmatpush3.bf16.msra.mxu1 %v13827_v43  ;;  %v5277_v58 = vld [vmem:[#allocation4 + $0x181] sm:$0xff]  ;;  %v6228_v43 = vld [vmem:[#allocation4 + $0xd9] sm:$0xff] }
 0x500   : > { %12558 = vmatprep.subr.bf16.mxu1 %v13828_v54 }
 0x503   : > { %12559 = vmatpush3.bf16.msra.mxu1 %v13828_v54  ;;  %v6253_v54 = vpack.c.bf16 %v6229_v60, %v6228_v43 }
 0x504   : > { %12560 = vmatprep.subr.bf16.mxu1 %v13829_v55 }
 0x506   : > { %12529 = vmatmul.mubr.msk.bf16.gmra.mrb[4].mxu1 %vm3648_vm4, %v15511_v39  ;;  %v5278_v39 = vld [vmem:[#allocation4 + $0x189] sm:$0xff] }
 0x507   : > { %12532 = vmatprep.mubr.msk.bf16.mxu1 %vm3648_vm4, %v15520_v26  ;;  %12561 = vmatpush3.bf16.msra.mxu1 %v13829_v55  ;;  %v15798_v26 = vpack.c.bf16 %v5278_v39, %v5277_v58  ;;  %v6234_v58 = vld [vmem:[#allocation4 + $0x121] sm:$0xff]  ;;  %v6235_v39 = vld [vmem:[#allocation4 + $0x129] sm:$0xff] }
 0x508   : > { %12562 = vmatprep.subr.bf16.mxu1 %v13830_v15 }
 0x50b   : > { %12563 = vmatpush3.bf16.msra.mxu1 %v13830_v15  ;;  %v6232_v15 = vld [vmem:[#allocation4 + $0x109] sm:$0xff] }
 0x50c   : > { %12596 = vmatprep.subr.bf16.mxu1 %v13831_v4 }
 0x50e   : > { %12533 = vmatmul.mubr.msk.bf16.gmra.mrb[8].mxu1 %vm3648_vm4, %v15522_v10  ;;  %v13832_v10 = vld [vmem:[%s17850_s30 + $0xc8] sm:$0xff]  }
 0x50f   : > { %12536 = vmatprep.mubr.msk.bf16.mxu1 %vm3648_vm4, %v15528_v36  ;;  %v13833_v36 = vld [vmem:[%s17850_s30 + $0xd0] sm:$0xff]  }
 0x516   : > { %12537 = vmatmul.mubr.msk.bf16.gmra.mrb[12].mxu1 %vm3648_vm4, %v15530_v30  ;;  %v13834_v30 = vld [vmem:[%s17850_s30 + $0xd8] sm:$0xff]  }
 0x517   : > { %12540 = vmatprep.mubr.msk.bf16.mxu1 %vm3648_vm4, %v15536_v59  ;;  %v13835_v59 = vld [vmem:[%s17850_s30 + $0xe0] sm:$0xff]  }
 0x51e   : > { %12541 = vmatmul.mubr.msk.bf16.gmra.mrb[16].mxu1 %vm3648_vm4, %v15538_v27  ;;  %v5599_v27 = vld [vmem:[#allocation4 + $0x182] sm:$0xff] }
 0x51f   : > { %12544 = vmatprep.mubr.msk.bf16.mxu1 %vm3648_vm4, %v15544_v31  ;;  %v5600_v31 = vld [vmem:[#allocation4 + $0x18a] sm:$0xff] }
 0x526   : > { %12545 = vmatmul.mubr.msk.bf16.gmra.mrb[20].mxu1 %vm3648_vm4, %v15546_v57  ;;  %v15844_v57 = vpack.c.bf16 %v5600_v31, %v5599_v27  ;;  %v6238_v27 = vld [vmem:[#allocation4 + $0x151] sm:$0xff]  ;;  %v6239_v31 = vld [vmem:[#allocation4 + $0x159] sm:$0xff] }
 0x527   : > { %12548 = vmatprep.mubr.msk.bf16.mxu1 %vm3648_vm4, %v15552_v51  ;;  %v13836_v51 = vld [vmem:[%s17850_s30 + $0xe8] sm:$0xff]  }
 0x52e   : > { %12549 = vmatmul.mubr.msk.bf16.gmra.mrb[24].mxu1 %vm3648_vm4, %v15554_v40  ;;  %v13837_v40 = vld [vmem:[%s17850_s30 + $0xf0] sm:$0xff]  }
 0x52f   : > { %12552 = vmatprep.mubr.msk.bf16.mxu1 %vm3648_vm4, %v15560_v61  ;;  %v13838_v61 = vld [vmem:[%s17850_s30 + $0xf8] sm:$0xff]  }
 0x536   : > { %12553 = vmatmul.mubr.msk.bf16.gmra.mrb[28].mxu1 %vm3648_vm4, %v15798_v26 }
 0x537   : > { %12564 = vmatprep.mubr.msk.bf16.mxu1 %vm3648_vm4, %v15638_v48  ;;  %v13841_v48 = vld [vmem:[%s17850_s30 + $0x110] sm:$0xff]  }
 0x53e   : > { %12565 = vmatmul.mubr.msk.bf16.vlgmr.msra.gmra.mrb[0].mxu1 %vm3648_vm4, %v15643_v41 }
 0x53f   : > { %12568 = vmatprep.mubr.msk.bf16.mxu1 %vm3648_vm4, %v15652_v32  ;;  %12597 = vmatpush3.bf16.msra.mxu1 %v13831_v4  ;;  %v6233_v4 = vld [vmem:[#allocation4 + $0x111] sm:$0xff] }
 0x540   : > { %12598 = vmatprep.subr.bf16.mxu1 %v13832_v10 }
 0x543   : > { %12599 = vmatpush3.bf16.msra.mxu1 %v13832_v10  ;;  %v6255_v10 = vpack.c.bf16 %v6233_v4, %v6232_v15 }
 0x544   : > { %12600 = vmatprep.subr.bf16.mxu1 %v13833_v36 }
 0x546   : > { %12569 = vmatmul.mubr.msk.bf16.gmra.mrb[4].mxu1 %vm3648_vm4, %v15657_v0 }
 0x547   : > { %12572 = vmatprep.mubr.msk.bf16.mxu1 %vm3648_vm4, %v15666_v3  ;;  %12601 = vmatpush3.bf16.msra.mxu1 %v13833_v36  ;;  %v6256_v36 = vpack.c.bf16 %v6235_v39, %v6234_v58 }
 0x548   : > { %12602 = vmatprep.subr.bf16.mxu1 %v13834_v30 }
 0x54b   : > { %12603 = vmatpush3.bf16.msra.mxu1 %v13834_v30  ;;  %v6236_v30 = vld [vmem:[#allocation4 + $0x139] sm:$0xff] }
 0x54c   : > { %12636 = vmatprep.subr.bf16.mxu1 %v13835_v59 }
 0x54e   : > { %12573 = vmatmul.mubr.msk.bf16.gmra.mrb[8].mxu1 %vm3648_vm4, %v15668_v20 }
 0x54f   : > { %12576 = vmatprep.mubr.msk.bf16.mxu1 %vm3648_vm4, %v15674_v29 }
 0x556   : > { %12577 = vmatmul.mubr.msk.bf16.gmra.mrb[12].mxu1 %vm3648_vm4, %v15676_v2 }
 0x557   : > { %12580 = vmatprep.mubr.msk.bf16.mxu1 %vm3648_vm4, %v15682_v46 }
 0x55e   : > { %12581 = vmatmul.mubr.msk.bf16.gmra.mrb[16].mxu1 %vm3648_vm4, %v15684_v18 }
 0x55f   : > { %12584 = vmatprep.mubr.msk.bf16.mxu1 %vm3648_vm4, %v15690_v35 }
 0x566   : > { %12585 = vmatmul.mubr.msk.bf16.gmra.mrb[20].mxu1 %vm3648_vm4, %v15692_v45 }
 0x567   : > { %12588 = vmatprep.mubr.msk.bf16.mxu1 %vm3648_vm4, %v15698_v21 }
 0x56e   : > { %12589 = vmatmul.mubr.msk.bf16.gmra.mrb[24].mxu1 %vm3648_vm4, %v15700_v23 }
 0x56f   : > { %12592 = vmatprep.mubr.msk.bf16.mxu1 %vm3648_vm4, %v15706_v11 }
 0x576   : > { %12593 = vmatmul.mubr.msk.bf16.gmra.mrb[28].mxu1 %vm3648_vm4, %v15844_v57 }
 0x577   : > { %12604 = vmatprep.mubr.msk.bf16.mxu1 %vm3648_vm4, %v15570_v19  ;;  %v13839_v19 = vld [vmem:[%s17850_s30 + $0x100] sm:$0xff]  }
 0x57e   : > { %12605 = vmatmul.mubr.msk.bf16.vlgmr.msra.gmra.mrb[0].mxu1 %vm3648_vm4, %v15579_v8  ;;  %v5922_v8 = vld [vmem:[#allocation4 + $0x198] sm:$0xff] }
 0x57f   : > { %12608 = vmatprep.mubr.msk.bf16.mxu1 %vm3648_vm4, %v15584_v28  ;;  %12637 = vmatpush3.bf16.msra.mxu1 %v13835_v59  ;;  %v5923_v28 = vld [vmem:[#allocation4 + $0x1a0] sm:$0xff] }
 0x580   : > { %12638 = vmatprep.subr.bf16.mxu1 %v13836_v51  ;;  %v6237_v59 = vld [vmem:[#allocation4 + $0x141] sm:$0xff] }
 0x583   : > { %12639 = vmatpush3.bf16.msra.mxu1 %v13836_v51  ;;  %v6257_v51 = vpack.c.bf16 %v6237_v59, %v6236_v30 }
 0x584   : > { %12640 = vmatprep.subr.bf16.mxu1 %v13837_v40 }
 0x586   : > { %12609 = vmatmul.mubr.msk.bf16.gmra.mrb[4].mxu1 %vm3648_vm4, %v15593_v14  ;;  %v5939_v14 = vpack.c.bf16 %v5923_v28, %v5922_v8  ;;  %v6244_v28 = vld [vmem:[#allocation4 + $0x199] sm:$0xff] }
 0x587   : > { %12612 = vmatprep.mubr.msk.bf16.mxu1 %vm3648_vm4, %v15595_v1  ;;  %12641 = vmatpush3.bf16.msra.mxu1 %v13837_v40  ;;  %v6214_v1 = vld [vmem:[#allocation4 + $0x31] sm:$0xff]  ;;  %v6258_v40 = vpack.c.bf16 %v6239_v31, %v6238_v27 }
 0x588   : > { %12642 = vmatprep.subr.bf16.mxu1 %v13838_v61 }
 0x58b   : > { %12643 = vmatpush3.bf16.msra.mxu1 %v13838_v61  ;;  %v6240_v61 = vld [vmem:[#allocation4 + $0x169] sm:$0xff] }
 0x58c   : > { %12676 = vmatprep.subr.bf16.mxu1 %v13839_v19 }
 0x58e   : > { %12613 = vmatmul.mubr.msk.bf16.gmra.mrb[8].mxu1 %vm3648_vm4, %v15601_v9  ;;  %v6215_v9 = vld [vmem:[#allocation4 + $0x39] sm:$0xff] }
 0x58f   : > { %12616 = vmatprep.mubr.msk.bf16.mxu1 %vm3648_vm4, %v15603_v16  ;;  %v6246_v16 = vpack.c.bf16 %v6215_v9, %v6214_v1 }
 0x596   : > { %12617 = vmatmul.mubr.msk.bf16.gmra.mrb[12].mxu1 %vm3648_vm4, %v15609_v52  ;;  %v6216_v52 = vld [vmem:[#allocation4 + $0x49] sm:$0xff] }
 0x597   : > { %12620 = vmatprep.mubr.msk.bf16.mxu1 %vm3648_vm4, %v15611_v13  ;;  %v6217_v13 = vld [vmem:[#allocation4 + $0x51] sm:$0xff] }
 0x59e   : > { %12621 = vmatmul.mubr.msk.bf16.gmra.mrb[16].mxu1 %vm3648_vm4, %v15617_v53  ;;  %v6218_v53 = vld [vmem:[#allocation4 + $0x61] sm:$0xff] }
 0x59f   : > { %12624 = vmatprep.mubr.msk.bf16.mxu1 %vm3648_vm4, %v15619_v6  ;;  %v6219_v6 = vld [vmem:[#allocation4 + $0x69] sm:$0xff] }
 0x5a6   : > { %12625 = vmatmul.mubr.msk.bf16.gmra.mrb[20].mxu1 %vm3648_vm4, %v15625_v62  ;;  %v6247_v62 = vpack.c.bf16 %v6217_v13, %v6216_v52 }
 0x5a7   : > { %12628 = vmatprep.mubr.msk.bf16.mxu1 %vm3648_vm4, %v15627_v33  ;;  %v13840_v33 = vld [vmem:[%s17850_s30 + $0x108] sm:$0xff]   ;;  %s17855_s30 = sshll.u32 %s14393_s29, 8  ;;  %s16550_s29 = sld [smem:[#allocation8]] }
 0x5a8   : > { %s16518_s6 = scalar_lea.vmem %s17856_s13, %s17855_s30  ;;  %s16667_s30 = sld [smem:[#allocation8 + $0x5]] }
 0x5a9   : > { %s16681_s13 = sld [smem:[#allocation8 + $0x8]] }
 0x5ae   : > { %12629 = vmatmul.mubr.msk.bf16.gmra.mrb[24].mxu1 %vm3648_vm4, %v15633_v7  ;;  %v6248_v7 = vpack.c.bf16 %v6219_v6, %v6218_v53 }
 0x5af   : > { %12632 = vmatprep.mubr.msk.bf16.mxu1 %vm3648_vm4, %v15752_v24  ;;  %v6231_v24 = vld [vmem:[#allocation4 + $0xf9] sm:$0xff] }
 0x5b0   : > { %v6254_v55 = vpack.c.bf16 %v6231_v24, %v6230_v22 }
 0x5b6   : > { %12633 = vmatmul.mubr.msk.bf16.gmra.mrb[28].mxu1 %vm3648_vm4, %v5939_v14  ;;  %v6245_v14 = vld [vmem:[#allocation4 + $0x1a1] sm:$0xff] }
 0x5b7   : > { %12644 = vmatprep.mubr.msk.bf16.mxu1 %vm3648_vm4, %v6246_v16  ;;  %v6261_v1 = vpack.c.bf16 %v6245_v14, %v6244_v28 }
 0x5be   : > { %12645 = vmatmul.mubr.msk.bf16.vlgmr.msra.gmra.mrb[0].mxu1 %vm3648_vm4, %v6247_v62 }
 0x5bf   : > { %12648 = vmatprep.mubr.msk.bf16.mxu1 %vm3648_vm4, %v6248_v7  ;;  %12677 = vmatpush3.bf16.msra.mxu1 %v13839_v19  ;;  %v6241_v19 = vld [vmem:[#allocation4 + $0x171] sm:$0xff] }
 0x5c0   : > { %12678 = vmatprep.subr.bf16.mxu1 %v13840_v33  ;;  %v6259_v8 = vpack.c.bf16 %v6241_v19, %v6240_v61 }
 0x5c3   : > { %12679 = vmatpush3.bf16.msra.mxu1 %v13840_v33 }
 0x5c4   : > { %12680 = vmatprep.subr.bf16.mxu1 %v13841_v48 }
 0x5c6   : > { %12649 = vmatmul.mubr.msk.bf16.gmra.mrb[4].mxu1 %vm3648_vm4, %v6249_v25 }
 0x5c7   : > { %12652 = vmatprep.mubr.msk.bf16.mxu1 %vm3648_vm4, %v6250_v47  ;;  %12681 = vmatpush3.bf16.msra.mxu1 %v13841_v48 }
 0x5c8   : > { %12682 = vmatprep.subr.bf16.mxu1 %v13842_v44 }
 0x5cb   : > { %12683 = vmatpush3.bf16.msra.mxu1 %v13842_v44 }
 0x5ce   : > { %12653 = vmatmul.mubr.msk.bf16.gmra.mrb[8].mxu1 %vm3648_vm4, %v6251_v17 }
 0x5cf   : > { %12656 = vmatprep.mubr.msk.bf16.mxu1 %vm3648_vm4, %v6252_v12 }
 0x5d6   : > { %12657 = vmatmul.mubr.msk.bf16.gmra.mrb[12].mxu1 %vm3648_vm4, %v6253_v54 }
 0x5d7   : > { %12660 = vmatprep.mubr.msk.bf16.mxu1 %vm3648_vm4, %v6254_v55 }
 0x5de   : > { %12661 = vmatmul.mubr.msk.bf16.gmra.mrb[16].mxu1 %vm3648_vm4, %v6255_v10 }
 0x5df   : > { %12664 = vmatprep.mubr.msk.bf16.mxu1 %vm3648_vm4, %v6256_v36 }
 0x5e6   : > { %12665 = vmatmul.mubr.msk.bf16.gmra.mrb[20].mxu1 %vm3648_vm4, %v6257_v51 }
 0x5e7   : > { %12668 = vmatprep.mubr.msk.bf16.mxu1 %vm3648_vm4, %v6258_v40 }
 0x5ee   : > { %12669 = vmatmul.mubr.msk.bf16.gmra.mrb[24].mxu1 %vm3648_vm4, %v6259_v8 }
 0x5ef   : > { %12672 = vmatprep.mubr.msk.bf16.mxu1 %vm3648_vm4, %v15798_v26 }
 0x5f6   : > { %12673 = vmatmul.mubr.msk.bf16.gmra.mrb[28].mxu1 %vm3648_vm4, %v6261_v1 }
 0x5f7   : > { %12684 = vmatprep.mubr.msk.bf16.mxu1 %vm3648_vm4, %v15643_v41  ;;  %v6566_v41 = vld [vmem:[#allocation4 + $0x19a] sm:$0xff] }
 0x5fe   : > { %12685 = vmatmul.mubr.msk.bf16.vlgmr.msra.gmra.mrb[0].mxu1 %vm3648_vm4, %v15652_v32  ;;  %v6567_v32 = vld [vmem:[#allocation4 + $0x1a2] sm:$0xff] }
 0x5ff   : > { %12688 = vmatprep.mubr.msk.bf16.mxu1 %vm3648_vm4, %v15657_v0  ;;  %v6583_v0 = vpack.c.bf16 %v6567_v32, %v6566_v41 }
 0x606   : > { %12689 = vmatmul.mubr.msk.bf16.gmra.mrb[4].mxu1 %vm3648_vm4, %v15666_v3  ;;  %v4009_v3 = vld [vmem:[%s17796_s10 + $0x8] sm:$0xff] }
 0x607   : > { %12692 = vmatprep.mubr.msk.bf16.mxu1 %vm3648_vm4, %v15668_v20  ;;  %6961 = vmatprep.mubr.f32.mxu0 %v4009_v3 }
 0x60e   : > { %12693 = vmatmul.mubr.msk.bf16.gmra.mrb[8].mxu1 %vm3648_vm4, %v15674_v29  ;;  %v15954_v29 = vld [vmem:[%s17851_s7] ss:$0 sm:$0xff]  ;;  %s16657_s7 = sld [smem:[#allocation8 + $0x3]] }
 0x60f   : > { %12696 = vmatprep.mubr.msk.bf16.mxu1 %vm3648_vm4, %v15676_v2 }
 0x616   : > { %12697 = vmatmul.mubr.msk.bf16.gmra.mrb[12].mxu1 %vm3648_vm4, %v15682_v46 }
 0x617   : > { %12700 = vmatprep.mubr.msk.bf16.mxu1 %vm3648_vm4, %v15684_v18 }
 0x61e   : > { %12701 = vmatmul.mubr.msk.bf16.gmra.mrb[16].mxu1 %vm3648_vm4, %v15690_v35 }
 0x61f   : > { %12704 = vmatprep.mubr.msk.bf16.mxu1 %vm3648_vm4, %v15692_v45 }
 0x626   : > { %12705 = vmatmul.mubr.msk.bf16.gmra.mrb[20].mxu1 %vm3648_vm4, %v15698_v21 }
 0x627   : > { %12708 = vmatprep.mubr.msk.bf16.mxu1 %vm3648_vm4, %v15700_v23 }
 0x62e   : > { %12709 = vmatmul.mubr.msk.bf16.gmra.mrb[24].mxu1 %vm3648_vm4, %v15706_v11 }
 0x62f   : > { %12712 = vmatprep.mubr.msk.bf16.mxu1 %vm3648_vm4, %v15844_v57 }
 0x636   : > { %12713 = vmatmul.mubr.msk.bf16.gmra.mrb[28].mxu1 %vm3648_vm4, %v6583_v0 }
 0x6d1   : > { %v12686_v20 = vpop.f32.mrb[0].mxu1 }
 0x6d2   : > { %v6699_v2 = vpop.f32.mrb[1].mxu1  ;;  %v6867_v18 = vadd.f32 %v12686_v20, %v15954_v29 }
 0x6d3   : > { %v12687_v46 = vpop.f32.mrb[2].mxu1  ;;  %v6865_v21 = vadd.f32 %v15954_v29, %v6699_v2 }
 0x6d4   : > { %v6868_v35 = vadd.f32 %v12687_v46, %v15954_v29  ;;  %v6702_v45 = vpop.f32.mrb[3].mxu1 }
 0x6d5   : > { %v6866_v23 = vadd.f32 %v15954_v29, %v6702_v45 }
 0x6d6   : > { %v13057_v11 = vpack.c.bf16 %v6868_v35, %v6867_v18 }
 0x6d7   : > { %v13053_v26 = vpack.c.bf16 %v6866_v23, %v6865_v21 }
 0x6d9   : > { %v12690_v57 = vpop.f32.mrb[4].mxu1 }
 0x6da   : > { %v6715_v9 = vpop.f32.mrb[5].mxu1  ;;  %v15961_v52 = vadd.f32 %v12690_v57, %v15954_v29 }
 0x6db   : > { %v12691_v16 = vpop.f32.mrb[6].mxu1  ;;  %v6869_v6 = vadd.f32 %v15954_v29, %v6715_v9 }
 0x6dc   : > { %v6872_v13 = vadd.f32 %v12691_v16, %v15954_v29  ;;  %v6718_v53 = vpop.f32.mrb[7].mxu1 }
 0x6dd   : > { %v6870_v62 = vadd.f32 %v15954_v29, %v6718_v53 }
 0x6de   : > { %v13065_v33 = vpack.c.bf16 %v6872_v13, %v15961_v52 }
 0x6df   : > { %v13061_v7 = vpack.c.bf16 %v6870_v62, %v6869_v6 }
 0x6e1   : > { %v12694_v48 = vpop.f32.mrb[8].mxu1 }
 0x6e2   : > { %v6731_v34 = vpop.f32.mrb[9].mxu1  ;;  %v15968_v37 = vadd.f32 %v12694_v48, %v15954_v29  ;;  %v4013_v48 = vld [vmem:[%s17796_s10 + $0x28] sm:$0xff] }
 0x6e3   : > { %v12695_v56 = vpop.f32.mrb[10].mxu1  ;;  %v6873_v44 = vadd.f32 %v15954_v29, %v6731_v34  ;;  %v4012_v34 = vld [vmem:[%s17796_s10 + $0x20] sm:$0xff] }
 0x6e4   : > { %v15971_v49 = vadd.f32 %v12695_v56, %v15954_v29  ;;  %v6734_v25 = vpop.f32.mrb[11].mxu1  ;;  %v4015_v56 = vld [vmem:[%s17796_s10 + $0x38] sm:$0xff] }
 0x6e5   : > { %v6874_v47 = vadd.f32 %v15954_v29, %v6734_v25  ;;  %v4016_v25 = vld [vmem:[%s17796_s10 + $0x40] sm:$0xff] }
 0x6e6   : > { %v13073_v63 = vpack.c.bf16 %v15971_v49, %v15968_v37  ;;  %v4014_v37 = vld [vmem:[%s17796_s10 + $0x30] sm:$0xff]  ;;  %v4017_v49 = vld [vmem:[%s17796_s10 + $0x48] sm:$0xff] }
 0x6e7   : > { %v13069_v50 = vpack.c.bf16 %v6874_v47, %v6873_v44  ;;  %v4019_v44 = vld [vmem:[%s17796_s10 + $0x58] sm:$0xff]  ;;  %v4018_v47 = vld [vmem:[%s17796_s10 + $0x50] sm:$0xff] }
 0x6e9   : > { %v12698_v38 = vpop.f32.mrb[12].mxu1 }
 0x6ea   : > { %v6747_v42 = vpop.f32.mrb[13].mxu1  ;;  %v6879_v12 = vadd.f32 %v12698_v38, %v15954_v29  ;;  %v4023_v38 = vld [vmem:[%s17796_s10 + $0x78] sm:$0xff] }
 0x6eb   : > { %v12699_v17 = vpop.f32.mrb[14].mxu1  ;;  %v6877_v22 = vadd.f32 %v15954_v29, %v6747_v42  ;;  %v4022_v42 = vld [vmem:[%s17796_s10 + $0x70] sm:$0xff] }
 0x6ec   : > { %v6880_v43 = vadd.f32 %v12699_v17, %v15954_v29  ;;  %v6750_v60 = vpop.f32.mrb[15].mxu1  ;;  %v13843_v17 = vld [vmem:[%s17852_s26 + $0x20] sm:$0xff]  }
 0x6ed   : > { %v6878_v24 = vadd.f32 %v15954_v29, %v6750_v60  ;;  %12716 = vmatprep.subr.bf16.mxu1 %v13843_v17  ;;  %v13846_v60 = vld [vmem:[%s17852_s26 + $0x38] sm:$0xff]  }
 0x6ee   : > { %v13081_v54 = vpack.c.bf16 %v6880_v43, %v6879_v12  ;;  %v13844_v12 = vld [vmem:[%s17852_s26 + $0x28] sm:$0xff]   ;;  %12717 = vmatpush3.bf16.msra.mxu1 %v13843_v17  ;;  %v13845_v43 = vld [vmem:[%s17852_s26 + $0x30] sm:$0xff]  }
 0x6ef   : > { %v13077_v55 = vpack.c.bf16 %v6878_v24, %v6877_v22  ;;  %12718 = vmatprep.subr.bf16.mxu1 %v13844_v12  ;;  %v16057_v22 = vld [vmem:[%s17852_s26] sm:$0xff]  }
 0x6f1   : > { %v12702_v15 = vpop.f32.mrb[16].mxu1 }
 0x6f2   : > { %v6763_v4 = vpop.f32.mrb[17].mxu1  ;;  %v6883_v39 = vadd.f32 %v12702_v15, %v15954_v29  ;;  %12719 = vmatpush3.bf16.msra.mxu1 %v13844_v12 }
 0x6f3   : > { %v12703_v58 = vpop.f32.mrb[18].mxu1  ;;  %v6881_v30 = vadd.f32 %v15954_v29, %v6763_v4  ;;  %12720 = vmatprep.subr.bf16.mxu1 %v13845_v43 }
 0x6f4   : > { %v6884_v10 = vadd.f32 %v12703_v58, %v15954_v29  ;;  %v6766_v36 = vpop.f32.mrb[19].mxu1 }
 0x6f5   : > { %v6882_v59 = vadd.f32 %v15954_v29, %v6766_v36 }
 0x6f6   : > { %v13055_v27 = vpack.c.bf16 %v6884_v10, %v6883_v39  ;;  %12721 = vmatpush3.bf16.msra.mxu1 %v13845_v43 }
 0x6f7   : > { %v13051_v31 = vpack.c.bf16 %v6882_v59, %v6881_v30  ;;  %12722 = vmatprep.subr.bf16.mxu1 %v13846_v60 }
 0x6f9   : > { %v12706_v51 = vpop.f32.mrb[20].mxu1  ;;  %13052 = vmatprep.subr.bf16.mxu0 %v13051_v31 }
 0x6fa   : > { %v6779_v40 = vpop.f32.mrb[21].mxu1  ;;  %13054 = vmatpush3.bf16.msra.mxu0 %v13053_v26  ;;  %v6887_v19 = vadd.f32 %v12706_v51, %v15954_v29  ;;  %12723 = vmatpush3.bf16.msra.mxu1 %v13846_v60 }
 0x6fb   : > { %v12707_v61 = vpop.f32.mrb[22].mxu1  ;;  %13056 = vmatprep.subr.bf16.mxu0 %v13055_v27  ;;  %v6885_v14 = vadd.f32 %v15954_v29, %v6779_v40  ;;  %12732 = vmatprep.subr.bf16.mxu1 %v16057_v22 }
 0x6fc   : > { %v6888_v8 = vadd.f32 %v12707_v61, %v15954_v29  ;;  %v6782_v28 = vpop.f32.mrb[23].mxu1 }
 0x6fd   : > { %v6886_v1 = vadd.f32 %v15954_v29, %v6782_v28 }
 0x6fe   : > { %v13063_v41 = vpack.c.bf16 %v6888_v8, %v6887_v19  ;;  %13058 = vmatpush3.bf16.msra.mxu0 %v13057_v11 }
 0x6ff   : > { %v13059_v32 = vpack.c.bf16 %v6886_v1, %v6885_v14 }
 0x701   : > { %v12710_v0 = vpop.f32.mrb[24].mxu1  ;;  %13060 = vmatprep.subr.bf16.mxu0 %v13059_v32 }
 0x702   : > { %v6795_v3 = vpop.f32.mrb[25].mxu1  ;;  %13062 = vmatpush3.bf16.msra.mxu0 %v13061_v7  ;;  %v6891_v2 = vadd.f32 %v12710_v0, %v15954_v29  ;;  %v4011_v7 = vld [vmem:[%s17796_s10 + $0x18] sm:$0xff] }
 0x703   : > { %v12711_v20 = vpop.f32.mrb[26].mxu1  ;;  %13064 = vmatprep.subr.bf16.mxu0 %v13063_v41  ;;  %v6889_v35 = vadd.f32 %v15954_v29, %v6795_v3 }
 0x704   : > { %v6892_v46 = vadd.f32 %v12711_v20, %v15954_v29  ;;  %v6798_v18 = vpop.f32.mrb[27].mxu1 }
 0x705   : > { %v6890_v45 = vadd.f32 %v15954_v29, %v6798_v18 }
 0x706   : > { %v13071_v21 = vpack.c.bf16 %v6892_v46, %v6891_v2  ;;  %13066 = vmatpush3.bf16.msra.mxu0 %v13065_v33  ;;  %v4008_v33 = vld [vmem:[%s17796_s10] sm:$0xff] }
 0x707   : > { %v13067_v23 = vpack.c.bf16 %v6890_v45, %v6889_v35 }
 0x709   : > { %v12714_v11 = vpop.f32.mrb[28].mxu1  ;;  %13068 = vmatprep.subr.bf16.mxu0 %v13067_v23 }
 0x70a   : > { %v6811_v26 = vpop.f32.mrb[29].mxu1  ;;  %13070 = vmatpush3.bf16.msra.mxu0 %v13069_v50  ;;  %v6895_v9 = vadd.f32 %v12714_v11, %v15954_v29  ;;  %v4020_v50 = vld [vmem:[%s17796_s10 + $0x60] sm:$0xff] }
 0x70b   : > { %v12715_v57 = vpop.f32.mrb[30].mxu1  ;;  %13072 = vmatprep.subr.bf16.mxu0 %v13071_v21  ;;  %v6893_v13 = vadd.f32 %v15954_v29, %v6811_v26 }
 0x70c   : > { %v6896_v16 = vadd.f32 %v12715_v57, %v15954_v29  ;;  %v6814_v52 = vpop.f32.mrb[31].mxu1 }
 0x70d   : > { %v6894_v53 = vadd.f32 %v15954_v29, %v6814_v52  ;;  %v4010_v29 = vld [vmem:[%s17796_s10 + $0x10] sm:$0xff] }
 0x70e   : > { %v13079_v6 = vpack.c.bf16 %v6896_v16, %v6895_v9  ;;  %13074 = vmatpush3.bf16.msra.mxu0 %v13073_v63  ;;  %v4021_v63 = vld [vmem:[%s17796_s10 + $0x68] sm:$0xff] }
 0x70f   : > { %v13075_v62 = vpack.c.bf16 %v6894_v53, %v6893_v13 }
 0x711   : > { %13076 = vmatprep.subr.bf16.mxu0 %v13075_v62 }
 0x712   : > { %13078 = vmatpush3.bf16.msra.mxu0 %v13077_v55 }
 0x713   : > { %13080 = vmatprep.subr.bf16.mxu0 %v13079_v6 }
 0x716   : > { %13082 = vmatpush3.bf16.msra.mxu0 %v13081_v54 }
 0x719   : > { %6962 = vmatmul.mubr.f32.vlgmr.msra.gmra.mrb[32].mxu0 %v4008_v33 }
 0x71a   : > { %6966 = vmatprep.mubr.f32.mxu0 %v4011_v7 }
 0x71d   : > { %6967 = vmatmul.mubr.f32.gmra.mrb[34].mxu0 %v4010_v29 }
 0x71e   : > { %6971 = vmatprep.mubr.f32.mxu0 %v4013_v48 }
 0x721   : > { %6972 = vmatmul.mubr.f32.gmra.mrb[36].mxu0 %v4012_v34 }
 0x722   : > { %6976 = vmatprep.mubr.f32.mxu0 %v4015_v56 }
 0x725   : > { %6977 = vmatmul.mubr.f32.gmra.mrb[38].mxu0 %v4014_v37 }
 0x726   : > { %6981 = vmatprep.mubr.f32.mxu0 %v4017_v49 }
 0x729   : > { %6982 = vmatmul.mubr.f32.gmra.mrb[40].mxu0 %v4016_v25 }
 0x72a   : > { %6986 = vmatprep.mubr.f32.mxu0 %v4019_v44 }
 0x72d   : > { %6987 = vmatmul.mubr.f32.gmra.mrb[42].mxu0 %v4018_v47 }
 0x72e   : > { %6991 = vmatprep.mubr.f32.mxu0 %v4021_v63 }
 0x731   : > { %6992 = vmatmul.mubr.f32.gmra.mrb[44].mxu0 %v4020_v50 }
 0x732   : > { %6996 = vmatprep.mubr.f32.mxu0 %v4023_v38 }
 0x735   : > { %6997 = vmatmul.mubr.f32.gmra.mrb[46].mxu0 %v4022_v42 }
 0x7ec   : > { %v11834_v24 = vpop.f32.mrb[32].mxu0 }
 0x7ed   : > { %v11835_v54 = vpop.f32.mrb[33].mxu0 }
 0x7ee   : > { %v11836_v55 = vadd.f32 %v11835_v54, %v11834_v24 }
 0x7f0   : > { %v11837_v15 = vpop.f32.mrb[34].mxu0  ;;  %v7002_v39 = vsel %vm3648_vm4, %v11836_v55, 0.0 }
 0x7f1   : > { %v11838_v4 = vpop.f32.mrb[35].mxu0 }
 0x7f2   : > { %v11839_v58 = vadd.f32 %v11838_v4, %v11837_v15 }
 0x7f4   : > { %v7003_v10 = vsel %vm3648_vm4, %v11839_v58, 0.0  ;;  %v11840_v36 = vpop.f32.mrb[36].mxu0 }
 0x7f5   : > { %v7004_v30 = vadd.f32 %v7003_v10, %v7002_v39  ;;  %v11841_v59 = vpop.f32.mrb[37].mxu0 }
 0x7f6   : > { %v11842_v27 = vadd.f32 %v11841_v59, %v11840_v36 }
 0x7f8   : > { %v7005_v31 = vsel %vm3648_vm4, %v11842_v27, 0.0  ;;  %v11843_v51 = vpop.f32.mrb[38].mxu0 }
 0x7f9   : > { %v7006_v40 = vadd.f32 %v7005_v31, %v7004_v30  ;;  %v11844_v61 = vpop.f32.mrb[39].mxu0 }
 0x7fa   : > { %v11845_v19 = vadd.f32 %v11844_v61, %v11843_v51 }
 0x7fc   : > { %v7007_v8 = vsel %vm3648_vm4, %v11845_v19, 0.0  ;;  %v11846_v28 = vpop.f32.mrb[40].mxu0 }
 0x7fd   : > { %v7008_v14 = vadd.f32 %v7007_v8, %v7006_v40  ;;  %v11847_v1 = vpop.f32.mrb[41].mxu0 }
 0x7fe   : > { %v11848_v41 = vadd.f32 %v11847_v1, %v11846_v28 }
 0x800   : > { %v7009_v32 = vsel %vm3648_vm4, %v11848_v41, 0.0  ;;  %v11849_v0 = vpop.f32.mrb[42].mxu0 }
 0x801   : > { %v7010_v3 = vadd.f32 %v7009_v32, %v7008_v14  ;;  %v11850_v20 = vpop.f32.mrb[43].mxu0 }
 0x802   : > { %v11851_v2 = vadd.f32 %v11850_v20, %v11849_v0 }
 0x804   : > { %v7011_v46 = vsel %vm3648_vm4, %v11851_v2, 0.0  ;;  %v11852_v18 = vpop.f32.mrb[44].mxu0 }
 0x805   : > { %v7012_v35 = vadd.f32 %v7011_v46, %v7010_v3  ;;  %v11853_v45 = vpop.f32.mrb[45].mxu0 }
 0x806   : > { %v11854_v21 = vadd.f32 %v11853_v45, %v11852_v18 }
 0x808   : > { %v7013_v23 = vsel %vm3648_vm4, %v11854_v21, 0.0  ;;  %v11855_v11 = vpop.f32.mrb[46].mxu0 }
 0x809   : > { %v7014_v26 = vadd.f32 %v7013_v23, %v7012_v35  ;;  %v11856_v57 = vpop.f32.mrb[47].mxu0 }
 0x80a   : > { %v11857_v9 = vadd.f32 %v11856_v57, %v11855_v11 }
 0x80c   : > { %v7015_v16 = vsel %vm3648_vm4, %v11857_v9, 0.0 }
 0x80d   : > { %v7016_v52 = vadd.f32 %v7015_v16, %v7014_v26 }
 0x80f   : > { %v7017_v13 = vrot.slane %v7016_v52, 4 }
 0x811   : > { %v7018_v53 = vadd.f32 %v7017_v13, %v7016_v52 }
 0x813   : > { %v7019_v6 = vrot.slane %v7018_v53, 2 }
 0x815   : > { %v7020_v62 = vadd.f32 %v7019_v6, %v7018_v53  ;;  %v7132_v53 = vld [vmem:[#allocation5 + $0x1] sm:$0xff] }
 0x817   : > { %v7021_v33 = vrot.slane %v7020_v62, 1 }
 0x819   : > { %v7022_v7 = vadd.f32 %v7021_v33, %v7020_v62 }
 0x81b   : > { %v7024_v29 = vmul.f32 0.015625, %v7022_v7 }
 0x81d   : > { %v7025_v48 = vsub.f32 %v11836_v55, %v7024_v29  ;;  %v7026_v34 = vsub.f32 %v11839_v58, %v7024_v29  ;;  %v7027_v56 = vsub.f32 %v11842_v27, %v7024_v29  ;;  %v7028_v37 = vsub.f32 %v11845_v19, %v7024_v29 }
 0x81e   : > { %v7029_v49 = vsub.f32 %v11848_v41, %v7024_v29  ;;  %v7030_v25 = vsub.f32 %v11851_v2, %v7024_v29  ;;  %v7031_v44 = vsub.f32 %v11854_v21, %v7024_v29  ;;  %v7032_v47 = vsub.f32 %v11857_v9, %v7024_v29 }
 0x81f   : > { %v7033_v63 = vmul.f32 %v7025_v48, %v7025_v48  ;;  %v7034_v50 = vmul.f32 %v7026_v34, %v7026_v34  ;;  %v7035_v38 = vmul.f32 %v7027_v56, %v7027_v56  ;;  %v7036_v42 = vmul.f32 %v7028_v37, %v7028_v37 }
 0x820   : > { %v7037_v60 = vmul.f32 %v7029_v49, %v7029_v49  ;;  %v7038_v55 = vmul.f32 %v7030_v25, %v7030_v25  ;;  %v7039_v58 = vmul.f32 %v7031_v44, %v7031_v44  ;;  %v7040_v36 = vmul.f32 %v7032_v47, %v7032_v47 }
 0x821   : > { %v7041_v17 = vsel %vm3648_vm4, %v7033_v63, 0.0  ;;  %v7042_v12 = vsel %vm3648_vm4, %v7034_v50, 0.0  ;;  %v7044_v24 = vsel %vm3648_vm4, %v7035_v38, 0.0  ;;  %v7046_v15 = vsel %vm3648_vm4, %v7036_v42, 0.0  ;;  %v13851_v42 = vld [vmem:[%s17852_s26 + $0x40] sm:$0xff]  }
 0x822   : > { %v7043_v43 = vadd.f32 %v7042_v12, %v7041_v17  ;;  %v7048_v39 = vsel %vm3648_vm4, %v7037_v60, 0.0  ;;  %v7050_v30 = vsel %vm3648_vm4, %v7038_v55, 0.0  ;;  %v7052_v27 = vsel %vm3648_vm4, %v7039_v58, 0.0 }
 0x823   : > { %v7054_v51 = vsel %vm3648_vm4, %v7040_v36, 0.0 }
 0x824   : > { %v7045_v54 = vadd.f32 %v7044_v24, %v7043_v43 }
 0x826   : > { %v7047_v4 = vadd.f32 %v7046_v15, %v7045_v54  ;;  %v13852_v54 = vld [vmem:[%s17852_s26 + $0x48] sm:$0xff]   ;;  %v13853_v15 = vld [vmem:[%s17852_s26 + $0x50] sm:$0xff]  }
 0x828   : > { %v7049_v10 = vadd.f32 %v7048_v39, %v7047_v4  ;;  %v7355_v39 = vld [vmem:[#allocation5 + $0x2] sm:$0xff] }
 0x82a   : > { %v7051_v59 = vadd.f32 %v7050_v30, %v7049_v10  ;;  %v13854_v30 = vld [vmem:[%s17852_s26 + $0x58] sm:$0xff]  }
 0x82c   : > { %v7053_v31 = vadd.f32 %v7052_v27, %v7051_v59  ;;  %v13855_v27 = vld [vmem:[%s17852_s26 + $0x60] sm:$0xff]  }
 0x82e   : > { %v7055_v40 = vadd.f32 %v7054_v51, %v7053_v31 }
 0x830   : > { %v7056_v61 = vrot.slane %v7055_v40, 4 }
 0x832   : > { %v7057_v19 = vadd.f32 %v7056_v61, %v7055_v40 }
 0x834   : > { %v7058_v8 = vrot.slane %v7057_v19, 2 }
 0x836   : > { %v7059_v28 = vadd.f32 %v7058_v8, %v7057_v19  ;;  %v13856_v8 = vld [vmem:[%s17852_s26 + $0x68] sm:$0xff]  }
 0x838   : > { %v7060_v14 = vrot.slane %v7059_v28, 1 }
 0x83a   : > { %v7061_v1 = vadd.f32 %v7060_v14, %v7059_v28  ;;  %v13857_v14 = vld [vmem:[%s17852_s26 + $0x70] sm:$0xff]  }
 0x83c   : > { %v7062_v41 = vmul.f32 0.015625, %v7061_v1 }
 0x83e   : > { %v7063_v32 = vadd.f32 1e-05, %v7062_v41 }
 0x840   : > { %13936 = vrsqrt.f32 %v7063_v32 }
 0x84a   : > { %v13937_v0 = vpop.eup %13936 }
 0x84b   : > { %v7065_v3 = vmul.f32 %v13937_v0, %v7025_v48  ;;  %v7066_v20 = vmul.f32 %v13937_v0, %v7026_v34  ;;  %v7067_v2 = vmul.f32 %v13937_v0, %v7027_v56  ;;  %v7068_v46 = vmul.f32 %v13937_v0, %v7028_v37  ;;  %v13848_v56 = vld [vmem:[%s17852_s26 + $0x8] sm:$0xff]  }
 0x84c   : > { %v7069_v18 = vmul.f32 %v13937_v0, %v7029_v49  ;;  %v7070_v35 = vmul.f32 %v13937_v0, %v7030_v25  ;;  %v7071_v45 = vmul.f32 %v13937_v0, %v7031_v44  ;;  %v7072_v21 = vmul.f32 %v13937_v0, %v7032_v47  ;;  %v13849_v49 = vld [vmem:[%s17852_s26 + $0x10] sm:$0xff]   ;;  %v13858_v0 = vld [vmem:[%s17852_s26 + $0x78] sm:$0xff]  }
 0x84d   : > { %v7073_v23 = vmax.f32 %v7065_v3, 0.0  ;;  %v7074_v11 = vmax.f32 %v7066_v20, 0.0  ;;  %v7075_v26 = vmax.f32 %v7067_v2, 0.0  ;;  %v7076_v57 = vmax.f32 %v7068_v46, 0.0  ;;  %v7112_v47 = vld [vmem:[#allocation5] sm:$0xff]  ;;  %v13859_v20 = vld [vmem:[%s17852_s26 + $0x80] sm:$0xff]  }
 0x84e   : > { %v7077_v9 = vmax.f32 %v7069_v18, 0.0  ;;  %v7078_v16 = vmax.f32 %v7070_v35, 0.0  ;;  %v7079_v52 = vmax.f32 %v7071_v45, 0.0  ;;  %v7080_v13 = vmax.f32 %v7072_v21, 0.0  ;;  %v13860_v46 = vld [vmem:[%s17852_s26 + $0x88] sm:$0xff]   ;;  %v13861_v35 = vld [vmem:[%s17852_s26 + $0x90] sm:$0xff]  }
 0x84f   : > { %7102 = vst.msk [vmem:[#allocation5 + $0x11] sm:$0xff] %vm3648_vm4, %v7073_v23  ;;  %7103 = vst.msk [vmem:[#allocation5 + $0x21] sm:$0xff] %vm3648_vm4, %v7074_v11  ;;  %v13862_v23 = vld [vmem:[%s17852_s26 + $0x98] sm:$0xff]  }
 0x850   : > { %7104 = vst.msk [vmem:[#allocation5 + $0x31] sm:$0xff] %vm3648_vm4, %v7075_v26  ;;  %7105 = vst.msk [vmem:[#allocation5 + $0x41] sm:$0xff] %vm3648_vm4, %v7076_v57  ;;  %v13863_v26 = vld [vmem:[%s17852_s26 + $0xa0] sm:$0xff]  }
 0x851   : > { %7106 = vst.msk [vmem:[#allocation5 + $0x51] sm:$0xff] %vm3648_vm4, %v7077_v9  ;;  %7107 = vst.msk [vmem:[#allocation5 + $0x61] sm:$0xff] %vm3648_vm4, %v7078_v16  ;;  %v13864_v9 = vld [vmem:[%s17852_s26 + $0xa8] sm:$0xff]  }
 0x852   : > { %7108 = vst.msk [vmem:[#allocation5 + $0x71] sm:$0xff] %vm3648_vm4, %v7079_v52  ;;  %7109 = vst.msk [vmem:[#allocation5 + $0x81] sm:$0xff] %vm3648_vm4, %v7080_v13  ;;  %v13865_v52 = vld [vmem:[%s17852_s26 + $0xb0] sm:$0xff]  }
 0x856   : > { %v16084_v6 = vld [vmem:[#allocation5 + $0x11] sm:$0xff]  ;;  %v16086_v62 = vld [vmem:[#allocation5 + $0x21] sm:$0xff] }
 0x857   : > { %v16088_v33 = vld [vmem:[#allocation5 + $0x31] sm:$0xff]  ;;  %v7140_v7 = vpack.c.bf16 %v16084_v6, %v7132_v53  ;;  %v16095_v48 = vld [vmem:[#allocation5 + $0x41] sm:$0xff]  ;;  %v7623_v11 = vpack.c.bf16 %v16086_v62, %v16084_v6 }
 0x858   : > { %v16093_v29 = vpack.c.bf16 %v16088_v33, %v16086_v62  ;;  %v16097_v34 = vld [vmem:[#allocation5 + $0x51] sm:$0xff]  ;;  %v16115_v25 = vld [vmem:[#allocation5 + $0x61] sm:$0xff]  ;;  %v7624_v57 = vpack.c.bf16 %v16095_v48, %v16088_v33 }
 0x859   : > { %12724 = vmatprep.mubr.msk.bf16.mxu1 %vm3648_vm4, %v7140_v7  ;;  %v16105_v37 = vpack.c.bf16 %v16097_v34, %v16095_v48  ;;  %v16117_v44 = vld [vmem:[#allocation5 + $0x71] sm:$0xff]  ;;  %v7114_v17 = vld [vmem:[#allocation5 + $0x20] sm:$0xff]  ;;  %v7625_v16 = vpack.c.bf16 %v16115_v25, %v16097_v34  ;;  %v13866_v6 = vld [vmem:[%s17852_s26 + $0xb8] sm:$0xff]  }
 0x85a   : > { %12725 = vmatmul.mubr.msk.bf16.vlgmr.msra.gmra.mrb[32].mxu1 %vm3648_vm4, %v16093_v29  ;;  %v16119_v63 = vld [vmem:[#allocation5 + $0x10] sm:$0xff]  ;;  %v16123_v50 = vpack.c.bf16 %v16117_v44, %v16115_v25  ;;  %v7116_v43 = vld [vmem:[#allocation5 + $0x40] sm:$0xff]  ;;  %v13868_v48 = vld [vmem:[%s17852_s26 + $0xc8] sm:$0xff]  }
 0x85b   : > { %12728 = vmatprep.mubr.msk.bf16.mxu1 %vm3648_vm4, %v16105_v37  ;;  %12733 = vmatpush3.bf16.msra.mxu1 %v16057_v22  ;;  %v13850_v22 = vld [vmem:[%s17852_s26 + $0x18] sm:$0xff]   ;;  %v7120_v38 = vpack.c.bf16 %v16119_v63, %v7112_v47  ;;  %v7115_v12 = vld [vmem:[#allocation5 + $0x30] sm:$0xff]  ;;  %v7118_v4 = vld [vmem:[#allocation5 + $0x60] sm:$0xff]  ;;  %v7493_v3 = vpack.c.bf16 %v7114_v17, %v16119_v63 }
 0x85c   : > { %12734 = vmatprep.subr.bf16.mxu1 %v13848_v56  ;;  %v7117_v60 = vld [vmem:[#allocation5 + $0x50] sm:$0xff]  ;;  %v16135_v24 = vpack.c.bf16 %v7115_v12, %v7114_v17  ;;  %v16163_v31 = vld [vmem:[#allocation5 + $0x22] sm:$0xff]  ;;  %v7494_v2 = vpack.c.bf16 %v7116_v43, %v7115_v12  ;;  %v13872_v63 = vld [vmem:[%s17852_s26 + $0xe8] sm:$0xff]  }
 0x85d   : > { %v16140_v55 = vpack.c.bf16 %v7117_v60, %v7116_v43  ;;  %v7119_v58 = vld [vmem:[#allocation5 + $0x70] sm:$0xff]  ;;  %v16167_v40 = vld [vmem:[#allocation5 + $0x42] sm:$0xff]  ;;  %v7495_v18 = vpack.c.bf16 %v7118_v4, %v7117_v60  ;;  %v13876_v43 = vld [vmem:[%s17852_s26 + $0x108] sm:$0xff]  }
 0x85e   : > { %v16149_v10 = vld [vmem:[#allocation5 + $0x12] sm:$0xff]  ;;  %v16151_v36 = vpack.c.bf16 %v7119_v58, %v7118_v4  ;;  %v7361_v1 = vld [vmem:[#allocation5 + $0x62] sm:$0xff]  ;;  %v11334_v4 = vld [vmem:[%s17853_s5] ss:$0 sm:$0xff]  ;;  %s16653_s5 = sld [smem:[#allocation8 + $0x2]] }
 0x85f   : > { %12735 = vmatpush3.bf16.msra.mxu1 %v13848_v56  ;;  %v7363_v59 = vpack.c.bf16 %v16149_v10, %v7355_v39  ;;  %v16165_v51 = vld [vmem:[#allocation5 + $0x32] sm:$0xff]  ;;  %v16212_v45 = vld [vmem:[#allocation5 + $0x80] sm:$0xff]  ;;  %v7753_v62 = vpack.c.bf16 %v16163_v31, %v16149_v10  ;;  %v13874_v17 = vld [vmem:[%s17852_s26 + $0xf8] sm:$0xff]  }
 0x860   : > { %12736 = vmatprep.subr.bf16.mxu1 %v13849_v49  ;;  %v16169_v61 = vld [vmem:[#allocation5 + $0x52] sm:$0xff]  ;;  %v16173_v19 = vpack.c.bf16 %v16165_v51, %v16163_v31  ;;  %v7496_v21 = vpack.c.bf16 %v16212_v45, %v7119_v58  ;;  %v16237_v13 = vld [vmem:[#allocation5 + $0x81] sm:$0xff]  ;;  %v7754_v7 = vpack.c.bf16 %v16167_v40, %v16165_v51 }
 0x861   : > { %v16180_v28 = vpack.c.bf16 %v16169_v61, %v16167_v40  ;;  %v16189_v41 = vld [vmem:[#allocation5 + $0x72] sm:$0xff]  ;;  %v7626_v53 = vpack.c.bf16 %v16237_v13, %v16117_v44  ;;  %v7755_v34 = vpack.c.bf16 %v7361_v1, %v16169_v61  ;;  %v13869_v56 = vld [vmem:[%s17852_s26 + $0xd0] sm:$0xff]   ;;  %v13870_v44 = vld [vmem:[%s17852_s26 + $0xd8] sm:$0xff]  }
 0x862   : > { %12729 = vmatmul.mubr.msk.bf16.gmra.mrb[36].mxu1 %vm3648_vm4, %v16123_v50  ;;  %v16192_v32 = vpack.c.bf16 %v16189_v41, %v7361_v1  ;;  %v13867_v33 = vld [vmem:[%s17852_s26 + $0xc0] sm:$0xff]  }
 0x863   : > { %12737 = vmatpush3.bf16.msra.mxu1 %v13849_v49  ;;  %12740 = vmatprep.mubr.msk.bf16.mxu1 %vm3648_vm4, %v7120_v38  ;;  %v7752_v49 = vld [vmem:[#allocation5 + $0x82] sm:$0xff]  ;;  %v13871_v47 = vld [vmem:[%s17852_s26 + $0xe0] sm:$0xff]  }
 0x864   : > { %12738 = vmatprep.subr.bf16.mxu1 %v13850_v22  ;;  %v7756_v25 = vpack.c.bf16 %v7752_v49, %v16189_v41  ;;  %v7883_v38 = vld [vmem:[#allocation5 + $0x90] sm:$0xff] }
 0x865   : > { %v13875_v12 = vld [vmem:[%s17852_s26 + $0x100] sm:$0xff]  }
 0x866   : > { %v8013_v60 = vld [vmem:[#allocation5 + $0x91] sm:$0xff] }
 0x867   : > { %12739 = vmatpush3.bf16.msra.mxu1 %v13850_v22  ;;  %v13873_v22 = vld [vmem:[%s17852_s26 + $0xf0] sm:$0xff]  }
 0x868   : > { %12748 = vmatprep.subr.bf16.mxu1 %v13851_v42 }
 0x86a   : > { %12741 = vmatmul.mubr.msk.bf16.vlgmr.msra.gmra.mrb[32].mxu1 %vm3648_vm4, %v16135_v24 }
 0x86b   : > { %12744 = vmatprep.mubr.msk.bf16.mxu1 %vm3648_vm4, %v16140_v55  ;;  %12749 = vmatpush3.bf16.msra.mxu1 %v13851_v42  ;;  %v7887_v42 = vpack.c.bf16 %v7883_v38, %v16212_v45  ;;  %v13884_v45 = vld [vmem:[%s17854_s1 + $0xf0] sm:$0xff]  }
 0x86c   : > { %12750 = vmatprep.subr.bf16.mxu1 %v13852_v54 }
 0x86f   : > { %12751 = vmatpush3.bf16.msra.mxu1 %v13852_v54  ;;  %v13878_v54 = vld [vmem:[%s17852_s26 + $0x118] sm:$0xff]  }
 0x870   : > { %12752 = vmatprep.subr.bf16.mxu1 %v13853_v15 }
 0x872   : > { %12745 = vmatmul.mubr.msk.bf16.gmra.mrb[36].mxu1 %vm3648_vm4, %v16151_v36 }
 0x873   : > { %12753 = vmatpush3.bf16.msra.mxu1 %v13853_v15  ;;  %12756 = vmatprep.mubr.msk.bf16.mxu1 %vm3648_vm4, %v7363_v59 }
 0x874   : > { %12754 = vmatprep.subr.bf16.mxu1 %v13854_v30 }
 0x877   : > { %12755 = vmatpush3.bf16.msra.mxu1 %v13854_v30 }
 0x878   : > { %12764 = vmatprep.subr.bf16.mxu1 %v13855_v27 }
 0x87a   : > { %12757 = vmatmul.mubr.msk.bf16.vlgmr.msra.gmra.mrb[32].mxu1 %vm3648_vm4, %v16173_v19 }
 0x87b   : > { %12760 = vmatprep.mubr.msk.bf16.mxu1 %vm3648_vm4, %v16180_v28  ;;  %12765 = vmatpush3.bf16.msra.mxu1 %v13855_v27 }
 0x87c   : > { %12766 = vmatprep.subr.bf16.mxu1 %v13856_v8 }
 0x87f   : > { %12767 = vmatpush3.bf16.msra.mxu1 %v13856_v8 }
 0x880   : > { %12768 = vmatprep.subr.bf16.mxu1 %v13857_v14 }
 0x882   : > { %12761 = vmatmul.mubr.msk.bf16.gmra.mrb[36].mxu1 %vm3648_vm4, %v16192_v32 }
 0x883   : > { %12769 = vmatpush3.bf16.msra.mxu1 %v13857_v14  ;;  %12772 = vmatprep.mubr.msk.bf16.mxu1 %vm3648_vm4, %v7493_v3  ;;  %v7111_v3 = vld [vmem:[%s17797_s11 + $0x8] sm:$0xff] }
 0x884   : > { %12770 = vmatprep.subr.bf16.mxu1 %v13858_v0 }
 0x887   : > { %12771 = vmatpush3.bf16.msra.mxu1 %v13858_v0 }
 0x888   : > { %12780 = vmatprep.subr.bf16.mxu1 %v13859_v20 }
 0x88a   : > { %12773 = vmatmul.mubr.msk.bf16.vlgmr.msra.gmra.mrb[32].mxu1 %vm3648_vm4, %v7494_v2  ;;  %v13880_v2 = vld [vmem:[%s17854_s1 + $0xe0] sm:$0xff]  }
 0x88b   : > { %12776 = vmatprep.mubr.msk.bf16.mxu1 %vm3648_vm4, %v7495_v18  ;;  %12781 = vmatpush3.bf16.msra.mxu1 %v13859_v20  ;;  %v13879_v20 = vld [vmem:[%s17854_s1 + $0x20] sm:$0xff]   ;;  %v13882_v18 = vld [vmem:[%s17854_s1 + $0xe8] sm:$0xff]  }
 0x88c   : > { %12782 = vmatprep.subr.bf16.mxu1 %v13860_v46 }
 0x88f   : > { %12783 = vmatpush3.bf16.msra.mxu1 %v13860_v46  ;;  %v13881_v46 = vld [vmem:[%s17854_s1 + $0x28] sm:$0xff]  }
 0x890   : > { %12784 = vmatprep.subr.bf16.mxu1 %v13861_v35 }
 0x892   : > { %12777 = vmatmul.mubr.msk.bf16.gmra.mrb[36].mxu1 %vm3648_vm4, %v7496_v21  ;;  %v13885_v21 = vld [vmem:[%s17854_s1 + $0x38] sm:$0xff]  }
 0x893   : > { %12785 = vmatpush3.bf16.msra.mxu1 %v13861_v35  ;;  %12788 = vmatprep.mubr.msk.bf16.mxu1 %vm3648_vm4, %v7623_v11  ;;  %v13883_v35 = vld [vmem:[%s17854_s1 + $0x30] sm:$0xff]  }
 0x894   : > { %12786 = vmatprep.subr.bf16.mxu1 %v13862_v23 }
 0x897   : > { %12787 = vmatpush3.bf16.msra.mxu1 %v13862_v23  ;;  %v13886_v23 = vld [vmem:[%s17854_s1 + $0xf8] sm:$0xff]  }
 0x898   : > { %12796 = vmatprep.subr.bf16.mxu1 %v13863_v26 }
 0x89a   : > { %12789 = vmatmul.mubr.msk.bf16.vlgmr.msra.gmra.mrb[32].mxu1 %vm3648_vm4, %v7624_v57 }
 0x89b   : > { %12792 = vmatprep.mubr.msk.bf16.mxu1 %vm3648_vm4, %v7625_v16  ;;  %12797 = vmatpush3.bf16.msra.mxu1 %v13863_v26 }
 0x89c   : > { %12798 = vmatprep.subr.bf16.mxu1 %v13864_v9 }
 0x89f   : > { %12799 = vmatpush3.bf16.msra.mxu1 %v13864_v9 }
 0x8a0   : > { %12800 = vmatprep.subr.bf16.mxu1 %v13865_v52 }
 0x8a2   : > { %12793 = vmatmul.mubr.msk.bf16.gmra.mrb[36].mxu1 %vm3648_vm4, %v7626_v53 }
 0x8a3   : > { %12801 = vmatpush3.bf16.msra.mxu1 %v13865_v52  ;;  %12804 = vmatprep.mubr.msk.bf16.mxu1 %vm3648_vm4, %v7753_v62 }
 0x8a4   : > { %12802 = vmatprep.subr.bf16.mxu1 %v13866_v6 }
 0x8a7   : > { %12803 = vmatpush3.bf16.msra.mxu1 %v13866_v6 }
 0x8a8   : > { %12812 = vmatprep.subr.bf16.mxu1 %v13867_v33 }
 0x8aa   : > { %12805 = vmatmul.mubr.msk.bf16.vlgmr.msra.gmra.mrb[32].mxu1 %vm3648_vm4, %v7754_v7 }
 0x8ab   : > { %12808 = vmatprep.mubr.msk.bf16.mxu1 %vm3648_vm4, %v7755_v34  ;;  %12813 = vmatpush3.bf16.msra.mxu1 %v13867_v33 }
 0x8ac   : > { %12814 = vmatprep.subr.bf16.mxu1 %v13868_v48 }
 0x8af   : > { %12815 = vmatpush3.bf16.msra.mxu1 %v13868_v48 }
 0x8b0   : > { %12816 = vmatprep.subr.bf16.mxu1 %v13869_v56 }
 0x8b2   : > { %12809 = vmatmul.mubr.msk.bf16.gmra.mrb[36].mxu1 %vm3648_vm4, %v7756_v25 }
 0x8b3   : > { %12817 = vmatpush3.bf16.msra.mxu1 %v13869_v56  ;;  %12820 = vmatprep.mubr.msk.bf16.mxu1 %vm3648_vm4, %v16135_v24  ;;  %v8017_v24 = vpack.c.bf16 %v8013_v60, %v16237_v13 }
 0x8b4   : > { %12818 = vmatprep.subr.bf16.mxu1 %v13870_v44 }
 0x8b7   : > { %12819 = vmatpush3.bf16.msra.mxu1 %v13870_v44 }
 0x8b8   : > { %12828 = vmatprep.subr.bf16.mxu1 %v13871_v47 }
 0x8ba   : > { %12821 = vmatmul.mubr.msk.bf16.vlgmr.msra.gmra.mrb[32].mxu1 %vm3648_vm4, %v16140_v55  ;;  %v7110_v55 = vld [vmem:[%s17797_s11] sm:$0xff] }
 0x8bb   : > { %12824 = vmatprep.mubr.msk.bf16.mxu1 %vm3648_vm4, %v16151_v36  ;;  %12829 = vmatpush3.bf16.msra.mxu1 %v13871_v47 }
 0x8bc   : > { %12830 = vmatprep.subr.bf16.mxu1 %v13872_v63  ;;  %12876 = vmatprep.mubr.msk.f32.mxu0 %vm3648_vm4, %v7110_v55 }
 0x8bf   : > { %12831 = vmatpush3.bf16.msra.mxu1 %v13872_v63 }
 0x8c0   : > { %12832 = vmatprep.subr.bf16.mxu1 %v13873_v22 }
 0x8c2   : > { %12825 = vmatmul.mubr.msk.bf16.gmra.mrb[36].mxu1 %vm3648_vm4, %v7887_v42 }
 0x8c3   : > { %12833 = vmatpush3.bf16.msra.mxu1 %v13873_v22  ;;  %12836 = vmatprep.mubr.msk.bf16.mxu1 %vm3648_vm4, %v16093_v29  ;;  %v13877_v29 = vld [vmem:[%s17852_s26 + $0x110] sm:$0xff]  }
 0x8c4   : > { %12834 = vmatprep.subr.bf16.mxu1 %v13874_v17 }
 0x8c7   : > { %12835 = vmatpush3.bf16.msra.mxu1 %v13874_v17 }
 0x8c8   : > { %12844 = vmatprep.subr.bf16.mxu1 %v13875_v12 }
 0x8ca   : > { %12837 = vmatmul.mubr.msk.bf16.vlgmr.msra.gmra.mrb[32].mxu1 %vm3648_vm4, %v16105_v37  ;;  %v8143_v37 = vld [vmem:[#allocation5 + $0x92] sm:$0xff] }
 0x8cb   : > { %12840 = vmatprep.mubr.msk.bf16.mxu1 %vm3648_vm4, %v16123_v50  ;;  %12845 = vmatpush3.bf16.msra.mxu1 %v13875_v12  ;;  %v8147_v50 = vpack.c.bf16 %v8143_v37, %v7752_v49 }
 0x8cc   : > { %12846 = vmatprep.subr.bf16.mxu1 %v13876_v43 }
 0x8cf   : > { %12847 = vmatpush3.bf16.msra.mxu1 %v13876_v43 }
 0x8d0   : > { %12848 = vmatprep.subr.bf16.mxu1 %v13877_v29 }
 0x8d2   : > { %12841 = vmatmul.mubr.msk.bf16.gmra.mrb[36].mxu1 %vm3648_vm4, %v8017_v24 }
 0x8d3   : > { %12849 = vmatpush3.bf16.msra.mxu1 %v13877_v29  ;;  %12852 = vmatprep.mubr.msk.bf16.mxu1 %vm3648_vm4, %v16173_v19 }
 0x8d4   : > { %12850 = vmatprep.subr.bf16.mxu1 %v13878_v54 }
 0x8d7   : > { %12851 = vmatpush3.bf16.msra.mxu1 %v13878_v54 }
 0x8d8   : > { %12963 = vmatprep.subr.bf16.mxu1 %v17823_v5 }
 0x8da   : > { %12853 = vmatmul.mubr.msk.bf16.vlgmr.msra.gmra.mrb[32].mxu1 %vm3648_vm4, %v16180_v28 }
 0x8db   : > { %12856 = vmatprep.mubr.msk.bf16.mxu1 %vm3648_vm4, %v16192_v32  ;;  %12964 = vmatpush3.bf16.msra.mxu1 %v13880_v2  ;;  %v13905_v2 = vld [vmem:[%s17854_s1 + $0x70] sm:$0xff]  }
 0x8dc   : > { %12965 = vmatprep.subr.bf16.mxu1 %v17823_v5 }
 0x8df   : > { %12966 = vmatpush3.bf16.msra.mxu1 %v13882_v18 }
 0x8e0   : > { %12967 = vmatprep.subr.bf16.mxu1 %v17823_v5 }
 0x8e2   : > { %12857 = vmatmul.mubr.msk.bf16.gmra.mrb[36].mxu1 %vm3648_vm4, %v8147_v50 }
 0x8e3   : > { %12971 = vmatprep.mubr.msk.bf16.mxu1 %vm14070_vm7, %v17823_v5  ;;  %12968 = vmatpush3.bf16.msra.mxu1 %v13884_v45  ;;  %v13909_v45 = vld [vmem:[%s17854_s1 + $0x80] sm:$0xff]  }
 0x8e4   : > { %12969 = vmatprep.subr.bf16.mxu1 %v17823_v5 }
 0x8e7   : > { %12970 = vmatpush3.bf16.msra.mxu1 %v13886_v23  ;;  %v13910_v23 = vld [vmem:[%s17854_s1 + $0x88] sm:$0xff]  }
 0x9ad   : > { %v12854_v15 = vpop.f32.mrb[32].mxu1 }
 0x9ae   : > { %v8227_v58 = vpop.f32.mrb[33].mxu1  ;;  %v8275_v10 = vadd.f32 %v12854_v15, %v11334_v4 }
 0x9af   : > { %v12855_v39 = vpop.f32.mrb[34].mxu1  ;;  %v8273_v59 = vadd.f32 %v11334_v4, %v8227_v58  ;;  %v13889_v58 = vld [vmem:[%s17854_s1] sm:$0xff]  }
 0x9b0   : > { %v8276_v36 = vadd.f32 %v12855_v39, %v11334_v4  ;;  %v8230_v30 = vpop.f32.mrb[35].mxu1 }
 0x9b1   : > { %v8274_v27 = vadd.f32 %v11334_v4, %v8230_v30 }
 0x9b2   : > { %v13087_v31 = vpack.c.bf16 %v8276_v36, %v8275_v10 }
 0x9b3   : > { %v13083_v51 = vpack.c.bf16 %v8274_v27, %v8273_v59  ;;  %v13892_v27 = vld [vmem:[%s17854_s1 + $0x8] sm:$0xff]  }
 0x9b5   : > { %v12858_v40 = vpop.f32.mrb[36].mxu1  ;;  %13084 = vmatprep.subr.bf16.mxu0 %v13083_v51 }
 0x9b6   : > { %v8243_v61 = vpop.f32.mrb[37].mxu1  ;;  %13086 = vmatpush3.bf16.msra.mxu0 %v13083_v51  ;;  %v8279_v8 = vadd.f32 %v12858_v40, %v11334_v4  ;;  %v13894_v51 = vld [vmem:[%s17854_s1 + $0x18] sm:$0xff]  }
 0x9b7   : > { %v12859_v19 = vpop.f32.mrb[38].mxu1  ;;  %13088 = vmatprep.subr.bf16.mxu0 %v13087_v31  ;;  %v8277_v1 = vadd.f32 %v11334_v4, %v8243_v61 }
 0x9b8   : > { %v8280_v28 = vadd.f32 %v12859_v19, %v11334_v4  ;;  %v8246_v14 = vpop.f32.mrb[39].mxu1  ;;  %v13897_v19 = vld [vmem:[%s17854_s1 + $0x40] sm:$0xff]  }
 0x9b9   : > { %v8278_v41 = vadd.f32 %v11334_v4, %v8246_v14  ;;  %v13899_v14 = vld [vmem:[%s17854_s1 + $0x50] sm:$0xff]  }
 0x9ba   : > { %v13095_v32 = vpack.c.bf16 %v8280_v28, %v8279_v8  ;;  %13090 = vmatpush3.bf16.msra.mxu0 %v13087_v31  ;;  %v13893_v31 = vld [vmem:[%s17854_s1 + $0x10] sm:$0xff]   ;;  %v13898_v28 = vld [vmem:[%s17854_s1 + $0x48] sm:$0xff]  }
 0x9bb   : > { %v13091_v0 = vpack.c.bf16 %v8278_v41, %v8277_v1  ;;  %v13900_v1 = vld [vmem:[%s17854_s1 + $0x58] sm:$0xff]  }
 0x9bd   : > { %13092 = vmatprep.subr.bf16.mxu0 %v13091_v0 }
 0x9be   : > { %13094 = vmatpush3.bf16.msra.mxu0 %v13091_v0  ;;  %v13903_v0 = vld [vmem:[%s17854_s1 + $0x60] sm:$0xff]  }
 0x9bf   : > { %13096 = vmatprep.subr.bf16.mxu0 %v13095_v32 }
 0x9c2   : > { %13098 = vmatpush3.bf16.msra.mxu0 %v13095_v32 }
 0x9c3   : > { %12879 = vmatprep.subr.bf16.mxu0 %v17823_v5 }
 0x9c5   : > { %12877 = vmatmul.mubr.msk.f32.vlgmr.msra.gmra.mrb[48].mxu0 %vm3648_vm4, %v7111_v3 }
 0x9c6   : > { %12887 = vmatprep.mubr.msk.bf16.mxu0 %vm14070_vm7, %v17823_v5  ;;  %12880 = vmatpush3.bf16.msra.mxu0 %v13879_v20  ;;  %v13904_v20 = vld [vmem:[%s17854_s1 + $0x68] sm:$0xff]  }
 0x9c7   : > { %12881 = vmatprep.subr.bf16.mxu0 %v17823_v5 }
 0x9ca   : > { %12882 = vmatpush3.bf16.msra.mxu0 %v13881_v46  ;;  %v13906_v46 = vld [vmem:[%s17854_s1 + $0x78] sm:$0xff]  }
 0x9cb   : > { %12883 = vmatprep.subr.bf16.mxu0 %v17823_v5 }
 0x9ce   : > { %12884 = vmatpush3.bf16.msra.mxu0 %v13883_v35 }
 0x9cf   : > { %12885 = vmatprep.subr.bf16.mxu0 %v17823_v5 }
 0x9d2   : > { %12886 = vmatpush3.bf16.msra.mxu0 %v13885_v21 }
 0x9d3   : > { %12891 = vmatprep.subr.bf16.mxu0 %v17823_v5 }
 0xa98   : > { %v12878_v11 = vpop.f32.mrb[48].mxu0 }
 0xa99   : > { %v8363_v26 = vsel %vm3648_vm4, %v12878_v11, 0.0  ;;  %v8353_v57 = vpop.f32.mrb[49].mxu0 }
 0xa9a   : > { %v8362_v9 = vsel %vm3648_vm4, %v8353_v57, 0.0 }
 0xa9b   : > { %v8364_v16 = vadd.f32 %v8363_v26, %v8362_v9  ;;  %v13912_v26 = vld [vmem:[%s17854_s1 + $0x98] sm:$0xff]  }
 0xa9d   : > { %v8365_v52 = vrot.slane %v8364_v16, 4 }
 0xa9f   : > { %v8366_v13 = vadd.f32 %v8365_v52, %v8364_v16  ;;  %v13915_v16 = vld [vmem:[%s17854_s1 + $0xa0] sm:$0xff]  }
 0xaa1   : > { %v8367_v53 = vrot.slane %v8366_v13, 2 }
 0xaa3   : > { %v8368_v6 = vadd.f32 %v8367_v53, %v8366_v13  ;;  %v13916_v13 = vld [vmem:[%s17854_s1 + $0xa8] sm:$0xff]   ;;  %v13917_v53 = vld [vmem:[%s17854_s1 + $0xb0] sm:$0xff]  }
 0xaa5   : > { %v8369_v62 = vrot.slane %v8368_v6, 1 }
 0xaa7   : > { %v8370_v33 = vadd.f32 %v8369_v62, %v8368_v6  ;;  %v13918_v6 = vld [vmem:[%s17854_s1 + $0xb8] sm:$0xff]  }
 0xaa9   : > { %v8372_v7 = vmul.f32 0.0625, %v8370_v33 }
 0xaab   : > { %v8373_v48 = vsub.f32 %v8353_v57, %v8372_v7  ;;  %v8374_v34 = vsub.f32 %v12878_v11, %v8372_v7  ;;  %v13911_v11 = vld [vmem:[%s17854_s1 + $0x90] sm:$0xff]   ;;  %v13921_v7 = vld [vmem:[%s17854_s1 + $0xc0] sm:$0xff]  }
 0xaad   : > { %v8375_v56 = vmul.f32 %v8373_v48, %v8373_v48  ;;  %v8376_v49 = vmul.f32 %v8374_v34, %v8374_v34 }
 0xaaf   : > { %v8377_v25 = vsel %vm3648_vm4, %v8375_v56, 0.0  ;;  %v8378_v44 = vsel %vm3648_vm4, %v8376_v49, 0.0  ;;  %v13923_v56 = vld [vmem:[%s17854_s1 + $0xd0] sm:$0xff]   ;;  %v13924_v49 = vld [vmem:[%s17854_s1 + $0xd8] sm:$0xff]  }
 0xab0   : > { %v8379_v47 = vadd.f32 %v8378_v44, %v8377_v25 }
 0xab2   : > { %v8380_v63 = vrot.slane %v8379_v47, 4 }
 0xab4   : > { %v8381_v22 = vadd.f32 %v8380_v63, %v8379_v47  ;;  %v13927_v47 = vld [vmem:[%s17854_s1 + $0x100] sm:$0xff]  }
 0xab6   : > { %v8382_v38 = vrot.slane %v8381_v22, 2 }
 0xab8   : > { %v8383_v42 = vadd.f32 %v8382_v38, %v8381_v22  ;;  %v13928_v22 = vld [vmem:[%s17854_s1 + $0x108] sm:$0xff]   ;;  %v13929_v38 = vld [vmem:[%s17854_s1 + $0x110] sm:$0xff]  }
 0xaba   : > { %v8384_v17 = vrot.slane %v8383_v42, 1 }
 0xabc   : > { %v8385_v12 = vadd.f32 %v8384_v17, %v8383_v42  ;;  %v13930_v42 = vld [vmem:[%s17854_s1 + $0x118] sm:$0xff]  }
 0xabe   : > { %v8386_v43 = vmul.f32 0.0625, %v8385_v12 }
 0xac0   : > { %v8387_v29 = vadd.f32 1e-05, %v8386_v43 }
 0xac2   : > { %13938 = vrsqrt.f32 %v8387_v29  ;;  %v17825_v29 = vmov 0.0|0.0  }
 0xac3   : > { %13099 = vmatprep.subr.bf16.mxu1 %v17825_v29 }
 0xacc   : > { %v13939_v60 = vpop.eup %13938 }
 0xacd   : > { %v8389_v24 = vmul.f32 %v13939_v60, %v8373_v48  ;;  %v8390_v54 = vmul.f32 %v13939_v60, %v8374_v34  ;;  %v13922_v34 = vld [vmem:[%s17854_s1 + $0xc8] sm:$0xff]   ;;  %v16521_v60 = vld [vmem:[%s16518_s6 + $0x70] sm:$0xff]  ;;  %s16701_s1 = sld [smem:[#allocation7]] }
 0xace   : > { %1005 = vst.msk [vmem:[#allocation3 + $0xc1] sm:$0xff] %vm934_vm9, %v16521_v60 }
 0xacf   : > { %v8391_v37 = vmax.f32 %v8389_v24, 0.0  ;;  %v8392_v50 = vmax.f32 %v8390_v54, 0.0  ;;  %v16524_v24 = vld [vmem:[%s16518_s6 + $0x78] sm:$0xff]  ;;  %v16527_v54 = vld [vmem:[%s16518_s6 + $0x80] sm:$0xff] }
 0xad0   : > { %1006 = vst.msk [vmem:[#allocation3 + $0xc9] sm:$0xff] %vm934_vm9, %v16524_v24  ;;  %1007 = vst.msk [vmem:[#allocation3 + $0xd9] sm:$0xff] %vm934_vm9, %v16527_v54 }
 0xad1   : > { %v8402_v55 = vcombine.high %v8391_v37, %v8391_v37  ;;  %v8403_v15 = vcombine.high %v8392_v50, %v8392_v50  ;;  %8408 = vst.msk [vmem:[#allocation6 + $0x9] sm:$0xf] %vm8407_vm8, %v8391_v37  ;;  %8410 = vst.msk [vmem:[#allocation6 + $0x19] sm:$0xf] %vm8407_vm8, %v8392_v50  ;;  %v919_v37 = vld [vmem:[%s16518_s6 + $0x88] sm:$0xff]  ;;  %v920_v50 = vld [vmem:[%s16518_s6 + $0x90] sm:$0xff] }
 0xad2   : > { %1008 = vst.msk [vmem:[#allocation3 + $0xe1] sm:$0xff] %vm934_vm9, %v919_v37  ;;  %1009 = vst.msk [vmem:[#allocation3 + $0xf1] sm:$0xff] %vm934_vm9, %v920_v50 }
 0xad3   : > { %8409 = vst.msk [vmem:[#allocation6 + $0x11] sm:$0xf] %vm8407_vm8, %v8402_v55  ;;  %8411 = vst.msk [vmem:[#allocation6 + $0x21] sm:$0xf] %vm8407_vm8, %v8403_v15  ;;  %v921_v55 = vld [vmem:[%s16518_s6 + $0x98] sm:$0xff]  ;;  %v902_v15 = vld [vmem:[%s16518_s6] sm:$0xff] }
 0xad4   : > { %1010 = vst.msk [vmem:[#allocation3 + $0xf9] sm:$0xff] %vm934_vm9, %v921_v55  ;;  %991 = vst.msk [vmem:[#allocation3 + $0x19] sm:$0xff] %vm934_vm9, %v902_v15 }
 0xad8   : > { %v13887_v4 = vld [vmem:[#allocation6 + $0x1] ss:$8 sps:$4 sm:$0xff]  }
 0xad9   : > { %v13895_v61 = vld [vmem:[#allocation6] ss:$8 sps:$4 sm:$0xff]   ;;  %v16750_v60 = vld [vmem:[#allocation3 + $0xf0] sm:$0xff] }
 0xada   : > { %v13888_v39 = vld [vmem:[#allocation6 + $0x11] ss:$8 sps:$4 sm:$0xff]   ;;  %v13891_v36 = vld [vmem:[#allocation6 + $0x21] ss:$8 sps:$4 sm:$0xff]  }
 0xadb   : > { %v13890_v10 = vld [vmem:[#allocation6 + $0x11] ss:$8 sps:$4 sm:$0xff]   ;;  %v8446_v30 = vpack.c.bf16 %v13888_v39, %v13887_v4  ;;  %v13901_v32 = vld [vmem:[#allocation6 + $0x2] ss:$8 sps:$4 sm:$0xff]  }
 0xadc   : > { %v9065_v59 = vpack.c.bf16 %v13891_v36, %v13890_v10  ;;  %v13896_v40 = vld [vmem:[#allocation6 + $0x10] ss:$8 sps:$4 sm:$0xff]   ;;  %v13926_v44 = vld [vmem:[#allocation6 + $0x20] ss:$8 sps:$4 sm:$0xff]  }
 0xadd   : > { %12888 = vmatmul.mubr.msk.bf16.vlgmr.msra.gmra.mrb[52].mxu0 %vm3648_vm4, %v8446_v30  ;;  %v8425_v8 = vpack.c.bf16 %v13896_v40, %v13895_v61  ;;  %v13902_v41 = vld [vmem:[#allocation6 + $0x12] ss:$8 sps:$4 sm:$0xff]   ;;  %v13932_v12 = vld [vmem:[#allocation6 + $0x22] ss:$8 sps:$4 sm:$0xff]  }
 0xade   : > { %12892 = vmatpush3.bf16.msra.mxu0 %v13889_v58  ;;  %12972 = vmatmul.mubr.msk.bf16.vlgmr.msra.gmra.mrb[40].mxu1 %vm3648_vm4, %v9065_v59  ;;  %v8604_v3 = vpack.c.bf16 %v13902_v41, %v13901_v32  ;;  %v13907_v18 = vld [vmem:[#allocation6 + $0x8] ss:$8 sps:$4 sm:$0xff]   ;;  %v13908_v35 = vld [vmem:[#allocation6 + $0x18] ss:$8 sps:$4 sm:$0xff]   ;;  %v16696_v32 = vstv %s16651_s3  ;;  %s14073_s3 = smov [#allocation12]  }
 0xadf   : > { %12893 = vmatprep.subr.bf16.mxu0 %v17823_v5  ;;  %12899 = vmatprep.mubr.msk.bf16.mxu0 %vm14070_vm7, %v17823_v5  ;;  %v8696_v21 = vpack.c.bf16 %v13908_v35, %v13907_v18  ;;  %v13913_v57 = vld [vmem:[#allocation6 + $0x9] ss:$8 sps:$4 sm:$0xff]   ;;  %v13914_v9 = vld [vmem:[#allocation6 + $0x19] ss:$8 sps:$4 sm:$0xff]   ;;  %v16707_v35 = vstv %s16657_s7  ;;  %s17701_s7 = sand.u32 1, %s14057_s28  }
 0xae0   : > { %12991 = vmatprep.mubr.msk.f32.mxu1 %vm14070_vm7, %v17823_v5  ;;  %v8788_v52 = vpack.c.bf16 %v13914_v9, %v13913_v57  ;;  %v13919_v62 = vld [vmem:[#allocation6 + $0xa] ss:$8 sps:$4 sm:$0xff]   ;;  %v13920_v33 = vld [vmem:[#allocation6 + $0x1a] ss:$8 sps:$4 sm:$0xff]  }
 0xae1   : > { %v8880_v48 = vpack.c.bf16 %v13920_v33, %v13919_v62  ;;  %v13925_v25 = vld [vmem:[#allocation6 + $0x10] ss:$8 sps:$4 sm:$0xff]   ;;  %v904_v58 = vld [vmem:[%s16518_s6 + $0x10] sm:$0xff]  ;;  %v905_v39 = vld [vmem:[%s16518_s6 + $0x18] sm:$0xff] }
 0xae2   : > { %12894 = vmatpush3.bf16.msra.mxu0 %v13892_v27  ;;  %v8973_v63 = vpack.c.bf16 %v13926_v44, %v13925_v25  ;;  %v13931_v17 = vld [vmem:[#allocation6 + $0x12] ss:$8 sps:$4 sm:$0xff]   ;;  %993 = vst.msk [vmem:[#allocation3 + $0x31] sm:$0xff] %vm934_vm9, %v904_v58  ;;  %994 = vst.msk [vmem:[#allocation3 + $0x39] sm:$0xff] %vm934_vm9, %v905_v39  ;;  %v9425_v18 = vld [vmem:[#allocation3 + $0xc1] sm:$0xff] }
 0xae3   : > { %12895 = vmatprep.subr.bf16.mxu0 %v17823_v5  ;;  %v9157_v43 = vpack.c.bf16 %v13932_v12, %v13931_v17  ;;  %v903_v4 = vld [vmem:[%s16518_s6 + $0x8] sm:$0xff]  ;;  %v922_v36 = vld [vmem:[%s16518_s6 + $0xa0] sm:$0xff]  ;;  %v9459_v9 = vmul.f32 %v16696_v32, %v9425_v18  ;;  %v16736_v44 = vld [vmem:[#allocation3 + $0xe1] sm:$0xff] }
 0xae4   : > { %992 = vst.msk [vmem:[#allocation3 + $0x21] sm:$0xff] %vm934_vm9, %v903_v4  ;;  %1011 = vst.msk [vmem:[#allocation3 + $0x109] sm:$0xff] %vm934_vm9, %v922_v36  ;;  %v906_v40 = vld [vmem:[%s16518_s6 + $0x20] sm:$0xff]  ;;  %v16723_v33 = vld [vmem:[#allocation3 + $0xd8] sm:$0xff]  ;;  %v16763_v4 = vstv %s16676_s4 }
 0xae5   : > { %995 = vst.msk [vmem:[#allocation3 + $0x49] sm:$0xff] %vm934_vm9, %v906_v40  ;;  %v9426_v57 = vld [vmem:[#allocation3 + $0xc9] sm:$0xff]  ;;  %v16752_v24 = vld [vmem:[#allocation3 + $0xf8] sm:$0xff] }
 0xae6   : > { %12896 = vmatpush3.bf16.msra.mxu0 %v13893_v31  ;;  %v16754_v54 = vld [vmem:[#allocation3 + $0xf1] sm:$0xff]  ;;  %v16760_v15 = vld [vmem:[#allocation3 + $0xf9] sm:$0xff]  ;;  %v9410_v40 = vld [vmem:[#allocation3 + $0x9] sm:$0xff] }
 0xae7   : > { %12897 = vmatprep.subr.bf16.mxu0 %v17823_v5  ;;  %v16765_v58 = vld [vmem:[#allocation3 + $0xf2] sm:$0xff]  ;;  %v16767_v39 = vld [vmem:[#allocation3 + $0xfa] sm:$0xff] }
 0xaea   : > { %12898 = vmatpush3.bf16.msra.mxu0 %v13894_v51  ;;  %v923_v51 = vld [vmem:[%s16518_s6 + $0xa8] sm:$0xff] }
 0xaeb   : > { %12903 = vmatprep.subr.bf16.mxu0 %v17823_v5  ;;  %1012 = vst.msk [vmem:[#allocation3 + $0x111] sm:$0xff] %vm934_vm9, %v923_v51  ;;  %v16774_v51 = vstv %s16681_s13 }
 0xaed   : > { %12900 = vmatmul.mubr.msk.bf16.vlgmr.msra.gmra.mrb[56].mxu0 %vm3648_vm4, %v8425_v8  ;;  %v16688_v8 = vstv %s16550_s29 }
 0xaee   : > { %12904 = vmatpush3.bf16.msra.mxu0 %v13897_v19  ;;  %12911 = vmatprep.mubr.msk.bf16.mxu0 %vm14070_vm7, %v17823_v5 }
 0xaef   : > { %12905 = vmatprep.subr.bf16.mxu0 %v17823_v5 }
 0xaf2   : > { %12906 = vmatpush3.bf16.msra.mxu0 %v13898_v28  ;;  %v907_v28 = vld [vmem:[%s16518_s6 + $0x28] sm:$0xff] }
 0xaf3   : > { %12907 = vmatprep.subr.bf16.mxu0 %v17823_v5  ;;  %996 = vst.msk [vmem:[#allocation3 + $0x51] sm:$0xff] %vm934_vm9, %v907_v28  ;;  %v9508_v28 = vld [vmem:[#allocation3 + $0xa] sm:$0xff] }
 0xaf6   : > { %12908 = vmatpush3.bf16.msra.mxu0 %v13899_v14  ;;  %v924_v14 = vld [vmem:[%s16518_s6 + $0xb0] sm:$0xff] }
 0xaf7   : > { %12909 = vmatprep.subr.bf16.mxu0 %v17823_v5  ;;  %1013 = vst.msk [vmem:[#allocation3 + $0x121] sm:$0xff] %vm934_vm9, %v924_v14 }
 0xafa   : > { %12910 = vmatpush3.bf16.msra.mxu0 %v13900_v1  ;;  %v925_v1 = vld [vmem:[%s16518_s6 + $0xb8] sm:$0xff] }
 0xafb   : > { %12915 = vmatprep.subr.bf16.mxu0 %v17823_v5  ;;  %1014 = vst.msk [vmem:[#allocation3 + $0x129] sm:$0xff] %vm934_vm9, %v925_v1  ;;  %v10146_v1 = vmul.f32 %v16774_v51, %v16765_v58 }
 0xafd   : > { %12912 = vmatmul.mubr.msk.bf16.vlgmr.msra.gmra.mrb[60].mxu0 %vm3648_vm4, %v8604_v3  ;;  %v9343_v3 = vld [vmem:[#allocation3] sm:$0xff] }
 0xafe   : > { %12916 = vmatpush3.bf16.msra.mxu0 %v13903_v0  ;;  %12923 = vmatprep.mubr.msk.bf16.mxu0 %vm14070_vm7, %v17823_v5  ;;  %v16699_v0 = vstv %s16653_s5  ;;  %s13971_s5 = sshll.u32 %s14073_s3, 4  ;;  %s13972_s5 = int_to_ptr.vmem [resolvable:$false] %s13971_s5 }
 0xaff   : > { %12917 = vmatprep.subr.bf16.mxu0 %v17823_v5 }
 0xb02   : > { %12918 = vmatpush3.bf16.msra.mxu0 %v13904_v20  ;;  %v9344_v20 = vld [vmem:[#allocation3 + $0x8] sm:$0xff] }
 0xb03   : > { %12919 = vmatprep.subr.bf16.mxu0 %v17823_v5 }
 0xb06   : > { %12920 = vmatpush3.bf16.msra.mxu0 %v13905_v2  ;;  %v9359_v2 = vld [vmem:[#allocation3 + $0xc0] sm:$0xff] }
 0xb07   : > { %12921 = vmatprep.subr.bf16.mxu0 %v17823_v5 }
 0xb0a   : > { %12922 = vmatpush3.bf16.msra.mxu0 %v13906_v46  ;;  %v9360_v46 = vld [vmem:[#allocation3 + $0xc8] sm:$0xff] }
 0xb0b   : > { %12927 = vmatprep.subr.bf16.mxu0 %v17823_v5 }
 0xb0d   : > { %12924 = vmatmul.mubr.msk.bf16.vlgmr.msra.gmra.mrb[64].mxu0 %vm3648_vm4, %v8696_v21  ;;  %v9377_v21 = vmul.f32 %v16688_v8, %v9343_v3  ;;  %v16781_v3 = vstv %s16701_s1 }
 0xb0e   : > { %12928 = vmatpush3.bf16.msra.mxu0 %v13909_v45  ;;  %12935 = vmatprep.mubr.msk.bf16.mxu0 %vm14070_vm7, %v17823_v5  ;;  %v16710_v45 = vstv %s16659_s0  ;;  %s769_s0 = scalar_lea.vmem [#allocation12], %s17701_s7 }
 0xb0f   : > { %12929 = vmatprep.subr.bf16.mxu0 %v17823_v5  ;;  %v9754_v17 = vmul.f32 %v16710_v45, %v16736_v44  ;;  %s10683_s1 = sshll.u32 %s769_s0, 4  ;;  %s10684_s1 = int_to_ptr.vmem [resolvable:$true] %s10683_s1 }
 0xb10   : > { %s13967_s29 = scalar_lea.vmem %s10684_s1, 16  ;;  %p13974_p13 = scmp.lt.s32.totalorder %s10684_s1, %s13972_s5 }
 0xb11   : > { %p13968_p9 = scmp.ne.s32.totalorder %s10684_s1, %s13967_s29 }
 0xb12   : > { %12930 = vmatpush3.bf16.msra.mxu0 %v13910_v23  ;;  %v9378_v23 = vmul.f32 %v16688_v8, %v9344_v20  ;;  %v16783_v20 = vld [vmem:[#allocation3 + $0x18] sm:$0xff] }
 0xb13   : > { %12931 = vmatprep.subr.bf16.mxu0 %v17823_v5  ;;  %p13969_p11 = pnand %p13968_p9, %p14241_p5 }
 0xb15   : > { %p13970_p12 = pneg %p13969_p11 }
 0xb16   : > { %12932 = vmatpush3.bf16.msra.mxu0 %v13911_v11  ;;  %v9393_v11 = vmul.f32 %v16688_v8, %v9359_v2  ;;  %v16785_v2 = vld [vmem:[#allocation3 + $0x20] sm:$0xff] }
 0xb17   : > { %12933 = vmatprep.subr.bf16.mxu0 %v17823_v5 }
 0xb1a   : > { %12934 = vmatpush3.bf16.msra.mxu0 %v13912_v26  ;;  %v9394_v26 = vmul.f32 %v16688_v8, %v9360_v46 }
 0xb1b   : > { %12939 = vmatprep.subr.bf16.mxu0 %v17823_v5 }
 0xb1d   : > { %12936 = vmatmul.mubr.msk.bf16.vlgmr.msra.gmra.mrb[68].mxu0 %vm3648_vm4, %v8788_v52  ;;  %v9524_v52 = vld [vmem:[#allocation3 + $0xca] sm:$0xff] }
 0xb1e   : > { %12940 = vmatpush3.bf16.msra.mxu0 %v13915_v16  ;;  %12947 = vmatprep.mubr.msk.bf16.mxu0 %vm14070_vm7, %v17823_v5  ;;  %v9523_v16 = vld [vmem:[#allocation3 + $0xc2] sm:$0xff]  ;;  %v9558_v62 = vmul.f32 %v16699_v0, %v9524_v52  ;;  %v9640_v52 = vmul.f32 %v16707_v35, %v16785_v2 }
 0xb1f   : > { %12941 = vmatprep.subr.bf16.mxu0 %v17823_v5 }
 0xb22   : > { %12942 = vmatpush3.bf16.msra.mxu0 %v13916_v13  ;;  %v16718_v13 = vstv %s16667_s30  ;;  %s17827_s30 = sshll.u32 %s14224_s14, 4 }
 0xb23   : > { %12943 = vmatprep.subr.bf16.mxu0 %v17823_v5  ;;  %s17713_s13 = scalar_lea.hbm %s17810_s24, %s17827_s30 }
 0xb26   : > { %12944 = vmatpush3.bf16.msra.mxu0 %v13917_v53  ;;  %v9460_v53 = vmul.f32 %v16696_v32, %v9426_v57 }
 0xb27   : > { %12945 = vmatprep.subr.bf16.mxu0 %v17823_v5 }
 0xb2a   : > { %12946 = vmatpush3.bf16.msra.mxu0 %v13918_v6  ;;  %v9557_v6 = vmul.f32 %v16699_v0, %v9523_v16  ;;  %v9639_v16 = vmul.f32 %v16707_v35, %v16783_v20 }
 0xb2b   : > { %12951 = vmatprep.subr.bf16.mxu0 %v17823_v5 }
 0xb2d   : > { %12948 = vmatmul.mubr.msk.bf16.vlgmr.msra.gmra.mrb[72].mxu0 %vm3648_vm4, %v8880_v48  ;;  %v16727_v48 = vld [vmem:[#allocation3 + $0xd9] sm:$0xff] }
 0xb2e   : > { %12952 = vmatpush3.bf16.msra.mxu0 %v13921_v7  ;;  %12959 = vmatprep.mubr.msk.bf16.mxu0 %vm14070_vm7, %v17823_v5  ;;  %v16725_v7 = vld [vmem:[#allocation3 + $0xe0] sm:$0xff] }
 0xb2f   : > { %12953 = vmatprep.subr.bf16.mxu0 %v17823_v5  ;;  %v9656_v25 = vmul.f32 %v16707_v35, %v16725_v7 }
 0xb32   : > { %12954 = vmatpush3.bf16.msra.mxu0 %v13922_v34  ;;  %v16730_v34 = vstv %s16669_s8 }
 0xb33   : > { %12955 = vmatprep.subr.bf16.mxu0 %v17823_v5  ;;  %v9950_v50 = vmul.f32 %v16730_v34, %v16750_v60  ;;  %v9951_v55 = vmul.f32 %v16730_v34, %v16752_v24 }
 0xb36   : > { %12956 = vmatpush3.bf16.msra.mxu0 %v13923_v56  ;;  %v9491_v56 = vadd.f32 %v9459_v9, %v9393_v11  ;;  %v9444_v11 = vmul.f32 %v16696_v32, %v9410_v40  ;;  %v9542_v9 = vmul.f32 %v16699_v0, %v9508_v28 }
 0xb37   : > { %12957 = vmatprep.subr.bf16.mxu0 %v17823_v5 }
 0xb38   : > { %v9589_v37 = vadd.f32 %v9557_v6, %v9491_v56  ;;  %v9476_v56 = vadd.f32 %v9444_v11, %v9378_v23 }
 0xb3a   : > { %12958 = vmatpush3.bf16.msra.mxu0 %v13924_v49  ;;  %v9655_v49 = vmul.f32 %v16707_v35, %v16723_v33 }
 0xb3b   : > { %12975 = vmatprep.subr.bf16.mxu0 %v17823_v5 }
 0xb3c   : > { %v9687_v14 = vadd.f32 %v9655_v49, %v9589_v37  ;;  %v16797_v49 = vld [vmem:[#allocation3 + $0x21] sm:$0xff] }
 0xb3d   : > { %12960 = vmatmul.mubr.msk.bf16.vlgmr.msra.gmra.mrb[76].mxu0 %vm3648_vm4, %v8973_v63  ;;  %v16740_v63 = vld [vmem:[#allocation3 + $0xda] sm:$0xff] }
 0xb3e   : > { %12976 = vmatpush3.bf16.msra.mxu0 %v13927_v47  ;;  %12983 = vmatprep.mubr.msk.bf16.mxu0 %vm14070_vm7, %v17823_v5  ;;  %v9753_v47 = vmul.f32 %v16710_v45, %v16727_v48  ;;  %v9851_v12 = vmul.f32 %v16718_v13, %v16740_v63 }
 0xb3f   : > { %12977 = vmatprep.subr.bf16.mxu0 %v17823_v5 }
 0xb40   : > { %v9785_v57 = vadd.f32 %v9753_v47, %v9687_v14  ;;  %v16803_v47 = vld [vmem:[#allocation3 + $0x22] sm:$0xff]  ;;  %v9574_v14 = vadd.f32 %v9542_v9, %v9476_v56  ;;  %v16831_v56 = vld [vmem:[#allocation3 + $0x39] sm:$0xff] }
 0xb42   : > { %12978 = vmatpush3.bf16.msra.mxu0 %v13928_v22  ;;  %v16742_v22 = vld [vmem:[#allocation3 + $0xe2] sm:$0xff]  ;;  %v9883_v37 = vadd.f32 %v9851_v12, %v9785_v57  ;;  %v16818_v12 = vld [vmem:[#allocation3 + $0x31] sm:$0xff] }
 0xb43   : > { %12979 = vmatprep.subr.bf16.mxu0 %v17823_v5 }
 0xb44   : > { %v9982_v57 = vadd.f32 %v9950_v50, %v9883_v37  ;;  %v16833_v50 = vld [vmem:[#allocation3 + $0x32] sm:$0xff] }
 0xb46   : > { %12980 = vmatpush3.bf16.msra.mxu0 %v13929_v38  ;;  %v9409_v38 = vld [vmem:[#allocation3 + $0x1] sm:$0xff] }
 0xb47   : > { %12981 = vmatprep.subr.bf16.mxu0 %v17823_v5  ;;  %v9443_v18 = vmul.f32 %v16696_v32, %v9409_v38  ;;  %v16801_v38 = vld [vmem:[#allocation3 + $0x1a] sm:$0xff] }
 0xb48   : > { %v9835_v40 = vmul.f32 %v16718_v13, %v16801_v38 }
 0xb4a   : > { %12982 = vmatpush3.bf16.msra.mxu0 %v13930_v42  ;;  %v9492_v42 = vadd.f32 %v9460_v53, %v9394_v26  ;;  %v16795_v53 = vld [vmem:[#allocation3 + $0x19] sm:$0xff] }
 0xb4c   : > { %v9590_v36 = vadd.f32 %v9558_v62, %v9492_v42  ;;  %v9475_v62 = vadd.f32 %v9443_v18, %v9377_v21  ;;  %v9836_v21 = vmul.f32 %v16718_v13, %v16803_v47  ;;  %v16816_v18 = vld [vmem:[#allocation3 + $0x38] sm:$0xff] }
 0xb4d   : > { %12984 = vmatmul.mubr.msk.bf16.vlgmr.msra.gmra.mrb[80].mxu0 %vm3648_vm4, %v9157_v43  ;;  %v9852_v43 = vmul.f32 %v16718_v13, %v16742_v22  ;;  %v9935_v29 = vmul.f32 %v16730_v34, %v16816_v18 }
 0xb4e   : > { %v9688_v46 = vadd.f32 %v9656_v25, %v9590_v36  ;;  %v9737_v25 = vmul.f32 %v16710_v45, %v16795_v53  ;;  %v9738_v36 = vmul.f32 %v16710_v45, %v16797_v49 }
 0xb50   : > { %v9786_v6 = vadd.f32 %v9754_v17, %v9688_v46  ;;  %v16814_v46 = vld [vmem:[#allocation3 + $0x30] sm:$0xff] }
 0xb51   : > { %v9934_v5 = vmul.f32 %v16730_v34, %v16814_v46 }
 0xbb0   : > { %v16665_v10 = vpop.f32.mrb[52].mxu0 }
 0xbb1   : > { %v16674_v30 = vpop.f32.mrb[40].mxu1  ;;  %v12889_v59 = vpop.f32.mrb[53].mxu0 }
 0xbb2   : > { %v12973_v27 = vpop.f32.mrb[41].mxu1  ;;  %v16679_v31 = vpop.f32.mrb[54].mxu0  ;;  %v10048_v59 = vmul.f32 %v16763_v4, %v16754_v54 }
 0xbb3   : > { %v16685_v61 = vpop.f32.mrb[42].mxu1  ;;  %v12890_v19 = vpop.f32.mrb[55].mxu0  ;;  %v10049_v27 = vmul.f32 %v16763_v4, %v16760_v15 }
 0xbb4   : > { %v12974_v41 = vpop.f32.mrb[43].mxu1  ;;  %v9507_v19 = vld [vmem:[#allocation3 + $0x2] sm:$0xff]  ;;  %v10080_v37 = vadd.f32 %v10048_v59, %v9982_v57  ;;  %v9462_v57 = vmul.f32 %v16736_v44, %v16696_v32  ;;  %v911_v44 = vld [vmem:[%s16518_s6 + $0x48] sm:$0xff] }
 0xbb5   : > { %v10147_v41 = vmul.f32 %v16774_v51, %v16767_v39  ;;  %v9541_v26 = vmul.f32 %v16699_v0, %v9507_v19  ;;  %v9884_v19 = vadd.f32 %v9852_v43, %v9786_v6  ;;  %1000 = vst.msk [vmem:[#allocation3 + $0x81] sm:$0xff] %vm934_vm9, %v911_v44 }
 0xbb6   : > { %v10178_v59 = vadd.f32 %v10146_v1, %v10080_v37  ;;  %v912_v37 = vld [vmem:[%s16518_s6 + $0x50] sm:$0xff] }
 0xbb7   : > { %v9573_v28 = vadd.f32 %v9541_v26, %v9475_v62  ;;  %v9983_v9 = vadd.f32 %v9951_v55, %v9884_v19  ;;  %v9672_v62 = vadd.f32 %v9640_v52, %v9574_v14  ;;  %v9396_v14 = vmul.f32 %v16725_v7, %v16688_v8  ;;  %v927_v7 = vld [vmem:[%s16518_s6 + $0xc8] sm:$0xff]  ;;  %1001 = vst.msk [vmem:[#allocation3 + $0x91] sm:$0xff] %vm934_vm9, %v912_v37 }
 0xbb8   : > { %v10212_v1 = vadd.f32 %v16781_v3, %v10178_v59  ;;  %1016 = vst.msk [vmem:[#allocation3 + $0x141] sm:$0xff] %vm934_vm9, %v927_v7  ;;  %v930_v59 = vld [vmem:[%s16518_s6 + $0xe0] sm:$0xff]  ;;  %v933_v7 = vld [vmem:[%s16518_s6 + $0xf8] sm:$0xff] }
 0xbb9   : > { %v9671_v6 = vadd.f32 %v9639_v16, %v9573_v28  ;;  %v10081_v16 = vadd.f32 %v10049_v27, %v9983_v9  ;;  %v9770_v19 = vadd.f32 %v9738_v36, %v9672_v62  ;;  %v9395_v28 = vmul.f32 %v16723_v33, %v16688_v8  ;;  %v909_v27 = vld [vmem:[%s16518_s6 + $0x38] sm:$0xff]  ;;  %1019 = vst.msk [vmem:[#allocation3 + $0x169] sm:$0xff] %vm934_vm9, %v930_v59 }
 0xbba   : > { %v9559_v33 = vmul.f32 %v16740_v63, %v16699_v0  ;;  %998 = vst.msk [vmem:[#allocation3 + $0x69] sm:$0xff] %vm934_vm9, %v909_v27  ;;  %v928_v63 = vld [vmem:[%s16518_s6 + $0xd0] sm:$0xff]  ;;  %v929_v62 = vld [vmem:[%s16518_s6 + $0xd8] sm:$0xff]  ;;  %v915_v27 = vld [vmem:[%s16518_s6 + $0x68] sm:$0xff] }
 0xbbb   : > { %v9769_v52 = vadd.f32 %v9737_v25, %v9671_v6  ;;  %v926_v25 = vld [vmem:[%s16518_s6 + $0xc0] sm:$0xff]  ;;  %v10179_v9 = vadd.f32 %v10147_v41, %v10081_v16  ;;  %v9868_v6 = vadd.f32 %v9836_v21, %v9770_v19  ;;  %v9560_v21 = vmul.f32 %v16742_v22, %v16699_v0  ;;  %1017 = vst.msk [vmem:[#allocation3 + $0x151] sm:$0xff] %vm934_vm9, %v928_v63  ;;  %v913_v22 = vld [vmem:[%s16518_s6 + $0x58] sm:$0xff] }
 0xbbc   : > { %1015 = vst.msk [vmem:[#allocation3 + $0x139] sm:$0xff] %vm934_vm9, %v926_v25  ;;  %1018 = vst.msk [vmem:[#allocation3 + $0x159] sm:$0xff] %vm934_vm9, %v929_v62  ;;  %v932_v25 = vld [vmem:[%s16518_s6 + $0xf0] sm:$0xff]  ;;  %v16908_v63 = vld [vmem:[#allocation3 + $0x108] sm:$0xff] }
 0xbbd   : > { %v9867_v36 = vadd.f32 %v9835_v40, %v9769_v52  ;;  %v9494_v40 = vadd.f32 %v9462_v57, %v9396_v14  ;;  %v10213_v16 = vadd.f32 %v16781_v3, %v10179_v9  ;;  %v9967_v19 = vadd.f32 %v9935_v29, %v9868_v6  ;;  %v931_v14 = vld [vmem:[%s16518_s6 + $0xe8] sm:$0xff]  ;;  %1002 = vst.msk [vmem:[#allocation3 + $0x99] sm:$0xff] %vm934_vm9, %v913_v22  ;;  %v16910_v62 = vld [vmem:[#allocation3 + $0x110] sm:$0xff] }
 0xbbe   : > { %v9658_v29 = vmul.f32 %v16752_v24, %v16707_v35  ;;  %1020 = vst.msk [vmem:[#allocation3 + $0x171] sm:$0xff] %vm934_vm9, %v931_v14  ;;  %1004 = vst.msk [vmem:[#allocation3 + $0xb1] sm:$0xff] %vm934_vm9, %v915_v27 }
 0xbbf   : > { %v9966_v52 = vadd.f32 %v9934_v5, %v9867_v36  ;;  %v9592_v5 = vadd.f32 %v9560_v21, %v9494_v40  ;;  %v10245_v9 = vmax.f32 %v10213_v16, 0.0  ;;  %1021 = vst.msk [vmem:[#allocation3 + $0x181] sm:$0xff] %vm934_vm9, %v932_v25  ;;  %1022 = vst.msk [vmem:[#allocation3 + $0x189] sm:$0xff] %vm934_vm9, %v933_v7  ;;  %v9854_v21 = vmul.f32 %v16767_v39, %v16718_v13 }
 0xbc0   : > { %v8585_v42 = vpop.f32.mrb[56].mxu0  ;;  %v9379_v7 = vmul.f32 %v16783_v20, %v16688_v8  ;;  %v9543_v20 = vmul.f32 %v16801_v38, %v16699_v0 }
 0xbc1   : > { %v16812_v23 = vadd.f32 %v8585_v42, %v16665_v10  ;;  %v12901_v17 = vpop.f32.mrb[57].mxu0  ;;  %v16826_v10 = vmul.f32 %v16763_v4, %v16818_v12  ;;  %v16835_v42 = vld [vmem:[#allocation3 + $0x3a] sm:$0xff]  ;;  %v9690_v44 = vadd.f32 %v9658_v29, %v9592_v5 }
 0xbc2   : > { %v8588_v11 = vpop.f32.mrb[58].mxu0  ;;  %v10033_v17 = vmul.f32 %v16763_v4, %v16831_v56  ;;  %v16845_v55 = vmul.f32 %v16774_v51, %v16835_v42 }
 0xbc3   : > { %v16829_v43 = vadd.f32 %v8588_v11, %v16679_v31  ;;  %v12902_v26 = vpop.f32.mrb[59].mxu0  ;;  %v16841_v31 = vmul.f32 %v16774_v51, %v16833_v50  ;;  %v9461_v11 = vmul.f32 %v16727_v48, %v16696_v32  ;;  %v910_v48 = vld [vmem:[%s16518_s6 + $0x40] sm:$0xff]  ;;  %v10064_v36 = vadd.f32 %v16826_v10, %v9966_v52 }
 0xbc4   : > { %v908_v26 = vld [vmem:[%s16518_s6 + $0x30] sm:$0xff]  ;;  %999 = vst.msk [vmem:[#allocation3 + $0x79] sm:$0xff] %vm934_vm9, %v910_v48  ;;  %v10065_v6 = vadd.f32 %v10033_v17, %v9967_v19  ;;  %v9952_v52 = vmul.f32 %v16730_v34, %v16908_v63  ;;  %v9953_v19 = vmul.f32 %v16730_v34, %v16910_v62 }
 0xbc5   : > { %997 = vst.msk [vmem:[#allocation3 + $0x61] sm:$0xff] %vm934_vm9, %v908_v26  ;;  %v9493_v41 = vadd.f32 %v9461_v11, %v9395_v28  ;;  %v9657_v28 = vmul.f32 %v16750_v60, %v16707_v35  ;;  %v10244_v11 = vmax.f32 %v10212_v1, 0.0  ;;  %v914_v26 = vld [vmem:[%s16518_s6 + $0x60] sm:$0xff]  ;;  %v9756_v1 = vmul.f32 %v16760_v15, %v16710_v45  ;;  %s10658_s6 = scalar_lea.sflag [#allocation13], %s17701_s7 }
 0xbc6   : > { %1003 = vst.msk [vmem:[#allocation3 + $0xa9] sm:$0xff] %vm934_vm9, %v914_v26  ;;  %v10162_v17 = vadd.f32 %v16841_v31, %v10064_v36  ;;  %v10163_v40 = vadd.f32 %v16845_v55, %v10065_v6  ;;  %v16918_v31 = vld [vmem:[#allocation3 + $0x111] sm:$0xff] }
 0xbc7   : > { %v9591_v57 = vadd.f32 %v9559_v33, %v9493_v41  ;;  %v9755_v33 = vmul.f32 %v16754_v54, %v16710_v45  ;;  %v9853_v41 = vmul.f32 %v16765_v58, %v16718_v13  ;;  %v13102_v10 = vpack.c.bf16 %v10245_v9, %v10244_v11  ;;  %v16926_v11 = vld [vmem:[#allocation3 + $0x10a] sm:$0xff] }
 0xbc8   : > { %v9788_v16 = vadd.f32 %v9756_v1, %v9690_v44  ;;  %v10196_v55 = vadd.f32 %v16781_v3, %v10162_v17  ;;  %v10197_v22 = vadd.f32 %v16781_v3, %v10163_v40  ;;  %v10051_v14 = vmul.f32 %v16763_v4, %v16918_v31 }
 0xbc9   : > { %v9689_v48 = vadd.f32 %v9657_v28, %v9591_v57  ;;  %v16916_v28 = vld [vmem:[#allocation3 + $0x109] sm:$0xff]  ;;  %13103 = vmatprep.subr.bf16.mxu0 %v13102_v10  ;;  %v16928_v57 = vld [vmem:[#allocation3 + $0x112] sm:$0xff]  ;;  %v10148_v27 = vmul.f32 %v16774_v51, %v16926_v11  ;;  %v9445_v10 = vmul.f32 %v16795_v53, %v16696_v32  ;;  %v9641_v53 = vmul.f32 %v16814_v46, %v16707_v35 }
 0xbca   : > { %v10050_v59 = vmul.f32 %v16763_v4, %v16916_v28  ;;  %v9886_v26 = vadd.f32 %v9854_v21, %v9788_v16  ;;  %v10149_v25 = vmul.f32 %v16774_v51, %v16928_v57  ;;  %v10228_v6 = vmax.f32 %v10196_v55, 0.0 }
 0xbcb   : > { %v9787_v37 = vadd.f32 %v9755_v33, %v9689_v48  ;;  %v10229_v33 = vmax.f32 %v10197_v22, 0.0  ;;  %v9446_v21 = vmul.f32 %v16797_v49, %v16696_v32  ;;  %v9739_v49 = vmul.f32 %v16818_v12, %v16710_v45 }
 0xbcc   : > { %v9985_v1 = vadd.f32 %v9953_v19, %v9886_v26  ;;  %v16966_v26 = vld [vmem:[#allocation3 + $0x50] sm:$0xff] }
 0xbcd   : > { %v9885_v29 = vadd.f32 %v9853_v41, %v9787_v37  ;;  %v9380_v41 = vmul.f32 %v16785_v2, %v16688_v8  ;;  %v13104_v40 = vpack.c.bf16 %v10229_v33, %v10228_v6  ;;  %v9544_v2 = vmul.f32 %v16803_v47, %v16699_v0 }
 0xbce   : > { %v10083_v16 = vadd.f32 %v10051_v14, %v9985_v1  ;;  %v16960_v14 = vld [vmem:[#allocation3 + $0x48] sm:$0xff]  ;;  %v9937_v33 = vmul.f32 %v16730_v34, %v16966_v26 }
 0xbcf   : > { %v9984_v44 = vadd.f32 %v9952_v52, %v9885_v29  ;;  %v9477_v52 = vadd.f32 %v9445_v10, %v9379_v7  ;;  %13105 = vmatpush3.bf16.msra.mxu0 %v13104_v40  ;;  %v9478_v19 = vadd.f32 %v9446_v21, %v9380_v41  ;;  %v9838_v29 = vmul.f32 %v16835_v42, %v16718_v13  ;;  %v16974_v7 = vld [vmem:[#allocation3 + $0x49] sm:$0xff] }
 0xbd0   : > { %v8675_v5 = vpop.f32.mrb[60].mxu0  ;;  %v10181_v22 = vadd.f32 %v10149_v25, %v10083_v16  ;;  %v10034_v41 = vmul.f32 %v16763_v4, %v16974_v7 }
 0xbd1   : > { %v16935_v9 = vadd.f32 %v8675_v5, %v16812_v23  ;;  %v12913_v36 = vpop.f32.mrb[61].mxu0  ;;  %v10082_v37 = vadd.f32 %v10050_v59, %v9984_v44  ;;  %v9575_v38 = vadd.f32 %v9543_v20, %v9477_v52  ;;  %v9740_v59 = vmul.f32 %v16831_v56, %v16710_v45  ;;  %v16978_v44 = vld [vmem:[#allocation3 + $0x4a] sm:$0xff] }
 0xbd2   : > { %v8678_v48 = vpop.f32.mrb[62].mxu0  ;;  %v9576_v47 = vadd.f32 %v9544_v2, %v9478_v19  ;;  %v9837_v5 = vmul.f32 %v16833_v50, %v16718_v13  ;;  %v9936_v36 = vmul.f32 %v16730_v34, %v16960_v14  ;;  %v10215_v25 = vadd.f32 %v16781_v3, %v10181_v22 }
 0xbd3   : > { %v16944_v17 = vadd.f32 %v8678_v48, %v16829_v43  ;;  %v12914_v23 = vpop.f32.mrb[63].mxu0  ;;  %v9642_v43 = vmul.f32 %v16816_v18, %v16707_v35  ;;  %v10180_v55 = vadd.f32 %v10148_v27, %v10082_v37  ;;  %v9673_v6 = vadd.f32 %v9641_v53, %v9575_v38  ;;  %v16976_v48 = vld [vmem:[#allocation3 + $0x51] sm:$0xff] }
 0xbd4   : > { %v10035_v10 = vmul.f32 %v16763_v4, %v16976_v48  ;;  %v16984_v23 = vld [vmem:[#allocation3 + $0x52] sm:$0xff]  ;;  %v10132_v40 = vmul.f32 %v16774_v51, %v16978_v44  ;;  %v10247_v20 = vmax.f32 %v10215_v25, 0.0  ;;  %v9397_v2 = vmul.f32 %v16750_v60, %v16688_v8 }
 0xbd5   : > { %v10214_v27 = vadd.f32 %v16781_v3, %v10180_v55  ;;  %v9674_v1 = vadd.f32 %v9642_v43, %v9576_v47  ;;  %v9771_v37 = vadd.f32 %v9739_v49, %v9673_v6  ;;  %v10133_v16 = vmul.f32 %v16774_v51, %v16984_v23 }
 0xbd6   : > { %v9398_v19 = vmul.f32 %v16752_v24, %v16688_v8  ;;  %v9463_v53 = vmul.f32 %v16754_v54, %v16696_v32  ;;  %v9464_v22 = vmul.f32 %v16760_v15, %v16696_v32  ;;  %v9561_v49 = vmul.f32 %v16765_v58, %v16699_v0 }
 0xbd7   : > { %v10246_v21 = vmax.f32 %v10214_v27, 0.0  ;;  %v9772_v52 = vadd.f32 %v9740_v59, %v9674_v1  ;;  %v9869_v55 = vadd.f32 %v9837_v5, %v9771_v37  ;;  %v9562_v59 = vmul.f32 %v16767_v39, %v16699_v0 }
 0xbd8   : > { %v9495_v47 = vadd.f32 %v9463_v53, %v9397_v2  ;;  %v9659_v60 = vmul.f32 %v16908_v63, %v16707_v35  ;;  %v9496_v27 = vadd.f32 %v9464_v22, %v9398_v19  ;;  %v9660_v54 = vmul.f32 %v16910_v62, %v16707_v35 }
 0xbd9   : > { %v13106_v43 = vpack.c.bf16 %v10247_v20, %v10246_v21  ;;  %v9870_v38 = vadd.f32 %v9838_v29, %v9772_v52  ;;  %v9968_v24 = vadd.f32 %v9936_v36, %v9869_v55  ;;  %v9757_v15 = vmul.f32 %v16916_v28, %v16710_v45  ;;  %v17012_v29 = vld [vmem:[#allocation3 + $0x120] sm:$0xff]  ;;  %v17016_v20 = vld [vmem:[#allocation3 + $0x128] sm:$0xff] }
 0xbda   : > { %v9593_v25 = vadd.f32 %v9561_v49, %v9495_v47  ;;  %v9758_v58 = vmul.f32 %v16918_v31, %v16710_v45  ;;  %v9855_v39 = vmul.f32 %v16926_v11, %v16718_v13  ;;  %v9594_v36 = vadd.f32 %v9562_v59, %v9496_v27  ;;  %v17033_v47 = vld [vmem:[#allocation3 + $0x122] sm:$0xff]  ;;  %v17038_v27 = vld [vmem:[#allocation3 + $0x12a] sm:$0xff] }
 0xbdb   : > { %13107 = vmatprep.subr.bf16.mxu0 %v13106_v43  ;;  %v9969_v5 = vadd.f32 %v9937_v33, %v9870_v38  ;;  %v10066_v1 = vadd.f32 %v10034_v41, %v9968_v24  ;;  %v9856_v21 = vmul.f32 %v16928_v57, %v16718_v13  ;;  %v9954_v33 = vmul.f32 %v16730_v34, %v17012_v29  ;;  %v17025_v43 = vld [vmem:[#allocation3 + $0x121] sm:$0xff]  ;;  %v17027_v41 = vld [vmem:[#allocation3 + $0x129] sm:$0xff] }
 0xbdc   : > { %v9691_v19 = vadd.f32 %v9659_v60, %v9593_v25  ;;  %v9955_v53 = vmul.f32 %v16730_v34, %v17016_v20  ;;  %v9692_v49 = vadd.f32 %v9660_v54, %v9594_v36  ;;  %v10052_v38 = vmul.f32 %v16763_v4, %v17025_v43 }
 0xbdd   : > { %v10067_v2 = vadd.f32 %v10035_v10, %v9969_v5  ;;  %v10164_v22 = vadd.f32 %v10132_v40, %v10066_v1  ;;  %v10150_v40 = vmul.f32 %v16774_v51, %v17033_v47  ;;  %v10151_v25 = vmul.f32 %v16774_v51, %v17038_v27 }
 0xbde   : > { %v9789_v24 = vadd.f32 %v9757_v15, %v9691_v19  ;;  %v9790_v5 = vadd.f32 %v9758_v58, %v9692_v49  ;;  %v9447_v15 = vmul.f32 %v16818_v12, %v16696_v32  ;;  %v9448_v58 = vmul.f32 %v16831_v56, %v16696_v32 }
 0xbdf   : > { %v10165_v60 = vadd.f32 %v10133_v16, %v10067_v2  ;;  %v10198_v54 = vadd.f32 %v16781_v3, %v10164_v22  ;;  %v9382_v16 = vmul.f32 %v16816_v18, %v16688_v8  ;;  %v9545_v2 = vmul.f32 %v16833_v50, %v16699_v0 }
 0xbe0   : > { %v8767_v6 = vpop.f32.mrb[64].mxu0  ;;  %v9887_v1 = vadd.f32 %v9855_v39, %v9789_v24  ;;  %v9546_v39 = vmul.f32 %v16835_v42, %v16699_v0  ;;  %v9643_v18 = vmul.f32 %v16960_v14, %v16707_v35  ;;  %v9644_v12 = vmul.f32 %v16966_v26, %v16707_v35 }
 0xbe1   : > { %v17021_v37 = vadd.f32 %v8767_v6, %v16935_v9  ;;  %v12925_v52 = vpop.f32.mrb[65].mxu0  ;;  %v10053_v9 = vmul.f32 %v16763_v4, %v17027_v41  ;;  %v9381_v6 = vmul.f32 %v16814_v46, %v16688_v8  ;;  %v10230_v36 = vmax.f32 %v10198_v54, 0.0 }
 0xbe2   : > { %v8770_v55 = vpop.f32.mrb[66].mxu0  ;;  %v9888_v52 = vadd.f32 %v9856_v21, %v9790_v5  ;;  %v9480_v49 = vadd.f32 %v9448_v58, %v9382_v16  ;;  %v9741_v50 = vmul.f32 %v16974_v7, %v16710_v45  ;;  %v9742_v24 = vmul.f32 %v16976_v48, %v16710_v45 }
 0xbe3   : > { %v17036_v10 = vadd.f32 %v8770_v55, %v16944_v17  ;;  %v12926_v59 = vpop.f32.mrb[67].mxu0  ;;  %v10199_v17 = vadd.f32 %v16781_v3, %v10165_v60  ;;  %v9986_v55 = vadd.f32 %v9954_v33, %v9887_v1  ;;  %v9479_v46 = vadd.f32 %v9447_v15, %v9381_v6  ;;  %v17072_v6 = vld [vmem:[#allocation3 + $0x68] sm:$0xff] }
 0xbe4   : > { %v9987_v22 = vadd.f32 %v9955_v53, %v9888_v52  ;;  %v9578_v33 = vadd.f32 %v9546_v39, %v9480_v49  ;;  %v9839_v42 = vmul.f32 %v16978_v44, %v16718_v13  ;;  %v17068_v53 = vld [vmem:[#allocation3 + $0x60] sm:$0xff]  ;;  %v9939_v15 = vmul.f32 %v16730_v34, %v17072_v6 }
 0xbe5   : > { %v10231_v19 = vmax.f32 %v10199_v17, 0.0  ;;  %v10084_v59 = vadd.f32 %v10052_v38, %v9986_v55  ;;  %v9577_v56 = vadd.f32 %v9545_v2, %v9479_v46  ;;  %v9840_v38 = vmul.f32 %v16984_v23, %v16718_v13  ;;  %v17076_v17 = vld [vmem:[#allocation3 + $0x61] sm:$0xff]  ;;  %v17089_v55 = vld [vmem:[#allocation3 + $0x6a] sm:$0xff] }
 0xbe6   : > { %v10085_v60 = vadd.f32 %v10053_v9, %v9987_v22  ;;  %v9938_v9 = vmul.f32 %v16730_v34, %v17068_v53  ;;  %v9676_v16 = vadd.f32 %v9644_v12, %v9578_v33  ;;  %v17084_v52 = vld [vmem:[#allocation3 + $0x62] sm:$0xff]  ;;  %v10135_v22 = vmul.f32 %v16774_v51, %v17089_v55 }
 0xbe7   : > { %v13108_v21 = vpack.c.bf16 %v10231_v19, %v10230_v36  ;;  %v10182_v54 = vadd.f32 %v10150_v40, %v10084_v59  ;;  %v9675_v5 = vadd.f32 %v9643_v18, %v9577_v56  ;;  %v17080_v36 = vld [vmem:[#allocation3 + $0x69] sm:$0xff]  ;;  %v10036_v40 = vmul.f32 %v16763_v4, %v17076_v17 }
 0xbe8   : > { %v10183_v1 = vadd.f32 %v10151_v25, %v10085_v60  ;;  %v10037_v19 = vmul.f32 %v16763_v4, %v17080_v36  ;;  %v10134_v25 = vmul.f32 %v16774_v51, %v17084_v52  ;;  %v9774_v39 = vadd.f32 %v9742_v24, %v9676_v16 }
 0xbe9   : > { %13109 = vmatpush3.bf16.msra.mxu0 %v13108_v21  ;;  %v10216_v58 = vadd.f32 %v16781_v3, %v10182_v54  ;;  %v9773_v2 = vadd.f32 %v9741_v50, %v9675_v5  ;;  %v9399_v49 = vmul.f32 %v16908_v63, %v16688_v8  ;;  %v9400_v21 = vmul.f32 %v16910_v62, %v16688_v8 }
 0xbea   : > { %v10217_v46 = vadd.f32 %v16781_v3, %v10183_v1  ;;  %v9465_v59 = vmul.f32 %v16916_v28, %v16696_v32  ;;  %v9872_v60 = vadd.f32 %v9840_v38, %v9774_v39  ;;  %v9466_v33 = vmul.f32 %v16918_v31, %v16696_v32 }
 0xbeb   : > { %v10248_v18 = vmax.f32 %v10216_v58, 0.0  ;;  %v9871_v12 = vadd.f32 %v9839_v42, %v9773_v2  ;;  %v9563_v24 = vmul.f32 %v16926_v11, %v16699_v0  ;;  %v9564_v62 = vmul.f32 %v16928_v57, %v16699_v0 }
 0xbec   : > { %v10249_v50 = vmax.f32 %v10217_v46, 0.0  ;;  %v9497_v5 = vadd.f32 %v9465_v59, %v9399_v49  ;;  %v9971_v16 = vadd.f32 %v9939_v15, %v9872_v60  ;;  %v9498_v58 = vadd.f32 %v9466_v33, %v9400_v21  ;;  %v17128_v21 = vld [vmem:[#allocation3 + $0x140] sm:$0xff] }
 0xbed   : > { %v9970_v42 = vadd.f32 %v9938_v9, %v9871_v12  ;;  %v9661_v38 = vmul.f32 %v17012_v29, %v16707_v35  ;;  %v9662_v9 = vmul.f32 %v17016_v20, %v16707_v35  ;;  %v9759_v57 = vmul.f32 %v17025_v43, %v16710_v45  ;;  %v17126_v12 = vld [vmem:[#allocation3 + $0x138] sm:$0xff]  ;;  %v17136_v60 = vld [vmem:[#allocation3 + $0x141] sm:$0xff] }
 0xbee   : > { %v13110_v28 = vpack.c.bf16 %v10249_v50, %v10248_v18  ;;  %v10069_v46 = vadd.f32 %v10037_v19, %v9971_v16  ;;  %v9596_v39 = vadd.f32 %v9564_v62, %v9498_v58  ;;  %v9760_v15 = vmul.f32 %v17027_v41, %v16710_v45 }
 0xbef   : > { %v10068_v2 = vadd.f32 %v10036_v40, %v9970_v42  ;;  %v9858_v40 = vmul.f32 %v17038_v27, %v16718_v13  ;;  %v9957_v50 = vmul.f32 %v16730_v34, %v17128_v21  ;;  %v17143_v42 = vld [vmem:[#allocation3 + $0x13a] sm:$0xff] }
 0xbf0   : > { %v8859_v56 = vpop.f32.mrb[68].mxu0  ;;  %13111 = vmatprep.subr.bf16.mxu0 %v13110_v28  ;;  %v10167_v19 = vadd.f32 %v10135_v22, %v10069_v46  ;;  %v9694_v59 = vadd.f32 %v9662_v9, %v9596_v39  ;;  %v10055_v22 = vmul.f32 %v16763_v4, %v17136_v60  ;;  %v10152_v28 = vmul.f32 %v16774_v51, %v17143_v42 }
 0xbf1   : > { %v17107_v54 = vadd.f32 %v8859_v56, %v17021_v37  ;;  %v12937_v63 = vpop.f32.mrb[69].mxu0  ;;  %v9595_v37 = vadd.f32 %v9563_v24, %v9497_v5  ;;  %v10166_v49 = vadd.f32 %v10134_v25, %v10068_v2  ;;  %v9956_v56 = vmul.f32 %v16730_v34, %v17126_v12  ;;  %v17134_v25 = vld [vmem:[#allocation3 + $0x139] sm:$0xff]  ;;  %v17145_v5 = vld [vmem:[#allocation3 + $0x142] sm:$0xff] }
 0xbf2   : > { %v8862_v1 = vpop.f32.mrb[70].mxu0  ;;  %v10054_v63 = vmul.f32 %v16763_v4, %v17134_v25  ;;  %v10201_v62 = vadd.f32 %v16781_v3, %v10167_v19  ;;  %v10153_v16 = vmul.f32 %v16774_v51, %v17145_v5  ;;  %v9384_v2 = vmul.f32 %v16966_v26, %v16688_v8 }
 0xbf3   : > { %v17114_v31 = vadd.f32 %v8862_v1, %v17036_v10  ;;  %v12938_v11 = vpop.f32.mrb[71].mxu0  ;;  %v9693_v18 = vadd.f32 %v9661_v38, %v9595_v37  ;;  %v9857_v10 = vmul.f32 %v17033_v47, %v16718_v13  ;;  %v10200_v33 = vadd.f32 %v16781_v3, %v10166_v49 }
 0xbf4   : > { %v9792_v1 = vadd.f32 %v9760_v15, %v9694_v59  ;;  %v9383_v11 = vmul.f32 %v16960_v14, %v16688_v8  ;;  %v10233_v37 = vmax.f32 %v10201_v62, 0.0  ;;  %v9449_v46 = vmul.f32 %v16974_v7, %v16696_v32 }
 0xbf5   : > { %v9791_v24 = vadd.f32 %v9759_v57, %v9693_v18  ;;  %v10232_v58 = vmax.f32 %v10200_v33, 0.0  ;;  %v9450_v39 = vmul.f32 %v16976_v48, %v16696_v32  ;;  %v9547_v15 = vmul.f32 %v16978_v44, %v16699_v0 }
 0xbf6   : > { %v9890_v9 = vadd.f32 %v9858_v40, %v9792_v1  ;;  %v9548_v49 = vmul.f32 %v16984_v23, %v16699_v0  ;;  %v9645_v14 = vmul.f32 %v17068_v53, %v16707_v35  ;;  %v9646_v7 = vmul.f32 %v17072_v6, %v16707_v35 }
 0xbf7   : > { %v9889_v38 = vadd.f32 %v9857_v10, %v9791_v24  ;;  %v13112_v18 = vpack.c.bf16 %v10233_v37, %v10232_v58  ;;  %v9481_v10 = vadd.f32 %v9449_v46, %v9383_v11  ;;  %v9482_v40 = vadd.f32 %v9450_v39, %v9384_v2  ;;  %v17176_v24 = vld [vmem:[#allocation3 + $0x80] sm:$0xff] }
 0xbf8   : > { %v9989_v26 = vadd.f32 %v9957_v50, %v9890_v9  ;;  %v9743_v48 = vmul.f32 %v17076_v17, %v16710_v45  ;;  %v9744_v44 = vmul.f32 %v17080_v36, %v16710_v45  ;;  %v9841_v33 = vmul.f32 %v17084_v52, %v16718_v13  ;;  %v17174_v50 = vld [vmem:[#allocation3 + $0x78] sm:$0xff]  ;;  %v17186_v9 = vld [vmem:[#allocation3 + $0x81] sm:$0xff] }
 0xbf9   : > { %v9988_v57 = vadd.f32 %v9956_v56, %v9889_v38  ;;  %13113 = vmatpush3.bf16.msra.mxu0 %v13112_v18  ;;  %v9579_v23 = vadd.f32 %v9547_v15, %v9481_v10  ;;  %v9580_v56 = vadd.f32 %v9548_v49, %v9482_v40  ;;  %v9842_v62 = vmul.f32 %v17089_v55, %v16718_v13  ;;  %v17190_v46 = vld [vmem:[#allocation3 + $0x7a] sm:$0xff]  ;;  %v17198_v18 = vld [vmem:[#allocation3 + $0x82] sm:$0xff] }
 0xbfa   : > { %v10087_v59 = vadd.f32 %v10055_v22, %v9989_v26  ;;  %v9940_v1 = vmul.f32 %v16730_v34, %v17174_v50  ;;  %v9941_v58 = vmul.f32 %v16730_v34, %v17176_v24  ;;  %v17184_v22 = vld [vmem:[#allocation3 + $0x79] sm:$0xff]  ;;  %v10039_v49 = vmul.f32 %v16763_v4, %v17186_v9 }
 0xbfb   : > { %v10086_v19 = vadd.f32 %v10054_v63, %v9988_v57  ;;  %v9677_v2 = vadd.f32 %v9645_v14, %v9579_v23  ;;  %v9678_v37 = vadd.f32 %v9646_v7, %v9580_v56  ;;  %v9401_v23 = vmul.f32 %v17012_v29, %v16688_v8 }
 0xbfc   : > { %v10185_v11 = vadd.f32 %v10153_v16, %v10087_v59  ;;  %v10136_v16 = vmul.f32 %v16774_v51, %v17190_v46  ;;  %v9402_v56 = vmul.f32 %v17016_v20, %v16688_v8  ;;  %v9663_v29 = vmul.f32 %v17126_v12, %v16707_v35 }
 0xbfd   : > { %v10184_v63 = vadd.f32 %v10152_v28, %v10086_v19  ;;  %v10038_v28 = vmul.f32 %v16763_v4, %v17184_v22  ;;  %v9775_v10 = vadd.f32 %v9743_v48, %v9677_v2  ;;  %v9776_v40 = vadd.f32 %v9744_v44, %v9678_v37 }
 0xbfe   : > { %v10219_v26 = vadd.f32 %v16781_v3, %v10185_v11  ;;  %v9467_v48 = vmul.f32 %v17025_v43, %v16696_v32  ;;  %v9468_v44 = vmul.f32 %v17027_v41, %v16696_v32  ;;  %v9566_v11 = vmul.f32 %v17038_v27, %v16699_v0 }
 0xbff   : > { %v10218_v15 = vadd.f32 %v16781_v3, %v10184_v63  ;;  %v9664_v43 = vmul.f32 %v17128_v21, %v16707_v35  ;;  %v9761_v41 = vmul.f32 %v17134_v25, %v16710_v45 }
 0xc00   : > { %v8951_v38 = vpop.f32.mrb[72].mxu0  ;;  %v10251_v63 = vmax.f32 %v10219_v26, 0.0  ;;  %v9859_v26 = vmul.f32 %v17143_v42, %v16718_v13 }
 0xc01   : > { %v17193_v39 = vadd.f32 %v8951_v38, %v17107_v54  ;;  %v12949_v57 = vpop.f32.mrb[73].mxu0  ;;  %v10137_v54 = vmul.f32 %v16774_v51, %v17198_v18  ;;  %v10250_v59 = vmax.f32 %v10218_v15, 0.0  ;;  %v9873_v38 = vadd.f32 %v9841_v33, %v9775_v10 }
 0xc02   : > { %v8954_v14 = vpop.f32.mrb[74].mxu0  ;;  %v9874_v57 = vadd.f32 %v9842_v62, %v9776_v40  ;;  %v9499_v33 = vadd.f32 %v9467_v48, %v9401_v23  ;;  %v9500_v62 = vadd.f32 %v9468_v44, %v9402_v56  ;;  %v9860_v40 = vmul.f32 %v17145_v5, %v16718_v13  ;;  %v17248_v48 = vld [vmem:[#allocation3 + $0x15a] sm:$0xff] }
 0xc03   : > { %v17206_v19 = vadd.f32 %v8954_v14, %v17114_v31  ;;  %v12950_v7 = vpop.f32.mrb[75].mxu0  ;;  %v9565_v31 = vmul.f32 %v17033_v47, %v16699_v0  ;;  %v13114_v2 = vpack.c.bf16 %v10251_v63, %v10250_v59  ;;  %v9972_v20 = vadd.f32 %v9940_v1, %v9873_v38  ;;  %v17230_v1 = vld [vmem:[#allocation3 + $0x150] sm:$0xff]  ;;  %v17242_v63 = vld [vmem:[#allocation3 + $0x159] sm:$0xff] }
 0xc04   : > { %v9973_v37 = vadd.f32 %v9941_v58, %v9874_v57  ;;  %v9762_v47 = vmul.f32 %v17136_v60, %v16710_v45  ;;  %v17232_v58 = vld [vmem:[#allocation3 + $0x158] sm:$0xff]  ;;  %v9598_v10 = vadd.f32 %v9566_v11, %v9500_v62  ;;  %v9958_v7 = vmul.f32 %v16730_v34, %v17230_v1 }
 0xc05   : > { %13115 = vmatprep.subr.bf16.mxu0 %v13114_v2  ;;  %v10070_v15 = vadd.f32 %v10038_v28, %v9972_v20  ;;  %v9597_v14 = vadd.f32 %v9565_v31, %v9499_v33  ;;  %v9959_v59 = vmul.f32 %v16730_v34, %v17232_v58  ;;  %v17240_v28 = vld [vmem:[#allocation3 + $0x151] sm:$0xff]  ;;  %v10057_v31 = vmul.f32 %v16763_v4, %v17242_v63 }
 0xc06   : > { %v10071_v27 = vadd.f32 %v10039_v49, %v9973_v37  ;;  %v10056_v38 = vmul.f32 %v16763_v4, %v17240_v28  ;;  %v17246_v57 = vld [vmem:[#allocation3 + $0x152] sm:$0xff]  ;;  %v9696_v44 = vadd.f32 %v9664_v43, %v9598_v10  ;;  %v9385_v20 = vmul.f32 %v17068_v53, %v16688_v8 }
 0xc07   : > { %v10168_v49 = vadd.f32 %v10136_v16, %v10070_v15  ;;  %v9695_v56 = vadd.f32 %v9663_v29, %v9597_v14  ;;  %v10154_v11 = vmul.f32 %v16774_v51, %v17246_v57  ;;  %v10155_v16 = vmul.f32 %v16774_v51, %v17248_v48 }
 0xc08   : > { %v10169_v23 = vadd.f32 %v10137_v54, %v10071_v27  ;;  %v9794_v37 = vadd.f32 %v9762_v47, %v9696_v44  ;;  %v9386_v33 = vmul.f32 %v17072_v6, %v16688_v8  ;;  %v9451_v62 = vmul.f32 %v17076_v17, %v16696_v32 }
 0xc09   : > { %v10202_v54 = vadd.f32 %v16781_v3, %v10168_v49  ;;  %v9793_v2 = vadd.f32 %v9761_v41, %v9695_v56  ;;  %v9452_v43 = vmul.f32 %v17080_v36, %v16696_v32  ;;  %v9549_v10 = vmul.f32 %v17084_v52, %v16699_v0 }
 0xc0a   : > { %v10203_v29 = vadd.f32 %v16781_v3, %v10169_v23  ;;  %v9892_v41 = vadd.f32 %v9860_v40, %v9794_v37  ;;  %v9483_v49 = vadd.f32 %v9451_v62, %v9385_v20  ;;  %v9550_v53 = vmul.f32 %v17089_v55, %v16699_v0 }
 0xc0b   : > { %v10234_v15 = vmax.f32 %v10202_v54, 0.0  ;;  %v9891_v14 = vadd.f32 %v9859_v26, %v9793_v2  ;;  %v9484_v23 = vadd.f32 %v9452_v43, %v9386_v33  ;;  %v9647_v17 = vmul.f32 %v17174_v50, %v16707_v35  ;;  %v17285_v43 = vld [vmem:[#allocation3 + $0x90] sm:$0xff] }
 0xc0c   : > { %v10235_v27 = vmax.f32 %v10203_v29, 0.0  ;;  %v9648_v36 = vmul.f32 %v17176_v24, %v16707_v35  ;;  %v9991_v54 = vadd.f32 %v9959_v59, %v9892_v41  ;;  %v9581_v52 = vadd.f32 %v9549_v10, %v9483_v49  ;;  %v17298_v49 = vld [vmem:[#allocation3 + $0x91] sm:$0xff] }
 0xc0d   : > { %v9990_v56 = vadd.f32 %v9958_v7, %v9891_v14  ;;  %v9582_v40 = vadd.f32 %v9550_v53, %v9484_v23  ;;  %v9745_v55 = vmul.f32 %v17184_v22, %v16710_v45  ;;  %v9746_v7 = vmul.f32 %v17186_v9, %v16710_v45  ;;  %v17289_v14 = vld [vmem:[#allocation3 + $0x98] sm:$0xff] }
 0xc0e   : > { %v13116_v6 = vpack.c.bf16 %v10235_v27, %v10234_v15  ;;  %v9843_v20 = vmul.f32 %v17190_v46, %v16718_v13  ;;  %v10089_v59 = vadd.f32 %v10057_v31, %v9991_v54  ;;  %v9679_v62 = vadd.f32 %v9647_v17, %v9581_v52 }
 0xc0f   : > { %v10088_v2 = vadd.f32 %v10056_v38, %v9990_v56  ;;  %v9680_v15 = vadd.f32 %v9648_v36, %v9582_v40  ;;  %v9844_v27 = vmul.f32 %v17198_v18, %v16718_v13  ;;  %v9942_v10 = vmul.f32 %v16730_v34, %v17285_v43 }
 0xc10   : > { %v9044_v47 = vpop.f32.mrb[76].mxu0  ;;  %13117 = vmatpush3.bf16.msra.mxu0 %v13116_v6  ;;  %v10187_v41 = vadd.f32 %v10155_v16, %v10089_v59  ;;  %v9943_v31 = vmul.f32 %v16730_v34, %v17289_v14  ;;  %v17309_v16 = vld [vmem:[#allocation3 + $0x9a] sm:$0xff]  ;;  %v9403_v52 = vmul.f32 %v17126_v12, %v16688_v8  ;;  %v9404_v40 = vmul.f32 %v17128_v21, %v16688_v8 }
 0xc11   : > { %v9051_v26 = vadd.f32 %v9044_v47, %v17193_v39  ;;  %v12961_v44 = vpop.f32.mrb[77].mxu0  ;;  %v10186_v38 = vadd.f32 %v10154_v11, %v10088_v2  ;;  %v17300_v11 = vld [vmem:[#allocation3 + $0x99] sm:$0xff]  ;;  %v9778_v53 = vadd.f32 %v9746_v7, %v9680_v15  ;;  %v10040_v47 = vmul.f32 %v16763_v4, %v17298_v49 }
 0xc12   : > { %v9047_v29 = vpop.f32.mrb[78].mxu0  ;;  %v10041_v6 = vmul.f32 %v16763_v4, %v17300_v11  ;;  %v10221_v56 = vadd.f32 %v16781_v3, %v10187_v41  ;;  %v9470_v7 = vmul.f32 %v17136_v60, %v16696_v32  ;;  %v9665_v12 = vmul.f32 %v17230_v1, %v16707_v35 }
 0xc13   : > { %v9052_v37 = vadd.f32 %v9047_v29, %v17206_v19  ;;  %v12962_v33 = vpop.f32.mrb[79].mxu0  ;;  %v17283_v39 = vadd.f32 %v16674_v30, %v9051_v26  ;;  %v9777_v30 = vadd.f32 %v9745_v55, %v9679_v62  ;;  %v10220_v23 = vadd.f32 %v16781_v3, %v10186_v38 }
 0xc14   : > { %v10139_v26 = vmul.f32 %v16774_v51, %v17309_v16  ;;  %v9876_v54 = vadd.f32 %v9844_v27, %v9778_v53  ;;  %v10253_v29 = vmax.f32 %v10221_v56, 0.0  ;;  %v9469_v55 = vmul.f32 %v17134_v25, %v16696_v32  ;;  %v17348_v56 = vld [vmem:[#allocation3 + $0x169] sm:$0xff] }
 0xc15   : > { %v17294_v19 = vadd.f32 %v16685_v61, %v9052_v37  ;;  %v17307_v61 = vld [vmem:[#allocation3 + $0x92] sm:$0xff]  ;;  %v9875_v17 = vadd.f32 %v9843_v20, %v9777_v30  ;;  %v10252_v44 = vmax.f32 %v10220_v23, 0.0  ;;  %v9567_v37 = vmul.f32 %v17143_v42, %v16699_v0  ;;  %v17338_v30 = vld [vmem:[#allocation3 + $0x168] sm:$0xff] }
 0xc16   : > { %v10138_v36 = vmul.f32 %v16774_v51, %v17307_v61  ;;  %v9975_v20 = vadd.f32 %v9943_v31, %v9876_v54  ;;  %v9568_v33 = vmul.f32 %v17145_v5, %v16699_v0  ;;  %v9501_v62 = vadd.f32 %v9469_v55, %v9403_v52  ;;  %v17340_v31 = vld [vmem:[#allocation3 + $0x170] sm:$0xff] }
 0xc17   : > { %v9974_v2 = vadd.f32 %v9942_v10, %v9875_v17  ;;  %v13118_v59 = vpack.c.bf16 %v10253_v29, %v10252_v44  ;;  %v9502_v38 = vadd.f32 %v9470_v7, %v9404_v40  ;;  %v9666_v25 = vmul.f32 %v17232_v58, %v16707_v35  ;;  %v17351_v54 = vld [vmem:[#allocation3 + $0x171] sm:$0xff] }
 0xc18   : > { %v10073_v15 = vadd.f32 %v10041_v6, %v9975_v20  ;;  %v9763_v60 = vmul.f32 %v17240_v28, %v16710_v45  ;;  %v9764_v42 = vmul.f32 %v17242_v63, %v16710_v45  ;;  %v9599_v5 = vadd.f32 %v9567_v37, %v9501_v62  ;;  %v17355_v52 = vld [vmem:[#allocation3 + $0x16a] sm:$0xff]  ;;  %v17357_v40 = vld [vmem:[#allocation3 + $0x172] sm:$0xff] }
 0xc19   : > { %v10072_v21 = vadd.f32 %v10040_v47, %v9974_v2  ;;  %13119 = vmatprep.subr.bf16.mxu0 %v13118_v59  ;;  %v9600_v10 = vadd.f32 %v9568_v33, %v9502_v38  ;;  %v9861_v41 = vmul.f32 %v17246_v57, %v16718_v13  ;;  %v9862_v53 = vmul.f32 %v17248_v48, %v16718_v13  ;;  %v11446_v2 = vld [vmem:[%s17857_s9] ss:$0 sm:$0xff]  ;;  %s13973_s9 = scalar_lea.vmem %s13972_s5, 32 }
 0xc1a   : > { %v10171_v23 = vadd.f32 %v10139_v26, %v10073_v15  ;;  %v9960_v47 = vmul.f32 %v16730_v34, %v17338_v30  ;;  %v9961_v6 = vmul.f32 %v16730_v34, %v17340_v31  ;;  %v10058_v26 = vmul.f32 %v16763_v4, %v17348_v56  ;;  %p13975_p0 = scmp.lt.s32.totalorder %s13973_s9, %s13967_s29 }
 0xc1b   : > { %v10170_v27 = vadd.f32 %v10138_v36, %v10072_v21  ;;  %v9697_v36 = vadd.f32 %v9665_v12, %v9599_v5  ;;  %v9698_v44 = vadd.f32 %v9666_v25, %v9600_v10  ;;  %v10059_v7 = vmul.f32 %v16763_v4, %v17351_v54 }
 0xc1c   : > { %v10205_v55 = vadd.f32 %v16781_v3, %v10171_v23  ;;  %v10156_v20 = vmul.f32 %v16774_v51, %v17355_v52  ;;  %v10157_v37 = vmul.f32 %v16774_v51, %v17357_v40  ;;  %v9387_v25 = vmul.f32 %v17174_v50, %v16688_v8  ;;  %p13976_p1 = por %p13975_p0, %p13974_p13 }
 0xc1d   : > { %v10204_v17 = vadd.f32 %v16781_v3, %v10170_v27  ;;  %v9795_v21 = vadd.f32 %v9763_v60, %v9697_v36  ;;  %v9796_v62 = vadd.f32 %v9764_v42, %v9698_v44  ;;  %v9388_v27 = vmul.f32 %v17176_v24, %v16688_v8 }
 0xc1e   : > { %v10237_v15 = vmax.f32 %v10205_v55, 0.0  ;;  %v9453_v5 = vmul.f32 %v17184_v22, %v16696_v32  ;;  %v9454_v60 = vmul.f32 %v17186_v9, %v16696_v32  ;;  %v9551_v50 = vmul.f32 %v17190_v46, %v16699_v0  ;;  %p13977_p2 = pnand %p13976_p1, %p13970_p12 }
 0xc1f   : > { %v10236_v59 = vmax.f32 %v10204_v17, 0.0  ;;  %v9552_v22 = vmul.f32 %v17198_v18, %v16699_v0  ;;  %v9747_v46 = vmul.f32 %v17298_v49, %v16710_v45  ;;  %v9748_v18 = vmul.f32 %v17300_v11, %v16710_v45 }
 0xc20   : > { %v9228_v29 = vpop.f32.mrb[80].mxu0  ;;  %v9485_v42 = vadd.f32 %v9453_v5, %v9387_v25  ;;  %v9486_v55 = vadd.f32 %v9454_v60, %v9388_v27  ;;  %v17404_v27 = vld [vmem:[#allocation3 + $0xa9] sm:$0xff] }
 0xc21   : > { %v9235_v33 = vadd.f32 %v9228_v29, %v17283_v39  ;;  %v12985_v12 = vpop.f32.mrb[81].mxu0  ;;  %v9893_v29 = vadd.f32 %v9861_v41, %v9795_v21  ;;  %v13120_v17 = vpack.c.bf16 %v10237_v15, %v10236_v59  ;;  %v9649_v41 = vmul.f32 %v17285_v43, %v16707_v35  ;;  %v17393_v21 = vld [vmem:[#allocation3 + $0xa8] sm:$0xff]  ;;  %v17400_v15 = vld [vmem:[#allocation3 + $0xb0] sm:$0xff] }
 0xc22   : > { %v9231_v38 = vpop.f32.mrb[82].mxu0  ;;  %v9894_v12 = vadd.f32 %v9862_v53, %v9796_v62  ;;  %v9650_v53 = vmul.f32 %v17289_v14, %v16707_v35  ;;  %v8412_v62 = vld [vmem:[%s17798_s12] sm:$0xf]  ;;  %v9944_v25 = vmul.f32 %v16730_v34, %v17393_v21 }
 0xc23   : > { %v9244_v10 = vadd.f32 %v11446_v2, %v9235_v33  ;;  %v9236_v23 = vadd.f32 %v9231_v38, %v17294_v19  ;;  %v12986_v39 = vpop.f32.mrb[83].mxu0  ;;  %v9992_v44 = vadd.f32 %v9960_v47, %v9893_v29  ;;  %13121 = vmatpush3.bf16.msra.mxu0 %v13120_v17  ;;  %v9583_v19 = vadd.f32 %v9551_v50, %v9485_v42  ;;  %v17419_v42 = vld [vmem:[#allocation3 + $0xb2] sm:$0xff] }
 0xc24   : > { %v9993_v24 = vadd.f32 %v9961_v6, %v9894_v12  ;;  %v9584_v47 = vadd.f32 %v9552_v22, %v9486_v55  ;;  %v9846_v38 = vmul.f32 %v17309_v16, %v16718_v13  ;;  %v17408_v39 = vld [vmem:[#allocation3 + $0xb1] sm:$0xff]  ;;  %v17858_v29 = vmov 0.0|0.0  }
 0xc25   : > { %v9245_v36 = vadd.f32 %v11446_v2, %v9236_v23  ;;  %v10090_v33 = vadd.f32 %v10058_v26, %v9992_v44  ;;  %v9681_v6 = vadd.f32 %v9649_v41, %v9583_v19  ;;  %v9845_v2 = vmul.f32 %v17307_v61, %v16718_v13 }
 0xc26   : > { %v10091_v59 = vadd.f32 %v10059_v7, %v9993_v24  ;;  %v9682_v5 = vadd.f32 %v9650_v53, %v9584_v47  ;;  %v9945_v23 = vmul.f32 %v16730_v34, %v17400_v15  ;;  %v10043_v60 = vmul.f32 %v16763_v4, %v17408_v39 }
 0xc27   : > { %v13100_v9 = vpack.c.bf16 %v9245_v36, %v9244_v10  ;;  %v10188_v26 = vadd.f32 %v10156_v20, %v10090_v33  ;;  %v9779_v10 = vadd.f32 %v9747_v46, %v9681_v6  ;;  %v10042_v20 = vmul.f32 %v16763_v4, %v17404_v27 }
 0xc28   : > { %v10189_v7 = vadd.f32 %v10157_v37, %v10091_v59  ;;  %v17412_v37 = vld [vmem:[#allocation3 + $0xaa] sm:$0xff]  ;;  %v9780_v36 = vadd.f32 %v9748_v18, %v9682_v5  ;;  %v10141_v24 = vmul.f32 %v16774_v51, %v17419_v42  ;;  %v9405_v22 = vmul.f32 %v17230_v1, %v16688_v8 }
 0xc29   : > { %13101 = vmatpush3.bf16.msra.mxu1 %v13100_v9  ;;  %v10222_v12 = vadd.f32 %v16781_v3, %v10188_v26  ;;  %v10140_v50 = vmul.f32 %v16774_v51, %v17412_v37  ;;  %v9877_v44 = vadd.f32 %v9845_v2, %v9779_v10  ;;  %v9406_v41 = vmul.f32 %v17232_v58, %v16688_v8 }
 0xc2a   : > { %13134 = vmatprep.subr.bf16.mxu1 %v17858_v29  ;;  %v10223_v17 = vadd.f32 %v16781_v3, %v10189_v7  ;;  %v9471_v53 = vmul.f32 %v17240_v28, %v16696_v32  ;;  %v17859_v9 = vmov 0.0   ;;  %v9878_v33 = vadd.f32 %v9846_v38, %v9780_v36 }
 0xc2b   : > { %v10254_v55 = vmax.f32 %v10222_v12, 0.0  ;;  %v9976_v59 = vadd.f32 %v9944_v25, %v9877_v44  ;;  %v9472_v46 = vmul.f32 %v17242_v63, %v16696_v32  ;;  %v9569_v47 = vmul.f32 %v17246_v57, %v16699_v0  ;;  %v17456_v12 = vld [vmem:[#allocation3 + $0x181] sm:$0xff] }
 0xc2c   : > { %12992 = vmatmul.mubr.msk.f32.vlgmr.msra.gmra.mrb[44].mxu1 %vm9246_vm11, %v8412_v62  ;;  %v10255_v19 = vmax.f32 %v10223_v17, 0.0  ;;  %v9503_v6 = vadd.f32 %v9471_v53, %v9405_v22  ;;  %v9570_v18 = vmul.f32 %v17248_v48, %v16699_v0  ;;  %v9667_v58 = vmul.f32 %v17338_v30, %v16707_v35  ;;  %v17462_v22 = vld [vmem:[#allocation3 + $0x189] sm:$0xff] }
 0xc2d   : > { %13010 = vmatprep.mubr.msk.f32.mxu1 %vm14070_vm7, %v17859_v9  ;;  %v9977_v28 = vadd.f32 %v9945_v23, %v9878_v33  ;;  %v10074_v2 = vadd.f32 %v10042_v20, %v9976_v59  ;;  %v9504_v62 = vadd.f32 %v9472_v46, %v9406_v41  ;;  %v9668_v26 = vmul.f32 %v17340_v31, %v16707_v35  ;;  %v17452_v23 = vld [vmem:[#allocation3 + $0x180] sm:$0xff]  ;;  %v17454_v20 = vld [vmem:[#allocation3 + $0x188] sm:$0xff] }
 0xc2e   : > { %v13122_v1 = vpack.c.bf16 %v10255_v19, %v10254_v55  ;;  %v9601_v7 = vadd.f32 %v9569_v47, %v9503_v6  ;;  %v9765_v63 = vmul.f32 %v17348_v56, %v16710_v45  ;;  %v9766_v57 = vmul.f32 %v17351_v54, %v16710_v45  ;;  %v17469_v53 = vld [vmem:[#allocation3 + $0x182] sm:$0xff]  ;;  %v17471_v33 = vld [vmem:[#allocation3 + $0x18a] sm:$0xff] }
 0xc2f   : > { %v9863_v48 = vmul.f32 %v17355_v52, %v16718_v13  ;;  %v10075_v38 = vadd.f32 %v10043_v60, %v9977_v28  ;;  %v10172_v25 = vadd.f32 %v10140_v50, %v10074_v2  ;;  %v9602_v5 = vadd.f32 %v9570_v18, %v9504_v62 }
 0xc30   : > { %13123 = vmatprep.subr.bf16.mxu0 %v13122_v1  ;;  %v9864_v10 = vmul.f32 %v17357_v40, %v16718_v13  ;;  %v9699_v17 = vadd.f32 %v9667_v58, %v9601_v7  ;;  %v9962_v36 = vmul.f32 %v16730_v34, %v17452_v23  ;;  %v9963_v44 = vmul.f32 %v16730_v34, %v17454_v20 }
 0xc31   : > { %v10060_v60 = vmul.f32 %v16763_v4, %v17456_v12  ;;  %v10173_v50 = vadd.f32 %v10141_v24, %v10075_v38  ;;  %v10206_v55 = vadd.f32 %v16781_v3, %v10172_v25  ;;  %v9700_v19 = vadd.f32 %v9668_v26, %v9602_v5 }
 0xc32   : > { %v10061_v41 = vmul.f32 %v16763_v4, %v17462_v22  ;;  %v9797_v59 = vadd.f32 %v9765_v63, %v9699_v17  ;;  %v10158_v46 = vmul.f32 %v16774_v51, %v17469_v53  ;;  %v10159_v47 = vmul.f32 %v16774_v51, %v17471_v33 }
 0xc33   : > { %v9389_v24 = vmul.f32 %v17285_v43, %v16688_v8  ;;  %v10207_v1 = vadd.f32 %v16781_v3, %v10173_v50  ;;  %v10238_v6 = vmax.f32 %v10206_v55, 0.0  ;;  %v9798_v18 = vadd.f32 %v9766_v57, %v9700_v19  ;;  %v17502_v55 = vld [vmem:[#allocation3 + $0xc8] sm:$0xff] }
 0xc34   : > { %v9390_v58 = vmul.f32 %v17289_v14, %v16688_v8  ;;  %v9895_v28 = vadd.f32 %v9863_v48, %v9797_v59  ;;  %v9455_v2 = vmul.f32 %v17298_v49, %v16696_v32  ;;  %v9456_v62 = vmul.f32 %v17300_v11, %v16696_v32 }
 0xc35   : > { %v9553_v26 = vmul.f32 %v17307_v61, %v16699_v0  ;;  %v10239_v7 = vmax.f32 %v10207_v1, 0.0  ;;  %v9896_v63 = vadd.f32 %v9864_v10, %v9798_v18  ;;  %v9554_v43 = vmul.f32 %v17309_v16, %v16699_v0 }
 0xc36   : > { %v9651_v57 = vmul.f32 %v17393_v21, %v16707_v35  ;;  %v9994_v38 = vadd.f32 %v9962_v36, %v9895_v28  ;;  %v9487_v14 = vadd.f32 %v9455_v2, %v9389_v24  ;;  %v9488_v48 = vadd.f32 %v9456_v62, %v9390_v58  ;;  %v17500_v36 = vld [vmem:[#allocation3 + $0xc0] sm:$0xff]  ;;  %v17512_v58 = vld [vmem:[#allocation3 + $0xc9] sm:$0xff] }
 0xc37   : > { %v9652_v49 = vmul.f32 %v17400_v15, %v16707_v35  ;;  %v13124_v25 = vpack.c.bf16 %v10239_v7, %v10238_v6  ;;  %v9995_v5 = vadd.f32 %v9963_v44, %v9896_v63  ;;  %v9749_v11 = vmul.f32 %v17404_v27, %v16710_v45  ;;  %v17510_v24 = vld [vmem:[#allocation3 + $0xc1] sm:$0xff]  ;;  %v17518_v2 = vld [vmem:[#allocation3 + $0xca] sm:$0xff] }
 0xc38   : > { %v9750_v61 = vmul.f32 %v17408_v39, %v16710_v45  ;;  %v10092_v10 = vadd.f32 %v10060_v60, %v9994_v38  ;;  %v9585_v17 = vadd.f32 %v9553_v26, %v9487_v14  ;;  %v9586_v16 = vadd.f32 %v9554_v43, %v9488_v48 }
 0xc39   : > { %v9847_v50 = vmul.f32 %v17412_v37, %v16718_v13  ;;  %13125 = vmatpush3.bf16.msra.mxu0 %v13124_v25  ;;  %v10093_v19 = vadd.f32 %v10061_v41, %v9995_v5  ;;  %v9848_v44 = vmul.f32 %v17419_v42, %v16718_v13  ;;  %v9946_v59 = vmul.f32 %v16730_v34, %v17500_v36  ;;  %v17516_v41 = vld [vmem:[#allocation3 + $0xc2] sm:$0xff] }
 0xc3a   : > { %v9947_v60 = vmul.f32 %v16730_v34, %v17502_v55  ;;  %v10190_v1 = vadd.f32 %v10158_v46, %v10092_v10  ;;  %v9683_v6 = vadd.f32 %v9651_v57, %v9585_v17  ;;  %v9684_v18 = vadd.f32 %v9652_v49, %v9586_v16 }
 0xc3b   : > { %v10044_v28 = vmul.f32 %v16763_v4, %v17510_v24  ;;  %v10191_v62 = vadd.f32 %v10159_v47, %v10093_v19  ;;  %v10045_v26 = vmul.f32 %v16763_v4, %v17512_v58  ;;  %v10142_v7 = vmul.f32 %v16774_v51, %v17516_v41 }
 0xc3c   : > { %v10143_v46 = vmul.f32 %v16774_v51, %v17518_v2  ;;  %v10224_v63 = vadd.f32 %v16781_v3, %v10190_v1  ;;  %v9781_v43 = vadd.f32 %v9749_v11, %v9683_v6  ;;  %v9782_v57 = vadd.f32 %v9750_v61, %v9684_v18  ;;  %v9930_v1 = vld [vmem:[#allocation3 + $0x198] sm:$0xff]  ;;  %v9931_v18 = vld [vmem:[#allocation3 + $0x1a0] sm:$0xff] }
 0xc3d   : > { %v9407_v38 = vmul.f32 %v17338_v30, %v16688_v8  ;;  %v10225_v14 = vadd.f32 %v16781_v3, %v10191_v62  ;;  %v9408_v47 = vmul.f32 %v17340_v31, %v16688_v8  ;;  %v9473_v48 = vmul.f32 %v17348_v56, %v16696_v32  ;;  %v10028_v62 = vld [vmem:[#allocation3 + $0x199] sm:$0xff] }
 0xc3e   : > { %v9474_v49 = vmul.f32 %v17351_v54, %v16696_v32  ;;  %v10256_v25 = vmax.f32 %v10224_v63, 0.0  ;;  %v9879_v5 = vadd.f32 %v9847_v50, %v9781_v43  ;;  %v9880_v10 = vadd.f32 %v9848_v44, %v9782_v57 }
 0xc3f   : > { %v9571_v11 = vmul.f32 %v17355_v52, %v16699_v0  ;;  %v10257_v61 = vmax.f32 %v10225_v14, 0.0  ;;  %v9505_v17 = vadd.f32 %v9473_v48, %v9407_v38  ;;  %v9572_v16 = vmul.f32 %v17357_v40, %v16699_v0  ;;  %v10127_v14 = vld [vmem:[#allocation3 + $0x1a2] sm:$0xff] }
 0xc40   : > { %v9506_v30 = vadd.f32 %v9474_v49, %v9408_v47  ;;  %v9978_v19 = vadd.f32 %v9946_v59, %v9879_v5  ;;  %v9979_v31 = vadd.f32 %v9947_v60, %v9880_v10  ;;  %v9669_v56 = vmul.f32 %v17452_v23, %v16707_v35  ;;  %v10029_v59 = vld [vmem:[#allocation3 + $0x1a1] sm:$0xff] }
 0xc41   : > { %v9670_v54 = vmul.f32 %v17454_v20, %v16707_v35  ;;  %v13126_v50 = vpack.c.bf16 %v10257_v61, %v10256_v25  ;;  %v9603_v44 = vadd.f32 %v9571_v11, %v9505_v17  ;;  %v9767_v52 = vmul.f32 %v17456_v12, %v16710_v45  ;;  %v10126_v60 = vld [vmem:[#allocation3 + $0x19a] sm:$0xff] }
 0xc42   : > { %v9604_v6 = vadd.f32 %v9572_v16, %v9506_v30  ;;  %v10076_v63 = vadd.f32 %v10044_v28, %v9978_v19  ;;  %v10077_v43 = vadd.f32 %v10045_v26, %v9979_v31  ;;  %v9768_v40 = vmul.f32 %v17462_v22, %v16710_v45 }
 0xc43   : > { %v9865_v23 = vmul.f32 %v17469_v53, %v16718_v13  ;;  %13127 = vmatprep.subr.bf16.mxu0 %v13126_v50  ;;  %v9701_v20 = vadd.f32 %v9669_v56, %v9603_v44  ;;  %v9866_v38 = vmul.f32 %v17471_v33, %v16718_v13  ;;  %v9964_v12 = vmul.f32 %v16730_v34, %v9930_v1 }
 0xc44   : > { %v9702_v57 = vadd.f32 %v9670_v54, %v9604_v6  ;;  %v10174_v47 = vadd.f32 %v10142_v7, %v10076_v63  ;;  %v10175_v28 = vadd.f32 %v10143_v46, %v10077_v43  ;;  %v9965_v26 = vmul.f32 %v16730_v34, %v9931_v18  ;;  %v9915_v63 = vld [vmem:[#allocation3 + $0xe0] sm:$0xff] }
 0xc45   : > { %v10062_v22 = vmul.f32 %v16763_v4, %v10028_v62  ;;  %v9799_v48 = vadd.f32 %v9767_v52, %v9701_v20  ;;  %v10063_v53 = vmul.f32 %v16763_v4, %v10029_v59  ;;  %v10160_v25 = vmul.f32 %v16774_v51, %v10126_v60  ;;  %v10012_v43 = vld [vmem:[#allocation3 + $0xd9] sm:$0xff]  ;;  %v10013_v59 = vld [vmem:[#allocation3 + $0xe1] sm:$0xff] }
 0xc46   : > { %v9800_v49 = vadd.f32 %v9768_v40, %v9702_v57  ;;  %v10208_v5 = vadd.f32 %v16781_v3, %v10174_v47  ;;  %v10209_v10 = vadd.f32 %v16781_v3, %v10175_v28  ;;  %v10161_v33 = vmul.f32 %v16774_v51, %v10127_v14  ;;  %v10110_v20 = vld [vmem:[#allocation3 + $0xda] sm:$0xff] }
 0xc47   : > { %v9391_v7 = vmul.f32 %v17393_v21, %v16688_v8  ;;  %v9897_v46 = vadd.f32 %v9865_v23, %v9799_v48  ;;  %v9392_v61 = vmul.f32 %v17400_v15, %v16688_v8  ;;  %v9457_v17 = vmul.f32 %v17404_v27, %v16696_v32 }
 0xc48   : > { %v9898_v11 = vadd.f32 %v9866_v38, %v9800_v49  ;;  %v10240_v30 = vmax.f32 %v10208_v5, 0.0  ;;  %v10241_v16 = vmax.f32 %v10209_v10, 0.0  ;;  %v9458_v19 = vmul.f32 %v17408_v39, %v16696_v32 }
 0xc49   : > { %v9555_v31 = vmul.f32 %v17412_v37, %v16699_v0  ;;  %v9996_v56 = vadd.f32 %v9964_v12, %v9897_v46  ;;  %v9489_v1 = vadd.f32 %v9457_v17, %v9391_v7  ;;  %v9556_v21 = vmul.f32 %v17419_v42, %v16699_v0  ;;  %v9914_v0 = vld [vmem:[#allocation3 + $0xd8] sm:$0xff] }
 0xc4a   : > { %v9997_v54 = vadd.f32 %v9965_v26, %v9898_v11  ;;  %v13128_v50 = vpack.c.bf16 %v10241_v16, %v10240_v30  ;;  %v9490_v44 = vadd.f32 %v9458_v19, %v9392_v61  ;;  %v9653_v8 = vmul.f32 %v17500_v36, %v16707_v35  ;;  %v10335_v61 = vld [vmem:[%s17802_s16 + $0x8] sm:$0xff]  ;;  %v10337_v30 = vld [vmem:[%s17802_s16 + $0x18] sm:$0xff]  ;;  %v10564_v16 = vld [vmem:[%s17807_s21] sm:$0xff] }
 0xc4b   : > { %v9654_v15 = vmul.f32 %v17502_v55, %v16707_v35  ;;  %v10094_v27 = vadd.f32 %v10062_v22, %v9996_v56  ;;  %v9587_v32 = vadd.f32 %v9555_v31, %v9489_v1  ;;  %v9751_v39 = vmul.f32 %v17510_v24, %v16710_v45  ;;  %v10260_v35 = vld [vmem:[%s17801_s15] sm:$0xff]  ;;  %v10565_v31 = vld [vmem:[%s17807_s21 + $0x8] sm:$0xff]  ;;  %v10566_v56 = vld [vmem:[%s17807_s21 + $0x10] sm:$0xff] }
 0xc4c   : > { %v10095_v6 = vadd.f32 %v10063_v53, %v9997_v54  ;;  %13129 = vmatpush3.bf16.msra.mxu0 %v13128_v50  ;;  %v9588_v37 = vadd.f32 %v9556_v21, %v9490_v44  ;;  %v9752_v52 = vmul.f32 %v17512_v58, %v16710_v45  ;;  %v9849_v36 = vmul.f32 %v17516_v41, %v16718_v13  ;;  %v10567_v54 = vld [vmem:[%s17807_s21 + $0x18] sm:$0xff]  ;;  %v10338_v21 = vld [vmem:[%s17802_s16 + $0x20] sm:$0xff]  ;;  %v10339_v50 = vld [vmem:[%s17802_s16 + $0x28] sm:$0xff] }
 0xc4d   : > { %v10192_v42 = vadd.f32 %v10160_v25, %v10094_v27  ;;  %v9685_v62 = vadd.f32 %v9653_v8, %v9587_v32  ;;  %v9850_v24 = vmul.f32 %v17518_v2, %v16718_v13  ;;  %v9948_v23 = vmul.f32 %v16730_v34, %v9914_v0  ;;  %v10111_v13 = vld [vmem:[#allocation3 + $0xe2] sm:$0xff]  ;;  %v10568_v27 = vld [vmem:[%s17807_s21 + $0x20] sm:$0xff] }
 0xc4e   : > { %v10193_v18 = vadd.f32 %v10161_v33, %v10095_v6  ;;  %v9686_v55 = vadd.f32 %v9654_v15, %v9588_v37  ;;  %v9949_v41 = vmul.f32 %v16730_v34, %v9915_v63  ;;  %v10262_v57 = vcombine.high %v10260_v35, %v10260_v35  ;;  %v10569_v6 = vld [vmem:[%s17807_s21 + $0x28] sm:$0xff]  ;;  %v10340_v32 = vld [vmem:[%s17802_s16 + $0x30] sm:$0xff] }
 0xc4f   : > { %v10226_v40 = vadd.f32 %v16781_v3, %v10192_v42  ;;  %v9783_v58 = vadd.f32 %v9751_v39, %v9685_v62  ;;  %v10046_v47 = vmul.f32 %v16763_v4, %v10012_v43  ;;  %v10047_v28 = vmul.f32 %v16763_v4, %v10013_v59  ;;  %v10341_v39 = vld [vmem:[%s17802_s16 + $0x38] sm:$0xff]  ;;  %v10570_v0 = vld [vmem:[%s17807_s21 + $0x30] sm:$0xff] }
 0xc50   : > { %v10227_v45 = vadd.f32 %v16781_v3, %v10193_v18  ;;  %v9784_v60 = vadd.f32 %v9752_v52, %v9686_v55  ;;  %10328 = vmatprep.mubr.f32.mxu0 %v10262_v57  ;;  %v10144_v48 = vmul.f32 %v16774_v51, %v10110_v20  ;;  %v10145_v53 = vmul.f32 %v16774_v51, %v10111_v13  ;;  %v10334_v51 = vld [vmem:[%s17802_s16] sm:$0xff]  ;;  %v10571_v42 = vld [vmem:[%s17807_s21 + $0x38] sm:$0xff] }
 0xc51   : > { %v10258_v38 = vmax.f32 %v10226_v40, 0.0  ;;  %v9881_v14 = vadd.f32 %v9849_v36, %v9783_v58  ;;  %v13135_v17 = vpack.c.bf16 %v10335_v61, %v10334_v51  ;;  %v14072_v1 = vmov 0   ;;  %v10477_v61 = vld [vmem:[%s17805_s19 + $0x18] sm:$0xff] }
 0xc52   : > { %v10259_v12 = vmax.f32 %v10227_v45, 0.0  ;;  %v9882_v2 = vadd.f32 %v9850_v24, %v9784_v60  ;;  %13806 = vset.pattern.permute.xlu0 %v14072_v1  ;;  %v13159_v44 = vpack.c.bf16 %v10565_v31, %v10564_v16  ;;  %v13162_v8 = vpack.c.bf16 %v10567_v54, %v10566_v56  ;;  %v10481_v31 = vld [vmem:[%s17805_s19 + $0x38] sm:$0xff]  ;;  %v11456_v54 = vld [vmem:[%s17803_s17] ss:$0 sm:$0xff] }
 0xc53   : > { %v9980_v22 = vadd.f32 %v9948_v23, %v9881_v14  ;;  %13136 = vmatpush3.bf16.msra.mxu1 %v13135_v17  ;;  %v13141_v15 = vpack.c.bf16 %v10339_v50, %v10338_v21  ;;  %v13165_v37 = vpack.c.bf16 %v10569_v6, %v10568_v27  ;;  %v13144_v52 = vpack.c.bf16 %v10341_v39, %v10340_v32  ;;  %v10478_v17 = vld [vmem:[%s17805_s19 + $0x20] sm:$0xff] }
 0xc54   : > { %v13130_v26 = vpack.c.bf16 %v10259_v12, %v10258_v38  ;;  %v9981_v49 = vadd.f32 %v9949_v41, %v9882_v2  ;;  %13137 = vmatprep.subr.bf16.mxu1 %v17858_v29  ;;  %v13168_v18 = vpack.c.bf16 %v10571_v42, %v10570_v0 }
 0xc55   : > { %v10078_v34 = vadd.f32 %v10046_v47, %v9980_v22 }
 0xc56   : > { %13131 = vmatprep.subr.bf16.mxu0 %v13130_v26  ;;  %v10079_v25 = vadd.f32 %v10047_v28, %v9981_v49 }
 0xc57   : > { %v10176_v5 = vadd.f32 %v10144_v48, %v10078_v34 }
 0xc58   : > { %v10177_v10 = vadd.f32 %v10145_v53, %v10079_v25 }
 0xc59   : > { %v10210_v33 = vadd.f32 %v16781_v3, %v10176_v5 }
 0xc5a   : > { %v10211_v7 = vadd.f32 %v16781_v3, %v10177_v10  ;;  %v10336_v3 = vld [vmem:[%s17802_s16 + $0x10] sm:$0xff] }
 0xc5b   : > { %v10242_v46 = vmax.f32 %v10210_v33, 0.0  ;;  %v13138_v19 = vpack.c.bf16 %v10337_v30, %v10336_v3  ;;  %v10479_v30 = vld [vmem:[%s17805_s19 + $0x28] sm:$0xff] }
 0xc5c   : > { %v10243_v11 = vmax.f32 %v10211_v7, 0.0  ;;  %v13153_v16 = vpack.c.bf16 %v10479_v30, %v10478_v17 }
 0xc5d   : > { %13139 = vmatpush3.bf16.msra.mxu1 %v13138_v19  ;;  %v10480_v19 = vld [vmem:[%s17805_s19 + $0x30] sm:$0xff] }
 0xc5e   : > { %v13132_v4 = vpack.c.bf16 %v10243_v11, %v10242_v46  ;;  %13140 = vmatprep.subr.bf16.mxu1 %v17858_v29  ;;  %v10474_v11 = vld [vmem:[%s17805_s19] sm:$0xff]  ;;  %v13156_v56 = vpack.c.bf16 %v10481_v31, %v10480_v19 }
 0xc60   : > { %13133 = vmatpush3.bf16.msra.mxu0 %v13132_v4  ;;  %v10476_v4 = vld [vmem:[%s17805_s19 + $0x10] sm:$0xff] }
 0xc61   : > { %13158 = vmatprep.subr.bf16.mxu0 %v17858_v29  ;;  %13142 = vmatpush3.bf16.msra.mxu1 %v13141_v15  ;;  %v13150_v3 = vpack.c.bf16 %v10477_v61, %v10476_v4 }
 0xc62   : > { %13143 = vmatprep.subr.bf16.mxu1 %v17858_v29 }
 0xc63   : > { %10329 = vmatmul.mubr.f32.vlgmr.msra.gmra.mrb[50].mxu0 %v10260_v35 }
 0xc64   : > { %13048 = vmatprep.mubr.msk.f32.mxu0 %vm14070_vm7, %v17859_v9  ;;  %13160 = vmatpush3.bf16.msra.mxu0 %v13159_v44  ;;  %v11458_v44 = vld [vmem:[%s17804_s18] ss:$0 sm:$0xff] }
 0xc65   : > { %13161 = vmatprep.subr.bf16.mxu0 %v17858_v29  ;;  %13145 = vmatpush3.bf16.msra.mxu1 %v13144_v52  ;;  %v10572_v52 = vld [vmem:[%s17808_s22] sm:$0x1] }
 0xc66   : > { %13146 = vmatprep.subr.bf16.mxu1 %v17858_v29 }
 0xc68   : > { %13163 = vmatpush3.bf16.msra.mxu0 %v13162_v8 }
 0xc69   : > { %13164 = vmatprep.subr.bf16.mxu0 %v17858_v29 }
 0xc6c   : > { %13166 = vmatpush3.bf16.msra.mxu0 %v13165_v37 }
 0xc6d   : > { %13167 = vmatprep.subr.bf16.mxu0 %v17858_v29 }
 0xc70   : > { %13169 = vmatpush3.bf16.msra.mxu0 %v13168_v18 }
 0xcff   : > { %v9316_v62 = vpop.f32.mrb[44].mxu1 }
 0xd00   : > { %v9320_v36 = vsel %vm8407_vm8, %v9316_v62, 0.0  ;;  %v12993_v63 = vpop.f32.mrb[45].mxu1 }
 0xd01   : > { %v9321_v35 = vrot.slane %v9320_v36, 4 }
 0xd03   : > { %v9322_v55 = vadd.f32 %v9321_v35, %v9320_v36 }
 0xd05   : > { %v9323_v24 = vrot.slane %v9322_v55, 2 }
 0xd07   : > { %v9324_v43 = vadd.f32 %v9323_v24, %v9322_v55 }
 0xd09   : > { %v9325_v40 = vrot.slane %v9324_v43, 1 }
 0xd0b   : > { %v9326_v45 = vadd.f32 %v9325_v40, %v9324_v43 }
 0xd0d   : > { %v9328_v58 = vmul.f32 0.25, %v9326_v45 }
 0xd0f   : > { %v9329_v23 = vsub.f32 %v9316_v62, %v9328_v58 }
 0xd11   : > { %v9330_v59 = vmul.f32 %v9329_v23, %v9329_v23 }
 0xd13   : > { %v9331_v60 = vsel %vm8407_vm8, %v9330_v59, 0.0 }
 0xd14   : > { %v9332_v41 = vrot.slane %v9331_v60, 4 }
 0xd16   : > { %v9333_v20 = vadd.f32 %v9332_v41, %v9331_v60 }
 0xd18   : > { %v9334_v57 = vrot.slane %v9333_v20, 2 }
 0xd1a   : > { %v9335_v38 = vadd.f32 %v9334_v57, %v9333_v20 }
 0xd1c   : > { %v9336_v12 = vrot.slane %v9335_v38, 1 }
 0xd1e   : > { %v9337_v14 = vadd.f32 %v9336_v12, %v9335_v38 }
 0xd20   : > { %v9338_v47 = vmul.f32 0.25, %v9337_v14 }
 0xd22   : > { %v9339_v13 = vadd.f32 1e-05, %v9338_v47 }
 0xd24   : > { %13940 = vrsqrt.f32 %v9339_v13 }
 0xd2e   : > { %v13941_v2 = vpop.eup %13940 }
 0xd2f   : > { %v9341_v28 = vmul.f32 %v13941_v2, %v9329_v23 }
 0xd31   : > { %v9342_v26 = vmax.f32 %v9341_v28, 0.0 }
 0xd33   : > { %v10466_v22 = vsel %vm8407_vm8, %v9342_v26, 0.0  ;;  %13011 = vmatmul.mubr.msk.f32.vlgmr.msra.gmra.mrb[46].mxu1 %vm3648_vm4, %v9342_v26 }
 0xd34   : > { %v10467_v48 = vrot.slane %v10466_v22, 4  ;;  %13029 = vmatprep.mubr.msk.f32.mxu1 %vm14070_vm7, %v17859_v9  ;;  %v10475_v9 = vld [vmem:[%s17805_s19 + $0x8] sm:$0xff] }
 0xd35   : > { %v13147_v51 = vpack.c.bf16 %v10475_v9, %v10474_v11 }
 0xd36   : > { %v10468_v49 = vadd.f32 %v10467_v48, %v10466_v22  ;;  %v12020_v34 = vpop.f32.mrb[50].mxu0 }
 0xd37   : > { %v12021_v5 = vpop.f32.mrb[51].mxu0  ;;  %13148 = vmatpush3.bf16.msra.mxu1 %v13147_v51 }
 0xd38   : > { %v10469_v53 = vrot.slane %v10468_v49, 2  ;;  %v12022_v10 = vadd.f32 %v12021_v5, %v12020_v34  ;;  %13149 = vmatprep.subr.bf16.mxu1 %v17858_v29 }
 0xd3a   : > { %v10470_v25 = vadd.f32 %v10469_v53, %v10468_v49  ;;  %10345 = vperm.xlu0 %13806, %v12022_v10  }
 0xd3b   : > { %13151 = vmatpush3.bf16.msra.mxu1 %v13150_v3 }
 0xd3c   : > { %v10471_v33 = vrot.slane %v10470_v25, 1  ;;  %13152 = vmatprep.subr.bf16.mxu1 %v17858_v29 }
 0xd3e   : > { %v10472_v7 = vadd.f32 %v10471_v33, %v10470_v25 }
 0xd3f   : > { %13154 = vmatpush3.bf16.msra.mxu1 %v13153_v16 }
 0xd40   : > { %v10473_v46 = vmul.f32 0.25, %v10472_v7  ;;  %13155 = vmatprep.subr.bf16.mxu1 %v17858_v29 }
 0xd42   : > { %13049 = vmatmul.mubr.msk.f32.vlgmr.msra.gmra.mrb[84].mxu0 %vm3648_vm4, %v10473_v46 }
 0xd43   : > { %13157 = vmatpush3.bf16.msra.mxu1 %v13156_v56 }
 0xdb9   : > { %v10346_v1 = vpop.permute.xlu0 %10345 }
 0xdba   : > { %v10354_v21 = vmul.f32 %v11456_v54, %v10346_v1 }
 0xe06   : > { %v10424_v50 = vpop.f32.mrb[46].mxu1 }
 0xe07   : > { %v10425_v8 = vadd.f32 %v10424_v50, %v10354_v21  ;;  %v13012_v15 = vpop.f32.mrb[47].mxu1 }
 0xe09   : > { %v10435_v27 = vadd.f32 %v11458_v44, %v10425_v8 }
 0xe0b   : > { %v10436_v6 = vsel %vm8407_vm8, %v10435_v27, 0.0 }
 0xe0c   : > { %v10437_v32 = vrot.slane %v10436_v6, 4 }
 0xe0e   : > { %v10438_v39 = vadd.f32 %v10437_v32, %v10436_v6 }
 0xe10   : > { %v10439_v29 = vrot.slane %v10438_v39, 2 }
 0xe12   : > { %v10440_v37 = vadd.f32 %v10439_v29, %v10438_v39 }
 0xe14   : > { %v10441_v0 = vrot.slane %v10440_v37, 1 }
 0xe15   : > { %v10642_v42 = vpop.f32.mrb[84].mxu0 }
 0xe16   : > { %v10442_v18 = vadd.f32 %v10441_v0, %v10440_v37  ;;  %v10643_v62 = vadd.f32 %v10642_v42, %v10572_v52  ;;  %v13050_v36 = vpop.f32.mrb[85].mxu0 }
 0xe18   : > { %v10443_v63 = vmul.f32 0.25, %v10442_v18  ;;  %v11462_v35 = vmul.f32 -1.442695, %v10643_v62 }
 0xe1a   : > { %v10444_v55 = vsub.f32 %v10435_v27, %v10443_v63  ;;  %13942 = vpow2.f32 %v11462_v35 }
 0xe1c   : > { %v10445_v24 = vmul.f32 %v10444_v55, %v10444_v55 }
 0xe1e   : > { %v10446_v43 = vsel %vm8407_vm8, %v10445_v24, 0.0 }
 0xe1f   : > { %v10447_v40 = vrot.slane %v10446_v43, 4 }
 0xe21   : > { %v10448_v45 = vadd.f32 %v10447_v40, %v10446_v43 }
 0xe23   : > { %v10449_v58 = vrot.slane %v10448_v45, 2 }
 0xe24   : > { %v13943_v23 = vpop.eup %13942 }
 0xe25   : > { %v10450_v59 = vadd.f32 %v10449_v58, %v10448_v45  ;;  %v10649_v60 = vadd.f32 1.0, %v13943_v23 }
 0xe27   : > { %v10451_v41 = vrot.slane %v10450_v59, 1  ;;  %13944 = vrcp.f32 %v10649_v60 }
 0xe29   : > { %v10452_v20 = vadd.f32 %v10451_v41, %v10450_v59 }
 0xe2b   : > { %v10453_v57 = vmul.f32 0.25, %v10452_v20 }
 0xe2d   : > { %v10454_v38 = vadd.f32 1e-05, %v10453_v57 }
 0xe2f   : > { %13946 = vrsqrt.f32 %v10454_v38 }
 0xe31   : > { %v13945_v12 = vpop.eup %13944 }
 0xe32   : > { %10652 = vst.msk [vmem:[%s769_s0] sm:$0x1] %vm10562_vm12, %v13945_v12 }
 0xe39   : > { %v13947_v14 = vpop.eup %13946 }
 0xe3a   : > { %v10456_v47 = vmul.f32 %v13947_v14, %v10444_v55 }
 0xe3c   : > { %v10457_v13 = vmax.f32 %v10456_v47, 0.0 }
 0xe3e   : > { %v10458_v2 = vsel %vm8407_vm8, %v10457_v13, 0.0 }
 0xe3f   : > { %v10459_v28 = vrot.slane %v10458_v2, 4 }
 0xe41   : > { %v10460_v26 = vadd.f32 %v10459_v28, %v10458_v2 }
 0xe43   : > { %v10461_v22 = vrot.slane %v10460_v26, 2 }
 0xe45   : > { %v10462_v48 = vadd.f32 %v10461_v22, %v10460_v26 }
 0xe47   : > { %v10463_v49 = vrot.slane %v10462_v48, 1 }
 0xe49   : > { %v10464_v53 = vadd.f32 %v10463_v49, %v10462_v48 }
 0xe4b   : > { %v10465_v34 = vmul.f32 0.25, %v10464_v53 }
 0xe4d   : > { %13030 = vmatmul.mubr.msk.f32.vlgmr.msra.gmra.mrb[48].mxu1 %vm3648_vm4, %v10465_v34 }
 0xe4e   : > { %13980 = shalt.err (!%p13977_p2)
}
 0xe4f   : > { %s13981_s0 = scalar_lea.hbm %s17713_s13, 16  ;;  %s13985_s3 = scalar_lea.hbm %s17810_s24, 32 }
 0xe50   : > { %p13982_p3 = scmp.ne.s32.totalorder %s17713_s13, %s13981_s0  ;;  %p13986_p8 = scmp.lt.u32.totalorder %s17713_s13, %s17810_s24 }
 0xe51   : > { %p13987_p10 = scmp.lt.u32.totalorder %s13985_s3, %s13981_s0  ;;  %p13989_p11 = scmp.lt.u32.totalorder %s13981_s0, %s17713_s13 }
 0xe52   : > { %p13983_p4 = pnand %p13982_p3, %p14241_p5 }
 0xe53   : > { %p13988_p9 = por %p13987_p10, %p13986_p8 }
 0xe54   : > { %p13984_p7 = pneg %p13983_p4 }
 0xe55   : > { %p13990_p12 = por %p13989_p11, %p13988_p9 }
 0xe57   : > { %p13991_p13 = pnand %p13990_p12, %p13984_p7 }
 0xe59   : > { %13994 = shalt.err (!%p13991_p13)
}
 0xe5a   : > { %13751 = dma.vmem_to_hbm [thread:$0]  (%p14241_p5), %s10684_s1, 16, %s17713_s13, %s10658_s6   ;;  %v10482_v25 = vld [vmem:[%s17806_s20] sm:$0x1] }
 0xe5b   : > { %s763_s30 = scalar_lea.vmem [#allocation11], %s17701_s7  ;;  %s17860_s8 = sshll.u32 %s14224_s14, 4 }
 0xe5c   : > { %s10670_s0 = sshll.u32 %s763_s30, 4  ;;  %s17742_s13 = scalar_lea.hbm %s17809_s23, %s17860_s8  ;;  %s17744_s0 = int_to_ptr.vmem [resolvable:$true] %s10670_s0 }
 0xe5d   : > { %s10654_s1 = scalar_lea.sflag [#allocation9], %s17701_s7  ;;  %s13995_s6 = scalar_lea.vmem %s17744_s0, 16 }
 0xe5e   : > { %p13996_p0 = scmp.ne.s32.totalorder %s17744_s0, %s13995_s6  ;;  %s14074_s14 = smov [#allocation11]  }
 0xe5f   : > { %s13999_s5 = sshll.u32 %s14074_s14, 4  ;;  %s14000_s5 = int_to_ptr.vmem [resolvable:$false] %s13999_s5 }
 0xe60   : > { %p13997_p1 = pnand %p13996_p0, %p14241_p5  ;;  %s14001_s9 = scalar_lea.vmem %s14000_s5, 32 }
 0xe61   : > { %p14002_p3 = scmp.lt.s32.totalorder %s17744_s0, %s14000_s5  ;;  %p14003_p4 = scmp.lt.s32.totalorder %s14001_s9, %s13995_s6 }
 0xe62   : > { %p13998_p2 = pneg %p13997_p1 }
 0xe63   : > { %p14004_p7 = por %p14003_p4, %p14002_p3 }
 0xe65   : > { %p14005_p8 = pnand %p14004_p7, %p13998_p2 }
 0xf20   : > { %v10552_v5 = vpop.f32.mrb[48].mxu1 }
 0xf21   : > { %v10553_v10 = vadd.f32 %v10552_v5, %v10482_v25  ;;  %v13031_v33 = vpop.f32.mrb[49].mxu1 }
 0xf23   : > { %v11460_v7 = vmul.f32 -1.442695, %v10553_v10 }
 0xf25   : > { %13948 = vpow2.f32 %v11460_v7 }
 0xf2f   : > { %v13949_v46 = vpop.eup %13948 }
 0xf30   : > { %v10559_v11 = vadd.f32 1.0, %v13949_v46 }
 0xf32   : > { %13950 = vrcp.f32 %v10559_v11 }
 0xf3c   : > { %v13951_v9 = vpop.eup %13950 }
 0xf3d   : > { %10563 = vst.msk [vmem:[%s763_s30] sm:$0x1] %vm10562_vm12, %v13951_v9 }
 0xf3e   : > { %14008 = shalt.err (!%p14005_p8)
}
 0xf3f   : > { %s14009_s7 = scalar_lea.hbm %s17742_s13, 16  ;;  %s14013_s8 = scalar_lea.hbm %s17809_s23, 32 }
 0xf40   : > { %p14010_p10 = scmp.ne.s32.totalorder %s17742_s13, %s14009_s7  ;;  %p14014_p12 = scmp.lt.u32.totalorder %s17742_s13, %s17809_s23 }
 0xf41   : > { %p14015_p13 = scmp.lt.u32.totalorder %s14013_s8, %s14009_s7  ;;  %p14017_p1 = scmp.lt.u32.totalorder %s14009_s7, %s17742_s13 }
 0xf42   : > { %p14011_p9 = pnand %p14010_p10, %p14241_p5 }
 0xf43   : > { %p14016_p0 = por %p14015_p13, %p14014_p12 }
 0xf44   : > { %p14012_p11 = pneg %p14011_p9 }
 0xf45   : > { %p14018_p2 = por %p14017_p1, %p14016_p0 }
 0xf47   : > { %p14019_p3 = pnand %p14018_p2, %p14012_p11 }
 0xf49   : > { %14022 = shalt.err (!%p14019_p3)
}
 0xf4a   : > { %13750 = dma.vmem_to_hbm [thread:$0]  (%p14241_p5), %s17744_s0, 16, %s17742_s13, %s10654_s1  }
 0xf4b PF: > { %p13767_p4 = scmp.ge.s32.totalorder %s14065_s2, 2  ;;  %s10695_s14 = sand.u32 1, %s14053_s27  }
 0xf4c   : > { %s10696_s5 = scalar_lea.sflag [#allocation9], %s10695_s14 }
 0xf4d   : > { %p13759_p7 = pnand %p13767_p4, %p14245_p6 }
 0xf4f   : > { %14044 = dma.done.wait (!%p13759_p7), %s10696_s5, 16  }
 0xf50   : > { %14046 = vsyncadd (!%p13759_p7), %s10696_s5, 4294967280  ;;  %s10704_s9 = scalar_lea.sflag [#allocation13], %s10695_s14 }
 0xf51   : > { %14048 = dma.done.wait (!%p13759_p7), %s10704_s9, 16  }
 0xf52   : > { %14050 = vsyncadd (!%p13759_p7), %s10704_s9, 4294967280  ;;  %s17862_s2 = sld [smem:[#allocation18_spill]]  ;;  %s17863_s25 = sld [smem:[#allocation17_spill]] }
 0xf53   : > { %s17864_s6 = sld [smem:[#allocation19_spill]]  ;;  %s17865_s27 = smov %s14057_s28 }
 0xf58   : > { %p40_p5 = scmp.ge.s32.totalorder %s17862_s2, 4   ;;  %s17866_s28 = smov %s17863_s25 }
 0xf5a   :  { %42 = sbr.rel (!%p40_p5) target bundleno = 19 (0x13), region = 214 }
 0xf61   :  { %10708 = vsyncpa [#allocation9], 1 }
 0xf62   :  { %10710 = vsyncpa [#allocation9 + $0x1], 1 }
 0xf63   :  { %10711 = vsyncpa [#allocation13], 1 }
 0xf64   :  { %10713 = vsyncpa [#allocation13 + $0x1], 1 }
 0xf65   :  { %10714 = vsyncpa [#allocation10], 1 }
 0xf66   :  { %10716 = vsyncpa [#allocation10 + $0x1], 1 }

</bundles_post_ra>
